<compile_context>
chip_gen: v7x
topology: tpu7x:2x2x1
jax: 0.10.0
libtpu: 0.0.40
codegen_flags: <defaults>
</compile_context>

<pallas_src>
import functools
import math

import jax
import jax.numpy as jnp
from jax.experimental import pallas as pl
from jax.experimental.pallas import tpu as pltpu


# ----------------------------- tiling helpers --------------------------------


def _spatial_tile(hw, batch, cap=512):
    """Largest pixel tile (multiple of 128, or full extent) that divides hw.

    Prefers >= 4 total grid steps so both v7x TensorCores get work and the DMA
    pipeline has slack; capped at `cap` rows (measured mem-bound sweet spot).
    """
    fallback = None
    for t in range(min(cap, hw), 127, -128):
        if hw % t != 0 or (t % 128 != 0 and t != hw):
            continue
        if batch * (hw // t) >= 4:
            return t
        if fallback is None:
            fallback = t
    return fallback if fallback is not None else hw


# ------------------------- kernel 1: 1x1 conv (MXU) ---------------------------


def _qkv1x1_kernel(x_ref, w_ref, o_ref):
    # x_ref: (C, t_hw) f32 slab of NCHW pixels; cast to bf16 on the VPU here
    # (avoids a separate XLA cast pass over the activation in HBM).
    x = x_ref[...].astype(jnp.bfloat16)
    o_ref[...] = jax.lax.dot_general(
        x, w_ref[...], (((0,), (0,)), ((), ())),
        preferred_element_type=jnp.float32).astype(o_ref.dtype)


def qkv_conv1x1_pallas(x_ncs, w_c_3c):
    """1x1 conv: (B, C, HW) f32 x (C, 3C) bf16 -> (B, HW, 3C) bf16 pixel-major."""
    b, c, hw = x_ncs.shape
    n = w_c_3c.shape[1]
    t = _spatial_tile(hw, b)
    return pl.pallas_call(
        _qkv1x1_kernel,
        out_shape=jax.ShapeDtypeStruct((b, hw, n), jnp.bfloat16),
        grid=(b, hw // t),
        in_specs=[
            pl.BlockSpec((None, c, t), lambda i, j: (i, 0, j)),
            pl.BlockSpec((c, n), lambda i, j: (0, 0)),
        ],
        out_specs=pl.BlockSpec((None, t, n), lambda i, j: (i, j, 0)),
        compiler_params=pltpu.CompilerParams(
            dimension_semantics=("parallel", "parallel")),
    )(x_ncs, w_c_3c)


# ---------------------- kernel 2: depthwise 3x3 (VPU) -------------------------


def _dwconv3x3_kernel(x_ref, w_ref, o_ref, xp_ref, *, H, W, C):
    # In-kernel zero halo (replaces the old XLA jnp.pad HBM pass):
    # xp_ref is (H+2, W+9, C) f32; x lands at rows [1, H+1) and cols [8, 8+W)
    # (tile-aligned sublane store), everything else stays zero, so every 3x3
    # tap below is a plain static slice.
    xp_ref[...] = jnp.zeros_like(xp_ref)
    xp_ref[1:H + 1, 8:8 + W, :] = x_ref[...].astype(jnp.float32)

    w = w_ref[...]                                     # (9, C) f32 per-channel taps
    acc = jnp.zeros((H, W, C), jnp.float32)
    for dy in range(3):
        slab = xp_ref[dy:dy + H]                       # (H, W+9, C) f32
        for dx in range(3):
            t = dy * 3 + dx
            acc = acc + slab[:, 7 + dx:7 + dx + W, :] * w[t:t + 1, :]
    o_ref[...] = acc.astype(o_ref.dtype)


def dwconv3x3_pallas(x_nhwc, w9):
    """Depthwise 3x3, stride 1, pad 1, groups=C. x: (B,H,W,C) bf16; w9: (9,C) f32."""
    b, h, w, c = x_nhwc.shape
    kern = functools.partial(_dwconv3x3_kernel, H=h, W=w, C=c)
    # TODO(synk): tile H (with a 2-row halo) into the grid for large feature
    #             maps so per-step VMEM stays bounded on v7x / both cores busy.
    return pl.pallas_call(
        kern,
        out_shape=jax.ShapeDtypeStruct((b, h, w, c), jnp.bfloat16),
        grid=(b,),
        in_specs=[
            pl.BlockSpec((None, h, w, c), lambda i: (i, 0, 0, 0)),
            pl.BlockSpec((9, c), lambda i: (0, 0)),
        ],
        out_specs=pl.BlockSpec((None, h, w, c), lambda i: (i, 0, 0, 0)),
        scratch_shapes=[pltpu.VMEM((h + 2, w + 9, c), jnp.float32)],
        compiler_params=pltpu.CompilerParams(dimension_semantics=("parallel",)),
    )(x_nhwc, w9)


# -------------- kernel 3: stacked-head attention + project_out ----------------


def _attn_proj_kernel(x_ref, temp_ref, mask_ref, wproj_ref, o_ref, *, dim):
    # x_ref: (HW, 3*dim) bf16 pixel-major qkv for one batch element.
    # q/k/v are lane slices (128-aligned when dim % 128 == 0, as in the demo).
    q = x_ref[:, :dim].astype(jnp.float32)             # (HW, dim)
    k = x_ref[:, dim:2 * dim].astype(jnp.float32)
    v = x_ref[:, 2 * dim:]                              # stays bf16 for the MXU

    # F.normalize(dim=-1): L2 over the spatial axis (rows here) — rsqrt on EUP.
    qn = q * jax.lax.rsqrt(
        jnp.maximum(jnp.sum(q * q, axis=0, keepdims=True), 1e-24))
    kn = k * jax.lax.rsqrt(
        jnp.maximum(jnp.sum(k * k, axis=0, keepdims=True), 1e-24))

    # One stacked (dim x dim) gram for all heads (contraction over HW on the
    # MXU); cross-head entries are removed by the additive block-diagonal mask.
    gram = jax.lax.dot_general(
        qn.astype(jnp.bfloat16), kn.astype(jnp.bfloat16),
        (((0,), (0,)), ((), ())), preferred_element_type=jnp.float32)
    logits = gram * temp_ref[...] + mask_ref[...]

    m = jnp.max(logits, axis=-1, keepdims=True)
    p = jnp.exp(logits - m)
    attn = p * pl.reciprocal(jnp.sum(p, axis=-1, keepdims=True), approx=True)

    # Reassociated projection: (Wproj @ attn) @ v  — dim^2*(dim + HW) MACs
    # instead of 2*dim^2*HW, and the intermediate is only (dim, dim).
    w2 = jnp.dot(wproj_ref[...], attn.astype(jnp.bfloat16),
                 preferred_element_type=jnp.float32)
    o_ref[...] = jax.lax.dot_general(
        w2.astype(jnp.bfloat16), v, (((1,), (1,)), ((), ())),
        preferred_element_type=jnp.float32)             # (dim, HW) channel-major


def attention_core_pallas(qkv_pm, temperature, w_proj, num_heads):
    """qkv_pm: (B, HW, 3*dim) bf16 pixel-major. Returns (B, dim, HW) f32."""
    b, hw, c3 = qkv_pm.shape
    dim = c3 // 3
    ch = dim // num_heads

    head_id = jnp.arange(dim) // ch
    mask = jnp.where(head_id[:, None] == head_id[None, :],
                     0.0, -1e30).astype(jnp.float32)                # (dim, dim)
    temp_rows = jnp.repeat(temperature.reshape(num_heads),
                           ch).reshape(dim, 1).astype(jnp.float32)
    wproj = w_proj.reshape(dim, dim).astype(jnp.bfloat16)

    kern = functools.partial(_attn_proj_kernel, dim=dim)
    # TODO(synk): for large HW on v7x, add an "arbitrary" HW-chunk grid axis
    #             (gram accumulated in VMEM scratch, projection streamed).
    return pl.pallas_call(
        kern,
        out_shape=jax.ShapeDtypeStruct((b, dim, hw), jnp.float32),
        grid=(b,),
        in_specs=[
            pl.BlockSpec((None, hw, c3), lambda i: (i, 0, 0)),
            pl.BlockSpec((dim, 1), lambda i: (0, 0)),
            pl.BlockSpec((dim, dim), lambda i: (0, 0)),
            pl.BlockSpec((dim, dim), lambda i: (0, 0)),
        ],
        out_specs=pl.BlockSpec((None, dim, hw), lambda i: (i, 0, 0)),
        compiler_params=pltpu.CompilerParams(dimension_semantics=("parallel",)),
    )(qkv_pm, temp_rows, mask, wproj)


# ------------------------------ module forward --------------------------------


def attention_forward(params, x_nchw, num_heads=4):
    b, c, h, w = x_nchw.shape
    assert c % num_heads == 0
    hw = h * w

    # 1) 1x1 qkv conv straight off the NCHW input (no input transpose); the
    #    bf16 pixel-major output feeds the depthwise conv via a free reshape.
    wq = params["qkv_w"].reshape(3 * c, c).T.astype(jnp.bfloat16)    # (C, 3C)
    qkv = qkv_conv1x1_pallas(x_nchw.reshape(b, c, hw), wq)           # (B, HW, 3C)

    # 2) Depthwise 3x3 (groups = 3C): bf16 in/out, f32 MACs, in-kernel halo.
    w9 = jnp.transpose(params["qkv_dw_w"].reshape(3 * c, 3, 3),
                       (1, 2, 0)).reshape(9, 3 * c).astype(jnp.float32)
    qkv = dwconv3x3_pallas(qkv.reshape(b, h, w, 3 * c), w9)          # (B,H,W,3C)

    # 3) Fused normalize + stacked-head attention + project_out; consumes the
    #    pixel-major layout directly (free reshape) and emits channel-major
    #    (dim, HW), i.e. already NCHW — no output transpose.
    out = attention_core_pallas(qkv.reshape(b, hw, 3 * c),
                                params["temperature"], params["proj_w"],
                                num_heads)
    return out.reshape(b, c, h, w)                                   # NCHW


# ------------------------------ parameter init --------------------------------


def init_params(dim, num_heads, seed=0):
    def conv_w(key, cout, cin_per_group, kh, kw):
        fan_in = cin_per_group * kh * kw
        return jax.random.normal(key, (cout, cin_per_group, kh, kw),
                                 jnp.float32) / math.sqrt(fan_in)

    k1, k2, k3 = jax.random.split(jax.random.PRNGKey(seed), 3)
    return dict(
        temperature=jnp.ones((num_heads, 1, 1), jnp.float32),
        qkv_w=conv_w(k1, dim * 3, dim, 1, 1),         # Conv2d(dim, 3*dim, 1)
        qkv_dw_w=conv_w(k2, dim * 3, 1, 3, 3),        # depthwise, groups=3*dim
        proj_w=conv_w(k3, dim, dim, 1, 1),            # Conv2d(dim, dim, 1)
    )


# ----------------------------------- main --------------------------------------

if __name__ == "__main__":
    # dim chosen so dim and 3*dim are multiples of 128 (lane-aligned q/k/v
    # slices and lane-dense stores); still a small Restormer-like config.
    B, DIM, H, W = 2, 128, 16, 16
    HEADS = 4

    key = jax.random.PRNGKey(0)
    kx, _ = jax.random.split(key)
    x = jax.random.normal(kx, (B, DIM, H, W), jnp.float32)
    params = init_params(DIM, HEADS, seed=0)

    fwd = jax.jit(functools.partial(attention_forward, num_heads=HEADS))
    out = fwd(params, x)
    jax.block_until_ready(out)
    assert out.shape == (B, DIM, H, W)
    assert bool(jnp.isfinite(out).all())
    print("KERNEL_OK")
</pallas_src>

<mosaic_0001>
module attributes {stable_mosaic.version = 11 : i64} {
  func.func @_qkv1x1_kernel(%arg0: i32, %arg1: i32, %arg2: memref<1x128x128xf32, #tpu.memory_space<vmem>>, %arg3: memref<128x384xbf16, #tpu.memory_space<vmem>>, %arg4: memref<1x128x384xbf16, #tpu.memory_space<vmem>>) attributes {dimension_semantics = [#tpu.dimension_semantics<parallel>, #tpu.dimension_semantics<parallel>], iteration_bounds = array<i64: 2, 2>, scalar_prefetch = 0 : i64, scratch_operands = 0 : i64, tpu.core_type = #tpu.core_type<tc>, window_params = [{transform_indices = @transform_0, window_bounds = array<i64: 1, 128, 128>}, {pipeline_mode = #tpu.pipeline_mode<synchronous>, transform_indices = @transform_1, window_bounds = array<i64: 128, 384>}, {transform_indices = @transform_2, window_bounds = array<i64: 1, 128, 384>}]} {
    %c0 = arith.constant 0 : index
    %c0_0 = arith.constant 0 : index
    %c0_1 = arith.constant 0 : index
    %0 = vector.load %arg2[%c0, %c0_0, %c0_1] : memref<1x128x128xf32, #tpu.memory_space<vmem>>, vector<1x128x128xf32>
    %1 = vector.shape_cast %0 : vector<1x128x128xf32> to vector<128x128xf32>
    %2 = arith.truncf %1 : vector<128x128xf32> to vector<128x128xbf16>
    %c0_2 = arith.constant 0 : index
    %c0_3 = arith.constant 0 : index
    %3 = vector.load %arg3[%c0_2, %c0_3] : memref<128x384xbf16, #tpu.memory_space<vmem>>, vector<128x384xbf16>
    %cst = arith.constant dense<0.000000e+00> : vector<128x384xf32>
    %4 = tpu.matmul %2, %3, %cst {dimension_numbers = #tpu.dot_dimension_numbers<[0], [0], [1], [1], [0, 1, 1, 1], [], []>} : vector<128x128xbf16>, vector<128x384xbf16>, vector<128x384xf32> -> vector<128x384xf32>
    %5 = arith.truncf %4 : vector<128x384xf32> to vector<128x384xbf16>
    %c0_4 = arith.constant 0 : index
    %c0_5 = arith.constant 0 : index
    %c0_6 = arith.constant 0 : index
    %6 = vector.load %arg4[%c0_4, %c0_5, %c0_6] : memref<1x128x384xbf16, #tpu.memory_space<vmem>>, vector<1x128x384xbf16>
    %7 = vector.shape_cast %6 : vector<1x128x384xbf16> to vector<128x384xbf16>
    %8 = vector.shape_cast %5 : vector<128x384xbf16> to vector<1x128x384xbf16>
    tpu.vector_store %arg4[%c0_4, %c0_5, %c0_6], %8 {strides = array<i32>} : memref<1x128x384xbf16, #tpu.memory_space<vmem>>, vector<1x128x384xbf16>,
    return
  }
  func.func @transform_0(%arg0: i32, %arg1: i32) -> (i32, i32, i32) {
    %c0_i32 = arith.constant 0 : i32
    %c0_i32_0 = arith.constant 0 : i32
    return %arg0, %c0_i32, %arg1 : i32, i32, i32
  }
  func.func @transform_1(%arg0: i32, %arg1: i32) -> (i32, i32) {
    %c0_i32 = arith.constant 0 : i32
    %c0_i32_0 = arith.constant 0 : i32
    %c0_i32_1 = arith.constant 0 : i32
    return %c0_i32, %c0_i32_0 : i32, i32
  }
  func.func @transform_2(%arg0: i32, %arg1: i32) -> (i32, i32, i32) {
    %c0_i32 = arith.constant 0 : i32
    %c0_i32_0 = arith.constant 0 : i32
    return %arg0, %arg1, %c0_i32 : i32, i32, i32
  }
}

module attributes {stable_mosaic.version = 11 : i64} {
  func.func @_dwconv3x3_kernel(%arg0: i32, %arg1: memref<1x16x16x384xbf16, #tpu.memory_space<vmem>>, %arg2: memref<9x384xf32, #tpu.memory_space<vmem>>, %arg3: memref<1x16x16x384xbf16, #tpu.memory_space<vmem>>, %arg4: memref<18x25x384xf32, #tpu.memory_space<vmem>>) attributes {dimension_semantics = [#tpu.dimension_semantics<parallel>], iteration_bounds = array<i64: 2>, scalar_prefetch = 0 : i64, scratch_operands = 1 : i64, tpu.core_type = #tpu.core_type<tc>, window_params = [{transform_indices = @transform_0, window_bounds = array<i64: 1, 16, 16, 384>}, {pipeline_mode = #tpu.pipeline_mode<synchronous>, transform_indices = @transform_1, window_bounds = array<i64: 9, 384>}, {transform_indices = @transform_2, window_bounds = array<i64: 1, 16, 16, 384>}]} {
    %cst = arith.constant 0.000000e+00 : f32
    %0 = vector.broadcast %cst : f32 to vector<18x25x384xf32>
    %c0 = arith.constant 0 : index
    %c0_0 = arith.constant 0 : index
    %c0_1 = arith.constant 0 : index
    %1 = vector.load %arg4[%c0, %c0_0, %c0_1] : memref<18x25x384xf32, #tpu.memory_space<vmem>>, vector<18x25x384xf32>
    tpu.vector_store %arg4[%c0, %c0_0, %c0_1], %0 {strides = array<i32>} : memref<18x25x384xf32, #tpu.memory_space<vmem>>, vector<18x25x384xf32>,
    %c0_2 = arith.constant 0 : index
    %c0_3 = arith.constant 0 : index
    %c0_4 = arith.constant 0 : index
    %c0_5 = arith.constant 0 : index
    %2 = vector.load %arg1[%c0_2, %c0_3, %c0_4, %c0_5] : memref<1x16x16x384xbf16, #tpu.memory_space<vmem>>, vector<1x16x16x384xbf16>
    %3 = vector.shape_cast %2 : vector<1x16x16x384xbf16> to vector<16x16x384xbf16>
    %4 = arith.extf %3 : vector<16x16x384xbf16> to vector<16x16x384xf32>
    %c1 = arith.constant 1 : index
    %c8 = arith.constant 8 : index
    %c0_6 = arith.constant 0 : index
    %5 = vector.load %arg4[%c1, %c8, %c0_6] : memref<18x25x384xf32, #tpu.memory_space<vmem>>, vector<16x16x384xf32>
    tpu.vector_store %arg4[%c1, %c8, %c0_6], %4 {strides = array<i32>} : memref<18x25x384xf32, #tpu.memory_space<vmem>>, vector<16x16x384xf32>,
    %c0_7 = arith.constant 0 : index
    %c0_8 = arith.constant 0 : index
    %6 = vector.load %arg2[%c0_7, %c0_8] : memref<9x384xf32, #tpu.memory_space<vmem>>, vector<9x384xf32>
    %cst_9 = arith.constant 0.000000e+00 : f32
    %7 = vector.broadcast %cst_9 : f32 to vector<16x16x384xf32>
    %c0_10 = arith.constant 0 : index
    %c0_11 = arith.constant 0 : index
    %c0_12 = arith.constant 0 : index
    %8 = vector.load %arg4[%c0_10, %c0_11, %c0_12] : memref<18x25x384xf32, #tpu.memory_space<vmem>>, vector<16x25x384xf32>
    %9 = vector.extract_strided_slice %8 {offsets = [0, 7, 0], sizes = [16, 16, 384], strides = [1, 1, 1]} : vector<16x25x384xf32> to vector<16x16x384xf32>
    %10 = vector.extract_strided_slice %6 {offsets = [0, 0], sizes = [1, 384], strides = [1, 1]} : vector<9x384xf32> to vector<1x384xf32>
    %11 = vector.shape_cast %10 : vector<1x384xf32> to vector<1x1x384xf32>
    %12 = vector.broadcast %11 : vector<1x1x384xf32> to vector<16x16x384xf32>
    %13 = arith.mulf %9, %12 : vector<16x16x384xf32>
    %14 = arith.addf %7, %13 : vector<16x16x384xf32>
    %15 = vector.extract_strided_slice %8 {offsets = [0, 8, 0], sizes = [16, 16, 384], strides = [1, 1, 1]} : vector<16x25x384xf32> to vector<16x16x384xf32>
    %16 = vector.extract_strided_slice %6 {offsets = [1, 0], sizes = [1, 384], strides = [1, 1]} : vector<9x384xf32> to vector<1x384xf32>
    %17 = vector.shape_cast %16 : vector<1x384xf32> to vector<1x1x384xf32>
    %18 = vector.broadcast %17 : vector<1x1x384xf32> to vector<16x16x384xf32>
    %19 = arith.mulf %15, %18 : vector<16x16x384xf32>
    %20 = arith.addf %14, %19 : vector<16x16x384xf32>
    %21 = vector.extract_strided_slice %8 {offsets = [0, 9, 0], sizes = [16, 16, 384], strides = [1, 1, 1]} : vector<16x25x384xf32> to vector<16x16x384xf32>
    %22 = vector.extract_strided_slice %6 {offsets = [2, 0], sizes = [1, 384], strides = [1, 1]} : vector<9x384xf32> to vector<1x384xf32>
    %23 = vector.shape_cast %22 : vector<1x384xf32> to vector<1x1x384xf32>
    %24 = vector.broadcast %23 : vector<1x1x384xf32> to vector<16x16x384xf32>
    %25 = arith.mulf %21, %24 : vector<16x16x384xf32>
    %26 = arith.addf %20, %25 : vector<16x16x384xf32>
    %c1_13 = arith.constant 1 : index
    %c0_14 = arith.constant 0 : index
    %c0_15 = arith.constant 0 : index
    %27 = vector.load %arg4[%c1_13, %c0_14, %c0_15] : memref<18x25x384xf32, #tpu.memory_space<vmem>>, vector<16x25x384xf32>
    %28 = vector.extract_strided_slice %27 {offsets = [0, 7, 0], sizes = [16, 16, 384], strides = [1, 1, 1]} : vector<16x25x384xf32> to vector<16x16x384xf32>
    %29 = vector.extract_strided_slice %6 {offsets = [3, 0], sizes = [1, 384], strides = [1, 1]} : vector<9x384xf32> to vector<1x384xf32>
    %30 = vector.shape_cast %29 : vector<1x384xf32> to vector<1x1x384xf32>
    %31 = vector.broadcast %30 : vector<1x1x384xf32> to vector<16x16x384xf32>
    %32 = arith.mulf %28, %31 : vector<16x16x384xf32>
    %33 = arith.addf %26, %32 : vector<16x16x384xf32>
    %34 = vector.extract_strided_slice %27 {offsets = [0, 8, 0], sizes = [16, 16, 384], strides = [1, 1, 1]} : vector<16x25x384xf32> to vector<16x16x384xf32>
    %35 = vector.extract_strided_slice %6 {offsets = [4, 0], sizes = [1, 384], strides = [1, 1]} : vector<9x384xf32> to vector<1x384xf32>
    %36 = vector.shape_cast %35 : vector<1x384xf32> to vector<1x1x384xf32>
    %37 = vector.broadcast %36 : vector<1x1x384xf32> to vector<16x16x384xf32>
    %38 = arith.mulf %34, %37 : vector<16x16x384xf32>
    %39 = arith.addf %33, %38 : vector<16x16x384xf32>
    %40 = vector.extract_strided_slice %27 {offsets = [0, 9, 0], sizes = [16, 16, 384], strides = [1, 1, 1]} : vector<16x25x384xf32> to vector<16x16x384xf32>
    %41 = vector.extract_strided_slice %6 {offsets = [5, 0], sizes = [1, 384], strides = [1, 1]} : vector<9x384xf32> to vector<1x384xf32>
    %42 = vector.shape_cast %41 : vector<1x384xf32> to vector<1x1x384xf32>
    %43 = vector.broadcast %42 : vector<1x1x384xf32> to vector<16x16x384xf32>
    %44 = arith.mulf %40, %43 : vector<16x16x384xf32>
    %45 = arith.addf %39, %44 : vector<16x16x384xf32>
    %c2 = arith.constant 2 : index
    %c0_16 = arith.constant 0 : index
    %c0_17 = arith.constant 0 : index
    %46 = vector.load %arg4[%c2, %c0_16, %c0_17] : memref<18x25x384xf32, #tpu.memory_space<vmem>>, vector<16x25x384xf32>
    %47 = vector.extract_strided_slice %46 {offsets = [0, 7, 0], sizes = [16, 16, 384], strides = [1, 1, 1]} : vector<16x25x384xf32> to vector<16x16x384xf32>
    %48 = vector.extract_strided_slice %6 {offsets = [6, 0], sizes = [1, 384], strides = [1, 1]} : vector<9x384xf32> to vector<1x384xf32>
    %49 = vector.shape_cast %48 : vector<1x384xf32> to vector<1x1x384xf32>
    %50 = vector.broadcast %49 : vector<1x1x384xf32> to vector<16x16x384xf32>
    %51 = arith.mulf %47, %50 : vector<16x16x384xf32>
    %52 = arith.addf %45, %51 : vector<16x16x384xf32>
    %53 = vector.extract_strided_slice %46 {offsets = [0, 8, 0], sizes = [16, 16, 384], strides = [1, 1, 1]} : vector<16x25x384xf32> to vector<16x16x384xf32>
    %54 = vector.extract_strided_slice %6 {offsets = [7, 0], sizes = [1, 384], strides = [1, 1]} : vector<9x384xf32> to vector<1x384xf32>
    %55 = vector.shape_cast %54 : vector<1x384xf32> to vector<1x1x384xf32>
    %56 = vector.broadcast %55 : vector<1x1x384xf32> to vector<16x16x384xf32>
    %57 = arith.mulf %53, %56 : vector<16x16x384xf32>
    %58 = arith.addf %52, %57 : vector<16x16x384xf32>
    %59 = vector.extract_strided_slice %46 {offsets = [0, 9, 0], sizes = [16, 16, 384], strides = [1, 1, 1]} : vector<16x25x384xf32> to vector<16x16x384xf32>
    %60 = vector.extract_strided_slice %6 {offsets = [8, 0], sizes = [1, 384], strides = [1, 1]} : vector<9x384xf32> to vector<1x384xf32>
    %61 = vector.shape_cast %60 : vector<1x384xf32> to vector<1x1x384xf32>
    %62 = vector.broadcast %61 : vector<1x1x384xf32> to vector<16x16x384xf32>
    %63 = arith.mulf %59, %62 : vector<16x16x384xf32>
    %64 = arith.addf %58, %63 : vector<16x16x384xf32>
    %65 = arith.truncf %64 : vector<16x16x384xf32> to vector<16x16x384xbf16>
    %c0_18 = arith.constant 0 : index
    %c0_19 = arith.constant 0 : index
    %c0_20 = arith.constant 0 : index
    %c0_21 = arith.constant 0 : index
    %66 = vector.load %arg3[%c0_18, %c0_19, %c0_20, %c0_21] : memref<1x16x16x384xbf16, #tpu.memory_space<vmem>>, vector<1x16x16x384xbf16>
    %67 = vector.shape_cast %66 : vector<1x16x16x384xbf16> to vector<16x16x384xbf16>
    %68 = vector.shape_cast %65 : vector<16x16x384xbf16> to vector<1x16x16x384xbf16>
    tpu.vector_store %arg3[%c0_18, %c0_19, %c0_20, %c0_21], %68 {strides = array<i32>} : memref<1x16x16x384xbf16, #tpu.memory_space<vmem>>, vector<1x16x16x384xbf16>,
    return
  }
  func.func @transform_0(%arg0: i32) -> (i32, i32, i32, i32) {
    %c0_i32 = arith.constant 0 : i32
    %c0_i32_0 = arith.constant 0 : i32
    %c0_i32_1 = arith.constant 0 : i32
    %c0_i32_2 = arith.constant 0 : i32
    return %arg0, %c0_i32, %c0_i32_0, %c0_i32_1 : i32, i32, i32, i32
  }
  func.func @transform_1(%arg0: i32) -> (i32, i32) {
    %c0_i32 = arith.constant 0 : i32
    %c0_i32_0 = arith.constant 0 : i32
    %c0_i32_1 = arith.constant 0 : i32
    return %c0_i32, %c0_i32_0 : i32, i32
  }
  func.func @transform_2(%arg0: i32) -> (i32, i32, i32, i32) {
    %c0_i32 = arith.constant 0 : i32
    %c0_i32_0 = arith.constant 0 : i32
    %c0_i32_1 = arith.constant 0 : i32
    %c0_i32_2 = arith.constant 0 : i32
    return %arg0, %c0_i32, %c0_i32_0, %c0_i32_1 : i32, i32, i32, i32
  }
}

module attributes {stable_mosaic.version = 11 : i64} {
  func.func @_attn_proj_kernel(%arg0: i32, %arg1: memref<1x256x384xbf16, #tpu.memory_space<vmem>>, %arg2: memref<128x1xf32, #tpu.memory_space<vmem>>, %arg3: memref<128x128xf32, #tpu.memory_space<vmem>>, %arg4: memref<128x128xbf16, #tpu.memory_space<vmem>>, %arg5: memref<1x128x256xf32, #tpu.memory_space<vmem>>) attributes {dimension_semantics = [#tpu.dimension_semantics<parallel>], iteration_bounds = array<i64: 2>, scalar_prefetch = 0 : i64, scratch_operands = 0 : i64, tpu.core_type = #tpu.core_type<tc>, window_params = [{transform_indices = @transform_0, window_bounds = array<i64: 1, 256, 384>}, {pipeline_mode = #tpu.pipeline_mode<synchronous>, transform_indices = @transform_1, window_bounds = array<i64: 128, 1>}, {pipeline_mode = #tpu.pipeline_mode<synchronous>, transform_indices = @transform_2, window_bounds = array<i64: 128, 128>}, {pipeline_mode = #tpu.pipeline_mode<synchronous>, transform_indices = @transform_3, window_bounds = array<i64: 128, 128>}, {transform_indices = @transform_4, window_bounds = array<i64: 1, 128, 256>}]} {
    %c0 = arith.constant 0 : index
    %c0_0 = arith.constant 0 : index
    %c0_1 = arith.constant 0 : index
    %0 = vector.load %arg1[%c0, %c0_0, %c0_1] : memref<1x256x384xbf16, #tpu.memory_space<vmem>>, vector<1x256x128xbf16>
    %1 = vector.shape_cast %0 : vector<1x256x128xbf16> to vector<256x128xbf16>
    %2 = arith.extf %1 : vector<256x128xbf16> to vector<256x128xf32>
    %c0_2 = arith.constant 0 : index
    %c0_3 = arith.constant 0 : index
    %c128 = arith.constant 128 : index
    %3 = vector.load %arg1[%c0_2, %c0_3, %c128] : memref<1x256x384xbf16, #tpu.memory_space<vmem>>, vector<1x256x128xbf16>
    %4 = vector.shape_cast %3 : vector<1x256x128xbf16> to vector<256x128xbf16>
    %5 = arith.extf %4 : vector<256x128xbf16> to vector<256x128xf32>
    %c0_4 = arith.constant 0 : index
    %c0_5 = arith.constant 0 : index
    %c256 = arith.constant 256 : index
    %6 = vector.load %arg1[%c0_4, %c0_5, %c256] : memref<1x256x384xbf16, #tpu.memory_space<vmem>>, vector<1x256x128xbf16>
    %7 = vector.shape_cast %6 : vector<1x256x128xbf16> to vector<256x128xbf16>
    %8 = arith.mulf %2, %2 : vector<256x128xf32>
    %cst = arith.constant dense<0.000000e+00> : vector<128xf32>
    %9 = vector.multi_reduction <add>, %8, %cst [0] : vector<256x128xf32> to vector<128xf32>
    %10 = vector.shape_cast %9 : vector<128xf32> to vector<1x128xf32>
    %cst_6 = arith.constant 1.000000e-24 : f32
    %11 = vector.broadcast %cst_6 : f32 to vector<1x128xf32>
    %12 = arith.maximumf %10, %11 : vector<1x128xf32>
    %13 = math.rsqrt %12 : vector<1x128xf32>
    %14 = vector.broadcast %13 : vector<1x128xf32> to vector<256x128xf32>
    %15 = arith.mulf %2, %14 : vector<256x128xf32>
    %16 = arith.mulf %5, %5 : vector<256x128xf32>
    %cst_7 = arith.constant dense<0.000000e+00> : vector<128xf32>
    %17 = vector.multi_reduction <add>, %16, %cst_7 [0] : vector<256x128xf32> to vector<128xf32>
    %18 = vector.shape_cast %17 : vector<128xf32> to vector<1x128xf32>
    %cst_8 = arith.constant 1.000000e-24 : f32
    %19 = vector.broadcast %cst_8 : f32 to vector<1x128xf32>
    %20 = arith.maximumf %18, %19 : vector<1x128xf32>
    %21 = math.rsqrt %20 : vector<1x128xf32>
    %22 = vector.broadcast %21 : vector<1x128xf32> to vector<256x128xf32>
    %23 = arith.mulf %5, %22 : vector<256x128xf32>
    %24 = arith.truncf %15 : vector<256x128xf32> to vector<256x128xbf16>
    %25 = arith.truncf %23 : vector<256x128xf32> to vector<256x128xbf16>
    %cst_9 = arith.constant dense<0.000000e+00> : vector<128x128xf32>
    %26 = tpu.matmul %24, %25, %cst_9 {dimension_numbers = #tpu.dot_dimension_numbers<[0], [0], [1], [1], [0, 1, 1, 1], [], []>} : vector<256x128xbf16>, vector<256x128xbf16>, vector<128x128xf32> -> vector<128x128xf32>
    %c0_10 = arith.constant 0 : index
    %c0_11 = arith.constant 0 : index
    %27 = vector.load %arg2[%c0_10, %c0_11] : memref<128x1xf32, #tpu.memory_space<vmem>>, vector<128x1xf32>
    %28 = vector.broadcast %27 : vector<128x1xf32> to vector<128x128xf32>
    %29 = arith.mulf %26, %28 : vector<128x128xf32>
    %c0_12 = arith.constant 0 : index
    %c0_13 = arith.constant 0 : index
    %30 = vector.load %arg3[%c0_12, %c0_13] : memref<128x128xf32, #tpu.memory_space<vmem>>, vector<128x128xf32>
    %31 = arith.addf %29, %30 : vector<128x128xf32>
    %cst_14 = arith.constant dense<0xFF800000> : vector<128xf32>
    %32 = vector.multi_reduction <maximumf>, %31, %cst_14 [1] : vector<128x128xf32> to vector<128xf32>
    %33 = vector.shape_cast %32 : vector<128xf32> to vector<128x1xf32>
    %34 = vector.broadcast %33 : vector<128x1xf32> to vector<128x128xf32>
    %35 = arith.subf %31, %34 : vector<128x128xf32>
    %36 = math.exp %35 : vector<128x128xf32>
    %cst_15 = arith.constant dense<0.000000e+00> : vector<128xf32>
    %37 = vector.multi_reduction <add>, %36, %cst_15 [1] : vector<128x128xf32> to vector<128xf32>
    %38 = vector.shape_cast %37 : vector<128xf32> to vector<128x1xf32>
    %39 = tpu.reciprocal %38 {approx = true} : vector<128x1xf32> -> vector<128x1xf32>
    %40 = vector.broadcast %39 : vector<128x1xf32> to vector<128x128xf32>
    %41 = arith.mulf %36, %40 : vector<128x128xf32>
    %c0_16 = arith.constant 0 : index
    %c0_17 = arith.constant 0 : index
    %42 = vector.load %arg4[%c0_16, %c0_17] : memref<128x128xbf16, #tpu.memory_space<vmem>>, vector<128x128xbf16>
    %43 = arith.truncf %41 : vector<128x128xf32> to vector<128x128xbf16>
    %cst_18 = arith.constant dense<0.000000e+00> : vector<128x128xf32>
    %44 = tpu.matmul %42, %43, %cst_18 {dimension_numbers = #tpu.dot_dimension_numbers<[1], [0], [0], [1], [0, 0, 1, 1], [], []>} : vector<128x128xbf16>, vector<128x128xbf16>, vector<128x128xf32> -> vector<128x128xf32>
    %45 = arith.truncf %44 : vector<128x128xf32> to vector<128x128xbf16>
    %cst_19 = arith.constant dense<0.000000e+00> : vector<128x256xf32>
    %46 = tpu.matmul %45, %7, %cst_19 {dimension_numbers = #tpu.dot_dimension_numbers<[1], [1], [0], [0], [0, 0, 1, 0], [], []>} : vector<128x128xbf16>, vector<256x128xbf16>, vector<128x256xf32> -> vector<128x256xf32>
    %c0_20 = arith.constant 0 : index
    %c0_21 = arith.constant 0 : index
    %c0_22 = arith.constant 0 : index
    %47 = vector.load %arg5[%c0_20, %c0_21, %c0_22] : memref<1x128x256xf32, #tpu.memory_space<vmem>>, vector<1x128x256xf32>
    %48 = vector.shape_cast %47 : vector<1x128x256xf32> to vector<128x256xf32>
    %49 = vector.shape_cast %46 : vector<128x256xf32> to vector<1x128x256xf32>
    tpu.vector_store %arg5[%c0_20, %c0_21, %c0_22], %49 {strides = array<i32>} : memref<1x128x256xf32, #tpu.memory_space<vmem>>, vector<1x128x256xf32>,
    return
  }
  func.func @transform_0(%arg0: i32) -> (i32, i32, i32) {
    %c0_i32 = arith.constant 0 : i32
    %c0_i32_0 = arith.constant 0 : i32
    %c0_i32_1 = arith.constant 0 : i32
    return %arg0, %c0_i32, %c0_i32_0 : i32, i32, i32
  }
  func.func @transform_1(%arg0: i32) -> (i32, i32) {
    %c0_i32 = arith.constant 0 : i32
    %c0_i32_0 = arith.constant 0 : i32
    %c0_i32_1 = arith.constant 0 : i32
    return %c0_i32, %c0_i32_0 : i32, i32
  }
  func.func @transform_2(%arg0: i32) -> (i32, i32) {
    %c0_i32 = arith.constant 0 : i32
    %c0_i32_0 = arith.constant 0 : i32
    %c0_i32_1 = arith.constant 0 : i32
    return %c0_i32, %c0_i32_0 : i32, i32
  }
  func.func @transform_3(%arg0: i32) -> (i32, i32) {
    %c0_i32 = arith.constant 0 : i32
    %c0_i32_0 = arith.constant 0 : i32
    %c0_i32_1 = arith.constant 0 : i32
    return %c0_i32, %c0_i32_0 : i32, i32
  }
  func.func @transform_4(%arg0: i32) -> (i32, i32, i32) {
    %c0_i32 = arith.constant 0 : i32
    %c0_i32_0 = arith.constant 0 : i32
    %c0_i32_1 = arith.constant 0 : i32
    return %arg0, %c0_i32, %c0_i32_0 : i32, i32, i32
  }
}

</mosaic_0001>

<bundles_post_ra>
// kernel: attention_forward.3
= control target key start
LH: loop header
LB: loop body
LE: loop exit
PB: predicated region body
PF: predicated region fallthrough
CT: control target
= control target key end

     0   :  { %s1280_s9 = smov 0   ;;  %s1282_s10 = smov 0   ;;  %s1520_s0 = inlined_call_operand.vmem [shape: f32[2,128,256], index: 0, kind: input, shape index: {}]   ;;  %s1521_s1 = inlined_call_operand.vmem [shape: bf16[128,384], index: 1, kind: input, shape index: {}]   ;;  %s1522_s2 = inlined_call_operand.vmem [shape: bf16[2,256,384], index: 2, kind: output, shape index: {}]  }
   0x1   :  { %s1284_s11 = smov 0   ;;  %s1286_s12 = smov 0  }
   0x2   :  { %s1288_s13 = smov 0   ;;  %s1290_s14 = smov 0  }
   0x3   :  { %s1292_s15 = smov 0  }
   0x4 LB: > { %s21_s16 = sadd.s32 1, %s1254_s13  ;;  %s24_s17 = sadd.s32 1, %s1258_s14  ;;  %s1262_s15 = sphi %s1292_s15, %s12_s15   ;;  %s1258_s14 = sphi %s1290_s14, %s1528_s14   ;;  %s1254_s13 = sphi %s1288_s13, %s1527_s13   ;;  %s1250_s12 = sphi %s1286_s12, %s1526_s12   ;;  %s1246_s11 = sphi %s1284_s11, %s1525_s11   ;;  %s1242_s10 = sphi %s1282_s10, %s1524_s10   ;;  %s1238_s9 = sphi %s1280_s9, %s1523_s9  }
   0x5   : > { %p22_p0 = scmp.ge.s32.totalorder %s21_s16, 2  ;;  %p40_p1 = scmp.ne.s32.totalorder %s1242_s10, %s1238_s9 }
   0x6   : > { %p41_p2 = scmp.eq.s32.totalorder %s1262_s15, 0  ;;  %s33_s21 = sadd.s32 1, %s1242_s10 }
   0x7   : > { %s1530_s16 = smov (%p22_p0, %s21_s16), 0  ;;  %s1532_s17 = smov (!%p22_p0, %s24_s17), %s1258_s14 }
   0x8   : > { %p42_p3 = por %p41_p2, %p40_p1  ;;  %p26_p4 = scmp.ge.s32.totalorder %s1532_s17, 2 }
   0x9   : > { %s29_s18 = ssub.s32 %s1254_s13, %s1530_s16  ;;  %p971_p6 = scmp.ge.s32.totalorder %s1262_s15, 4 }
   0xa   : > { %s1534_s17 = smov (%p26_p4, %s1532_s17), 0 }
   0xb   : > { %s28_s19 = ssub.s32 %s1258_s14, %s1534_s17  ;;  %118 = sbr.rel (%p971_p6) target bundleno = 32 (0x20), region = 20 }
   0xc   : > { %s30_s20 = sor.u32 %s29_s18, %s28_s19 }
   0xd   : > { %p31_p5 = scmp.eq.s32.totalorder %s30_s20, 0 }
   0xf   : > { %s1331_s22 = scalar_select %p31_p5, %s1242_s10, %s33_s21  }
  0x12   : > { %121 = sbr.rel (!%p42_p3) target bundleno = 32 (0x20), region = 24  ;;  %s123_s23 = sand.u32 (%p42_p3), 1, %s1242_s10  }
  0x13   : > { %s973_s24 = sshll.u32 (%p42_p3), %s1258_s14, 5  ;;  %s972_s25 = sshll.u32 (%p42_p3), %s123_s23, 7 }
  0x14   : > { %s127_s26 = sadd.s32 (%p42_p3), %s1254_s13, %s973_s24  ;;  %s125_s3 = scalar_lea.vmem (%p42_p3), [#allocation2], %s972_s25 }
  0x15   : > { %s974_s27 = sshll.u32 (%p42_p3), %s127_s26, 3 }
  0x16   : > { %s1340_s30 = scalar_lea.vmem (%p42_p3), %s1520_s0, %s974_s27 }
  0x17   : > { %v187_v0 = vld [vmem:[%s1340_s30] sm:$0xff] (%p42_p3)  ;;  %v189_v1 = vld [vmem:[%s1340_s30 + $0x10] sm:$0xff] (%p42_p3) }
  0x18   : > { %v191_v2 = vld [vmem:[%s1340_s30 + $0x20] sm:$0xff] (%p42_p3)  ;;  %188 = vst [vmem:[%s125_s3] sm:$0xff] (%p42_p3), %v187_v0  ;;  %190 = vst [vmem:[%s125_s3 + $0x8] sm:$0xff] (%p42_p3), %v189_v1  ;;  %v193_v3 = vld [vmem:[%s1340_s30 + $0x30] sm:$0xff] (%p42_p3) }
  0x19   : > { %192 = vst [vmem:[%s125_s3 + $0x10] sm:$0xff] %v191_v2  ;;  %v195_v4 = vld [vmem:[%s1340_s30 + $0x40] sm:$0xff]  ;;  %v197_v5 = vld [vmem:[%s1340_s30 + $0x50] sm:$0xff]  ;;  %194 = vst [vmem:[%s125_s3 + $0x18] sm:$0xff] %v193_v3 }
  0x1a   : > { %196 = vst [vmem:[%s125_s3 + $0x20] sm:$0xff] %v195_v4  ;;  %198 = vst [vmem:[%s125_s3 + $0x28] sm:$0xff] %v197_v5  ;;  %v199_v6 = vld [vmem:[%s1340_s30 + $0x60] sm:$0xff]  ;;  %v201_v7 = vld [vmem:[%s1340_s30 + $0x70] sm:$0xff] }
  0x1b   : > { %v203_v8 = vld [vmem:[%s1340_s30 + $0x80] sm:$0xff]  ;;  %200 = vst [vmem:[%s125_s3 + $0x30] sm:$0xff] %v199_v6  ;;  %202 = vst [vmem:[%s125_s3 + $0x38] sm:$0xff] %v201_v7  ;;  %v205_v9 = vld [vmem:[%s1340_s30 + $0x90] sm:$0xff] }
  0x1c   : > { %204 = vst [vmem:[%s125_s3 + $0x40] sm:$0xff] %v203_v8  ;;  %v207_v10 = vld [vmem:[%s1340_s30 + $0xa0] sm:$0xff]  ;;  %v209_v11 = vld [vmem:[%s1340_s30 + $0xb0] sm:$0xff]  ;;  %206 = vst [vmem:[%s125_s3 + $0x48] sm:$0xff] %v205_v9 }
  0x1d   : > { %208 = vst [vmem:[%s125_s3 + $0x50] sm:$0xff] %v207_v10  ;;  %210 = vst [vmem:[%s125_s3 + $0x58] sm:$0xff] %v209_v11  ;;  %v211_v12 = vld [vmem:[%s1340_s30 + $0xc0] sm:$0xff]  ;;  %v213_v13 = vld [vmem:[%s1340_s30 + $0xd0] sm:$0xff] }
  0x1e   : > { %v215_v14 = vld [vmem:[%s1340_s30 + $0xe0] sm:$0xff]  ;;  %212 = vst [vmem:[%s125_s3 + $0x60] sm:$0xff] %v211_v12  ;;  %214 = vst [vmem:[%s125_s3 + $0x68] sm:$0xff] %v213_v13  ;;  %v217_v15 = vld [vmem:[%s1340_s30 + $0xf0] sm:$0xff] }
  0x1f   : > { %216 = vst [vmem:[%s125_s3 + $0x70] sm:$0xff] %v215_v14  ;;  %218 = vst [vmem:[%s125_s3 + $0x78] sm:$0xff] %v217_v15 }
  0x20 PF: > { %p975_p7 = scmp.ge.s32.totalorder %s1262_s15, 1  ;;  %p223_p8 = scmp.lt.s32.totalorder %s1262_s15, 5 }
  0x22   : > { %p224_p9 = pnand %p975_p7, %p223_p8 }
  0x23   : > { %s230_s4 = sand.u32 (!%p224_p9), 1, %s1238_s9   ;;  %v1176_v16 = vld [vmem:[%s1521_s1 + $0x4] ss:$12 sps:$4 sm:$0xff] (!%p224_p9)   ;;  %v1178_v17 = vld [vmem:[%s1521_s1] ss:$12 sps:$4 sm:$0xff] (!%p224_p9)   ;;  %v1264_v18 = vmov (!%p224_p9), 0  }
  0x24   : > { %227 = sbr.rel (%p224_p9) target bundleno = 418 (0x1a2), region = 62  ;;  %s976_s7 = sshll.u32 (!%p224_p9), %s230_s4, 7  ;;  %500 = vmatprep.mubr.bf16.mxu0 (!%p224_p9), %v1264_v18  ;;  %468 = vmatprep.subr.bf16.mxu0 (!%p224_p9), %v1176_v16  ;;  %v1179_v19 = vld [vmem:[%s1521_s1 + $0x1c] ss:$12 sps:$4 sm:$0xff] (!%p224_p9)   ;;  %v1181_v20 = vld [vmem:[%s1521_s1 + $0x18] ss:$12 sps:$4 sm:$0xff] (!%p224_p9)  }
  0x25   : > { %s1374_s9 = scalar_lea.vmem (!%p224_p9), [#allocation2], %s976_s7  ;;  %469 = vmatpush1.bf16.msra.mxu0 (!%p224_p9), %v1178_v17  ;;  %v1182_v31 = vld [vmem:[%s1521_s1 + $0x8] ss:$12 sps:$4 sm:$0xff] (!%p224_p9)   ;;  %v1185_v34 = vld [vmem:[%s1521_s1 + $0x30] ss:$12 sps:$4 sm:$0xff] (!%p224_p9)   ;;  %p257_p10 = scmp.lt.s32.totalorder (!%p224_p9), %s1250_s12, 1 }
  0x26   : > { %v268_v21 = vld [vmem:[%s1374_s9] sm:$0xff] (!%p224_p9)  ;;  %v269_v22 = vld [vmem:[%s1374_s9 + $0x8] sm:$0xff] (!%p224_p9)  ;;  %v270_v23 = vld [vmem:[%s1374_s9 + $0x10] sm:$0xff] (!%p224_p9)  ;;  %470 = vmatprep.subr.bf16.mxu0 (!%p224_p9), %v1179_v19  ;;  %1085 = vmatprep.subr.bf16.mxu1 (!%p224_p9), %v1182_v31 }
  0x27   : > { %v284_v24 = vpack.c.bf16 (!%p224_p9), %v269_v22, %v268_v21  ;;  %v271_v25 = vld [vmem:[%s1374_s9 + $0x18] sm:$0xff] (!%p224_p9)  ;;  %v272_v27 = vld [vmem:[%s1374_s9 + $0x20] sm:$0xff] (!%p224_p9)  ;;  %v273_v28 = vld [vmem:[%s1374_s9 + $0x28] sm:$0xff] (!%p224_p9)  ;;  %1086 = vmatpush3.bf16.msra.mxu1 (!%p224_p9), %v1182_v31 }
  0x28   : > { %v285_v26 = vpack.c.bf16 (!%p224_p9), %v271_v25, %v270_v23  ;;  %v274_v29 = vld [vmem:[%s1374_s9 + $0x30] sm:$0xff] (!%p224_p9)  ;;  %v275_v30 = vld [vmem:[%s1374_s9 + $0x38] sm:$0xff] (!%p224_p9)  ;;  %v286_v33 = vpack.c.bf16 (!%p224_p9), %v273_v28, %v272_v27  ;;  %v1186_v35 = vld [vmem:[%s1521_s1 + $0x20] ss:$12 sps:$4 sm:$0xff] (!%p224_p9)  }
  0x29   : > { %324 = vxpose.xlu0.c.b16.start [1/8] (!%p224_p9), %v284_v24, 128  ;;  %471 = vmatpush1.bf16.msra.mxu0 (!%p224_p9), %v1181_v20  ;;  %v1183_v32 = vld [vmem:[%s1521_s1 + $0x34] ss:$12 sps:$4 sm:$0xff] (!%p224_p9)   ;;  %v1187_v36 = vld [vmem:[%s1521_s1 + $0x4c] ss:$12 sps:$4 sm:$0xff] (!%p224_p9)   ;;  %v287_v40 = vpack.c.bf16 (!%p224_p9), %v275_v30, %v274_v29  ;;  %v1191_v42 = vld [vmem:[%s1521_s1 + $0x64] ss:$12 sps:$4 sm:$0xff] (!%p224_p9)  }
  0x2a   : > { %472 = vmatprep.subr.bf16.mxu0 (!%p224_p9), %v1183_v32  ;;  %v1189_v37 = vld [vmem:[%s1521_s1 + $0x48] ss:$12 sps:$4 sm:$0xff] (!%p224_p9)   ;;  %v276_v38 = vld [vmem:[%s1374_s9 + $0x40] sm:$0xff] (!%p224_p9)  ;;  %1087 = vmatprep.subr.bf16.mxu1 (!%p224_p9), %v1186_v35  ;;  %v1194_v44 = vld [vmem:[%s1521_s1 + $0x50] ss:$12 sps:$4 sm:$0xff] (!%p224_p9)  }
  0x2b   : > { %v1190_v39 = vld [vmem:[%s1521_s1 + $0x38] ss:$12 sps:$4 sm:$0xff]   ;;  %v277_v41 = vld [vmem:[%s1374_s9 + $0x48] sm:$0xff]  ;;  %1088 = vmatpush3.bf16.msra.mxu1 %v1186_v35  ;;  %v278_v47 = vld [vmem:[%s1374_s9 + $0x50] sm:$0xff]  ;;  %s1536_s12 = smov (!%p257_p10, %s1250_s12), 1 }
  0x2c   : > { %v1193_v43 = vld [vmem:[%s1521_s1 + $0x60] ss:$12 sps:$4 sm:$0xff]   ;;  %1089 = vmatprep.subr.bf16.mxu1 %v1190_v39  ;;  %v1195_v45 = vld [vmem:[%s1521_s1 + $0x7c] ss:$12 sps:$4 sm:$0xff]   ;;  %v288_v46 = vpack.c.bf16 %v277_v41, %v276_v38  ;;  %v1197_v49 = vld [vmem:[%s1521_s1 + $0x78] ss:$12 sps:$4 sm:$0xff]  }
  0x2d   : > { %325 = vxpose.xlu0.c.b16.cont [2/8] %v285_v26, 128  ;;  %473 = vmatpush1.bf16.msra.mxu0 %v1185_v34  ;;  %v279_v48 = vld [vmem:[%s1374_s9 + $0x58] sm:$0xff]  ;;  %v1198_v50 = vld [vmem:[%s1521_s1 + $0x68] ss:$12 sps:$4 sm:$0xff]   ;;  %v280_v53 = vld [vmem:[%s1374_s9 + $0x60] sm:$0xff]  ;;  %s1118_s28 = smul.u32 96, %s1536_s12 }
  0x2e   : > { %474 = vmatprep.subr.bf16.mxu0 %v1187_v36  ;;  %v1199_v51 = vld [vmem:[%s1521_s1 + $0x94] ss:$12 sps:$4 sm:$0xff]   ;;  %v289_v52 = vpack.c.bf16 %v279_v48, %v278_v47  ;;  %v281_v54 = vld [vmem:[%s1374_s9 + $0x68] sm:$0xff]  ;;  %v1201_v55 = vld [vmem:[%s1521_s1 + $0x90] ss:$12 sps:$4 sm:$0xff]  }
  0x2f   : > { %1090 = vmatpush3.bf16.msra.mxu1 %v1190_v39  ;;  %v1202_v56 = vld [vmem:[%s1521_s1 + $0x80] ss:$12 sps:$4 sm:$0xff]   ;;  %v290_v58 = vpack.c.bf16 %v281_v54, %v280_v53  ;;  %v282_v59 = vld [vmem:[%s1374_s9 + $0x70] sm:$0xff]  ;;  %v283_v60 = vld [vmem:[%s1374_s9 + $0x78] sm:$0xff]  ;;  %s977_s9 = sshll.u32 %s1246_s11, 4 }
  0x30   : > { %1091 = vmatprep.subr.bf16.mxu1 %v1194_v44  ;;  %v1203_v57 = vld [vmem:[%s1521_s1 + $0xac] ss:$12 sps:$4 sm:$0xff]   ;;  %v1205_v61 = vld [vmem:[%s1521_s1 + $0xa8] ss:$12 sps:$4 sm:$0xff]   ;;  %v291_v63 = vpack.c.bf16 %v283_v60, %v282_v59  ;;  %v1207_v0 = vld [vmem:[%s1521_s1 + $0xb0] ss:$12 sps:$4 sm:$0xff]  }
  0x31   : > { %326 = vxpose.xlu0.c.b16.cont [3/8] %v286_v33, 128  ;;  %475 = vmatpush1.bf16.msra.mxu0 %v1189_v37  ;;  %v1206_v62 = vld [vmem:[%s1521_s1 + $0x98] ss:$12 sps:$4 sm:$0xff]   ;;  %p259_p11 = scmp.lt.s32.totalorder %s977_s9, 31 }
  0x32   : > { %476 = vmatprep.subr.bf16.mxu0 %v1191_v42 }
  0x33   : > { %1092 = vmatpush3.bf16.msra.mxu1 %v1194_v44  ;;  %s1538_s9 = smov (!%p259_p11, %s977_s9), 31 }
  0x34   : > { %1093 = vmatprep.subr.bf16.mxu1 %v1198_v50  ;;  %s1117_s29 = smul.u32 3, %s1538_s9 }
  0x35   : > { %327 = vxpose.xlu0.c.b16.cont [4/8] %v287_v40, 128  ;;  %477 = vmatpush1.bf16.msra.mxu0 %v1193_v43 }
  0x36   : > { %478 = vmatprep.subr.bf16.mxu0 %v1195_v45  ;;  %s263_s30 = sadd.s32 %s1118_s28, %s1117_s29 }
  0x37   : > { %1094 = vmatpush3.bf16.msra.mxu1 %v1198_v50  ;;  %s978_s3 = sshll.u32 %s263_s30, 2 }
  0x38   : > { %1095 = vmatprep.subr.bf16.mxu1 %v1202_v56  ;;  %s1465_s6 = scalar_lea.vmem %s1522_s2, %s978_s3 }
  0x39   : > { %328 = vxpose.xlu0.c.b16.cont [5/8] %v288_v46, 128  ;;  %479 = vmatpush1.bf16.msra.mxu0 %v1197_v49 }
  0x3a   : > { %480 = vmatprep.subr.bf16.mxu0 %v1199_v51 }
  0x3b   : > { %1096 = vmatpush3.bf16.msra.mxu1 %v1202_v56 }
  0x3c   : > { %1097 = vmatprep.subr.bf16.mxu1 %v1206_v62 }
  0x3d   : > { %329 = vxpose.xlu0.c.b16.cont [6/8] %v289_v52, 128  ;;  %481 = vmatpush1.bf16.msra.mxu0 %v1201_v55 }
  0x3e   : > { %482 = vmatprep.subr.bf16.mxu0 %v1203_v57 }
  0x3f   : > { %1098 = vmatpush3.bf16.msra.mxu1 %v1206_v62 }
  0x40   : > { %1099 = vmatprep.subr.bf16.mxu1 %v1207_v0 }
  0x41   : > { %330 = vxpose.xlu0.c.b16.cont [7/8] %v290_v58, 128  ;;  %483 = vmatpush1.bf16.msra.mxu0 %v1205_v61 }
  0x43   : > { %1100 = vmatpush3.bf16.msra.mxu1 %v1207_v0 }
  0x45   : > { %331 = vxpose.xlu0.c.b16.end [8/8] %v291_v63, 128 }
  0x8f   : > { %v332_v1 = vpop.trf.xlu0 }
  0x90   : > { %501 = vmatmul.mubr.bf16.vlgmr.msra.gmra.mrb[0].mxu0 %v332_v1  ;;  %1101 = vmatprep.mubr.bf16.mxu1 %v332_v1 }
  0x91   : > { %510 = vmatprep.mubr.bf16.mxu0 %v1264_v18 }
  0x93   : > { %v333_v2 = vpop.trf.xlu0 }
  0x94   : > { %1102 = vmatmul.mubr.bf16.vlgmr.msra.gmra.mrb[0].mxu1 %v333_v2 }
  0x97   : > { %v334_v3 = vpop.trf.xlu0 }
  0x98   : > { %511 = vmatmul.mubr.bf16.gmra.mrb[4].mxu0 %v333_v2  ;;  %1105 = vmatprep.mubr.bf16.mxu1 %v334_v3 }
  0x99   : > { %520 = vmatprep.mubr.bf16.mxu0 %v1264_v18 }
  0x9b   : > { %v335_v4 = vpop.trf.xlu0 }
  0x9c   : > { %1106 = vmatmul.mubr.bf16.gmra.mrb[4].mxu1 %v335_v4 }
  0x9f   : > { %v336_v5 = vpop.trf.xlu0 }
  0xa0   : > { %521 = vmatmul.mubr.bf16.gmra.mrb[8].mxu0 %v334_v3  ;;  %1109 = vmatprep.mubr.bf16.mxu1 %v336_v5 }
  0xa1   : > { %530 = vmatprep.mubr.bf16.mxu0 %v1264_v18 }
  0xa3   : > { %v337_v6 = vpop.trf.xlu0 }
  0xa4   : > { %1110 = vmatmul.mubr.bf16.gmra.mrb[8].mxu1 %v337_v6 }
  0xa7   : > { %v338_v7 = vpop.trf.xlu0 }
  0xa8   : > { %531 = vmatmul.mubr.bf16.gmra.mrb[12].mxu0 %v335_v4  ;;  %1113 = vmatprep.mubr.bf16.mxu1 %v338_v7 }
  0xa9   : > { %540 = vmatprep.mubr.bf16.mxu0 %v1264_v18 }
  0xab   : > { %v339_v8 = vpop.trf.xlu0 }
  0xac   : > { %1114 = vmatmul.mubr.bf16.gmra.mrb[12].mxu1 %v339_v8 }
  0xb0   : > { %541 = vmatmul.mubr.bf16.gmra.mrb[16].mxu0 %v336_v5 }
  0xb1   : > { %550 = vmatprep.mubr.bf16.mxu0 %v1264_v18 }
  0xb8   : > { %551 = vmatmul.mubr.bf16.gmra.mrb[20].mxu0 %v337_v6 }
  0xb9   : > { %560 = vmatprep.mubr.bf16.mxu0 %v1264_v18 }
  0xc0   : > { %561 = vmatmul.mubr.bf16.gmra.mrb[24].mxu0 %v338_v7 }
  0xc1   : > { %570 = vmatprep.mubr.bf16.mxu0 %v1264_v18 }
  0xc8   : > { %571 = vmatmul.mubr.bf16.gmra.mrb[28].mxu0 %v339_v8 }
 0x163   : > { %v502_v9 = vpop.f32.mrb[0].mxu0 }
 0x164   : > { %v504_v10 = vpop.f32.mrb[1].mxu0 }
 0x165   : > { %v1037_v11 = vpack.c.bf16 %v504_v10, %v502_v9  ;;  %v506_v12 = vpop.f32.mrb[2].mxu0 }
 0x166   : > { %v508_v13 = vpop.f32.mrb[3].mxu0 }
 0x167   : > { %838 = vst [vmem:[%s1465_s6] sm:$0xff] %v1037_v11  ;;  %v1039_v14 = vpack.c.bf16 %v508_v13, %v506_v12  ;;  %v1103_v15 = vpop.f32.mrb[0].mxu1 }
 0x168   : > { %v1042_v16 = vpack.c.bf16 %v1103_v15, %v1103_v15  ;;  %v615_v17 = vpop.f32.mrb[1].mxu1 }
 0x169   : > { %840 = vst [vmem:[%s1465_s6 + $0xc] sm:$0xff] %v1039_v14  ;;  %v1038_v18 = vpack.c.bf16 %v615_v17, %v615_v17  ;;  %v1104_v19 = vpop.f32.mrb[2].mxu1 }
 0x16a   : > { %843 = vst [vmem:[%s1465_s6 + $0x20] sm:$0xf] %v1042_v16  ;;  %v1044_v20 = vpack.c.bf16 %v1104_v19, %v1104_v19  ;;  %v618_v21 = vpop.f32.mrb[3].mxu1 }
 0x16b   : > { %839 = vst [vmem:[%s1465_s6 + $0x8] sm:$0xf] %v1038_v18  ;;  %v512_v22 = vpop.f32.mrb[4].mxu0  ;;  %v1040_v23 = vpack.c.bf16 %v618_v21, %v618_v21 }
 0x16c   : > { %845 = vst [vmem:[%s1465_s6 + $0x2c] sm:$0xf] %v1044_v20  ;;  %v514_v24 = vpop.f32.mrb[5].mxu0 }
 0x16d   : > { %841 = vst [vmem:[%s1465_s6 + $0x14] sm:$0xf] %v1040_v23  ;;  %v1041_v25 = vpack.c.bf16 %v514_v24, %v512_v22  ;;  %v516_v26 = vpop.f32.mrb[6].mxu0 }
 0x16e   : > { %v518_v27 = vpop.f32.mrb[7].mxu0 }
 0x16f   : > { %842 = vst [vmem:[%s1465_s6 + $0x18] sm:$0xff] %v1041_v25  ;;  %v1043_v28 = vpack.c.bf16 %v518_v27, %v516_v26  ;;  %v1107_v29 = vpop.f32.mrb[4].mxu1 }
 0x170   : > { %v1050_v30 = vpack.c.bf16 %v1107_v29, %v1107_v29  ;;  %v631_v31 = vpop.f32.mrb[5].mxu1 }
 0x171   : > { %844 = vst [vmem:[%s1465_s6 + $0x24] sm:$0xff] %v1043_v28  ;;  %v1046_v32 = vpack.c.bf16 %v631_v31, %v631_v31  ;;  %v1108_v33 = vpop.f32.mrb[6].mxu1 }
 0x172   : > { %851 = vst [vmem:[%s1465_s6 + $0x50] sm:$0xf] %v1050_v30  ;;  %v1052_v34 = vpack.c.bf16 %v1108_v33, %v1108_v33  ;;  %v634_v35 = vpop.f32.mrb[7].mxu1 }
 0x173   : > { %v522_v36 = vpop.f32.mrb[8].mxu0  ;;  %847 = vst [vmem:[%s1465_s6 + $0x38] sm:$0xf] %v1046_v32  ;;  %v1048_v37 = vpack.c.bf16 %v634_v35, %v634_v35 }
 0x174   : > { %v524_v38 = vpop.f32.mrb[9].mxu0  ;;  %853 = vst [vmem:[%s1465_s6 + $0x5c] sm:$0xf] %v1052_v34 }
 0x175   : > { %v1045_v39 = vpack.c.bf16 %v524_v38, %v522_v36  ;;  %v526_v40 = vpop.f32.mrb[10].mxu0  ;;  %849 = vst [vmem:[%s1465_s6 + $0x44] sm:$0xf] %v1048_v37 }
 0x176   : > { %v528_v41 = vpop.f32.mrb[11].mxu0 }
 0x177   : > { %846 = vst [vmem:[%s1465_s6 + $0x30] sm:$0xff] %v1045_v39  ;;  %v1047_v42 = vpack.c.bf16 %v528_v41, %v526_v40  ;;  %v1111_v43 = vpop.f32.mrb[8].mxu1 }
 0x178   : > { %v1058_v44 = vpack.c.bf16 %v1111_v43, %v1111_v43  ;;  %v647_v45 = vpop.f32.mrb[9].mxu1 }
 0x179   : > { %848 = vst [vmem:[%s1465_s6 + $0x3c] sm:$0xff] %v1047_v42  ;;  %v1054_v46 = vpack.c.bf16 %v647_v45, %v647_v45  ;;  %v1112_v47 = vpop.f32.mrb[10].mxu1 }
 0x17a   : > { %859 = vst [vmem:[%s1465_s6 + $0x80] sm:$0xf] %v1058_v44  ;;  %v1060_v48 = vpack.c.bf16 %v1112_v47, %v1112_v47  ;;  %v650_v49 = vpop.f32.mrb[11].mxu1 }
 0x17b   : > { %v532_v50 = vpop.f32.mrb[12].mxu0  ;;  %855 = vst [vmem:[%s1465_s6 + $0x68] sm:$0xf] %v1054_v46  ;;  %v1056_v51 = vpack.c.bf16 %v650_v49, %v650_v49 }
 0x17c   : > { %v534_v52 = vpop.f32.mrb[13].mxu0  ;;  %861 = vst [vmem:[%s1465_s6 + $0x8c] sm:$0xf] %v1060_v48 }
 0x17d   : > { %v1049_v53 = vpack.c.bf16 %v534_v52, %v532_v50  ;;  %v536_v54 = vpop.f32.mrb[14].mxu0  ;;  %857 = vst [vmem:[%s1465_s6 + $0x74] sm:$0xf] %v1056_v51 }
 0x17e   : > { %v538_v55 = vpop.f32.mrb[15].mxu0 }
 0x17f   : > { %850 = vst [vmem:[%s1465_s6 + $0x48] sm:$0xff] %v1049_v53  ;;  %v1051_v56 = vpack.c.bf16 %v538_v55, %v536_v54  ;;  %v1115_v57 = vpop.f32.mrb[12].mxu1 }
 0x180   : > { %v1066_v58 = vpack.c.bf16 %v1115_v57, %v1115_v57  ;;  %v663_v59 = vpop.f32.mrb[13].mxu1 }
 0x181   : > { %852 = vst [vmem:[%s1465_s6 + $0x54] sm:$0xff] %v1051_v56  ;;  %v1062_v60 = vpack.c.bf16 %v663_v59, %v663_v59  ;;  %v1116_v61 = vpop.f32.mrb[14].mxu1 }
 0x182   : > { %867 = vst [vmem:[%s1465_s6 + $0xb0] sm:$0xf] %v1066_v58  ;;  %v1068_v62 = vpack.c.bf16 %v1116_v61, %v1116_v61  ;;  %v666_v63 = vpop.f32.mrb[15].mxu1 }
 0x183   : > { %v542_v0 = vpop.f32.mrb[16].mxu0  ;;  %863 = vst [vmem:[%s1465_s6 + $0x98] sm:$0xf] %v1062_v60  ;;  %v1064_v1 = vpack.c.bf16 %v666_v63, %v666_v63 }
 0x184   : > { %v544_v2 = vpop.f32.mrb[17].mxu0  ;;  %869 = vst [vmem:[%s1465_s6 + $0xbc] sm:$0xf] %v1068_v62 }
 0x185   : > { %v1053_v3 = vpack.c.bf16 %v544_v2, %v542_v0  ;;  %v546_v4 = vpop.f32.mrb[18].mxu0  ;;  %865 = vst [vmem:[%s1465_s6 + $0xa4] sm:$0xf] %v1064_v1 }
 0x186   : > { %v548_v5 = vpop.f32.mrb[19].mxu0 }
 0x187   : > { %854 = vst [vmem:[%s1465_s6 + $0x60] sm:$0xff] %v1053_v3  ;;  %v1055_v6 = vpack.c.bf16 %v548_v5, %v546_v4 }
 0x189   : > { %856 = vst [vmem:[%s1465_s6 + $0x6c] sm:$0xff] %v1055_v6 }
 0x18b   : > { %v552_v7 = vpop.f32.mrb[20].mxu0 }
 0x18c   : > { %v554_v8 = vpop.f32.mrb[21].mxu0 }
 0x18d   : > { %v1057_v9 = vpack.c.bf16 %v554_v8, %v552_v7  ;;  %v556_v10 = vpop.f32.mrb[22].mxu0 }
 0x18e   : > { %v558_v11 = vpop.f32.mrb[23].mxu0 }
 0x18f   : > { %858 = vst [vmem:[%s1465_s6 + $0x78] sm:$0xff] %v1057_v9  ;;  %v1059_v12 = vpack.c.bf16 %v558_v11, %v556_v10 }
 0x191   : > { %860 = vst [vmem:[%s1465_s6 + $0x84] sm:$0xff] %v1059_v12 }
 0x193   : > { %v562_v13 = vpop.f32.mrb[24].mxu0 }
 0x194   : > { %v564_v14 = vpop.f32.mrb[25].mxu0 }
 0x195   : > { %v1061_v15 = vpack.c.bf16 %v564_v14, %v562_v13  ;;  %v566_v16 = vpop.f32.mrb[26].mxu0 }
 0x196   : > { %v568_v17 = vpop.f32.mrb[27].mxu0 }
 0x197   : > { %862 = vst [vmem:[%s1465_s6 + $0x90] sm:$0xff] %v1061_v15  ;;  %v1063_v18 = vpack.c.bf16 %v568_v17, %v566_v16 }
 0x199   : > { %864 = vst [vmem:[%s1465_s6 + $0x9c] sm:$0xff] %v1063_v18 }
 0x19b   : > { %v572_v19 = vpop.f32.mrb[28].mxu0 }
 0x19c   : > { %v574_v20 = vpop.f32.mrb[29].mxu0 }
 0x19d   : > { %v1065_v21 = vpack.c.bf16 %v574_v20, %v572_v19  ;;  %v576_v22 = vpop.f32.mrb[30].mxu0 }
 0x19e   : > { %v578_v23 = vpop.f32.mrb[31].mxu0 }
 0x19f   : > { %866 = vst [vmem:[%s1465_s6 + $0xa8] sm:$0xff] %v1065_v21  ;;  %v1067_v24 = vpack.c.bf16 %v578_v23, %v576_v22 }
 0x1a1   : > { %868 = vst [vmem:[%s1465_s6 + $0xb4] sm:$0xff] %v1067_v24 }
 0x1a2 PF: > { %s12_s15 = sadd.s32 1, %s1262_s15   ;;  %s1523_s9 = smov %s1242_s10 }
 0x1a3   : > { %p9_p12 = scmp.ge.s32.totalorder %s12_s15, 6   ;;  %s1524_s10 = smov %s1331_s22 }
 0x1a4   : > { %s1525_s11 = smov %s1254_s13  ;;  %s1526_s12 = smov %s1258_s14 }
 0x1a5   : > { %s1527_s13 = smov %s1530_s16  ;;  %s1528_s14 = smov %s1534_s17 }
 0x1a6   :  { %11 = sbr.rel (!%p9_p12) target bundleno = 4 (0x4), region = 101 }

// kernel: attention_forward.5
= control target key start
LH: loop header
LB: loop body
LE: loop exit
PB: predicated region body
PF: predicated region fallthrough
CT: control target
= control target key end

     0   :  { %s1853_s15 = smov 0   ;;  %s2560_s0 = inlined_call_operand.vmem [shape: bf16[2,256,384], index: 0, kind: input, shape index: {}]   ;;  %s2561_s1 = inlined_call_operand.vmem [shape: f32[128,1], index: 1, kind: input, shape index: {}]   ;;  %s2562_s2 = inlined_call_operand.vmem [shape: f32[128,128], index: 2, kind: input, shape index: {}]   ;;  %s2563_s3 = inlined_call_operand.vmem [shape: bf16[128,128], index: 3, kind: input, shape index: {}]   ;;  %s2564_s4 = inlined_call_operand.vmem [shape: f32[2,128,256], index: 4, kind: output, shape index: {}]  }
   0x1 LB: > { %s1487_s16 = sadd.s32 4294967295, %s1824_s15   ;;  %p1491_p0 = scmp.ge.s32.totalorder %s1824_s15, 1  ;;  %s1824_s15 = sphi %s1853_s15, %s14_s15  }
   0x2   : > { %p162_p1 = scmp.lt.s32.totalorder %s1824_s15, 3 }
   0x4   : > { %p163_p2 = pnand %p1491_p0, %p162_p1 }
   0x5   : > { %p188_p3 = scmp.lt.s32.totalorder (!%p163_p2), %s1487_s16, 1  ;;  %v1826_v28 = vmov (!%p163_p2), 1935823168   ;;  %v1812_v22 = vlaneseq (!%p163_p2) }
   0x6   : > { %166 = sbr.rel (%p163_p2) target bundleno = 1276 (0x4fc), region = 36  ;;  %v1810_v27 = vunpack.c.l.s4 (!%p163_p2), %v1826_v28 }
   0x7   : > { %v1813_v61 = vshrl.u32 (!%p163_p2), %v1812_v22, 7 }
   0x8   : > { %v1811_v29 = vunpack.c.0.s8 (!%p163_p2), %v1810_v27 }
   0xa   : > { %v1814_v43 = vsub.s32 (!%p163_p2), %v1811_v29, %v1813_v61 }
   0xd   : > { %s2611_s16 = smov (!%p188_p3, %s1487_s16), 1 }
   0xe   : > { %s1666_s17 = smul.u32 384, %s2611_s16 }
  0x10   : > { %s1867_s20 = scalar_lea.vmem %s2560_s0, %s1666_s17 }
  0x11   : > { %v1870_v0 = vld [vmem:[%s1867_s20] sm:$0xff]   ;;  %v1873_v1 = vld [vmem:[%s1867_s20 + $0xc] sm:$0xff]   ;;  %v1876_v2 = vld [vmem:[%s1867_s20 + $0x18] sm:$0xff]  }
  0x12   : > { %v231_v3 = vunpack.c.l.bf16 %v1870_v0  ;;  %v232_v4 = vunpack.c.l.bf16 %v1873_v1  ;;  %v1881_v5 = vld [vmem:[%s1867_s20 + $0x24] sm:$0xff]   ;;  %v1884_v6 = vld [vmem:[%s1867_s20 + $0x30] sm:$0xff]   ;;  %v233_v7 = vunpack.c.l.bf16 %v1876_v2  ;;  %v1888_v8 = vld [vmem:[%s1867_s20 + $0x3c] sm:$0xff]   ;;  %1774 = vmul.bf16.f32.vacc0 %v1870_v0, %v1870_v0 }
  0x13   : > { %v234_v9 = vunpack.c.l.bf16 %v1881_v5  ;;  %v1892_v10 = vld [vmem:[%s1867_s20 + $0x48] sm:$0xff]   ;;  %v235_v11 = vunpack.c.l.bf16 %v1884_v6  ;;  %v1896_v12 = vld [vmem:[%s1867_s20 + $0x54] sm:$0xff]   ;;  %v236_v13 = vunpack.c.l.bf16 %v1888_v8  ;;  %1775 = vmac.bf16.f32.vacc0 %v1873_v1, %v1873_v1  ;;  %v1904_v14 = vld [vmem:[%s1867_s20 + $0x60] sm:$0xff]  }
  0x14   : > { %1776 = vmac.bf16.f32.vacc0 %v1876_v2, %v1876_v2  ;;  %v1913_v17 = vld [vmem:[%s1867_s20 + $0x6c] sm:$0xff]   ;;  %v1916_v18 = vld [vmem:[%s1867_s20 + $0x78] sm:$0xff]   ;;  %v1925_v21 = vld [vmem:[%s1867_s20 + $0x84] sm:$0xff]  }
  0x15   : > { %1777 = vmac.bf16.f32.vacc0 %v1881_v5, %v1881_v5  ;;  %v1929_v23 = vld [vmem:[%s1867_s20 + $0x90] sm:$0xff]   ;;  %v1936_v26 = vld [vmem:[%s1867_s20 + $0x9c] sm:$0xff]   ;;  %v1944_v30 = vld [vmem:[%s1867_s20 + $0xa8] sm:$0xff]  }
  0x16   : > { %1778 = vmac.bf16.f32.vacc0 %v1884_v6, %v1884_v6  ;;  %v1951_v33 = vld [vmem:[%s1867_s20 + $0xb4] sm:$0xff]   ;;  %v1958_v36 = vld [vmem:[%s1867_s20 + $0xc0] sm:$0xff]   ;;  %v1965_v39 = vld [vmem:[%s1867_s20 + $0xcc] sm:$0xff]  }
  0x17   : > { %1779 = vmac.bf16.f32.vacc0 %v1888_v8, %v1888_v8  ;;  %v247_v41 = vunpack.c.l.bf16 %v1958_v36  ;;  %v1972_v42 = vld [vmem:[%s1867_s20 + $0xd8] sm:$0xff]   ;;  %v248_v44 = vunpack.c.l.bf16 %v1965_v39  ;;  %v1979_v45 = vld [vmem:[%s1867_s20 + $0xe4] sm:$0xff]   ;;  %v1986_v48 = vld [vmem:[%s1867_s20 + $0xf0] sm:$0xff]  }
  0x18   : > { %1780 = vmac.bf16.f32.vacc0 %v1892_v10, %v1892_v10  ;;  %v249_v47 = vunpack.c.l.bf16 %v1972_v42  ;;  %v250_v50 = vunpack.c.l.bf16 %v1979_v45  ;;  %v1993_v51 = vld [vmem:[%s1867_s20 + $0xfc] sm:$0xff]   ;;  %v251_v53 = vunpack.c.l.bf16 %v1986_v48  ;;  %v2000_v54 = vld [vmem:[%s1867_s20 + $0x108] sm:$0xff]   ;;  %v2007_v57 = vld [vmem:[%s1867_s20 + $0x114] sm:$0xff]  }
  0x19   : > { %1781 = vmac.bf16.f32.vacc0 %v1896_v12, %v1896_v12  ;;  %v252_v56 = vunpack.c.l.bf16 %v1993_v51  ;;  %v253_v59 = vunpack.c.l.bf16 %v2000_v54  ;;  %v2014_v60 = vld [vmem:[%s1867_s20 + $0x120] sm:$0xff]   ;;  %v2021_v63 = vld [vmem:[%s1867_s20 + $0x12c] sm:$0xff]   ;;  %v2028_v52 = vld [vmem:[%s1867_s20 + $0x138] sm:$0xff]  }
  0x1a   : > { %1782 = vmac.bf16.f32.vacc0 %v1904_v14, %v1904_v14  ;;  %v2035_v46 = vld [vmem:[%s1867_s20 + $0x144] sm:$0xff]   ;;  %v2042_v40 = vld [vmem:[%s1867_s20 + $0x150] sm:$0xff]   ;;  %v2049_v34 = vld [vmem:[%s1867_s20 + $0x15c] sm:$0xff]   ;;  %v321_v19 = vunpack.c.h.bf16 %v2028_v52 }
  0x1b   : > { %1783 = vmac.bf16.f32.vacc0 %v1913_v17, %v1913_v17  ;;  %v2056_v25 = vld [vmem:[%s1867_s20 + $0x168] sm:$0xff]   ;;  %v2063_v58 = vld [vmem:[%s1867_s20 + $0x174] sm:$0xff]   ;;  %v322_v35 = vunpack.c.h.bf16 %v2035_v46  ;;  %v323_v16 = vunpack.c.h.bf16 %v2042_v40  ;;  %v324_v62 = vunpack.c.h.bf16 %v2049_v34 }
  0x1c   : > { %1784 = vmac.bf16.f32.vacc0 %v1916_v18, %v1916_v18  ;;  %v325_v28 = vunpack.c.h.bf16 %v2056_v25  ;;  %v326_v22 = vunpack.c.h.bf16 %v2063_v58 }
  0x1d   : > { %1785 = vmac.bf16.f32.vacc0 %v1925_v21, %v1925_v21 }
  0x1e   : > { %1786 = vmac.bf16.f32.vacc0 %v1929_v23, %v1929_v23 }
  0x1f   : > { %1787 = vmac.bf16.f32.vacc0 %v1936_v26, %v1936_v26 }
  0x20   : > { %1788 = vmac.bf16.f32.vacc0 %v1944_v30, %v1944_v30 }
  0x21   : > { %1789 = vmac.bf16.f32.vacc0 %v1951_v33, %v1951_v33 }
  0x22   : > { %1790 = vmac.bf16.f32.vacc0 %v1958_v36, %v1958_v36 }
  0x23   : > { %1791 = vmac.bf16.f32.vacc0 %v1965_v39, %v1965_v39 }
  0x24   : > { %1792 = vmac.bf16.f32.vacc0 %v1972_v42, %v1972_v42 }
  0x25   : > { %1793 = vmac.bf16.f32.vacc0 %v1979_v45, %v1979_v45 }
  0x26   : > { %1794 = vmac.bf16.f32.vacc0 %v1986_v48, %v1986_v48 }
  0x27   : > { %1795 = vmac.bf16.f32.vacc0 %v1993_v51, %v1993_v51 }
  0x28   : > { %1796 = vmac.bf16.f32.vacc0 %v2000_v54, %v2000_v54 }
  0x29   : > { %1797 = vmac.bf16.f32.vacc0 %v2007_v57, %v2007_v57 }
  0x2a   : > { %1798 = vmac.bf16.f32.vacc0 %v2014_v60, %v2014_v60 }
  0x2b   : > { %1799 = vmac.bf16.f32.vacc0 %v2021_v63, %v2021_v63 }
  0x2c   : > { %1800 = vmac.bf16.f32.vacc0 %v2028_v52, %v2028_v52 }
  0x2d   : > { %1801 = vmac.bf16.f32.vacc0 %v2035_v46, %v2035_v46 }
  0x2e   : > { %1802 = vmac.bf16.f32.vacc0 %v2042_v40, %v2042_v40 }
  0x2f   : > { %1803 = vmac.bf16.f32.vacc0 %v2049_v34, %v2049_v34 }
  0x30   : > { %1804 = vmac.bf16.f32.vacc0 %v2056_v25, %v2056_v25 }
  0x31   : > { %1805 = vmac.bf16.f32.vacc0 %v2063_v58, %v2063_v58 }
  0x33   : > { %v1806_v32 = vmovacc.add.low.vacc0 }
  0x34   : > { %v1807_v24 = vmovacc.add.high.vacc0 }
  0x36   : > { %v1808_v31 = vcombine.low %v1806_v32, %v1807_v24  ;;  %v1809_v37 = vcombine.high %v1806_v32, %v1807_v24 }
  0x38   : > { %v1815_v20 = vrot.slane %v1808_v31, %v1814_v43  ;;  %v1821_v38 = vrot.slane %v1809_v37, %v1814_v43 }
  0x3a   : > { %v422_v49 = vrot.slane %v1815_v20, 4  ;;  %v525_v32 = vrot.slane %v1821_v38, 4 }
  0x3c   : > { %v423_v55 = vadd.f32 %v1815_v20, %v422_v49  ;;  %v526_v37 = vadd.f32 %v1821_v38, %v525_v32 }
  0x3e   : > { %v424_v15 = vrot.slane %v423_v55, 2  ;;  %v527_v61 = vrot.slane %v526_v37, 2 }
  0x40   : > { %v425_v24 = vadd.f32 %v424_v15, %v423_v55  ;;  %v528_v32 = vadd.f32 %v527_v61, %v526_v37  ;;  %v2566_v37 = vunpack.c.l.bf16 %v1892_v10 }
  0x42   : > { %v426_v27 = vrot.slane %v425_v24, 1 }
  0x44   : > { %v427_v29 = vadd.f32 %v426_v27, %v425_v24 }
  0x46   : > { %v428_v31 = vmax.f32 %v427_v29, 1e-24 }
  0x48   : > { %1702 = vrsqrt.f32 %v428_v31 }
  0x52   : > { %v1703_v43 = vpop.eup %1702 }
  0x53   : > { %v446_v20 = vmul.f32 %v1703_v43, %v247_v41  ;;  %v447_v49 = vmul.f32 %v1703_v43, %v248_v44  ;;  %v430_v15 = vmul.f32 %v1703_v43, %v231_v3  ;;  %v431_v55 = vmul.f32 %v1703_v43, %v232_v4 }
  0x54   : > { %v448_v24 = vmul.f32 %v1703_v43, %v249_v47  ;;  %v449_v38 = vmul.f32 %v1703_v43, %v250_v50  ;;  %v432_v27 = vmul.f32 %v1703_v43, %v233_v7  ;;  %v433_v41 = vmul.f32 %v1703_v43, %v234_v9 }
  0x55   : > { %v573_v29 = vpack.c.bf16 %v447_v49, %v446_v20  ;;  %v565_v44 = vpack.c.bf16 %v431_v55, %v430_v15  ;;  %v450_v3 = vmul.f32 %v1703_v43, %v251_v53  ;;  %v451_v4 = vmul.f32 %v1703_v43, %v252_v56 }
  0x56   : > { %v574_v31 = vpack.c.bf16 %v449_v38, %v448_v24  ;;  %v566_v47 = vpack.c.bf16 %v433_v41, %v432_v27  ;;  %v434_v50 = vmul.f32 %v1703_v43, %v235_v11  ;;  %v435_v7 = vmul.f32 %v1703_v43, %v236_v13 }
  0x57   : > { %613 = vxpose.xlu0.c.b16.start [1/8] %v573_v29, 128  ;;  %597 = vxpose.xlu1.c.b16.start [1/8] %v565_v44, 128  ;;  %v575_v9 = vpack.c.bf16 %v451_v4, %v450_v3  ;;  %v452_v20 = vmul.f32 %v1703_v43, %v253_v59  ;;  %v2565_v49 = vunpack.c.l.bf16 %v2007_v57  ;;  %v529_v15 = vrot.slane %v528_v32, 1 }
  0x58   : > { %v567_v56 = vpack.c.bf16 %v435_v7, %v434_v50  ;;  %v436_v61 = vmul.f32 %v1703_v43, %v2566_v37  ;;  %v2567_v55 = vunpack.c.l.bf16 %v1896_v12  ;;  %v2568_v13 = vunpack.c.l.bf16 %v2014_v60 }
  0x59   : > { %v453_v53 = vmul.f32 %v1703_v43, %v2565_v49  ;;  %v2569_v27 = vunpack.c.l.bf16 %v2021_v63  ;;  %v530_v41 = vadd.f32 %v529_v15, %v528_v32  ;;  %v2570_v44 = vunpack.c.l.bf16 %v1904_v14 }
  0x5a   : > { %v437_v11 = vmul.f32 %v1703_v43, %v2567_v55  ;;  %v454_v38 = vmul.f32 %v1703_v43, %v2568_v13  ;;  %v2571_v3 = vunpack.c.l.bf16 %v1913_v17  ;;  %v2572_v50 = vunpack.c.l.bf16 %v2028_v52 }
  0x5b   : > { %614 = vxpose.xlu0.c.b16.cont [2/8] %v574_v31, 128  ;;  %598 = vxpose.xlu1.c.b16.cont [2/8] %v566_v47, 128  ;;  %v576_v24 = vpack.c.bf16 %v453_v53, %v452_v20  ;;  %v455_v59 = vmul.f32 %v1703_v43, %v2569_v27  ;;  %v438_v31 = vmul.f32 %v1703_v43, %v2570_v44  ;;  %v531_v47 = vmax.f32 %v530_v41, 1e-24 }
  0x5c   : > { %v568_v29 = vpack.c.bf16 %v437_v11, %v436_v61  ;;  %v439_v4 = vmul.f32 %v1703_v43, %v2571_v3  ;;  %v456_v7 = vmul.f32 %v1703_v43, %v2572_v50  ;;  %v2573_v20 = vunpack.c.l.bf16 %v2035_v46 }
  0x5d   : > { %v2574_v53 = vunpack.c.l.bf16 %v1916_v18  ;;  %1704 = vrsqrt.f32 %v531_v47  ;;  %v577_v32 = vpack.c.bf16 %v455_v59, %v454_v38  ;;  %v2575_v15 = vunpack.c.l.bf16 %v1925_v21 }
  0x5e   : > { %v457_v49 = vmul.f32 %v1703_v43, %v2573_v20  ;;  %v2576_v55 = vunpack.c.l.bf16 %v2042_v40  ;;  %v2577_v13 = vunpack.c.l.bf16 %v2049_v34  ;;  %v2578_v44 = vunpack.c.l.bf16 %v1929_v23  ;;  %v732_v34 = vld [vmem:[%s2561_s1 + $0x30] sm:$0xff] }
  0x5f   : > { %615 = vxpose.xlu0.c.b16.cont [3/8] %v575_v9, 128  ;;  %599 = vxpose.xlu1.c.b16.cont [3/8] %v567_v56, 128  ;;  %v440_v37 = vmul.f32 %v1703_v43, %v2574_v53  ;;  %v569_v9 = vpack.c.bf16 %v439_v4, %v438_v31  ;;  %v441_v56 = vmul.f32 %v1703_v43, %v2575_v15  ;;  %v2580_v59 = vunpack.c.l.bf16 %v2056_v25 }
  0x60   : > { %v578_v61 = vpack.c.bf16 %v457_v49, %v456_v7  ;;  %v458_v11 = vmul.f32 %v1703_v43, %v2576_v55  ;;  %v459_v27 = vmul.f32 %v1703_v43, %v2577_v13  ;;  %v442_v3 = vmul.f32 %v1703_v43, %v2578_v44 }
  0x61   : > { %v570_v41 = vpack.c.bf16 %v441_v56, %v440_v37  ;;  %v2581_v31 = vunpack.c.l.bf16 %v2063_v58  ;;  %v2582_v47 = vunpack.c.l.bf16 %v1944_v30  ;;  %v2583_v7 = vunpack.c.l.bf16 %v1951_v33  ;;  %v734_v58 = vld [vmem:[%s2561_s1 + $0x40] sm:$0xff] }
  0x62   : > { %v579_v49 = vpack.c.bf16 %v459_v27, %v458_v11  ;;  %v2584_v15 = vunpack.c.h.bf16 %v1958_v36  ;;  %v2585_v55 = vunpack.c.h.bf16 %v1965_v39  ;;  %v2586_v44 = vunpack.c.h.bf16 %v1870_v0 }
  0x63   : > { %616 = vxpose.xlu0.c.b16.cont [4/8] %v576_v24, 128  ;;  %600 = vxpose.xlu1.c.b16.cont [4/8] %v568_v29, 128  ;;  %v2579_v24 = vunpack.c.l.bf16 %v1936_v26  ;;  %v460_v29 = vmul.f32 %v1703_v43, %v2580_v59  ;;  %v461_v4 = vmul.f32 %v1703_v43, %v2581_v31  ;;  %v444_v50 = vmul.f32 %v1703_v43, %v2582_v47 }
  0x64   : > { %v445_v20 = vmul.f32 %v1703_v43, %v2583_v7  ;;  %v2588_v27 = vunpack.c.h.bf16 %v1972_v42  ;;  %v2589_v36 = vunpack.c.h.bf16 %v1979_v45  ;;  %v2590_v39 = vunpack.c.h.bf16 %v1876_v2 }
  0x65   : > { %v443_v38 = vmul.f32 %v1703_v43, %v2579_v24  ;;  %v2591_v0 = vunpack.c.h.bf16 %v1881_v5  ;;  %v2592_v42 = vunpack.c.h.bf16 %v1986_v48  ;;  %v2593_v45 = vunpack.c.h.bf16 %v1993_v51 }
  0x66   : > { %v2594_v5 = vunpack.c.h.bf16 %v1884_v6  ;;  %v2605_v52 = vunpack.c.h.bf16 %v1925_v21  ;;  %v729_v21 = vld [vmem:[%s2561_s1 + $0x18] sm:$0xff]  ;;  %v2607_v40 = vunpack.c.h.bf16 %v1936_v26  ;;  %v731_v26 = vld [vmem:[%s2561_s1 + $0x28] sm:$0xff]  ;;  %v2609_v25 = vunpack.c.h.bf16 %v1951_v33  ;;  %v736_v33 = vld [vmem:[%s2561_s1 + $0x50] sm:$0xff] }
  0x67   : > { %617 = vxpose.xlu0.c.b16.cont [5/8] %v577_v32, 128  ;;  %601 = vxpose.xlu1.c.b16.cont [5/8] %v569_v9, 128  ;;  %v571_v53 = vpack.c.bf16 %v443_v38, %v442_v3  ;;  %v2157_v37 = vpop.eup %1704  ;;  %v580_v32 = vpack.c.bf16 %v461_v4, %v460_v29  ;;  %v572_v9 = vpack.c.bf16 %v445_v20, %v444_v50  ;;  %v2595_v50 = vunpack.c.h.bf16 %v1888_v8 }
  0x68   : > { %v549_v56 = vmul.f32 %v2157_v37, %v2584_v15  ;;  %v550_v13 = vmul.f32 %v2157_v37, %v2585_v55  ;;  %v533_v43 = vmul.f32 %v2157_v37, %v2586_v44  ;;  %v552_v3 = vmul.f32 %v2157_v37, %v2589_v36 }
  0x69   : > { %v535_v24 = vmul.f32 %v2157_v37, %v2590_v39  ;;  %v536_v38 = vmul.f32 %v2157_v37, %v2591_v0  ;;  %v553_v29 = vmul.f32 %v2157_v37, %v2592_v42  ;;  %v554_v4 = vmul.f32 %v2157_v37, %v2593_v45  ;;  %v733_v45 = vld [vmem:[%s2561_s1 + $0x38] sm:$0xff] }
  0x6a   : > { %v537_v47 = vmul.f32 %v2157_v37, %v2594_v5  ;;  %v538_v7 = vmul.f32 %v2157_v37, %v2595_v50  ;;  %v2596_v20 = vunpack.c.h.bf16 %v2000_v54  ;;  %v2598_v15 = vunpack.c.h.bf16 %v1892_v10  ;;  %v727_v10 = vld [vmem:[%s2561_s1 + $0x8] sm:$0xff]  ;;  %v740_v5 = vld [vmem:[%s2561_s1 + $0x70] sm:$0xff]  ;;  %v741_v50 = vld [vmem:[%s2561_s1 + $0x78] sm:$0xff] }
  0x6b   : > { %618 = vxpose.xlu0.c.b16.cont [6/8] %v578_v61, 128  ;;  %602 = vxpose.xlu1.c.b16.cont [6/8] %v570_v41, 128  ;;  %v2587_v61 = vunpack.c.h.bf16 %v1873_v1  ;;  %v551_v41 = vmul.f32 %v2157_v37, %v2588_v27  ;;  %v589_v1 = vpack.c.bf16 %v550_v13, %v549_v56  ;;  %v582_v2 = vpack.c.bf16 %v536_v38, %v535_v24 }
  0x6c   : > { %v591_v48 = vpack.c.bf16 %v554_v4, %v553_v29  ;;  %v555_v51 = vmul.f32 %v2157_v37, %v2596_v20  ;;  %v583_v6 = vpack.c.bf16 %v538_v7, %v537_v47  ;;  %v539_v8 = vmul.f32 %v2157_v37, %v2598_v15  ;;  %v738_v4 = vld [vmem:[%s2561_s1 + $0x60] sm:$0xff]  ;;  %v739_v47 = vld [vmem:[%s2561_s1 + $0x68] sm:$0xff] }
  0x6d   : > { %v534_v11 = vmul.f32 %v2157_v37, %v2587_v61  ;;  %v590_v31 = vpack.c.bf16 %v552_v3, %v551_v41  ;;  %1522 = vmatprep.subr.bf16.mxu1 %v589_v1  ;;  %v2599_v56 = vunpack.c.h.bf16 %v1896_v12  ;;  %v2600_v54 = vunpack.c.h.bf16 %v2014_v60 }
  0x6e   : > { %v2602_v12 = vunpack.c.h.bf16 %v1904_v14  ;;  %v2603_v61 = vunpack.c.h.bf16 %v1913_v17  ;;  %v559_v41 = vmul.f32 %v2157_v37, %v321_v19  ;;  %v560_v14 = vmul.f32 %v2157_v37, %v322_v35  ;;  %v728_v17 = vld [vmem:[%s2561_s1 + $0x10] sm:$0xff]  ;;  %v730_v35 = vld [vmem:[%s2561_s1 + $0x20] sm:$0xff] }
  0x6f   : > { %619 = vxpose.xlu0.c.b16.cont [7/8] %v579_v49, 128  ;;  %603 = vxpose.xlu1.c.b16.cont [7/8] %v571_v53, 128  ;;  %v581_v59 = vpack.c.bf16 %v534_v11, %v533_v43  ;;  %v2597_v49 = vunpack.c.h.bf16 %v2007_v57  ;;  %v557_v55 = vmul.f32 %v2157_v37, %v2600_v54  ;;  %v2601_v57 = vunpack.c.h.bf16 %v2021_v63  ;;  %v726_v63 = vld [vmem:[%s2561_s1] sm:$0xff] }
  0x70   : > { %v541_v43 = vmul.f32 %v2157_v37, %v2602_v12  ;;  %v542_v60 = vmul.f32 %v2157_v37, %v2603_v61  ;;  %v1827_v11 = vmov 0   ;;  %v2604_v3 = vunpack.c.h.bf16 %v1916_v18 }
  0x71   : > { %1523 = vmatpush3.bf16.msra.mxu1 %v581_v59  ;;  %v556_v53 = vmul.f32 %v2157_v37, %v2597_v49  ;;  %v558_v13 = vmul.f32 %v2157_v37, %v2601_v57  ;;  %v544_v19 = vmul.f32 %v2157_v37, %v2605_v52  ;;  %v594_v46 = vpack.c.bf16 %v560_v14, %v559_v41  ;;  %v839_v14 = vld [vmem:[%s2562_s2 + $0x8] sm:$0xff] }
  0x72   : > { %1524 = vmatprep.subr.bf16.mxu1 %v590_v31  ;;  %v585_v36 = vpack.c.bf16 %v542_v60, %v541_v43  ;;  %v543_v39 = vmul.f32 %v2157_v37, %v2604_v3  ;;  %v561_v24 = vmul.f32 %v2157_v37, %v323_v16  ;;  %v562_v18 = vmul.f32 %v2157_v37, %v324_v62 }
  0x73   : > { %620 = vxpose.xlu0.c.b16.end [8/8] %v580_v32, 128  ;;  %604 = vxpose.xlu1.c.b16.end [8/8] %v572_v9, 128  ;;  %v540_v32 = vmul.f32 %v2157_v37, %v2599_v56  ;;  %v592_v9 = vpack.c.bf16 %v556_v53, %v555_v51  ;;  %v593_v27 = vpack.c.bf16 %v558_v13, %v557_v55  ;;  %v2606_v38 = vunpack.c.h.bf16 %v1929_v23 }
  0x74   : > { %v586_v0 = vpack.c.bf16 %v544_v19, %v543_v39  ;;  %v546_v16 = vmul.f32 %v2157_v37, %v2607_v40  ;;  %v595_v62 = vpack.c.bf16 %v562_v18, %v561_v24  ;;  %v563_v59 = vmul.f32 %v2157_v37, %v325_v28  ;;  %v840_v18 = vld [vmem:[%s2562_s2 + $0x10] sm:$0xff] }
  0x75   : > { %1525 = vmatpush3.bf16.msra.mxu1 %v582_v2  ;;  %v584_v44 = vpack.c.bf16 %v540_v32, %v539_v8  ;;  %v545_v1 = vmul.f32 %v2157_v37, %v2606_v38  ;;  %v564_v23 = vmul.f32 %v2157_v37, %v326_v22  ;;  %v2608_v29 = vunpack.c.h.bf16 %v1944_v30  ;;  %v737_v2 = vld [vmem:[%s2561_s1 + $0x58] sm:$0xff] }
  0x76   : > { %1526 = vmatprep.subr.bf16.mxu1 %v591_v48  ;;  %v548_v28 = vmul.f32 %v2157_v37, %v2609_v25 }
  0x77   : > { %1677 = vset.pattern.permute.xlu1 %v1827_v11  ;;  %v587_v42 = vpack.c.bf16 %v546_v16, %v545_v1  ;;  %v547_v31 = vmul.f32 %v2157_v37, %v2608_v29  ;;  %v596_v22 = vpack.c.bf16 %v564_v23, %v563_v59  ;;  %v735_v37 = vld [vmem:[%s2561_s1 + $0x48] sm:$0xff]  ;;  %v841_v16 = vld [vmem:[%s2562_s2 + $0x18] sm:$0xff] }
  0x78   : > { %749 = vperm.xlu1 %1677, %v727_v10  }
  0x79   : > { %1527 = vmatpush3.bf16.msra.mxu1 %v583_v6  ;;  %v588_v30 = vpack.c.bf16 %v548_v28, %v547_v31  ;;  %v842_v31 = vld [vmem:[%s2562_s2 + $0x20] sm:$0xff] }
  0x7a   : > { %1528 = vmatprep.subr.bf16.mxu1 %v592_v9 }
  0x7c   : > { %1676 = vset.pattern.permute.xlu0 %v1827_v11  ;;  %754 = vperm.xlu1 %1677, %v728_v17  }
  0x7d   : > { %744 = vperm.xlu0 %1676, %v726_v63   ;;  %1529 = vmatpush3.bf16.msra.mxu1 %v584_v44  ;;  %v838_v63 = vld [vmem:[%s2562_s2] sm:$0xff] }
  0x7e   : > { %1530 = vmatprep.subr.bf16.mxu1 %v593_v27 }
  0x80   : > { %759 = vperm.xlu1 %1677, %v729_v21  }
  0x81   : > { %764 = vperm.xlu0 %1676, %v730_v35   ;;  %1531 = vmatpush3.bf16.msra.mxu1 %v585_v36 }
  0x82   : > { %1532 = vmatprep.subr.bf16.mxu1 %v594_v46 }
  0x84   : > { %769 = vperm.xlu1 %1677, %v731_v26  }
  0x85   : > { %774 = vperm.xlu0 %1676, %v732_v34   ;;  %1533 = vmatpush3.bf16.msra.mxu1 %v586_v0 }
  0x86   : > { %1534 = vmatprep.subr.bf16.mxu1 %v595_v62 }
  0x88   : > { %779 = vperm.xlu1 %1677, %v733_v45  }
  0x89   : > { %784 = vperm.xlu0 %1676, %v734_v58   ;;  %1535 = vmatpush3.bf16.msra.mxu1 %v587_v42 }
  0x8a   : > { %1536 = vmatprep.subr.bf16.mxu1 %v596_v22  ;;  %v843_v22 = vld [vmem:[%s2562_s2 + $0x28] sm:$0xff] }
  0x8c   : > { %789 = vperm.xlu1 %1677, %v735_v37  }
  0x8d   : > { %794 = vperm.xlu0 %1676, %v736_v33   ;;  %1537 = vmatpush3.bf16.msra.mxu1 %v588_v30 }
  0x90   : > { %799 = vperm.xlu1 %1677, %v737_v2  }
  0x91   : > { %804 = vperm.xlu0 %1676, %v738_v4  }
  0x94   : > { %809 = vperm.xlu1 %1677, %v739_v47  }
  0x95   : > { %814 = vperm.xlu0 %1676, %v740_v5  }
  0x98   : > { %819 = vperm.xlu1 %1677, %v741_v50  }
  0xbd   : > { %v621_v7 = vpop.trf.xlu0  ;;  %v605_v48 = vpop.trf.xlu1 }
  0xbe   : > { %661 = vmatprep.mubr.bf16.mxu1 %v621_v7  ;;  %v844_v7 = vld [vmem:[%s2562_s2 + $0x30] sm:$0xff] }
  0xbf   : > { %662 = vmatmul.mubr.bf16.vlgmr.msra.gmra.mrb[0].mxu1 %v605_v48 }
  0xc1   : > { %v622_v20 = vpop.trf.xlu0  ;;  %v606_v51 = vpop.trf.xlu1 }
  0xc2   : > { %669 = vmatprep.mubr.bf16.mxu1 %v622_v20 }
  0xc5   : > { %v623_v49 = vpop.trf.xlu0  ;;  %v607_v53 = vpop.trf.xlu1 }
  0xc7   : > { %670 = vmatmul.mubr.bf16.gmra.mrb[4].mxu1 %v606_v51 }
  0xc8   : > { %677 = vmatprep.mubr.bf16.mxu1 %v623_v49  ;;  %v845_v49 = vld [vmem:[%s2562_s2 + $0x38] sm:$0xff] }
  0xc9   : > { %v624_v6 = vpop.trf.xlu0  ;;  %v608_v15 = vpop.trf.xlu1 }
  0xcd   : > { %v625_v8 = vpop.trf.xlu0  ;;  %v609_v56 = vpop.trf.xlu1 }
  0xcf   : > { %678 = vmatmul.mubr.bf16.gmra.mrb[8].mxu1 %v607_v53 }
  0xd0   : > { %685 = vmatprep.mubr.bf16.mxu1 %v624_v6 }
  0xd1   : > { %v626_v32 = vpop.trf.xlu0  ;;  %v610_v9 = vpop.trf.xlu1 }
  0xd5   : > { %v627_v54 = vpop.trf.xlu0  ;;  %v611_v55 = vpop.trf.xlu1 }
  0xd7   : > { %686 = vmatmul.mubr.bf16.gmra.mrb[12].mxu1 %v608_v15 }
  0xd8   : > { %693 = vmatprep.mubr.bf16.mxu1 %v625_v8 }
  0xd9   : > { %v628_v57 = vpop.trf.xlu0  ;;  %v612_v13 = vpop.trf.xlu1 }
  0xdf   : > { %694 = vmatmul.mubr.bf16.gmra.mrb[16].mxu1 %v609_v56 }
  0xe0   : > { %701 = vmatprep.mubr.bf16.mxu1 %v626_v32 }
  0xe7   : > { %702 = vmatmul.mubr.bf16.gmra.mrb[20].mxu1 %v610_v9 }
  0xe8   : > { %709 = vmatprep.mubr.bf16.mxu1 %v627_v54 }
  0xef   : > { %710 = vmatmul.mubr.bf16.gmra.mrb[24].mxu1 %v611_v55 }
  0xf0   : > { %717 = vmatprep.mubr.bf16.mxu1 %v628_v57  ;;  %v846_v57 = vld [vmem:[%s2562_s2 + $0x40] sm:$0xff] }
  0xf7   : > { %718 = vmatmul.mubr.bf16.gmra.mrb[28].mxu1 %v612_v13  ;;  %v750_v10 = vpop.permute.xlu1 %749 }
  0xfb   : > { %v755_v3 = vpop.permute.xlu1 %754 }
  0xfc   : > { %v745_v12 = vpop.permute.xlu0 %744 }
  0xff   : > { %v760_v38 = vpop.permute.xlu1 %759 }
 0x100   : > { %v765_v42 = vpop.permute.xlu0 %764 }
 0x103   : > { %v770_v58 = vpop.permute.xlu1 %769 }
 0x104   : > { %v775_v47 = vpop.permute.xlu0 %774 }
 0x107   : > { %v780_v51 = vpop.permute.xlu1 %779 }
 0x108   : > { %v785_v54 = vpop.permute.xlu0 %784 }
 0x192   : > { %v1538_v44 = vpop.f32.mrb[0].mxu1 }
 0x193   : > { %v1539_v43 = vpop.f32.mrb[1].mxu1 }
 0x194   : > { %v1540_v61 = vadd.f32 %v1539_v43, %v1538_v44  ;;  %v1541_v60 = vpop.f32.mrb[2].mxu1  ;;  %v790_v44 = vpop.permute.xlu1 %789 }
 0x195   : > { %v1542_v11 = vpop.f32.mrb[3].mxu1 }
 0x196   : > { %v822_v27 = vmul.f32 %v1540_v61, %v745_v12  ;;  %v1543_v41 = vadd.f32 %v1542_v11, %v1541_v60  ;;  %v847_v12 = vld [vmem:[%s2562_s2 + $0x48] sm:$0xff] }
 0x198   : > { %v823_v17 = vmul.f32 %v1543_v41, %v750_v10  ;;  %v2309_v36 = vadd.f32 %v838_v63, %v822_v27 }
 0x19a   : > { %870 = vmax.xlane.f32.xlu0 %v2309_v36  ;;  %v1544_v39 = vpop.f32.mrb[4].mxu1  ;;  %v2312_v52 = vadd.f32 %v839_v14, %v823_v17  ;;  %v795_v14 = vpop.permute.xlu0 %794 }
 0x19b   : > { %v1545_v19 = vpop.f32.mrb[5].mxu1 }
 0x19c   : > { %v1546_v35 = vadd.f32 %v1545_v19, %v1544_v39  ;;  %v1547_v46 = vpop.f32.mrb[6].mxu1  ;;  %872 = vmax.xlane.f32.xlu1 %v2312_v52 }
 0x19d   : > { %v1548_v24 = vpop.f32.mrb[7].mxu1 }
 0x19e   : > { %v824_v21 = vmul.f32 %v1546_v35, %v755_v3  ;;  %v1549_v0 = vadd.f32 %v1548_v24, %v1547_v46  ;;  %v848_v3 = vld [vmem:[%s2562_s2 + $0x50] sm:$0xff]  ;;  %v800_v35 = vpop.permute.xlu1 %799  ;;  %v849_v46 = vld [vmem:[%s2562_s2 + $0x58] sm:$0xff] }
 0x1a0   : > { %v825_v1 = vmul.f32 %v1549_v0, %v760_v38  ;;  %v2318_v40 = vadd.f32 %v840_v18, %v824_v21 }
 0x1a2   : > { %v1550_v34 = vpop.f32.mrb[8].mxu1  ;;  %874 = vmax.xlane.f32.xlu0 %v2318_v40  ;;  %v2324_v26 = vadd.f32 %v841_v16, %v825_v1 }
 0x1a3   : > { %v1551_v62 = vpop.f32.mrb[9].mxu1 }
 0x1a4   : > { %v1552_v59 = vadd.f32 %v1551_v62, %v1550_v34  ;;  %v1553_v23 = vpop.f32.mrb[10].mxu1  ;;  %v805_v34 = vpop.permute.xlu0 %804 }
 0x1a5   : > { %v1554_v29 = vpop.f32.mrb[11].mxu1 }
 0x1a6   : > { %v826_v25 = vmul.f32 %v1552_v59, %v765_v42  ;;  %v1555_v28 = vadd.f32 %v1554_v29, %v1553_v23  ;;  %876 = vmax.xlane.f32.xlu0 %v2324_v26  ;;  %v850_v59 = vld [vmem:[%s2562_s2 + $0x60] sm:$0xff]  ;;  %v810_v29 = vpop.permute.xlu1 %809 }
 0x1a8   : > { %v827_v45 = vmul.f32 %v1555_v28, %v770_v58  ;;  %v2333_v30 = vadd.f32 %v842_v31, %v826_v25  ;;  %v851_v31 = vld [vmem:[%s2562_s2 + $0x68] sm:$0xff] }
 0x1aa   : > { %v1556_v33 = vpop.f32.mrb[12].mxu1  ;;  %878 = vmax.xlane.f32.xlu0 %v2333_v30  ;;  %v2336_v37 = vadd.f32 %v843_v22, %v827_v45 }
 0x1ab   : > { %v1557_v4 = vpop.f32.mrb[13].mxu1 }
 0x1ac   : > { %v1558_v2 = vadd.f32 %v1557_v4, %v1556_v33  ;;  %v1559_v5 = vpop.f32.mrb[14].mxu1  ;;  %880 = vmax.xlane.f32.xlu1 %v2336_v37 }
 0x1ad   : > { %v1560_v50 = vpop.f32.mrb[15].mxu1 }
 0x1ae   : > { %v828_v48 = vmul.f32 %v1558_v2, %v775_v47  ;;  %v1561_v20 = vadd.f32 %v1560_v50, %v1559_v5  ;;  %v815_v2 = vpop.permute.xlu0 %814  ;;  %v852_v47 = vld [vmem:[%s2562_s2 + $0x70] sm:$0xff] }
 0x1b0   : > { %v829_v53 = vmul.f32 %v1561_v20, %v780_v51  ;;  %v2345_v6 = vadd.f32 %v844_v7, %v828_v48  ;;  %v820_v48 = vpop.permute.xlu1 %819  ;;  %v853_v20 = vld [vmem:[%s2562_s2 + $0x78] sm:$0xff] }
 0x1b2   : > { %v1562_v15 = vpop.f32.mrb[16].mxu1  ;;  %882 = vmax.xlane.f32.xlu0 %v2345_v6  ;;  %v2348_v8 = vadd.f32 %v845_v49, %v829_v53 }
 0x1b3   : > { %v1563_v56 = vpop.f32.mrb[17].mxu1 }
 0x1b4   : > { %v1564_v32 = vadd.f32 %v1563_v56, %v1562_v15  ;;  %v1565_v9 = vpop.f32.mrb[18].mxu1  ;;  %884 = vmax.xlane.f32.xlu1 %v2348_v8 }
 0x1b5   : > { %v1566_v55 = vpop.f32.mrb[19].mxu1 }
 0x1b6   : > { %v830_v13 = vmul.f32 %v1564_v32, %v785_v54  ;;  %v1567_v10 = vadd.f32 %v1566_v55, %v1565_v9 }
 0x1b8   : > { %v831_v43 = vmul.f32 %v1567_v10, %v790_v44  ;;  %v2357_v61 = vadd.f32 %v846_v57, %v830_v13 }
 0x1ba   : > { %v1568_v60 = vpop.f32.mrb[20].mxu1  ;;  %886 = vmax.xlane.f32.xlu0 %v2357_v61  ;;  %v2360_v11 = vadd.f32 %v847_v12, %v831_v43 }
 0x1bb   : > { %v1569_v63 = vpop.f32.mrb[21].mxu1 }
 0x1bc   : > { %v1570_v27 = vadd.f32 %v1569_v63, %v1568_v60  ;;  %v1571_v41 = vpop.f32.mrb[22].mxu1  ;;  %888 = vmax.xlane.f32.xlu1 %v2360_v11 }
 0x1bd   : > { %v1572_v17 = vpop.f32.mrb[23].mxu1 }
 0x1be   : > { %v832_v39 = vmul.f32 %v1570_v27, %v795_v14  ;;  %v1573_v19 = vadd.f32 %v1572_v17, %v1571_v41 }
 0x1c0   : > { %v833_v24 = vmul.f32 %v1573_v19, %v800_v35  ;;  %v2369_v18 = vadd.f32 %v848_v3, %v832_v39 }
 0x1c2   : > { %v1574_v21 = vpop.f32.mrb[24].mxu1  ;;  %890 = vmax.xlane.f32.xlu0 %v2369_v18  ;;  %v2372_v0 = vadd.f32 %v849_v46, %v833_v24 }
 0x1c3   : > { %v1575_v38 = vpop.f32.mrb[25].mxu1 }
 0x1c4   : > { %v1576_v1 = vadd.f32 %v1575_v38, %v1574_v21  ;;  %v1577_v16 = vpop.f32.mrb[26].mxu1  ;;  %892 = vmax.xlane.f32.xlu1 %v2372_v0 }
 0x1c5   : > { %v1578_v62 = vpop.f32.mrb[27].mxu1 }
 0x1c6   : > { %v834_v23 = vmul.f32 %v1576_v1, %v805_v34  ;;  %v1579_v42 = vadd.f32 %v1578_v62, %v1577_v16 }
 0x1c8   : > { %v835_v25 = vmul.f32 %v1579_v42, %v810_v29  ;;  %v2381_v28 = vadd.f32 %v850_v59, %v834_v23 }
 0x1ca   : > { %v1580_v58 = vpop.f32.mrb[28].mxu1  ;;  %894 = vmax.xlane.f32.xlu0 %v2381_v28  ;;  %v2384_v22 = vadd.f32 %v851_v31, %v835_v25 }
 0x1cb   : > { %v1581_v45 = vpop.f32.mrb[29].mxu1 }
 0x1cc   : > { %v1582_v33 = vadd.f32 %v1581_v45, %v1580_v58  ;;  %v1583_v4 = vpop.f32.mrb[30].mxu1  ;;  %896 = vmax.xlane.f32.xlu1 %v2384_v22 }
 0x1cd   : > { %v1584_v5 = vpop.f32.mrb[31].mxu1 }
 0x1ce   : > { %v836_v50 = vmul.f32 %v1582_v33, %v815_v2  ;;  %v1585_v7 = vadd.f32 %v1584_v5, %v1583_v4 }
 0x1d0   : > { %v837_v51 = vmul.f32 %v1585_v7, %v820_v48  ;;  %v2393_v49 = vadd.f32 %v852_v47, %v836_v50 }
 0x1d2   : > { %898 = vmax.xlane.f32.xlu0 %v2393_v49  ;;  %v2396_v53 = vadd.f32 %v853_v20, %v837_v51 }
 0x1d4   : > { %900 = vmax.xlane.f32.xlu1 %v2396_v53 }
 0x227   : > { %v871_v15 = vpop.xlane.xlu0 %870 }
 0x228   : > { %v902_v56 = vsub.f32 %v2309_v36, %v871_v15  ;;  %v1678_v15 = vld [vmem:[%s2563_s3] sm:$0xff]  }
 0x229   : > { %v873_v32 = vpop.xlane.xlu1 %872  ;;  %1650 = vmatprep.mubr.bf16.mxu1 %v1678_v15 }
 0x22a   : > { %v918_v9 = vmul.f32 1.442695, %v902_v56  ;;  %v903_v54 = vsub.f32 %v2312_v52, %v873_v32  ;;  %v1686_v56 = vld [vmem:[%s1867_s20 + $0xc8] ss:$12 sps:$4 sm:$0xff]  }
 0x22b   : > { %v1687_v32 = vld [vmem:[%s1867_s20 + $0x8] ss:$12 sps:$4 sm:$0xff]   ;;  %1602 = vmatprep.subr.bf16.mxu0 %v1686_v56 }
 0x22c   : > { %1706 = vpow2.f32 %v918_v9  ;;  %v920_v55 = vmul.f32 1.442695, %v903_v54  ;;  %v1688_v9 = vld [vmem:[%s1867_s20 + $0xe0] ss:$12 sps:$4 sm:$0xff]   ;;  %1603 = vmatpush3.bf16.xpose.msra.mxu0 %v1687_v32 }
 0x22d   : > { %1604 = vmatprep.subr.bf16.mxu0 %v1688_v9  ;;  %v1689_v54 = vld [vmem:[%s1867_s20 + $0x20] ss:$12 sps:$4 sm:$0xff]  }
 0x22e   : > { %1708 = vpow2.f32 %v920_v55  ;;  %v1690_v55 = vld [vmem:[%s1867_s20 + $0xf8] ss:$12 sps:$4 sm:$0xff]  }
 0x22f   : > { %v875_v57 = vpop.xlane.xlu0 %874 }
 0x230   : > { %v904_v13 = vsub.f32 %v2318_v40, %v875_v57  ;;  %v1691_v57 = vld [vmem:[%s1867_s20 + $0x38] ss:$12 sps:$4 sm:$0xff]  }
 0x232   : > { %v922_v10 = vmul.f32 1.442695, %v904_v13  ;;  %v1692_v13 = vld [vmem:[%s1867_s20 + $0x110] ss:$12 sps:$4 sm:$0xff]  }
 0x233   : > { %v877_v44 = vpop.xlane.xlu0 %876 }
 0x234   : > { %1710 = vpow2.f32 %v922_v10  ;;  %v905_v12 = vsub.f32 %v2324_v26, %v877_v44  ;;  %1605 = vmatpush3.bf16.xpose.msra.mxu0 %v1689_v54  ;;  %v1693_v10 = vld [vmem:[%s1867_s20 + $0x50] ss:$12 sps:$4 sm:$0xff]   ;;  %v1694_v44 = vld [vmem:[%s1867_s20 + $0x128] ss:$12 sps:$4 sm:$0xff]  }
 0x235   : > { %1606 = vmatprep.subr.bf16.mxu0 %v1690_v55 }
 0x236   : > { %v2403_v43 = vpop.eup %1706  ;;  %v924_v60 = vmul.f32 1.442695, %v905_v12 }
 0x237   : > { %950 = vadd.xlane.f32.xlu0 %v2403_v43  ;;  %v879_v36 = vpop.xlane.xlu0 %878 }
 0x238   : > { %v2406_v63 = vpop.eup %1708  ;;  %1712 = vpow2.f32 %v924_v60  ;;  %v906_v52 = vsub.f32 %v2333_v30, %v879_v36  ;;  %v1695_v36 = vld [vmem:[%s1867_s20 + $0x68] ss:$12 sps:$4 sm:$0xff]  }
 0x239   : > { %952 = vadd.xlane.f32.xlu1 %v2406_v63  ;;  %v881_v27 = vpop.xlane.xlu1 %880 }
 0x23a   : > { %v926_v40 = vmul.f32 1.442695, %v906_v52  ;;  %v907_v41 = vsub.f32 %v2336_v37, %v881_v27  ;;  %v1696_v52 = vld [vmem:[%s1867_s20 + $0x140] ss:$12 sps:$4 sm:$0xff]  }
 0x23c   : > { %1714 = vpow2.f32 %v926_v40  ;;  %v928_v14 = vmul.f32 1.442695, %v907_v41  ;;  %1607 = vmatpush3.bf16.xpose.msra.mxu0 %v1691_v57 }
 0x23d   : > { %1608 = vmatprep.subr.bf16.mxu0 %v1692_v13 }
 0x23e   : > { %v2411_v26 = vpop.eup %1710  ;;  %1716 = vpow2.f32 %v928_v14 }
 0x23f   : > { %954 = vadd.xlane.f32.xlu0 %v2411_v26  ;;  %v883_v17 = vpop.xlane.xlu0 %882 }
 0x240   : > { %v908_v3 = vsub.f32 %v2345_v6, %v883_v17  ;;  %v1697_v17 = vld [vmem:[%s1867_s20 + $0x80] ss:$12 sps:$4 sm:$0xff]  }
 0x241   : > { %v885_v39 = vpop.xlane.xlu1 %884 }
 0x242   : > { %v2415_v19 = vpop.eup %1712  ;;  %v930_v30 = vmul.f32 1.442695, %v908_v3  ;;  %v909_v35 = vsub.f32 %v2348_v8, %v885_v39 }
 0x243   : > { %956 = vadd.xlane.f32.xlu1 %v2415_v19 }
 0x244   : > { %1718 = vpow2.f32 %v930_v30  ;;  %v932_v37 = vmul.f32 1.442695, %v909_v35  ;;  %1609 = vmatpush3.bf16.xpose.msra.mxu0 %v1693_v10  ;;  %v1698_v30 = vld [vmem:[%s1867_s20 + $0x158] ss:$12 sps:$4 sm:$0xff]  }
 0x245   : > { %1610 = vmatprep.subr.bf16.mxu0 %v1694_v44 }
 0x246   : > { %v2419_v46 = vpop.eup %1714  ;;  %1720 = vpow2.f32 %v932_v37 }
 0x247   : > { %958 = vadd.xlane.f32.xlu0 %v2419_v46  ;;  %v887_v24 = vpop.xlane.xlu0 %886 }
 0x248   : > { %v2422_v21 = vpop.eup %1716  ;;  %v910_v6 = vsub.f32 %v2357_v61, %v887_v24 }
 0x249   : > { %960 = vadd.xlane.f32.xlu1 %v2422_v21  ;;  %v889_v38 = vpop.xlane.xlu1 %888 }
 0x24a   : > { %v934_v1 = vmul.f32 1.442695, %v910_v6  ;;  %v911_v8 = vsub.f32 %v2360_v11, %v889_v38  ;;  %v1699_v38 = vld [vmem:[%s1867_s20 + $0x98] ss:$12 sps:$4 sm:$0xff]  }
 0x24c   : > { %1722 = vpow2.f32 %v934_v1  ;;  %v936_v16 = vmul.f32 1.442695, %v911_v8  ;;  %1611 = vmatpush3.bf16.xpose.msra.mxu0 %v1695_v36  ;;  %v1700_v1 = vld [vmem:[%s1867_s20 + $0x170] ss:$12 sps:$4 sm:$0xff]   ;;  %v1679_v36 = vld [vmem:[%s2563_s3 + $0x8] sm:$0xff]  }
 0x24d   : > { %1612 = vmatprep.subr.bf16.mxu0 %v1696_v52  ;;  %v1684_v52 = vld [vmem:[%s2563_s3 + $0x30] sm:$0xff]  }
 0x24e   : > { %v2427_v34 = vpop.eup %1718  ;;  %1724 = vpow2.f32 %v936_v16 }
 0x24f   : > { %962 = vadd.xlane.f32.xlu0 %v2427_v34  ;;  %v891_v62 = vpop.xlane.xlu0 %890 }
 0x250   : > { %v2430_v59 = vpop.eup %1720  ;;  %v912_v23 = vsub.f32 %v2369_v18, %v891_v62 }
 0x251   : > { %964 = vadd.xlane.f32.xlu1 %v2430_v59  ;;  %v893_v61 = vpop.xlane.xlu1 %892 }
 0x252   : > { %v938_v42 = vmul.f32 1.442695, %v912_v23  ;;  %v913_v29 = vsub.f32 %v2372_v0, %v893_v61 }
 0x254   : > { %1726 = vpow2.f32 %v938_v42  ;;  %v940_v11 = vmul.f32 1.442695, %v913_v29  ;;  %1613 = vmatpush3.bf16.xpose.msra.mxu0 %v1697_v17 }
 0x255   : > { %1614 = vmatprep.subr.bf16.mxu0 %v1698_v30 }
 0x256   : > { %v2435_v31 = vpop.eup %1722  ;;  %1728 = vpow2.f32 %v940_v11 }
 0x257   : > { %966 = vadd.xlane.f32.xlu0 %v2435_v31  ;;  %v895_v25 = vpop.xlane.xlu0 %894 }
 0x258   : > { %v2438_v58 = vpop.eup %1724  ;;  %v914_v45 = vsub.f32 %v2381_v28, %v895_v25 }
 0x259   : > { %968 = vadd.xlane.f32.xlu1 %v2438_v58  ;;  %v897_v18 = vpop.xlane.xlu1 %896 }
 0x25a   : > { %v942_v33 = vmul.f32 1.442695, %v914_v45  ;;  %v915_v4 = vsub.f32 %v2384_v22, %v897_v18 }
 0x25c   : > { %1730 = vpow2.f32 %v942_v33  ;;  %v944_v0 = vmul.f32 1.442695, %v915_v4  ;;  %1615 = vmatpush3.bf16.xpose.msra.mxu0 %v1699_v38 }
 0x25d   : > { %1616 = vmatprep.subr.bf16.mxu0 %v1700_v1 }
 0x25e   : > { %v2443_v2 = vpop.eup %1726  ;;  %1732 = vpow2.f32 %v944_v0 }
 0x25f   : > { %970 = vadd.xlane.f32.xlu0 %v2443_v2  ;;  %v899_v5 = vpop.xlane.xlu0 %898 }
 0x260   : > { %v2446_v47 = vpop.eup %1728  ;;  %v916_v50 = vsub.f32 %v2393_v49, %v899_v5 }
 0x261   : > { %972 = vadd.xlane.f32.xlu1 %v2446_v47  ;;  %v901_v28 = vpop.xlane.xlu1 %900 }
 0x262   : > { %v946_v7 = vmul.f32 1.442695, %v916_v50  ;;  %v917_v22 = vsub.f32 %v2396_v53, %v901_v28 }
 0x264   : > { %1734 = vpow2.f32 %v946_v7  ;;  %v948_v48 = vmul.f32 1.442695, %v917_v22 }
 0x266   : > { %v2451_v20 = vpop.eup %1730  ;;  %1736 = vpow2.f32 %v948_v48 }
 0x267   : > { %974 = vadd.xlane.f32.xlu0 %v2451_v20 }
 0x268   : > { %v2454_v51 = vpop.eup %1732 }
 0x269   : > { %976 = vadd.xlane.f32.xlu1 %v2454_v51 }
 0x26e   : > { %v2457_v49 = vpop.eup %1734 }
 0x26f   : > { %978 = vadd.xlane.f32.xlu0 %v2457_v49 }
 0x270   : > { %v2460_v53 = vpop.eup %1736 }
 0x271   : > { %980 = vadd.xlane.f32.xlu1 %v2460_v53 }
 0x2c4   : > { %v951_v12 = vpop.xlane.xlu0 %950 }
 0x2c5   : > { %1738 = vrcp.f32 %v951_v12 }
 0x2c6   : > { %v953_v60 = vpop.xlane.xlu1 %952 }
 0x2c7   : > { %1740 = vrcp.f32 %v953_v60 }
 0x2cc   : > { %v955_v27 = vpop.xlane.xlu0 %954 }
 0x2cd   : > { %1742 = vrcp.f32 %v955_v27  ;;  %v1685_v27 = vld [vmem:[%s2563_s3 + $0x38] sm:$0xff]  }
 0x2cf   : > { %v1739_v40 = vpop.eup %1738 }
 0x2d0   : > { %v957_v41 = vpop.xlane.xlu1 %956  ;;  %v998_v3 = vmul.f32 %v1739_v40, %v2403_v43  ;;  %v1701_v40 = vld [vmem:[%s1867_s20 + $0xb0] ss:$12 sps:$4 sm:$0xff]   ;;  %s1521_s20 = sshll.u32 %s2611_s16, 8 }
 0x2d1   : > { %v1741_v14 = vpop.eup %1740  ;;  %1744 = vrcp.f32 %v957_v41  ;;  %1617 = vmatpush3.bf16.xpose.msra.mxu0 %v1701_v40  ;;  %s2523_s8 = scalar_lea.vmem %s2564_s4, %s1521_s20 }
 0x2d2   : > { %v999_v39 = vmul.f32 %v1741_v14, %v2406_v63 }
 0x2d4   : > { %v959_v35 = vpop.xlane.xlu0 %958  ;;  %v1030_v37 = vpack.c.bf16 %v999_v39, %v998_v3 }
 0x2d5   : > { %1746 = vrcp.f32 %v959_v35 }
 0x2d6   : > { %1634 = vmatprep.subr.bf16.mxu1 %v1030_v37  ;;  %v961_v24 = vpop.xlane.xlu1 %960 }
 0x2d7   : > { %1748 = vrcp.f32 %v961_v24  ;;  %1635 = vmatpush3.bf16.msra.mxu1 %v1030_v37  ;;  %v1743_v6 = vpop.eup %1742 }
 0x2d8   : > { %v1000_v62 = vmul.f32 %v1743_v6, %v2411_v26 }
 0x2db   : > { %v1745_v8 = vpop.eup %1744 }
 0x2dc   : > { %v963_v16 = vpop.xlane.xlu0 %962  ;;  %v1001_v43 = vmul.f32 %v1745_v8, %v2415_v19 }
 0x2dd   : > { %1750 = vrcp.f32 %v963_v16 }
 0x2de   : > { %v965_v63 = vpop.xlane.xlu1 %964  ;;  %v1031_v23 = vpack.c.bf16 %v1001_v43, %v1000_v62 }
 0x2df   : > { %v1747_v61 = vpop.eup %1746  ;;  %1752 = vrcp.f32 %v965_v63 }
 0x2e0   : > { %1636 = vmatprep.subr.bf16.mxu1 %v1031_v23  ;;  %v1002_v29 = vmul.f32 %v1747_v61, %v2419_v46 }
 0x2e1   : > { %v1749_v42 = vpop.eup %1748  ;;  %1637 = vmatpush3.bf16.msra.mxu1 %v1031_v23 }
 0x2e2   : > { %v1003_v11 = vmul.f32 %v1749_v42, %v2422_v21 }
 0x2e4   : > { %v967_v25 = vpop.xlane.xlu0 %966  ;;  %v1032_v45 = vpack.c.bf16 %v1003_v11, %v1002_v29 }
 0x2e5   : > { %1754 = vrcp.f32 %v967_v25 }
 0x2e6   : > { %1638 = vmatprep.subr.bf16.mxu1 %v1032_v45  ;;  %v969_v26 = vpop.xlane.xlu1 %968 }
 0x2e7   : > { %v1751_v19 = vpop.eup %1750  ;;  %1756 = vrcp.f32 %v969_v26  ;;  %1639 = vmatpush3.bf16.msra.mxu1 %v1032_v45 }
 0x2e8   : > { %v1004_v33 = vmul.f32 %v1751_v19, %v2427_v34 }
 0x2e9   : > { %v1753_v18 = vpop.eup %1752 }
 0x2ea   : > { %v1005_v4 = vmul.f32 %v1753_v18, %v2430_v59 }
 0x2ec   : > { %v971_v0 = vpop.xlane.xlu0 %970  ;;  %v1033_v5 = vpack.c.bf16 %v1005_v4, %v1004_v33 }
 0x2ed   : > { %1758 = vrcp.f32 %v971_v0 }
 0x2ee   : > { %1640 = vmatprep.subr.bf16.mxu1 %v1033_v5  ;;  %v973_v46 = vpop.xlane.xlu1 %972 }
 0x2ef   : > { %v1755_v50 = vpop.eup %1754  ;;  %1760 = vrcp.f32 %v973_v46  ;;  %1641 = vmatpush3.bf16.msra.mxu1 %v1033_v5 }
 0x2f0   : > { %v1006_v28 = vmul.f32 %v1755_v50, %v2435_v31 }
 0x2f1   : > { %v1757_v21 = vpop.eup %1756 }
 0x2f2   : > { %v1007_v7 = vmul.f32 %v1757_v21, %v2438_v58 }
 0x2f4   : > { %v975_v22 = vpop.xlane.xlu0 %974  ;;  %v1034_v48 = vpack.c.bf16 %v1007_v7, %v1006_v28 }
 0x2f5   : > { %1762 = vrcp.f32 %v975_v22 }
 0x2f6   : > { %1642 = vmatprep.subr.bf16.mxu1 %v1034_v48  ;;  %v977_v34 = vpop.xlane.xlu1 %976 }
 0x2f7   : > { %v1759_v15 = vpop.eup %1758  ;;  %1764 = vrcp.f32 %v977_v34  ;;  %1643 = vmatpush3.bf16.msra.mxu1 %v1034_v48 }
 0x2f8   : > { %v1008_v56 = vmul.f32 %v1759_v15, %v2443_v2 }
 0x2f9   : > { %v1761_v59 = vpop.eup %1760 }
 0x2fa   : > { %v1009_v32 = vmul.f32 %v1761_v59, %v2446_v47 }
 0x2fc   : > { %v979_v9 = vpop.xlane.xlu0 %978  ;;  %v1035_v54 = vpack.c.bf16 %v1009_v32, %v1008_v56 }
 0x2fd   : > { %1766 = vrcp.f32 %v979_v9 }
 0x2fe   : > { %1644 = vmatprep.subr.bf16.mxu1 %v1035_v54  ;;  %v981_v31 = vpop.xlane.xlu1 %980 }
 0x2ff   : > { %v1763_v55 = vpop.eup %1762  ;;  %1768 = vrcp.f32 %v981_v31  ;;  %1645 = vmatpush3.bf16.msra.mxu1 %v1035_v54 }
 0x300   : > { %v1010_v57 = vmul.f32 %v1763_v55, %v2451_v20  ;;  %v1680_v20 = vld [vmem:[%s2563_s3 + $0x10] sm:$0xff]  }
 0x301   : > { %v1765_v58 = vpop.eup %1764 }
 0x302   : > { %v1011_v13 = vmul.f32 %v1765_v58, %v2454_v51  ;;  %v1681_v51 = vld [vmem:[%s2563_s3 + $0x18] sm:$0xff]  }
 0x304   : > { %v1036_v10 = vpack.c.bf16 %v1011_v13, %v1010_v57 }
 0x306   : > { %1646 = vmatprep.subr.bf16.mxu1 %v1036_v10 }
 0x307   : > { %v1767_v44 = vpop.eup %1766  ;;  %1647 = vmatpush3.bf16.msra.mxu1 %v1036_v10 }
 0x308   : > { %v1012_v47 = vmul.f32 %v1767_v44, %v2457_v49  ;;  %v1682_v49 = vld [vmem:[%s2563_s3 + $0x20] sm:$0xff]  }
 0x309   : > { %v1769_v2 = vpop.eup %1768 }
 0x30a   : > { %v1013_v12 = vmul.f32 %v1769_v2, %v2460_v53  ;;  %v1683_v53 = vld [vmem:[%s2563_s3 + $0x28] sm:$0xff]  }
 0x30c   : > { %v1037_v60 = vpack.c.bf16 %v1013_v12, %v1012_v47 }
 0x30e   : > { %1648 = vmatprep.subr.bf16.mxu1 %v1037_v60 }
 0x30f   : > { %1649 = vmatpush3.bf16.msra.mxu1 %v1037_v60 }
 0x312   : > { %1651 = vmatmul.mubr.bf16.vlgmr.msra.gmra.mrb[32].mxu1 %v1679_v36 }
 0x313   : > { %1654 = vmatprep.mubr.bf16.mxu1 %v1680_v20 }
 0x31a   : > { %1655 = vmatmul.mubr.bf16.gmra.mrb[36].mxu1 %v1681_v51 }
 0x31b   : > { %1658 = vmatprep.mubr.bf16.mxu1 %v1682_v49 }
 0x322   : > { %1659 = vmatmul.mubr.bf16.gmra.mrb[40].mxu1 %v1683_v53 }
 0x323   : > { %1662 = vmatprep.mubr.bf16.mxu1 %v1684_v52 }
 0x32a   : > { %1663 = vmatmul.mubr.bf16.gmra.mrb[44].mxu1 %v1685_v27 }
 0x3e5   : > { %v1652_v41 = vpop.f32.mrb[32].mxu1 }
 0x3e6   : > { %v1120_v14 = vpop.f32.mrb[33].mxu1 }
 0x3e7   : > { %v1653_v17 = vpop.f32.mrb[34].mxu1 }
 0x3e8   : > { %v1184_v3 = vpack.c.bf16 %v1653_v17, %v1652_v41  ;;  %v1123_v39 = vpop.f32.mrb[35].mxu1 }
 0x3e9   : > { %v1183_v30 = vpack.c.bf16 %v1123_v39, %v1120_v14 }
 0x3eb   : > { %1618 = vmatprep.mubr.bf16.mxu0 %v1183_v30 }
 0x3ec   : > { %1619 = vmatmul.mubr.bf16.vlgmr.msra.gmra.mrb[0].mxu0 %v1183_v30 }
 0x3ed   : > { %1620 = vmatprep.mubr.bf16.mxu0 %v1184_v3  ;;  %v1656_v35 = vpop.f32.mrb[36].mxu1 }
 0x3ee   : > { %v1136_v37 = vpop.f32.mrb[37].mxu1 }
 0x3ef   : > { %v1657_v24 = vpop.f32.mrb[38].mxu1 }
 0x3f0   : > { %v1186_v6 = vpack.c.bf16 %v1657_v24, %v1656_v35  ;;  %v1139_v38 = vpop.f32.mrb[39].mxu1 }
 0x3f1   : > { %v1185_v1 = vpack.c.bf16 %v1139_v38, %v1136_v37 }
 0x3f4   : > { %1621 = vmatmul.mubr.bf16.gmra.mrb[4].mxu0 %v1184_v3 }
 0x3f5   : > { %1622 = vmatprep.mubr.bf16.mxu0 %v1185_v1  ;;  %v1660_v8 = vpop.f32.mrb[40].mxu1 }
 0x3f6   : > { %v1152_v16 = vpop.f32.mrb[41].mxu1 }
 0x3f7   : > { %v1661_v62 = vpop.f32.mrb[42].mxu1 }
 0x3f8   : > { %v1188_v43 = vpack.c.bf16 %v1661_v62, %v1660_v8  ;;  %v1155_v63 = vpop.f32.mrb[43].mxu1 }
 0x3f9   : > { %v1187_v23 = vpack.c.bf16 %v1155_v63, %v1152_v16 }
 0x3fc   : > { %1623 = vmatmul.mubr.bf16.gmra.mrb[8].mxu0 %v1185_v1 }
 0x3fd   : > { %1624 = vmatprep.mubr.bf16.mxu0 %v1186_v6  ;;  %v1664_v61 = vpop.f32.mrb[44].mxu1 }
 0x3fe   : > { %v1168_v42 = vpop.f32.mrb[45].mxu1 }
 0x3ff   : > { %v1665_v29 = vpop.f32.mrb[46].mxu1 }
 0x400   : > { %v1190_v11 = vpack.c.bf16 %v1665_v29, %v1664_v61  ;;  %v1171_v25 = vpop.f32.mrb[47].mxu1 }
 0x401   : > { %v1189_v45 = vpack.c.bf16 %v1171_v25, %v1168_v42 }
 0x404   : > { %1625 = vmatmul.mubr.bf16.gmra.mrb[12].mxu0 %v1186_v6 }
 0x405   : > { %1626 = vmatprep.mubr.bf16.mxu0 %v1187_v23 }
 0x40c   : > { %1627 = vmatmul.mubr.bf16.gmra.mrb[16].mxu0 %v1187_v23 }
 0x40d   : > { %1628 = vmatprep.mubr.bf16.mxu0 %v1188_v43 }
 0x414   : > { %1629 = vmatmul.mubr.bf16.gmra.mrb[20].mxu0 %v1188_v43 }
 0x415   : > { %1630 = vmatprep.mubr.bf16.mxu0 %v1189_v45 }
 0x41c   : > { %1631 = vmatmul.mubr.bf16.gmra.mrb[24].mxu0 %v1189_v45 }
 0x41d   : > { %1632 = vmatprep.mubr.bf16.mxu0 %v1190_v11 }
 0x424   : > { %1633 = vmatmul.mubr.bf16.gmra.mrb[28].mxu0 %v1190_v11 }
 0x4bf   : > { %v1321_v26 = vpop.f32.mrb[0].mxu0 }
 0x4c0   : > { %1400 = vst [vmem:[%s2523_s8] sm:$0xff] %v1321_v26  ;;  %v1323_v19 = vpop.f32.mrb[1].mxu0 }
 0x4c1   : > { %1401 = vst [vmem:[%s2523_s8 + $0x8] sm:$0xff] %v1323_v19  ;;  %v1325_v18 = vpop.f32.mrb[2].mxu0 }
 0x4c2   : > { %1402 = vst [vmem:[%s2523_s8 + $0x10] sm:$0xff] %v1325_v18  ;;  %v1327_v33 = vpop.f32.mrb[3].mxu0 }
 0x4c3   : > { %1403 = vst [vmem:[%s2523_s8 + $0x18] sm:$0xff] %v1327_v33 }
 0x4c7   : > { %v1331_v4 = vpop.f32.mrb[4].mxu0 }
 0x4c8   : > { %1404 = vst [vmem:[%s2523_s8 + $0x20] sm:$0xff] %v1331_v4  ;;  %v1333_v0 = vpop.f32.mrb[5].mxu0 }
 0x4c9   : > { %1405 = vst [vmem:[%s2523_s8 + $0x28] sm:$0xff] %v1333_v0  ;;  %v1335_v5 = vpop.f32.mrb[6].mxu0 }
 0x4ca   : > { %1406 = vst [vmem:[%s2523_s8 + $0x30] sm:$0xff] %v1335_v5  ;;  %v1337_v46 = vpop.f32.mrb[7].mxu0 }
 0x4cb   : > { %1407 = vst [vmem:[%s2523_s8 + $0x38] sm:$0xff] %v1337_v46 }
 0x4cf   : > { %v1341_v50 = vpop.f32.mrb[8].mxu0 }
 0x4d0   : > { %1408 = vst [vmem:[%s2523_s8 + $0x40] sm:$0xff] %v1341_v50  ;;  %v1343_v21 = vpop.f32.mrb[9].mxu0 }
 0x4d1   : > { %1409 = vst [vmem:[%s2523_s8 + $0x48] sm:$0xff] %v1343_v21  ;;  %v1345_v28 = vpop.f32.mrb[10].mxu0 }
 0x4d2   : > { %1410 = vst [vmem:[%s2523_s8 + $0x50] sm:$0xff] %v1345_v28  ;;  %v1347_v7 = vpop.f32.mrb[11].mxu0 }
 0x4d3   : > { %1411 = vst [vmem:[%s2523_s8 + $0x58] sm:$0xff] %v1347_v7 }
 0x4d7   : > { %v1351_v22 = vpop.f32.mrb[12].mxu0 }
 0x4d8   : > { %1412 = vst [vmem:[%s2523_s8 + $0x60] sm:$0xff] %v1351_v22  ;;  %v1353_v48 = vpop.f32.mrb[13].mxu0 }
 0x4d9   : > { %1413 = vst [vmem:[%s2523_s8 + $0x68] sm:$0xff] %v1353_v48  ;;  %v1355_v34 = vpop.f32.mrb[14].mxu0 }
 0x4da   : > { %1414 = vst [vmem:[%s2523_s8 + $0x70] sm:$0xff] %v1355_v34  ;;  %v1357_v15 = vpop.f32.mrb[15].mxu0 }
 0x4db   : > { %1415 = vst [vmem:[%s2523_s8 + $0x78] sm:$0xff] %v1357_v15 }
 0x4df   : > { %v1361_v59 = vpop.f32.mrb[16].mxu0 }
 0x4e0   : > { %1416 = vst [vmem:[%s2523_s8 + $0x80] sm:$0xff] %v1361_v59  ;;  %v1363_v56 = vpop.f32.mrb[17].mxu0 }
 0x4e1   : > { %1417 = vst [vmem:[%s2523_s8 + $0x88] sm:$0xff] %v1363_v56  ;;  %v1365_v32 = vpop.f32.mrb[18].mxu0 }
 0x4e2   : > { %1418 = vst [vmem:[%s2523_s8 + $0x90] sm:$0xff] %v1365_v32  ;;  %v1367_v9 = vpop.f32.mrb[19].mxu0 }
 0x4e3   : > { %1419 = vst [vmem:[%s2523_s8 + $0x98] sm:$0xff] %v1367_v9 }
 0x4e7   : > { %v1371_v54 = vpop.f32.mrb[20].mxu0 }
 0x4e8   : > { %1420 = vst [vmem:[%s2523_s8 + $0xa0] sm:$0xff] %v1371_v54  ;;  %v1373_v31 = vpop.f32.mrb[21].mxu0 }
 0x4e9   : > { %1421 = vst [vmem:[%s2523_s8 + $0xa8] sm:$0xff] %v1373_v31  ;;  %v1375_v55 = vpop.f32.mrb[22].mxu0 }
 0x4ea   : > { %1422 = vst [vmem:[%s2523_s8 + $0xb0] sm:$0xff] %v1375_v55  ;;  %v1377_v58 = vpop.f32.mrb[23].mxu0 }
 0x4eb   : > { %1423 = vst [vmem:[%s2523_s8 + $0xb8] sm:$0xff] %v1377_v58 }
 0x4ef   : > { %v1381_v57 = vpop.f32.mrb[24].mxu0 }
 0x4f0   : > { %1424 = vst [vmem:[%s2523_s8 + $0xc0] sm:$0xff] %v1381_v57  ;;  %v1383_v13 = vpop.f32.mrb[25].mxu0 }
 0x4f1   : > { %1425 = vst [vmem:[%s2523_s8 + $0xc8] sm:$0xff] %v1383_v13  ;;  %v1385_v10 = vpop.f32.mrb[26].mxu0 }
 0x4f2   : > { %1426 = vst [vmem:[%s2523_s8 + $0xd0] sm:$0xff] %v1385_v10  ;;  %v1387_v44 = vpop.f32.mrb[27].mxu0 }
 0x4f3   : > { %1427 = vst [vmem:[%s2523_s8 + $0xd8] sm:$0xff] %v1387_v44 }
 0x4f7   : > { %v1391_v2 = vpop.f32.mrb[28].mxu0 }
 0x4f8   : > { %1428 = vst [vmem:[%s2523_s8 + $0xe0] sm:$0xff] %v1391_v2  ;;  %v1393_v47 = vpop.f32.mrb[29].mxu0 }
 0x4f9   : > { %1429 = vst [vmem:[%s2523_s8 + $0xe8] sm:$0xff] %v1393_v47  ;;  %v1395_v12 = vpop.f32.mrb[30].mxu0 }
 0x4fa   : > { %1430 = vst [vmem:[%s2523_s8 + $0xf0] sm:$0xff] %v1395_v12  ;;  %v1397_v60 = vpop.f32.mrb[31].mxu0 }
 0x4fb   : > { %1431 = vst [vmem:[%s2523_s8 + $0xf8] sm:$0xff] %v1397_v60 }
 0x4fc PF: > { %s14_s15 = sadd.s32 1, %s1824_s15  }
 0x4fd   : > { %p11_p4 = scmp.ge.s32.totalorder %s14_s15, 4  }
 0x4ff   :  { %13 = sbr.rel (!%p11_p4) target bundleno = 1 (0x1), region = 66 }

// kernel: attention_forward.4
= control target key start
LH: loop header
LB: loop body
LE: loop exit
PB: predicated region body
PF: predicated region fallthrough
CT: control target
= control target key end

     0   :  { %s8141_s9 = smov 0   ;;  %s13699_s0 = inlined_call_operand.vmem [shape: bf16[2,16,16,384], index: 0, kind: input, shape index: {}]   ;;  %s13700_s1 = inlined_call_operand.vmem [shape: f32[9,384], index: 1, kind: input, shape index: {}]   ;;  %s13701_s2 = inlined_call_operand.vmem [shape: bf16[2,16,16,384], index: 2, kind: output, shape index: {}]  }
   0x1 LB: > { %s7816_s10 = sadd.s32 4294967295, %s8123_s9   ;;  %p7820_p0 = scmp.ge.s32.totalorder %s8123_s9, 1  ;;  %s8123_s9 = sphi %s8141_s9, %s12_s9  }
   0x2   : > { %p112_p1 = scmp.lt.s32.totalorder %s8123_s9, 3 }
   0x4   : > { %p113_p2 = pnand %p7820_p0, %p112_p1 }
   0x6   : > { %116 = sbr.rel (%p113_p2) target bundleno = 1138 (0x472), region = 28 }
   0xd   : > { %p8151_p3 = scmp.lt.s32.totalorder %s7816_s10, 1  ;;  %v815_v0 = vlaneseq  ;;  %v8125_v1 = vmov 0.0   ;;  %v8164_v3 = vld [vmem:[%s13700_s1] sm:$0xff]  ;;  %v8169_v4 = vld [vmem:[%s13700_s1 + $0x8] sm:$0xff]  ;;  %vm1319_vm0 = vcmask 1046528   ;;  %vm2052_vm1 = vcmask 1045504  }
   0xe   : > { %147 = vst [vmem:[#allocation2 + $0x18] sm:$0xff] %v8125_v1  ;;  %153 = vst [vmem:[#allocation2 + $0x48] sm:$0x1] %v8125_v1  ;;  %vm6926_vm2 = vsmask.f32 256 }
   0xf   : > { %154 = vst [vmem:[#allocation2 + $0x50] sm:$0x1] %v8125_v1  ;;  %155 = vst [vmem:[#allocation2 + $0x58] sm:$0x1] %v8125_v1  ;;  %s15310_s10 = smov (!%p8151_p3, %s7816_s10), 1  ;;  %v816_v2 = vshrl.u32 %v815_v0, 7 }
  0x10   : > { %165 = vst [vmem:[#allocation2 + $0xa8] sm:$0x1] %v8125_v1  ;;  %166 = vst [vmem:[#allocation2 + $0xb0] sm:$0x1] %v8125_v1  ;;  %s8052_s16 = smul.u32 384, %s15310_s10 }
  0x11   : > { %167 = vst [vmem:[#allocation2 + $0xb8] sm:$0x1] %v8125_v1  ;;  %177 = vst [vmem:[#allocation2 + $0x108] sm:$0x1] %v8125_v1  ;;  %v8172_v5 = vsub.s32 0, %v816_v2  ;;  %v8174_v6 = vsub.s32 1, %v816_v2 }
  0x12   : > { %178 = vst [vmem:[#allocation2 + $0x110] sm:$0x1] %v8125_v1  ;;  %179 = vst [vmem:[#allocation2 + $0x118] sm:$0x1] %v8125_v1  ;;  %v8176_v7 = vsub.s32 2, %v816_v2  ;;  %v8178_v8 = vsub.s32 3, %v816_v2  ;;  %s8193_s19 = scalar_lea.vmem %s13699_s0, %s8052_s16  ;;  %s8571_s28 = scalar_lea.vmem %s13701_s2, %s8052_s16 }
  0x13   : > { %189 = vst [vmem:[#allocation2 + $0x168] sm:$0x1] %v8125_v1  ;;  %190 = vst [vmem:[#allocation2 + $0x170] sm:$0x1] %v8125_v1  ;;  %v8180_v9 = vsub.s32 4, %v816_v2  ;;  %v8182_v10 = vsub.s32 5, %v816_v2  ;;  %v8197_v13 = vrot.slane %v8164_v3, %v8172_v5  ;;  %v8201_v14 = vrot.slane %v8169_v4, %v8172_v5 }
  0x14   : > { %191 = vst [vmem:[#allocation2 + $0x178] sm:$0x1] %v8125_v1  ;;  %201 = vst [vmem:[#allocation2 + $0x1c8] sm:$0x1] %v8125_v1  ;;  %v8184_v11 = vsub.s32 6, %v816_v2  ;;  %v8186_v12 = vsub.s32 7, %v816_v2  ;;  %v8205_v15 = vrot.slane %v8164_v3, %v8174_v6  ;;  %v8209_v16 = vrot.slane %v8169_v4, %v8174_v6 }
  0x15   : > { %202 = vst [vmem:[#allocation2 + $0x1d0] sm:$0x1] %v8125_v1  ;;  %203 = vst [vmem:[#allocation2 + $0x1d8] sm:$0x1] %v8125_v1  ;;  %v360_v17 = vld [vmem:[%s8193_s19] sm:$0xff]  ;;  %v362_v19 = vld [vmem:[%s8193_s19 + $0xc] sm:$0xff]  ;;  %v8216_v20 = vrot.slane %v8164_v3, %v8176_v7  ;;  %v8220_v21 = vrot.slane %v8169_v4, %v8176_v7  ;;  %v8224_v22 = vrot.slane %v8164_v3, %v8178_v8 }
  0x16   : > { %213 = vst [vmem:[#allocation2 + $0x228] sm:$0x1] %v8125_v1  ;;  %214 = vst [vmem:[#allocation2 + $0x230] sm:$0x1] %v8125_v1  ;;  %v361_v18 = vld [vmem:[%s8193_s19 + $0x8] ss:$12 sps:$4 sm:$0xff]   ;;  %v8228_v23 = vrot.slane %v8169_v4, %v8178_v8  ;;  %v8230_v24 = vunpack.c.l.bf16 %v360_v17  ;;  %v8232_v25 = vunpack.c.h.bf16 %v360_v17  ;;  %v8236_v27 = vunpack.c.l.bf16 %v362_v19 }
  0x17   : > { %215 = vst [vmem:[#allocation2 + $0x238] sm:$0x1] %v8125_v1  ;;  %225 = vst [vmem:[#allocation2 + $0x288] sm:$0x1] %v8125_v1  ;;  %v8234_v26 = vunpack.c.l.bf16 %v361_v18  ;;  %v364_v28 = vld [vmem:[%s8193_s19 + $0x18] sm:$0xff]  ;;  %v366_v30 = vld [vmem:[%s8193_s19 + $0x24] sm:$0xff]  ;;  %v8241_v31 = vunpack.c.h.bf16 %v362_v19  ;;  %v8243_v32 = vunpack.c.h.bf16 %v361_v18 }
  0x18   : > { %226 = vst [vmem:[#allocation2 + $0x290] sm:$0x1] %v8125_v1  ;;  %227 = vst [vmem:[#allocation2 + $0x298] sm:$0x1] %v8125_v1  ;;  %v365_v29 = vld [vmem:[%s8193_s19 + $0x20] ss:$12 sps:$4 sm:$0xff]   ;;  %v8245_v33 = vunpack.c.l.bf16 %v364_v28  ;;  %v8247_v34 = vunpack.c.h.bf16 %v364_v28  ;;  %v8258_v39 = vunpack.c.l.bf16 %v366_v30  ;;  %v8260_v40 = vunpack.c.h.bf16 %v366_v30 }
  0x19   : > { %237 = vst [vmem:[#allocation2 + $0x2e8] sm:$0x1] %v8125_v1  ;;  %238 = vst [vmem:[#allocation2 + $0x2f0] sm:$0x1] %v8125_v1  ;;  %v368_v35 = vld [vmem:[%s8193_s19 + $0x30] sm:$0xff]  ;;  %v370_v37 = vld [vmem:[%s8193_s19 + $0x3c] sm:$0xff]  ;;  %v8256_v38 = vunpack.c.l.bf16 %v365_v29  ;;  %v8262_v41 = vunpack.c.h.bf16 %v365_v29 }
  0x1a   : > { %239 = vst [vmem:[#allocation2 + $0x2f8] sm:$0x1] %v8125_v1  ;;  %249 = vst [vmem:[#allocation2 + $0x348] sm:$0x1] %v8125_v1  ;;  %v369_v36 = vld [vmem:[%s8193_s19 + $0x38] ss:$12 sps:$4 sm:$0xff]   ;;  %v436_v45 = vunpack.c.l.bf16 %v368_v35  ;;  %v437_v46 = vunpack.c.h.bf16 %v368_v35  ;;  %v439_v48 = vunpack.c.l.bf16 %v370_v37  ;;  %v440_v52 = vunpack.c.h.bf16 %v370_v37 }
  0x1b   : > { %250 = vst [vmem:[#allocation2 + $0x350] sm:$0x1] %v8125_v1  ;;  %251 = vst [vmem:[#allocation2 + $0x358] sm:$0x1] %v8125_v1  ;;  %v372_v42 = vld [vmem:[%s8193_s19 + $0x48] sm:$0xff]  ;;  %v374_v44 = vld [vmem:[%s8193_s19 + $0x54] sm:$0xff]  ;;  %v438_v47 = vunpack.c.l.bf16 %v369_v36  ;;  %v441_v53 = vunpack.c.h.bf16 %v369_v36 }
  0x1c   : > { %261 = vst [vmem:[#allocation2 + $0x3a8] sm:$0x1] %v8125_v1  ;;  %262 = vst [vmem:[#allocation2 + $0x3b0] sm:$0x1] %v8125_v1  ;;  %v373_v43 = vld [vmem:[%s8193_s19 + $0x50] ss:$12 sps:$4 sm:$0xff]   ;;  %v442_v54 = vunpack.c.l.bf16 %v372_v42  ;;  %v443_v55 = vunpack.c.h.bf16 %v372_v42  ;;  %v445_v58 = vunpack.c.l.bf16 %v374_v44  ;;  %v446_v59 = vunpack.c.h.bf16 %v374_v44 }
  0x1d   : > { %263 = vst [vmem:[#allocation2 + $0x3b8] sm:$0x1] %v8125_v1  ;;  %273 = vst [vmem:[#allocation2 + $0x408] sm:$0x1] %v8125_v1  ;;  %v376_v49 = vld [vmem:[%s8193_s19 + $0x60] sm:$0xff]  ;;  %v378_v51 = vld [vmem:[%s8193_s19 + $0x6c] sm:$0xff]  ;;  %v444_v57 = vunpack.c.l.bf16 %v373_v43  ;;  %v447_v60 = vunpack.c.h.bf16 %v373_v43 }
  0x1e   : > { %274 = vst [vmem:[#allocation2 + $0x410] sm:$0x1] %v8125_v1  ;;  %275 = vst [vmem:[#allocation2 + $0x418] sm:$0x1] %v8125_v1  ;;  %v377_v50 = vld [vmem:[%s8193_s19 + $0x68] ss:$12 sps:$4 sm:$0xff]   ;;  %v448_v63 = vunpack.c.l.bf16 %v376_v49  ;;  %v449_v0 = vunpack.c.h.bf16 %v376_v49  ;;  %v451_v2 = vunpack.c.l.bf16 %v378_v51  ;;  %v452_v28 = vunpack.c.h.bf16 %v378_v51 }
  0x1f   : > { %285 = vst [vmem:[#allocation2 + $0x468] sm:$0x1] %v8125_v1  ;;  %286 = vst [vmem:[#allocation2 + $0x470] sm:$0x1] %v8125_v1  ;;  %v380_v56 = vld [vmem:[%s8193_s19 + $0x78] sm:$0xff]  ;;  %v382_v62 = vld [vmem:[%s8193_s19 + $0x84] sm:$0xff]  ;;  %v453_v29 = vunpack.c.h.bf16 %v377_v50 }
  0x20   : > { %287 = vst [vmem:[#allocation2 + $0x478] sm:$0x1] %v8125_v1  ;;  %297 = vst [vmem:[#allocation2 + $0x4c8] sm:$0x1] %v8125_v1  ;;  %v381_v61 = vld [vmem:[%s8193_s19 + $0x80] ss:$12 sps:$4 sm:$0xff]   ;;  %v454_v30 = vunpack.c.l.bf16 %v380_v56  ;;  %v455_v35 = vunpack.c.h.bf16 %v380_v56  ;;  %v457_v42 = vunpack.c.l.bf16 %v382_v62  ;;  %v458_v43 = vunpack.c.h.bf16 %v382_v62 }
  0x21   : > { %298 = vst [vmem:[#allocation2 + $0x4d0] sm:$0x1] %v8125_v1  ;;  %299 = vst [vmem:[#allocation2 + $0x4d8] sm:$0x1] %v8125_v1  ;;  %v384_v17 = vld [vmem:[%s8193_s19 + $0x90] sm:$0xff]  ;;  %v386_v19 = vld [vmem:[%s8193_s19 + $0x9c] sm:$0xff]  ;;  %v456_v37 = vunpack.c.l.bf16 %v381_v61  ;;  %v459_v44 = vunpack.c.h.bf16 %v381_v61 }
  0x22   : > { %309 = vst [vmem:[#allocation2 + $0x528] sm:$0x1] %v8125_v1  ;;  %310 = vst [vmem:[#allocation2 + $0x530] sm:$0x1] %v8125_v1  ;;  %v385_v18 = vld [vmem:[%s8193_s19 + $0x98] ss:$12 sps:$4 sm:$0xff]  }
  0x23   : > { %311 = vst [vmem:[#allocation2 + $0x538] sm:$0x1] %v8125_v1  ;;  %321 = vst [vmem:[#allocation2 + $0x588] sm:$0x1] %v8125_v1  ;;  %v388_v36 = vld [vmem:[%s8193_s19 + $0xa8] sm:$0xff]  ;;  %v462_v49 = vunpack.c.l.bf16 %v385_v18  ;;  %v392_v51 = vld [vmem:[%s8193_s19 + $0xc0] sm:$0xff] }
  0x24   : > { %322 = vst [vmem:[#allocation2 + $0x590] sm:$0x1] %v8125_v1  ;;  %323 = vst [vmem:[#allocation2 + $0x598] sm:$0x1] %v8125_v1  ;;  %v466_v56 = vunpack.c.l.bf16 %v388_v36  ;;  %vm6927_vm3 = vsmask.f32 4368 }
  0x25   : > { %333 = vst [vmem:[#allocation2 + $0x5e8] sm:$0x1] %v8125_v1  ;;  %334 = vst [vmem:[#allocation2 + $0x5f0] sm:$0x1] %v8125_v1 }
  0x26   : > { %335 = vst [vmem:[#allocation2 + $0x5f8] sm:$0x1] %v8125_v1  ;;  %345 = vst [vmem:[#allocation2 + $0x648] sm:$0x1] %v8125_v1 }
  0x27   : > { %346 = vst [vmem:[#allocation2 + $0x650] sm:$0x1] %v8125_v1  ;;  %347 = vst [vmem:[#allocation2 + $0x658] sm:$0x1] %v8125_v1 }
  0x28   : > { %357 = vst [vmem:[#allocation2 + $0x6a8] sm:$0x1] %v8125_v1  ;;  %358 = vst [vmem:[#allocation2 + $0x6b0] sm:$0x1] %v8125_v1 }
  0x29   : > { %359 = vst [vmem:[#allocation2 + $0x6b8] sm:$0x1] %v8125_v1  ;;  %14433 = vst [vmem:[#allocation3_spill] sm:$0xff] %v8197_v13  ;;  %v450_v1 = vunpack.c.l.bf16 %v377_v50  ;;  %v463_v50 = vunpack.c.l.bf16 %v386_v19 }
  0x2a   : > { %14434 = vst [vmem:[#allocation4_spill] sm:$0xff] %v8201_v14  ;;  %14435 = vst [vmem:[#allocation5_spill] sm:$0xff] %v8205_v15 }
  0x2b   : > { %14436 = vst [vmem:[#allocation6_spill] sm:$0xff] %v8209_v16  ;;  %14437 = vst [vmem:[#allocation7_spill] sm:$0xff] %v8216_v20 }
  0x2c   : > { %14438 = vst [vmem:[#allocation8_spill] sm:$0xff] %v8220_v21  ;;  %521 = vst [vmem:[#allocation2 + $0x78] sm:$0xff] %v8230_v24 }
  0x2d   : > { %522 = vst [vmem:[#allocation2 + $0x80] sm:$0xff] %v8232_v25  ;;  %523 = vst [vmem:[#allocation2 + $0x88] sm:$0xff] %v8234_v26 }
  0x2e   : > { %524 = vst [vmem:[#allocation2 + $0x90] sm:$0xff] %v8236_v27  ;;  %525 = vst [vmem:[#allocation2 + $0x98] sm:$0xff] %v8241_v31 }
  0x2f   : > { %526 = vst [vmem:[#allocation2 + $0xa0] sm:$0xff] %v8243_v32  ;;  %527 = vst [vmem:[#allocation2 + $0xd8] sm:$0xff] %v8245_v33 }
  0x30   : > { %528 = vst [vmem:[#allocation2 + $0xe0] sm:$0xff] %v8247_v34  ;;  %529 = vst [vmem:[#allocation2 + $0xe8] sm:$0xff] %v8256_v38 }
  0x31   : > { %530 = vst [vmem:[#allocation2 + $0xf0] sm:$0xff] %v8258_v39  ;;  %531 = vst [vmem:[#allocation2 + $0xf8] sm:$0xff] %v8260_v40 }
  0x32   : > { %532 = vst [vmem:[#allocation2 + $0x100] sm:$0xff] %v8262_v41  ;;  %533 = vst [vmem:[#allocation2 + $0x138] sm:$0xff] %v436_v45  ;;  %v389_v45 = vld [vmem:[%s8193_s19 + $0xb0] ss:$12 sps:$4 sm:$0xff]  }
  0x33   : > { %534 = vst [vmem:[#allocation2 + $0x140] sm:$0xff] %v437_v46  ;;  %535 = vst [vmem:[#allocation2 + $0x148] sm:$0xff] %v438_v47  ;;  %v390_v46 = vld [vmem:[%s8193_s19 + $0xb4] sm:$0xff]  ;;  %v460_v47 = vunpack.c.l.bf16 %v384_v17  ;;  %v471_v62 = vunpack.c.h.bf16 %v389_v45 }
  0x34   : > { %536 = vst [vmem:[#allocation2 + $0x150] sm:$0xff] %v439_v48  ;;  %537 = vst [vmem:[#allocation2 + $0x158] sm:$0xff] %v440_v52  ;;  %v461_v48 = vunpack.c.h.bf16 %v384_v17  ;;  %v393_v52 = vld [vmem:[%s8193_s19 + $0xc8] ss:$12 sps:$4 sm:$0xff]   ;;  %v470_v61 = vunpack.c.h.bf16 %v390_v46 }
  0x35   : > { %538 = vst [vmem:[#allocation2 + $0x160] sm:$0xff] %v441_v53  ;;  %539 = vst [vmem:[#allocation2 + $0x198] sm:$0xff] %v442_v54  ;;  %v394_v53 = vld [vmem:[%s8193_s19 + $0xcc] sm:$0xff]  ;;  %v464_v54 = vunpack.c.h.bf16 %v386_v19  ;;  %v474_v17 = vunpack.c.l.bf16 %v393_v52 }
  0x36   : > { %540 = vst [vmem:[#allocation2 + $0x1a0] sm:$0xff] %v443_v55  ;;  %541 = vst [vmem:[#allocation2 + $0x1a8] sm:$0xff] %v444_v57  ;;  %v465_v55 = vunpack.c.h.bf16 %v385_v18  ;;  %v467_v57 = vunpack.c.h.bf16 %v388_v36  ;;  %v475_v18 = vunpack.c.l.bf16 %v394_v53  ;;  %v400_v19 = vld [vmem:[%s8193_s19 + $0xf0] sm:$0xff] }
  0x37   : > { %542 = vst [vmem:[#allocation2 + $0x1b0] sm:$0xff] %v445_v58  ;;  %543 = vst [vmem:[#allocation2 + $0x1b8] sm:$0xff] %v446_v59  ;;  %v396_v58 = vld [vmem:[%s8193_s19 + $0xd8] sm:$0xff]  ;;  %v468_v59 = vunpack.c.l.bf16 %v389_v45 }
  0x38   : > { %544 = vst [vmem:[#allocation2 + $0x1c0] sm:$0xff] %v447_v60  ;;  %545 = vst [vmem:[#allocation2 + $0x1f8] sm:$0xff] %v448_v63  ;;  %v469_v60 = vunpack.c.l.bf16 %v390_v46  ;;  %v397_v63 = vld [vmem:[%s8193_s19 + $0xe0] ss:$12 sps:$4 sm:$0xff]   ;;  %v478_v36 = vunpack.c.l.bf16 %v396_v58 }
  0x39   : > { %546 = vst [vmem:[#allocation2 + $0x200] sm:$0xff] %v449_v0  ;;  %547 = vst [vmem:[#allocation2 + $0x208] sm:$0xff] %v450_v1  ;;  %v398_v0 = vld [vmem:[%s8193_s19 + $0xe4] sm:$0xff]  ;;  %v472_v1 = vunpack.c.l.bf16 %v392_v51  ;;  %v483_v46 = vunpack.c.h.bf16 %v397_v63 }
  0x3a   : > { %548 = vst [vmem:[#allocation2 + $0x210] sm:$0xff] %v451_v2  ;;  %549 = vst [vmem:[#allocation2 + $0x218] sm:$0xff] %v452_v28  ;;  %v473_v2 = vunpack.c.h.bf16 %v392_v51  ;;  %v401_v28 = vld [vmem:[%s8193_s19 + $0xf8] ss:$12 sps:$4 sm:$0xff]   ;;  %v482_v45 = vunpack.c.h.bf16 %v398_v0 }
  0x3b   : > { %550 = vst [vmem:[#allocation2 + $0x220] sm:$0xff] %v453_v29  ;;  %551 = vst [vmem:[#allocation2 + $0x258] sm:$0xff] %v454_v30  ;;  %v402_v29 = vld [vmem:[%s8193_s19 + $0xfc] sm:$0xff]  ;;  %v476_v30 = vunpack.c.h.bf16 %v394_v53  ;;  %v486_v51 = vunpack.c.l.bf16 %v401_v28 }
  0x3c   : > { %552 = vst [vmem:[#allocation2 + $0x260] sm:$0xff] %v455_v35  ;;  %553 = vst [vmem:[#allocation2 + $0x268] sm:$0xff] %v456_v37  ;;  %v477_v35 = vunpack.c.h.bf16 %v393_v52  ;;  %v479_v37 = vunpack.c.h.bf16 %v396_v58  ;;  %v487_v52 = vunpack.c.l.bf16 %v402_v29  ;;  %v408_v53 = vld [vmem:[%s8193_s19 + $0x120] sm:$0xff] }
  0x3d   : > { %554 = vst [vmem:[#allocation2 + $0x270] sm:$0xff] %v457_v42  ;;  %555 = vst [vmem:[#allocation2 + $0x278] sm:$0xff] %v458_v43  ;;  %v404_v42 = vld [vmem:[%s8193_s19 + $0x108] sm:$0xff]  ;;  %v480_v43 = vunpack.c.l.bf16 %v397_v63 }
  0x3e   : > { %556 = vst [vmem:[#allocation2 + $0x280] sm:$0xff] %v459_v44  ;;  %557 = vst [vmem:[#allocation2 + $0x2b8] sm:$0xff] %v460_v47  ;;  %v481_v44 = vunpack.c.l.bf16 %v398_v0  ;;  %v405_v47 = vld [vmem:[%s8193_s19 + $0x110] ss:$12 sps:$4 sm:$0xff]   ;;  %v490_v58 = vunpack.c.l.bf16 %v404_v42 }
  0x3f   : > { %558 = vst [vmem:[#allocation2 + $0x2c0] sm:$0xff] %v461_v48  ;;  %559 = vst [vmem:[#allocation2 + $0x2c8] sm:$0xff] %v462_v49  ;;  %v406_v48 = vld [vmem:[%s8193_s19 + $0x114] sm:$0xff]  ;;  %v484_v49 = vunpack.c.l.bf16 %v400_v19  ;;  %v495_v0 = vunpack.c.h.bf16 %v405_v47 }
  0x40   : > { %560 = vst [vmem:[#allocation2 + $0x2d0] sm:$0xff] %v463_v50  ;;  %561 = vst [vmem:[#allocation2 + $0x2d8] sm:$0xff] %v464_v54  ;;  %v485_v50 = vunpack.c.h.bf16 %v400_v19  ;;  %v409_v54 = vld [vmem:[%s8193_s19 + $0x128] ss:$12 sps:$4 sm:$0xff]   ;;  %v494_v63 = vunpack.c.h.bf16 %v406_v48 }
  0x41   : > { %562 = vst [vmem:[#allocation2 + $0x2e0] sm:$0xff] %v465_v55  ;;  %563 = vst [vmem:[#allocation2 + $0x318] sm:$0xff] %v466_v56  ;;  %v410_v55 = vld [vmem:[%s8193_s19 + $0x12c] sm:$0xff]  ;;  %v488_v56 = vunpack.c.h.bf16 %v402_v29  ;;  %v498_v19 = vunpack.c.l.bf16 %v409_v54 }
  0x42   : > { %564 = vst [vmem:[#allocation2 + $0x320] sm:$0xff] %v467_v57  ;;  %565 = vst [vmem:[#allocation2 + $0x328] sm:$0xff] %v468_v59  ;;  %v489_v57 = vunpack.c.h.bf16 %v401_v28  ;;  %v491_v59 = vunpack.c.h.bf16 %v404_v42  ;;  %v499_v28 = vunpack.c.l.bf16 %v410_v55  ;;  %v416_v29 = vld [vmem:[%s8193_s19 + $0x150] sm:$0xff] }
  0x43   : > { %566 = vst [vmem:[#allocation2 + $0x330] sm:$0xff] %v469_v60  ;;  %567 = vst [vmem:[#allocation2 + $0x338] sm:$0xff] %v470_v61  ;;  %v412_v60 = vld [vmem:[%s8193_s19 + $0x138] sm:$0xff]  ;;  %v492_v61 = vunpack.c.l.bf16 %v405_v47 }
  0x44   : > { %568 = vst [vmem:[#allocation2 + $0x340] sm:$0xff] %v471_v62  ;;  %569 = vst [vmem:[#allocation2 + $0x378] sm:$0xff] %v472_v1  ;;  %v493_v62 = vunpack.c.l.bf16 %v406_v48  ;;  %v413_v1 = vld [vmem:[%s8193_s19 + $0x140] ss:$12 sps:$4 sm:$0xff]   ;;  %v502_v42 = vunpack.c.l.bf16 %v412_v60 }
  0x45   : > { %570 = vst [vmem:[#allocation2 + $0x380] sm:$0xff] %v473_v2  ;;  %571 = vst [vmem:[#allocation2 + $0x388] sm:$0xff] %v474_v17  ;;  %v414_v2 = vld [vmem:[%s8193_s19 + $0x144] sm:$0xff]  ;;  %v496_v17 = vunpack.c.l.bf16 %v408_v53  ;;  %v507_v48 = vunpack.c.h.bf16 %v413_v1 }
  0x46   : > { %572 = vst [vmem:[#allocation2 + $0x390] sm:$0xff] %v475_v18  ;;  %573 = vst [vmem:[#allocation2 + $0x398] sm:$0xff] %v476_v30  ;;  %v497_v18 = vunpack.c.h.bf16 %v408_v53  ;;  %v417_v30 = vld [vmem:[%s8193_s19 + $0x158] ss:$12 sps:$4 sm:$0xff]   ;;  %v506_v47 = vunpack.c.h.bf16 %v414_v2 }
  0x47   : > { %574 = vst [vmem:[#allocation2 + $0x3a0] sm:$0xff] %v477_v35  ;;  %575 = vst [vmem:[#allocation2 + $0x3d8] sm:$0xff] %v478_v36  ;;  %v418_v35 = vld [vmem:[%s8193_s19 + $0x15c] sm:$0xff]  ;;  %v500_v36 = vunpack.c.h.bf16 %v410_v55  ;;  %v510_v53 = vunpack.c.l.bf16 %v417_v30 }
  0x48   : > { %576 = vst [vmem:[#allocation2 + $0x3e0] sm:$0xff] %v479_v37  ;;  %577 = vst [vmem:[#allocation2 + $0x3e8] sm:$0xff] %v480_v43  ;;  %v501_v37 = vunpack.c.h.bf16 %v409_v54  ;;  %v503_v43 = vunpack.c.h.bf16 %v412_v60  ;;  %v511_v54 = vunpack.c.l.bf16 %v418_v35  ;;  %v512_v55 = vunpack.c.h.bf16 %v418_v35 }
  0x49   : > { %578 = vst [vmem:[#allocation2 + $0x3f0] sm:$0xff] %v481_v44  ;;  %579 = vst [vmem:[#allocation2 + $0x3f8] sm:$0xff] %v482_v45  ;;  %v420_v44 = vld [vmem:[%s8193_s19 + $0x168] sm:$0xff]  ;;  %v504_v45 = vunpack.c.l.bf16 %v413_v1  ;;  %v1127_v1 = vmul.f32 0.0, %v8205_v15  ;;  %v2788_v35 = vmul.f32 %v8224_v22, %v8230_v24 }
  0x4a   : > { %580 = vst [vmem:[#allocation2 + $0x400] sm:$0xff] %v483_v46  ;;  %581 = vst [vmem:[#allocation2 + $0x438] sm:$0xff] %v484_v49  ;;  %v505_v46 = vunpack.c.l.bf16 %v414_v2  ;;  %v421_v49 = vld [vmem:[%s8193_s19 + $0x170] ss:$12 sps:$4 sm:$0xff]   ;;  %v1128_v2 = vmul.f32 0.0, %v8209_v16 }
  0x4b   : > { %582 = vst [vmem:[#allocation2 + $0x440] sm:$0xff] %v485_v50  ;;  %583 = vst [vmem:[#allocation2 + $0x448] sm:$0xff] %v486_v51  ;;  %v422_v50 = vld [vmem:[%s8193_s19 + $0x174] sm:$0xff]  ;;  %v508_v51 = vunpack.c.l.bf16 %v416_v29 }
  0x4c   : > { %584 = vst [vmem:[#allocation2 + $0x450] sm:$0xff] %v487_v52  ;;  %585 = vst [vmem:[#allocation2 + $0x458] sm:$0xff] %v488_v56  ;;  %v509_v52 = vunpack.c.h.bf16 %v416_v29  ;;  %v513_v56 = vunpack.c.h.bf16 %v417_v30  ;;  %v517_v60 = vunpack.c.l.bf16 %v422_v50  ;;  %v1320_v29 = vrot.slane %v1127_v1, 1 }
  0x4d   : > { %586 = vst [vmem:[#allocation2 + $0x460] sm:$0xff] %v489_v57  ;;  %587 = vst [vmem:[#allocation2 + $0x498] sm:$0xff] %v490_v58  ;;  %v514_v57 = vunpack.c.l.bf16 %v420_v44  ;;  %v515_v58 = vunpack.c.h.bf16 %v420_v44  ;;  %v1321_v30 = vrot.slane %v1128_v2, 1  ;;  %v8343_v44 = vrot.slane %v8169_v4, %v8180_v9 }
  0x4e   : > { %588 = vst [vmem:[#allocation2 + $0x4a0] sm:$0xff] %v491_v59  ;;  %589 = vst [vmem:[#allocation2 + $0x4a8] sm:$0xff] %v492_v61  ;;  %v516_v59 = vunpack.c.l.bf16 %v421_v49  ;;  %v518_v61 = vunpack.c.h.bf16 %v422_v50  ;;  %v8375_v1 = vrot.slane %v8164_v3, %v8182_v10  ;;  %v8379_v2 = vrot.slane %v8169_v4, %v8182_v10 }
  0x4f   : > { %590 = vst [vmem:[#allocation2 + $0x4b0] sm:$0xff] %v493_v62  ;;  %591 = vst [vmem:[#allocation2 + $0x4b8] sm:$0xff] %v494_v63  ;;  %v519_v62 = vunpack.c.h.bf16 %v421_v49  ;;  %v8312_v63 = vmul.f32 0.0, %v8197_v13  ;;  %v3086_v50 = vmul.f32 %v8343_v44, %v8232_v25 }
  0x50   : > { %592 = vst [vmem:[#allocation2 + $0x4c0] sm:$0xff] %v495_v0  ;;  %593 = vst [vmem:[#allocation2 + $0x4f8] sm:$0xff] %v496_v17  ;;  %v8315_v0 = vmul.f32 0.0, %v8201_v14  ;;  %v8320_v17 = vmul.f32 0.0, %v8216_v20  ;;  %v2591_v14 = vld [vmem:[#allocation2 + $0xb0] sm:$0x1] }
  0x51   : > { %594 = vst [vmem:[#allocation2 + $0x500] sm:$0xff] %v497_v18  ;;  %595 = vst [vmem:[#allocation2 + $0x508] sm:$0xff] %v498_v19  ;;  %v8323_v18 = vmul.f32 0.0, %v8220_v21  ;;  %v8326_v19 = vmul.f32 0.0, %v8224_v22 }
  0x52   : > { %596 = vst [vmem:[#allocation2 + $0x510] sm:$0xff] %v499_v28  ;;  %597 = vst [vmem:[#allocation2 + $0x518] sm:$0xff] %v500_v36  ;;  %v8329_v28 = vmul.f32 0.0, %v8228_v23  ;;  %v2789_v36 = vmul.f32 %v8228_v23, %v8232_v25 }
  0x53   : > { %598 = vst [vmem:[#allocation2 + $0x520] sm:$0xff] %v501_v37  ;;  %599 = vst [vmem:[#allocation2 + $0x558] sm:$0xff] %v502_v42  ;;  %v13705_v37 = vrot.slane %v8320_v17, 2  ;;  %v13704_v42 = vrot.slane %v8323_v18, 2 }
  0x54   : > { %600 = vst [vmem:[#allocation2 + $0x560] sm:$0xff] %v503_v43  ;;  %601 = vst [vmem:[#allocation2 + $0x568] sm:$0xff] %v504_v45  ;;  %v8339_v43 = vrot.slane %v8164_v3, %v8180_v9  ;;  %v8346_v45 = vadd.f32 %v1320_v29, %v8312_v63 }
  0x55   : > { %602 = vst [vmem:[#allocation2 + $0x570] sm:$0xff] %v505_v46  ;;  %603 = vst [vmem:[#allocation2 + $0x578] sm:$0xff] %v506_v47  ;;  %v8349_v46 = vadd.f32 %v1321_v30, %v8315_v0 }
  0x56   : > { %604 = vst [vmem:[#allocation2 + $0x580] sm:$0xff] %v507_v48  ;;  %605 = vst [vmem:[#allocation2 + $0x5b8] sm:$0xff] %v508_v51  ;;  %v2437_v47 = vadd.f32 %v13705_v37, %v8346_v45  ;;  %v3085_v49 = vmul.f32 %v8339_v43, %v8230_v24  ;;  %v8363_v51 = vmul.f32 %v8339_v43, %v8236_v27 }
  0x57   : > { %606 = vst [vmem:[#allocation2 + $0x5c0] sm:$0xff] %v509_v52  ;;  %607 = vst [vmem:[#allocation2 + $0x5c8] sm:$0xff] %v510_v53  ;;  %v2438_v48 = vadd.f32 %v13704_v42, %v8349_v46  ;;  %v8367_v52 = vmul.f32 %v8343_v44, %v8241_v31 }
  0x58   : > { %608 = vst [vmem:[#allocation2 + $0x5d0] sm:$0xff] %v511_v54  ;;  %609 = vst [vmem:[#allocation2 + $0x5d8] sm:$0xff] %v512_v55  ;;  %v2929_v53 = vadd.f32 %v8326_v19, %v2437_v47  ;;  %v3277_v55 = vrot.slane %v3085_v49, 1  ;;  %v3721_v49 = vmul.f32 %v8375_v1, %v8230_v24 }
  0x59   : > { %610 = vst [vmem:[#allocation2 + $0x5e0] sm:$0xff] %v513_v56  ;;  %611 = vst [vmem:[#allocation2 + $0x618] sm:$0xff] %v514_v57  ;;  %v2930_v54 = vadd.f32 %v8329_v28, %v2438_v48  ;;  %v3278_v56 = vrot.slane %v3086_v50, 1  ;;  %v2932_v57 = vadd.f32 %v2788_v35, %v2437_v47  ;;  %v8389_v35 = vrot.slane %v8164_v3, %v8184_v11 }
  0x5a   : > { %612 = vst [vmem:[#allocation2 + $0x620] sm:$0xff] %v515_v58  ;;  %14439 = vst [vmem:[#allocation9_spill] sm:$0xff] %v8312_v63  ;;  %v2933_v58 = vadd.f32 %v2789_v36, %v2438_v48  ;;  %v8393_v36 = vrot.slane %v8169_v4, %v8184_v11  ;;  %v3722_v50 = vmul.f32 %v8379_v2, %v8232_v25 }
  0x5b   : > { %14440 = vst [vmem:[#allocation10_spill] sm:$0xff] %v8315_v0  ;;  %613 = vst [vmem:[#allocation2 + $0x628] sm:$0xff] %v516_v59  ;;  %v13703_v59 = vrot.slane %v8363_v51, 1  ;;  %v4745_v24 = vmul.f32 %v8389_v35, %v8245_v33 }
  0x5c   : > { %614 = vst [vmem:[#allocation2 + $0x630] sm:$0xff] %v517_v60  ;;  %615 = vst [vmem:[#allocation2 + $0x638] sm:$0xff] %v518_v61  ;;  %v13702_v60 = vrot.slane %v8367_v52, 1  ;;  %v3565_v61 = vadd.f32 %v3277_v55, %v2929_v53  ;;  %v8401_v53 = vmul.f32 %v8375_v1, %v8236_v27  ;;  %v4746_v25 = vmul.f32 %v8393_v36, %v8247_v34 }
  0x5d   : > { %616 = vst [vmem:[#allocation2 + $0x640] sm:$0xff] %v519_v62  ;;  %14441 = vst [vmem:[#allocation11_spill] sm:$0xff] %v8326_v19  ;;  %v3566_v62 = vadd.f32 %v3278_v56, %v2930_v54  ;;  %v3281_v29 = vsel %vm1319_vm0, %v3277_v55, %v13703_v59  ;;  %v8405_v54 = vmul.f32 %v8379_v2, %v8241_v31  ;;  %v8408_v55 = vmul.f32 0.0, %v8389_v35 }
  0x5e   : > { %14442 = vst [vmem:[#allocation12_spill] sm:$0xff] %v8329_v28  ;;  %14443 = vst [vmem:[#allocation13_spill] sm:$0xff] %v8339_v43  ;;  %v3283_v30 = vsel %vm1319_vm0, %v3278_v56, %v13702_v60  ;;  %v3568_v47 = vadd.f32 %v3281_v29, %v2932_v57  ;;  %v8411_v56 = vmul.f32 0.0, %v8393_v36  ;;  %v4009_v57 = vrot.slane %v3721_v49, 2  ;;  %v8420_v29 = vld [vmem:[%s13700_s1 + $0x18] ss:$0 sm:$0xff] }
  0x5f   : > { %14444 = vst [vmem:[#allocation14_spill] sm:$0xff] %v8343_v44  ;;  %14445 = vst [vmem:[#allocation15_spill] sm:$0xff] %v8379_v2  ;;  %v3569_v48 = vadd.f32 %v3283_v30, %v2933_v58  ;;  %v4010_v58 = vrot.slane %v3722_v50, 2  ;;  %v8425_v30 = vld [vmem:[%s13700_s1 + $0x20] ss:$0 sm:$0xff]  ;;  %v13716_v60 = vrot.slane %v8401_v53, 2  ;;  %v8431_v50 = vrot.slane %v8164_v3, %v8186_v12 }
  0x60   : > { %14446 = vst [vmem:[#allocation16_spill] sm:$0xff] %v8389_v35  ;;  %14447 = vst [vmem:[#allocation17_spill] sm:$0xff] %v8393_v36  ;;  %v8435_v59 = vrot.slane %v8169_v4, %v8186_v12  ;;  %v4393_v42 = vadd.f32 %v4009_v57, %v3565_v61  ;;  %v5678_v44 = vmul.f32 %v8420_v29, %v8245_v33  ;;  %v14452_v28 = vrot.slane %v8405_v54, 2 }
  0x61   : > { %14448 = vst [vmem:[#allocation18_spill] sm:$0xff] %v8408_v55  ;;  %14449 = vst [vmem:[#allocation19_spill] sm:$0xff] %v8411_v56  ;;  %v4394_v37 = vadd.f32 %v4010_v58, %v3566_v62  ;;  %v5679_v43 = vmul.f32 %v8425_v30, %v8247_v34  ;;  %v4013_v49 = vsel %vm2052_vm1, %v4009_v57, %v13716_v60 }
  0x62   : > { %14450 = vst [vmem:[#allocation20_spill] sm:$0xff] %v8431_v50  ;;  %14451 = vst [vmem:[#allocation21_spill] sm:$0xff] %v8435_v59  ;;  %v4015_v3 = vsel %vm2052_vm1, %v4010_v58, %v14452_v28  ;;  %v5042_v4 = vmul.f32 %v8431_v50, %v8245_v33  ;;  %v5043_v61 = vmul.f32 %v8435_v59, %v8247_v34 }
  0x63   : > { %v4396_v62 = vadd.f32 %v4013_v49, %v3568_v47  ;;  %v4397_v19 = vadd.f32 %v4015_v3, %v3569_v48  ;;  %v4886_v0 = vadd.f32 %v8408_v55, %v4393_v42  ;;  %v4887_v63 = vadd.f32 %v8411_v56, %v4394_v37  ;;  %v619_v37 = vld [vmem:[%s13700_s1 + $0x10] sm:$0xff]  ;;  %vm8551_vm4 = vmor %vm6926_vm2, %vm6927_vm3 }
  0x64   : > { %v8455_v16 = vmul.f32 %v8431_v50, %v8258_v39  ;;  %v8459_v57 = vmul.f32 %v8435_v59, %v8260_v40  ;;  %v5234_v28 = vrot.slane %v5042_v4, 1  ;;  %v5235_v58 = vrot.slane %v5043_v61, 1 }
  0x65   : > { %v4889_v33 = vadd.f32 %v4745_v24, %v4396_v62  ;;  %v4890_v60 = vadd.f32 %v4746_v25, %v4397_v19  ;;  %v8463_v34 = vmul.f32 %v8420_v29, %v8258_v39  ;;  %v8467_v42 = vmul.f32 %v8425_v30, %v8260_v40 }
  0x66   : > { %v13718_v47 = vrot.slane %v8455_v16, 1  ;;  %v13719_v48 = vrot.slane %v8459_v57, 1  ;;  %v5522_v49 = vadd.f32 %v5234_v28, %v4886_v0  ;;  %v5523_v3 = vadd.f32 %v5235_v58, %v4887_v63 }
  0x67   : > { %v5966_v24 = vrot.slane %v5678_v44, 2  ;;  %v5967_v19 = vrot.slane %v5679_v43, 2  ;;  %v13720_v25 = vrot.slane %v8463_v34, 2  ;;  %v13721_v4 = vrot.slane %v8467_v42, 2 }
  0x68   : > { %v5238_v61 = vsel %vm1319_vm0, %v5234_v28, %v13718_v47  ;;  %v5240_v62 = vsel %vm1319_vm0, %v5235_v58, %v13719_v48  ;;  %v8483_v56 = vrot.slane %v619_v37, %v8172_v5  ;;  %v8486_v0 = vrot.slane %v619_v37, %v8174_v6 }
  0x69   : > { %v5525_v63 = vadd.f32 %v5238_v61, %v4889_v33  ;;  %v5526_v43 = vadd.f32 %v5240_v62, %v4890_v60  ;;  %v5970_v44 = vsel %vm2052_vm1, %v5966_v24, %v13720_v25  ;;  %v5972_v28 = vsel %vm2052_vm1, %v5967_v19, %v13721_v4 }
  0x6a   : > { %14453 = vst [vmem:[#allocation22_spill] sm:$0xff] %v8483_v56  ;;  %14454 = vst [vmem:[#allocation23_spill] sm:$0xff] %v8486_v0  ;;  %v6350_v47 = vadd.f32 %v5966_v24, %v5522_v49  ;;  %v6351_v58 = vadd.f32 %v5967_v19, %v5523_v3  ;;  %v8495_v5 = vmul.f32 0.0, %v8483_v56  ;;  %v1129_v6 = vmul.f32 0.0, %v8486_v0 }
  0x6b   : > { %v6353_v48 = vadd.f32 %v5970_v44, %v5525_v63  ;;  %v6354_v33 = vadd.f32 %v5972_v28, %v5526_v43  ;;  %v8499_v60 = vrot.slane %v619_v37, %v8176_v7  ;;  %v8502_v61 = vrot.slane %v619_v37, %v8178_v8 }
  0x6c   : > { %14455 = vst [vmem:[#allocation24_spill] sm:$0xff] %v8495_v5  ;;  %v7956_v62 = vpack.c.bf16 %v6351_v58, %v6350_v47  ;;  %v1322_v25 = vrot.slane %v1129_v6, 1  ;;  %v8505_v4 = vrot.slane %v619_v37, %v8180_v9  ;;  %v8508_v49 = vrot.slane %v619_v37, %v8182_v10 }
  0x6d   : > { %v7958_v3 = vpack.c.bf16 %v6354_v33, %v6353_v48  ;;  %v8511_v24 = vmul.f32 0.0, %v8499_v60  ;;  %v8514_v19 = vmul.f32 0.0, %v8502_v61  ;;  %v2790_v7 = vmul.f32 %v8502_v61, %v8234_v26 }
  0x6e   : > { %14456 = vst [vmem:[#allocation25_spill] sm:$0xff] %v8505_v4  ;;  %v6930_v8 = vshrl.u32 %v7956_v62, 16  ;;  %v8519_v47 = vadd.f32 %v1322_v25, %v8495_v5  ;;  %v3087_v9 = vmul.f32 %v8505_v4, %v8234_v26  ;;  %v8526_v44 = vmul.f32 %v8505_v4, %v8243_v32  ;;  %v8558_v5 = vld [vmem:[#allocation2 + $0x18] sm:$0xff] }
  0x6f   : > { %14457 = vst [vmem:[#allocation26_spill] sm:$0xff] %v8514_v19  ;;  %v6935_v63 = vshrl.u32 %v7958_v3, 16  ;;  %v6938_v10 = vshll.u32 %v7958_v3, 16  ;;  %v13724_v48 = vrot.slane %v8511_v24, 2  ;;  %v3723_v58 = vmul.f32 %v8508_v49, %v8234_v26  ;;  %14465 = vst [vmem:[#allocation31_spill] sm:$0xff] %v8558_v5 }
  0x70   : > { %v7922_v43 = vrot.slane %v6930_v8, 11  ;;  %14458 = vst [vmem:[#allocation27_spill] sm:$0xff] %v8526_v44  ;;  %v3279_v28 = vrot.slane %v3087_v9, 1  ;;  %v8537_v33 = vmul.f32 %v8508_v49, %v8243_v32  ;;  %v8541_v8 = vrot.slane %v619_v37, %v8184_v11 }
  0x71   : > { %v8530_v6 = vrot.slane %v6935_v63, 7  ;;  %v2439_v25 = vadd.f32 %v13724_v48, %v8519_v47  ;;  %v4011_v3 = vrot.slane %v3723_v58, 2  ;;  %v8547_v4 = vrot.slane %v619_v37, %v8186_v12  ;;  %v632_v37 = vld [vmem:[#allocation2 + $0x48] sm:$0x1]  ;;  %v633_v63 = vld [vmem:[#allocation2 + $0x50] sm:$0x1] }
  0x72   : > { %14459 = vst [vmem:[#allocation28_spill] sm:$0xff] %v8541_v8  ;;  %v14461_v48 = vmov 0  ;;  %v14464_v58 = vrot.slane %v8526_v44, 1  ;;  %v4747_v12 = vmul.f32 %v8541_v8, %v8256_v38  ;;  %v1771_v59 = vmul.f32 %v8220_v21, %v633_v63 }
  0x73   : > { %v6940_v9 = vor.u32 %v6938_v10, %v8530_v6  ;;  %v2931_v26 = vadd.f32 %v8514_v19, %v2439_v25  ;;  %14460 = vst [vmem:[#allocation29_spill] sm:$0xff] %v8547_v4  ;;  %v14462_v48 = vsel %vm8551_vm4, 4294967295, %v14461_v48  ;;  %v2934_v62 = vadd.f32 %v2790_v7, %v2439_v25  ;;  %v8578_v25 = vld [vmem:[%s13700_s1 + $0x28] ss:$0 sm:$0xff] }
  0x74   : > { %14463 = vst [vmem:[#allocation30_spill] sm:$0xff] %v14462_v48  ;;  %v3285_v11 = vsel %vm1319_vm0, %v3279_v28, %v14464_v58  ;;  %v8562_v10 = vmul.f32 %v8558_v5, %v8541_v8  ;;  %v14466_v5 = vrot.slane %v8537_v33, 2  ;;  %v5044_v0 = vmul.f32 %v8547_v4, %v8256_v38 }
  0x75   : > { %v6941_v7 = vsel %vm8551_vm4, %v7922_v43, %v6940_v9  ;;  %v3567_v58 = vadd.f32 %v3279_v28, %v2931_v26  ;;  %v3570_v56 = vadd.f32 %v3285_v11, %v2934_v62  ;;  %v8588_v55 = vmul.f32 %v8547_v4, %v8262_v41  ;;  %v2590_v4 = vld [vmem:[#allocation2 + $0xa8] sm:$0x1] }
  0x76   : > { %v4017_v19 = vsel %vm2052_vm1, %v4011_v3, %v14466_v5  ;;  %7697 = vst [vmem:[%s8571_s28] sm:$0xff] %v6941_v7  ;;  %v5680_v43 = vmul.f32 %v8578_v25, %v8256_v38  ;;  %v8594_v9 = vmul.f32 %v8578_v25, %v8262_v41  ;;  %v5236_v26 = vrot.slane %v5044_v0, 1 }
  0x77   : > { %v4395_v28 = vadd.f32 %v4011_v3, %v3567_v58  ;;  %v1770_v5 = vmul.f32 %v8216_v20, %v632_v37  ;;  %v4398_v50 = vadd.f32 %v4017_v19, %v3570_v56  ;;  %v13745_v62 = vrot.slane %v8588_v55, 1 }
  0x78   : > { %v5968_v11 = vrot.slane %v5680_v43, 2  ;;  %v13746_v7 = vrot.slane %v8594_v9, 2  ;;  %v2064_v15 = vrot.slane %v1771_v59, 2  ;;  %v2791_v3 = vmul.f32 %v8224_v22, %v8236_v27 }
  0x79   : > { %v4888_v44 = vadd.f32 %v8562_v10, %v4395_v28  ;;  %v2062_v38 = vrot.slane %v1770_v5, 2  ;;  %v4891_v0 = vadd.f32 %v4747_v12, %v4398_v50  ;;  %v5242_v63 = vsel %vm1319_vm0, %v5236_v26, %v13745_v62 }
  0x7a   : > { %v5974_v56 = vsel %vm2052_vm1, %v5968_v11, %v13746_v7  ;;  %v2792_v19 = vmul.f32 %v8228_v23, %v8241_v31  ;;  %v14467_v58 = vrot.slane %v8320_v17, 2  ;;  %v14468_v43 = vrot.slane %v8323_v18, 2  ;;  %v4547_v7 = vld [vmem:[#allocation2 + $0x108] sm:$0x1]  ;;  %v4548_v31 = vld [vmem:[#allocation2 + $0x110] sm:$0x1] }
  0x7b   : > { %v5524_v37 = vadd.f32 %v5236_v26, %v4888_v44  ;;  %v3727_v50 = vmul.f32 %v8375_v1, %v2590_v4  ;;  %v5527_v12 = vadd.f32 %v5242_v63, %v4891_v0  ;;  %v3728_v62 = vmul.f32 %v8379_v2, %v2591_v14 }
  0x7c   : > { %v2063_v59 = vsel %vm2052_vm1, %v14467_v58, %v2062_v38  ;;  %v2065_v27 = vsel %vm2052_vm1, %v14468_v43, %v2064_v15  ;;  %v4748_v17 = vmul.f32 %v8389_v35, %v8258_v39  ;;  %v4749_v18 = vmul.f32 %v8393_v36, %v8260_v40 }
  0x7d   : > { %v2443_v28 = vadd.f32 %v2063_v59, %v8346_v45  ;;  %v2444_v5 = vadd.f32 %v2065_v27, %v8349_v46  ;;  %v6352_v44 = vadd.f32 %v5968_v11, %v5524_v37  ;;  %v4018_v26 = vrot.slane %v3727_v50, 2 }
  0x7e   : > { %v6355_v15 = vadd.f32 %v5974_v56, %v5527_v12  ;;  %v4020_v0 = vrot.slane %v3728_v62, 2  ;;  %v14469_v45 = vrot.slane %v8401_v53, 2  ;;  %v5684_v14 = vmul.f32 %v8420_v29, %v4547_v7  ;;  %v634_v56 = vld [vmem:[#allocation2 + $0x58] sm:$0x1] }
  0x7f   : > { %v2935_v38 = vadd.f32 %v2791_v3, %v2443_v28  ;;  %v2936_v4 = vadd.f32 %v2792_v19, %v2444_v5  ;;  %v7957_v63 = vpack.c.bf16 %v6352_v44, %v6352_v44  ;;  %v5685_v11 = vmul.f32 %v8425_v30, %v4548_v31  ;;  %v2592_v5 = vld [vmem:[#allocation2 + $0xb8] sm:$0x1] }
  0x80   : > { %v4019_v46 = vsel %vm2052_vm1, %v14469_v45, %v4018_v26  ;;  %v7959_v37 = vpack.c.bf16 %v6355_v15, %v6355_v15  ;;  %v14470_v58 = vrot.slane %v8363_v51, 1  ;;  %v14471_v59 = vrot.slane %v8367_v52, 1  ;;  %v4549_v51 = vld [vmem:[#allocation2 + $0x118] sm:$0x1] }
  0x81   : > { %v14472_v3 = vrot.slane %v8405_v54, 2  ;;  %v6943_v19 = vshrl.u32 %v7957_v63, 16  ;;  %v5975_v53 = vrot.slane %v5684_v14, 2  ;;  %v5977_v43 = vrot.slane %v5685_v11, 2  ;;  %v638_v45 = vld [vmem:[#allocation2 + $0x78] sm:$0xff] }
  0x82   : > { %v3571_v39 = vadd.f32 %v14470_v58, %v2935_v38  ;;  %v3572_v40 = vadd.f32 %v14471_v59, %v2936_v4  ;;  %v6955_v27 = vrot.slane %v8530_v6, 4  ;;  %v6948_v7 = vshrl.u32 %v7959_v37, 16 }
  0x83   : > { %v4021_v62 = vsel %vm2052_vm1, %v14472_v3, %v4020_v0  ;;  %v6951_v50 = vshll.u32 %v7959_v37, 16  ;;  %v7923_v31 = vrot.slane %v6943_v19, 11  ;;  %v14473_v52 = vrot.slane %v8463_v34, 2 }
  0x84   : > { %v4399_v12 = vadd.f32 %v4019_v46, %v3571_v39  ;;  %v4400_v28 = vadd.f32 %v4021_v62, %v3572_v40  ;;  %v14474_v54 = vrot.slane %v8467_v42, 2  ;;  %v1772_v15 = vmul.f32 %v8499_v60, %v634_v56  ;;  %v639_v39 = vld [vmem:[#allocation2 + $0x80] sm:$0xff]  ;;  %v8662_v62 = vld [vmem:[#allocation2 + $0x90] sm:$0xff] }
  0x85   : > { %v5976_v44 = vsel %vm2052_vm1, %v14473_v52, %v5975_v53  ;;  %v8645_v38 = vrot.slane %v6948_v7, 7  ;;  %v2793_v63 = vmul.f32 %v8502_v61, %v8243_v32  ;;  %v3729_v14 = vmul.f32 %v8508_v49, %v2592_v5 }
  0x86   : > { %v5978_v26 = vsel %vm2052_vm1, %v14474_v54, %v5977_v43  ;;  %v4892_v4 = vadd.f32 %v4748_v17, %v4399_v12  ;;  %v4893_v0 = vadd.f32 %v4749_v18, %v4400_v28  ;;  %v2066_v46 = vrot.slane %v1772_v15, 2  ;;  %v8668_v43 = vld [vmem:[#allocation2 + $0x98] sm:$0xff]  ;;  %v14480_v28 = vld [vmem:[#allocation4_spill] sm:$0xff] }
  0x87   : > { %v4750_v34 = vmul.f32 %v8541_v8, %v8262_v41  ;;  %v5686_v42 = vmul.f32 %v8578_v25, %v4549_v51  ;;  %v6953_v11 = vor.u32 %v6951_v50, %v8645_v38  ;;  %v14475_v37 = vrot.slane %v8455_v16, 1  ;;  %v14481_v51 = vld [vmem:[#allocation5_spill] sm:$0xff]  ;;  %v14482_v54 = vld [vmem:[#allocation6_spill] sm:$0xff] }
  0x88   : > { %v14476_v17 = vrot.slane %v8459_v57, 1  ;;  %v6964_v32 = vrot.slane %v8645_v38, 4  ;;  %v14477_v59 = vrot.slane %v8511_v24, 2  ;;  %v4022_v3 = vrot.slane %v3729_v14, 2  ;;  %v14483_v14 = vld [vmem:[#allocation27_spill] sm:$0xff] }
  0x89   : > { %v5528_v58 = vadd.f32 %v14475_v37, %v4892_v4  ;;  %v5979_v41 = vrot.slane %v5686_v42, 2  ;;  %v839_v56 = vmul.f32 %v8197_v13, %v638_v45  ;;  %v6954_v16 = vsel %vm8551_vm4, %v7923_v31, %v6953_v11 }
  0x8a   : > { %v5529_v18 = vadd.f32 %v14476_v17, %v4893_v0  ;;  %v2067_v40 = vsel %vm2052_vm1, %v14477_v59, %v2066_v46  ;;  %7698 = vst [vmem:[%s8571_s28 + $0x8] sm:$0xf] %v6954_v16  ;;  %v14478_v24 = vrot.slane %v8537_v33, 2  ;;  %v14479_v50 = vrot.slane %v8594_v9, 2  ;;  %v14485_v17 = vld [vmem:[#allocation9_spill] sm:$0xff] }
  0x8b   : > { %v6356_v19 = vadd.f32 %v5976_v44, %v5528_v58  ;;  %v2445_v57 = vadd.f32 %v2067_v40, %v8519_v47  ;;  %v840_v5 = vmul.f32 %v14480_v28, %v639_v39  ;;  %v1133_v52 = vmul.f32 %v14481_v51, %v638_v45 }
  0x8c   : > { %v6357_v53 = vadd.f32 %v5978_v26, %v5529_v18  ;;  %v4023_v7 = vsel %vm2052_vm1, %v14478_v24, %v4022_v3  ;;  %v5980_v12 = vsel %vm2052_vm1, %v14479_v50, %v5979_v41  ;;  %v1134_v26 = vmul.f32 %v14482_v54, %v639_v39  ;;  %v14486_v3 = vld [vmem:[#allocation10_spill] sm:$0xff] }
  0x8d   : > { %v2937_v44 = vadd.f32 %v2793_v63, %v2445_v57  ;;  %v8682_v47 = vmul.f32 %v14481_v51, %v8662_v62  ;;  %v8686_v33 = vmul.f32 %v14482_v54, %v8668_v43  ;;  %v1329_v15 = vrot.slane %v1133_v52, 1  ;;  %v8710_v24 = vld [vmem:[#allocation2 + $0xd8] sm:$0xff]  ;;  %v14499_v54 = vld [vmem:[#allocation19_spill] sm:$0xff] }
  0x8e   : > { %v7960_v31 = vpack.c.bf16 %v6357_v53, %v6356_v19  ;;  %v1773_v9 = vmul.f32 %v8216_v20, %v638_v45  ;;  %v1774_v4 = vmul.f32 %v8220_v21, %v639_v39  ;;  %v14484_v42 = vrot.slane %v14483_v14, 1  ;;  %14487 = vst [vmem:[#allocation27_spill] sm:$0xff] %v8710_v24 }
  0x8f   : > { %v1330_v11 = vrot.slane %v1134_v26, 1  ;;  %v13752_v37 = vrot.slane %v8682_v47, 1  ;;  %v13751_v58 = vrot.slane %v8686_v33, 1  ;;  %v1617_v18 = vadd.f32 %v1329_v15, %v14485_v17 }
  0x90   : > { %v6957_v0 = vshrl.u32 %v7960_v31, 16  ;;  %v6960_v46 = vshll.u32 %v7960_v31, 16  ;;  %v3573_v63 = vadd.f32 %v14484_v42, %v2937_v44  ;;  %v8697_v59 = vmul.f32 %v8216_v20, %v8662_v62 }
  0x91   : > { %v1618_v39 = vadd.f32 %v1330_v11, %v14486_v3  ;;  %v8702_v41 = vmul.f32 %v8220_v21, %v8668_v43  ;;  %v1333_v16 = vsel %vm1319_vm0, %v1329_v15, %v13752_v37  ;;  %v1335_v19 = vsel %vm1319_vm0, %v1330_v11, %v13751_v58  ;;  %v14491_v11 = vld [vmem:[#allocation12_spill] sm:$0xff]  ;;  %v14492_v3 = vld [vmem:[#allocation13_spill] sm:$0xff]  ;;  %v8781_v58 = vld [vmem:[#allocation2 + $0x158] sm:$0xff] }
  0x92   : > { %v6959_v40 = vrot.slane %v6957_v0, 7  ;;  %v4401_v45 = vadd.f32 %v4023_v7, %v3573_v63  ;;  %v2068_v53 = vrot.slane %v1773_v9, 2  ;;  %v2069_v57 = vrot.slane %v1774_v4, 2  ;;  %v8712_v7 = vld [vmem:[#allocation2 + $0xe0] sm:$0xff]  ;;  %v8722_v63 = vld [vmem:[#allocation2 + $0xf0] sm:$0xff] }
  0x93   : > { %14488 = vst [vmem:[#allocation9_spill] sm:$0xff] %v8712_v7  ;;  %v1620_v31 = vadd.f32 %v1333_v16, %v839_v56  ;;  %v1621_v44 = vadd.f32 %v1335_v19, %v840_v5  ;;  %v13748_v26 = vrot.slane %v8697_v59, 2  ;;  %v13747_v0 = vrot.slane %v8702_v41, 2  ;;  %v14493_v16 = vld [vmem:[#allocation14_spill] sm:$0xff] }
  0x94   : > { %v6962_v50 = vor.u32 %v6960_v46, %v6959_v40  ;;  %v4894_v52 = vadd.f32 %v4750_v34, %v4401_v45  ;;  %v2446_v15 = vadd.f32 %v2068_v53, %v1617_v18  ;;  %v2447_v14 = vadd.f32 %v2069_v57, %v1618_v39  ;;  %v8724_v46 = vld [vmem:[#allocation2 + $0xf8] sm:$0xff] }
  0x95   : > { %v14489_v4 = vrot.slane %v8588_v55, 1  ;;  %v2797_v34 = vmul.f32 %v8224_v22, %v8710_v24  ;;  %v2798_v56 = vmul.f32 %v8228_v23, %v8712_v7  ;;  %v2072_v6 = vsel %vm2052_vm1, %v2068_v53, %v13748_v26 }
  0x96   : > { %v6963_v9 = vsel %vm8551_vm4, %v6955_v27, %v6962_v50  ;;  %v2074_v55 = vsel %vm2052_vm1, %v2069_v57, %v13747_v0  ;;  %v14490_v27 = vld [vmem:[#allocation11_spill] sm:$0xff]  ;;  %v2939_v17 = vadd.f32 %v14491_v11, %v2447_v14  ;;  %v2449_v40 = vadd.f32 %v2072_v6, %v1620_v31  ;;  %v8761_v11 = vld [vmem:[#allocation2 + $0x138] sm:$0xff] }
  0x97   : > { %v5530_v42 = vadd.f32 %v14489_v4, %v4894_v52  ;;  %7699 = vst [vmem:[%s8571_s28 + $0xc] sm:$0xff] %v6963_v9  ;;  %v2938_v5 = vadd.f32 %v14490_v27, %v2446_v15  ;;  %v2450_v45 = vadd.f32 %v2074_v55, %v1621_v44  ;;  %v3091_v39 = vmul.f32 %v14492_v3, %v8710_v24 }
  0x98   : > { %v3092_v19 = vmul.f32 %v14493_v16, %v8712_v7  ;;  %v8745_v53 = vmul.f32 %v14492_v3, %v8722_v63  ;;  %v8749_v57 = vmul.f32 %v14493_v16, %v8724_v46  ;;  %v3730_v50 = vmul.f32 %v8375_v1, %v8710_v24  ;;  %14494 = vst [vmem:[#allocation10_spill] sm:$0xff] %v8761_v11  ;;  %v14498_v16 = vld [vmem:[#allocation18_spill] sm:$0xff] }
  0x99   : > { %v6358_v18 = vadd.f32 %v5980_v12, %v5530_v42  ;;  %v2941_v52 = vadd.f32 %v2797_v34, %v2449_v40  ;;  %v2942_v31 = vadd.f32 %v2798_v56, %v2450_v45  ;;  %v3286_v44 = vrot.slane %v3091_v39, 1 }
  0x9a   : > { %v3287_v15 = vrot.slane %v3092_v19, 1  ;;  %v13750_v14 = vrot.slane %v8745_v53, 1  ;;  %v13749_v9 = vrot.slane %v8749_v57, 1  ;;  %v3731_v4 = vmul.f32 %v8379_v2, %v8712_v7 }
  0x9b   : > { %v7961_v12 = vpack.c.bf16 %v6358_v18, %v6358_v18  ;;  %v3574_v55 = vadd.f32 %v3286_v44, %v2938_v5  ;;  %v8759_v27 = vmul.f32 %v8375_v1, %v8722_v63  ;;  %v8771_v40 = vmul.f32 %v8379_v2, %v8724_v46  ;;  %v8773_v5 = vld [vmem:[#allocation2 + $0x140] sm:$0xff] }
  0x9c   : > { %v3290_v34 = vsel %vm1319_vm0, %v3286_v44, %v13750_v14  ;;  %v3292_v56 = vsel %vm1319_vm0, %v3287_v15, %v13749_v9  ;;  %v3575_v18 = vadd.f32 %v3287_v15, %v2939_v17  ;;  %14495 = vst [vmem:[#allocation11_spill] sm:$0xff] %v8773_v5  ;;  %v4025_v0 = vrot.slane %v3731_v4, 2  ;;  %v8779_v14 = vld [vmem:[#allocation2 + $0x150] sm:$0xff] }
  0x9d   : > { %v6966_v42 = vshrl.u32 %v7961_v12, 16  ;;  %v6969_v6 = vshll.u32 %v7961_v12, 16  ;;  %v3577_v39 = vadd.f32 %v3290_v34, %v2941_v52  ;;  %v3578_v19 = vadd.f32 %v3292_v56, %v2942_v31 }
  0x9e   : > { %v4024_v12 = vrot.slane %v3730_v50, 2  ;;  %v13756_v26 = vrot.slane %v8759_v27, 2  ;;  %v13757_v44 = vrot.slane %v8771_v40, 2  ;;  %v4754_v9 = vmul.f32 %v8389_v35, %v8761_v11  ;;  %v14496_v50 = vld [vmem:[#allocation20_spill] sm:$0xff] }
  0x9f   : > { %v6968_v45 = vrot.slane %v6966_v42, 7  ;;  %v4755_v52 = vmul.f32 %v8393_v36, %v8773_v5  ;;  %v5048_v31 = vmul.f32 %v14496_v50, %v8761_v11 }
  0xa0   : > { %v4402_v15 = vadd.f32 %v4024_v12, %v3574_v55  ;;  %v4028_v4 = vsel %vm2052_vm1, %v4024_v12, %v13756_v26  ;;  %v4030_v42 = vsel %vm2052_vm1, %v4025_v0, %v13757_v44  ;;  %v14497_v55 = vld [vmem:[#allocation21_spill] sm:$0xff]  ;;  %v8804_v26 = vmul.f32 %v14496_v50, %v8779_v14 }
  0xa1   : > { %v6971_v17 = vor.u32 %v6969_v6, %v6968_v45  ;;  %v4403_v6 = vadd.f32 %v4025_v0, %v3575_v18  ;;  %v5049_v34 = vmul.f32 %v14497_v55, %v8773_v5  ;;  %v4405_v45 = vadd.f32 %v4028_v4, %v3577_v39  ;;  %v640_v39 = vld [vmem:[#allocation2 + $0x88] sm:$0xff] }
  0xa2   : > { %v4406_v37 = vadd.f32 %v4030_v42, %v3578_v19  ;;  %v4895_v3 = vadd.f32 %v14498_v16, %v4402_v15  ;;  %14500 = vst [vmem:[#allocation12_spill] sm:$0xff] %v8804_v26  ;;  %v8808_v0 = vmul.f32 %v14497_v55, %v8781_v58  ;;  %v5243_v18 = vrot.slane %v5048_v31, 1 }
  0xa3   : > { %v6972_v56 = vsel %vm8551_vm4, %v6964_v32, %v6971_v17  ;;  %v4896_v12 = vadd.f32 %v14499_v54, %v4403_v6  ;;  %v4898_v38 = vadd.f32 %v4754_v9, %v4405_v45  ;;  %v5244_v51 = vrot.slane %v5049_v34, 1  ;;  %v14502_v6 = vld [vmem:[#allocation22_spill] sm:$0xff] }
  0xa4   : > { %7700 = vst [vmem:[%s8571_s28 + $0x14] sm:$0xf] %v6972_v56  ;;  %14501 = vst [vmem:[#allocation18_spill] sm:$0xff] %v8808_v0  ;;  %v4899_v44 = vadd.f32 %v4755_v52, %v4406_v37  ;;  %v5687_v32 = vmul.f32 %v8420_v29, %v8761_v11  ;;  %v13765_v16 = vrot.slane %v8804_v26, 1  ;;  %v13766_v54 = vrot.slane %v8808_v0, 1  ;;  %v8824_v52 = vld [vmem:[#allocation2 + $0xa0] sm:$0xff] }
  0xa5   : > { %v5531_v19 = vadd.f32 %v5243_v18, %v4895_v3  ;;  %v5688_v17 = vmul.f32 %v8425_v30, %v8773_v5  ;;  %v5532_v15 = vadd.f32 %v5244_v51, %v4896_v12  ;;  %v8818_v4 = vmul.f32 %v8420_v29, %v8779_v14  ;;  %v14503_v5 = vld [vmem:[#allocation23_spill] sm:$0xff]  ;;  %v14507_v0 = vld [vmem:[#allocation25_spill] sm:$0xff]  ;;  %v14511_v26 = vld [vmem:[#allocation26_spill] sm:$0xff] }
  0xa6   : > { %v8822_v37 = vmul.f32 %v8425_v30, %v8781_v58  ;;  %v5981_v9 = vrot.slane %v5687_v32, 2  ;;  %v5247_v31 = vsel %vm1319_vm0, %v5243_v18, %v13765_v16  ;;  %v5249_v3 = vsel %vm1319_vm0, %v5244_v51, %v13766_v54  ;;  %v8840_v16 = vld [vmem:[#allocation2 + $0xe8] sm:$0xff]  ;;  %v8853_v54 = vld [vmem:[#allocation2 + $0x100] sm:$0xff] }
  0xa7   : > { %v5982_v42 = vrot.slane %v5688_v17, 2  ;;  %v841_v34 = vmul.f32 %v14502_v6, %v640_v39  ;;  %v5534_v56 = vadd.f32 %v5247_v31, %v4898_v38  ;;  %v5535_v45 = vadd.f32 %v5249_v3, %v4899_v44  ;;  %14504 = vst [vmem:[#allocation19_spill] sm:$0xff] %v8840_v16 }
  0xa8   : > { %v13771_v12 = vrot.slane %v8818_v4, 2  ;;  %v13770_v55 = vrot.slane %v8822_v37, 2  ;;  %v6359_v32 = vadd.f32 %v5981_v9, %v5531_v19  ;;  %v1135_v11 = vmul.f32 %v14503_v5, %v640_v39 }
  0xa9   : > { %v6360_v50 = vadd.f32 %v5982_v42, %v5532_v15  ;;  %v8838_v18 = vmul.f32 %v14503_v5, %v8824_v52  ;;  %v1775_v38 = vmul.f32 %v8499_v60, %v640_v39  ;;  %v8851_v19 = vmul.f32 %v8499_v60, %v8824_v52 }
  0xaa   : > { %v5985_v51 = vsel %vm2052_vm1, %v5981_v9, %v13771_v12  ;;  %v5987_v44 = vsel %vm2052_vm1, %v5982_v42, %v13770_v55  ;;  %v1331_v3 = vrot.slane %v1135_v11, 1  ;;  %v2799_v42 = vmul.f32 %v8502_v61, %v8840_v16  ;;  %v14506_v12 = vld [vmem:[#allocation24_spill] sm:$0xff] }
  0xab   : > { %14505 = vst [vmem:[#allocation22_spill] sm:$0xff] %v8851_v19  ;;  %v6362_v17 = vadd.f32 %v5985_v51, %v5534_v56  ;;  %v6363_v15 = vadd.f32 %v5987_v44, %v5535_v45  ;;  %v7962_v31 = vpack.c.bf16 %v6360_v50, %v6359_v32  ;;  %v13776_v5 = vrot.slane %v8838_v18, 1  ;;  %v8874_v51 = vld [vmem:[#allocation2 + $0x148] sm:$0xff] }
  0xac   : > { %v2070_v7 = vrot.slane %v1775_v38, 2  ;;  %v13775_v9 = vrot.slane %v8851_v19, 2  ;;  %v1619_v24 = vadd.f32 %v1331_v3, %v14506_v12  ;;  %v3093_v56 = vmul.f32 %v14507_v0, %v8840_v16  ;;  %14509 = vst [vmem:[#allocation32_spill] sm:$0xff] %v8874_v51 }
  0xad   : > { %v7964_v55 = vpack.c.bf16 %v6363_v15, %v6362_v17  ;;  %v6974_v39 = vshrl.u32 %v7962_v31, 16  ;;  %v1337_v11 = vsel %vm1319_vm0, %v1331_v3, %v13776_v5  ;;  %v8870_v45 = vmul.f32 %v14507_v0, %v8853_v54  ;;  %v8881_v5 = vld [vmem:[#allocation2 + $0x160] sm:$0xff] }
  0xae   : > { %v2076_v50 = vsel %vm2052_vm1, %v2070_v7, %v13775_v9  ;;  %v3732_v32 = vmul.f32 %v8508_v49, %v8840_v16  ;;  %v1622_v17 = vadd.f32 %v1337_v11, %v841_v34  ;;  %v2448_v15 = vadd.f32 %v2070_v7, %v1619_v24  ;;  %v14512_v34 = vld [vmem:[#allocation29_spill] sm:$0xff] }
  0xaf   : > { %14508 = vst [vmem:[#allocation24_spill] sm:$0xff] %v8870_v45  ;;  %v7924_v12 = vrot.slane %v6974_v39, 11  ;;  %v6979_v44 = vshrl.u32 %v7964_v55, 16  ;;  %v6982_v38 = vshll.u32 %v7964_v55, 16  ;;  %v3288_v31 = vrot.slane %v3093_v56, 1 }
  0xb0   : > { %v13782_v3 = vrot.slane %v8870_v45, 1  ;;  %v8879_v9 = vmul.f32 %v8508_v49, %v8853_v54  ;;  %v2451_v19 = vadd.f32 %v2076_v50, %v1622_v17  ;;  %v4026_v16 = vrot.slane %v3732_v32, 2  ;;  %v644_v45 = vld [vmem:[#allocation2 + $0xa8] sm:$0x1] }
  0xb1   : > { %v8883_v0 = vrot.slane %v6979_v44, 7  ;;  %v4756_v39 = vmul.f32 %v8541_v8, %v8874_v51  ;;  %v2940_v55 = vadd.f32 %v14511_v26, %v2448_v15  ;;  %v5050_v56 = vmul.f32 %v14512_v34, %v8874_v51 }
  0xb2   : > { %14510 = vst [vmem:[#allocation33_spill] sm:$0xff] %v8879_v9  ;;  %v3294_v24 = vsel %vm1319_vm0, %v3288_v31, %v13782_v3  ;;  %v13787_v7 = vrot.slane %v8879_v9, 2  ;;  %v2943_v44 = vadd.f32 %v2799_v42, %v2451_v19  ;;  %v8897_v50 = vmul.f32 %v14512_v34, %v8881_v5 }
  0xb3   : > { %v6984_v11 = vor.u32 %v6982_v38, %v8883_v0  ;;  %v5689_v26 = vmul.f32 %v8578_v25, %v8874_v51  ;;  %v3576_v32 = vadd.f32 %v3288_v31, %v2940_v55  ;;  %v5245_v15 = vrot.slane %v5050_v56, 1  ;;  %v645_v38 = vld [vmem:[#allocation2 + $0xb0] sm:$0x1] }
  0xb4   : > { %14513 = vst [vmem:[#allocation26_spill] sm:$0xff] %v8897_v50  ;;  %v4032_v17 = vsel %vm2052_vm1, %v4026_v16, %v13787_v7  ;;  %v8906_v3 = vmul.f32 %v8578_v25, %v8881_v5  ;;  %v3579_v42 = vadd.f32 %v3294_v24, %v2943_v44  ;;  %v13791_v34 = vrot.slane %v8897_v50, 1  ;;  %v2603_v44 = vld [vmem:[#allocation2 + $0x110] sm:$0x1]  ;;  %v4559_v50 = vld [vmem:[#allocation2 + $0x168] sm:$0x1] }
  0xb5   : > { %v6985_v19 = vsel %vm8551_vm4, %v7924_v12, %v6984_v11  ;;  %v5983_v8 = vrot.slane %v5689_v26, 2  ;;  %v4404_v31 = vadd.f32 %v4026_v16, %v3576_v32  ;;  %v842_v56 = vmul.f32 %v8197_v13, %v8662_v62  ;;  %v2602_v11 = vld [vmem:[#allocation2 + $0x108] sm:$0x1] }
  0xb6   : > { %7701 = vst [vmem:[%s8571_s28 + $0x18] sm:$0xff] %v6985_v19  ;;  %v13792_v55 = vrot.slane %v8906_v3, 2  ;;  %v843_v7 = vmul.f32 %v14480_v28, %v8668_v43  ;;  %v4407_v51 = vadd.f32 %v4032_v17, %v3579_v42  ;;  %v5251_v9 = vsel %vm1319_vm0, %v5245_v15, %v13791_v34 }
  0xb7   : > { %v1779_v12 = vmul.f32 %v8216_v20, %v644_v45  ;;  %v1780_v24 = vmul.f32 %v8220_v21, %v645_v38  ;;  %v4897_v16 = vadd.f32 %v8562_v10, %v4404_v31  ;;  %v14514_v26 = vrot.slane %v8682_v47, 1 }
  0xb8   : > { %v5989_v62 = vsel %vm2052_vm1, %v5983_v8, %v13792_v55  ;;  %v14515_v32 = vrot.slane %v8686_v33, 1  ;;  %v4900_v19 = vadd.f32 %v4756_v39, %v4407_v51  ;;  %v2800_v45 = vmul.f32 %v8224_v22, %v8722_v63 }
  0xb9   : > { %v1623_v43 = vadd.f32 %v14514_v26, %v842_v56  ;;  %v2077_v42 = vrot.slane %v1779_v12, 2  ;;  %v2079_v34 = vrot.slane %v1780_v24, 2  ;;  %v5533_v38 = vadd.f32 %v5245_v15, %v4897_v16 }
  0xba   : > { %v1624_v17 = vadd.f32 %v14515_v32, %v843_v7  ;;  %v2801_v10 = vmul.f32 %v8228_v23, %v8724_v46  ;;  %v3736_v31 = vmul.f32 %v8375_v1, %v2602_v11  ;;  %v3737_v55 = vmul.f32 %v8379_v2, %v2603_v44  ;;  %v4560_v11 = vld [vmem:[#allocation2 + $0x170] sm:$0x1] }
  0xbb   : > { %v5536_v47 = vadd.f32 %v5251_v9, %v4900_v19  ;;  %v14516_v56 = vrot.slane %v8697_v59, 2  ;;  %v14517_v51 = vrot.slane %v8702_v41, 2  ;;  %v4757_v7 = vmul.f32 %v8389_v35, %v8779_v14 }
  0xbc   : > { %v6361_v15 = vadd.f32 %v5983_v8, %v5533_v38  ;;  %v4033_v16 = vrot.slane %v3736_v31, 2  ;;  %v4035_v44 = vrot.slane %v3737_v55, 2  ;;  %v4758_v9 = vmul.f32 %v8393_v36, %v8781_v58 }
  0xbd   : > { %v2078_v33 = vsel %vm2052_vm1, %v14516_v56, %v2077_v42  ;;  %v2080_v39 = vsel %vm2052_vm1, %v14517_v51, %v2079_v34  ;;  %v6364_v26 = vadd.f32 %v5989_v62, %v5536_v47  ;;  %v5693_v59 = vmul.f32 %v8420_v29, %v4559_v50 }
  0xbe   : > { %v2452_v12 = vadd.f32 %v2078_v33, %v1623_v43  ;;  %v2453_v24 = vadd.f32 %v2080_v39, %v1624_v17  ;;  %v7963_v32 = vpack.c.bf16 %v6361_v15, %v6361_v15  ;;  %v14518_v34 = vrot.slane %v8759_v27, 2  ;;  %v646_v27 = vld [vmem:[#allocation2 + $0xb8] sm:$0x1] }
  0xbf   : > { %v7965_v56 = vpack.c.bf16 %v6364_v26, %v6364_v26  ;;  %v14519_v8 = vrot.slane %v8771_v40, 2  ;;  %v5694_v62 = vmul.f32 %v8425_v30, %v4560_v11  ;;  %v5990_v55 = vrot.slane %v5693_v59, 2  ;;  %v2604_v39 = vld [vmem:[#allocation2 + $0x118] sm:$0x1] }
  0xc0   : > { %v2944_v19 = vadd.f32 %v2800_v45, %v2452_v12  ;;  %v2945_v41 = vadd.f32 %v2801_v10, %v2453_v24  ;;  %v4034_v42 = vsel %vm2052_vm1, %v14518_v34, %v4033_v16  ;;  %v6987_v17 = vshrl.u32 %v7963_v32, 16  ;;  %v4561_v24 = vld [vmem:[#allocation2 + $0x178] sm:$0x1] }
  0xc1   : > { %v4036_v43 = vsel %vm2052_vm1, %v14519_v8, %v4035_v44  ;;  %v14520_v38 = vrot.slane %v8745_v53, 1  ;;  %v14521_v29 = vrot.slane %v8749_v57, 1  ;;  %v6999_v45 = vrot.slane %v8883_v0, 4  ;;  %v14526_v8 = vld [vmem:[#allocation12_spill] sm:$0xff] }
  0xc2   : > { %v6992_v10 = vshrl.u32 %v7965_v56, 16  ;;  %v6995_v47 = vshll.u32 %v7965_v56, 16  ;;  %v14522_v33 = vrot.slane %v8818_v4, 2  ;;  %v5992_v51 = vrot.slane %v5694_v62, 2 }
  0xc3   : > { %v3580_v31 = vadd.f32 %v14520_v38, %v2944_v19  ;;  %v3581_v50 = vadd.f32 %v14521_v29, %v2945_v41  ;;  %v7925_v30 = vrot.slane %v6987_v17, 11  ;;  %v844_v53 = vmul.f32 %v14502_v6, %v8824_v52 }
  0xc4   : > { %v5991_v40 = vsel %vm2052_vm1, %v14522_v33, %v5990_v55  ;;  %v8964_v57 = vrot.slane %v6992_v10, 7  ;;  %v14523_v16 = vrot.slane %v8822_v37, 2  ;;  %v1781_v26 = vmul.f32 %v8499_v60, %v646_v27  ;;  %v14525_v37 = vld [vmem:[#allocation28_spill] sm:$0xff]  ;;  %v14528_v55 = vld [vmem:[#allocation18_spill] sm:$0xff]  ;;  %v14532_v10 = vld [vmem:[#allocation31_spill] sm:$0xff] }
  0xc5   : > { %v4408_v15 = vadd.f32 %v4034_v42, %v3580_v31  ;;  %v4409_v12 = vadd.f32 %v4036_v43, %v3581_v50  ;;  %v2802_v4 = vmul.f32 %v8502_v61, %v8853_v54  ;;  %v14524_v32 = vrot.slane %v8838_v18, 1  ;;  %v14530_v31 = vld [vmem:[#allocation22_spill] sm:$0xff]  ;;  %v9109_v18 = vld [vmem:[#allocation2 + $0x1a0] sm:$0xff] }
  0xc6   : > { %v5993_v11 = vsel %vm2052_vm1, %v14523_v16, %v5992_v51  ;;  %v3738_v52 = vmul.f32 %v8508_v49, %v2604_v39  ;;  %v6997_v41 = vor.u32 %v6995_v47, %v8964_v57  ;;  %v2081_v34 = vrot.slane %v1781_v26, 2  ;;  %v14534_v39 = vld [vmem:[#allocation33_spill] sm:$0xff]  ;;  %v14538_v16 = vld [vmem:[#allocation27_spill] sm:$0xff] }
  0xc7   : > { %v4901_v44 = vadd.f32 %v4757_v7, %v4408_v15  ;;  %v4902_v59 = vadd.f32 %v4758_v9, %v4409_v12  ;;  %v1625_v19 = vadd.f32 %v14524_v32, %v844_v53  ;;  %v4759_v42 = vmul.f32 %v14525_v37, %v8881_v5  ;;  %v14540_v32 = vld [vmem:[#allocation5_spill] sm:$0xff]  ;;  %14553 = vst [vmem:[#allocation33_spill] sm:$0xff] %v9109_v18 }
  0xc8   : > { %v5695_v56 = vmul.f32 %v8578_v25, %v4561_v24  ;;  %v14527_v43 = vrot.slane %v14526_v8, 1  ;;  %v14529_v7 = vrot.slane %v14528_v55, 1  ;;  %v4037_v9 = vrot.slane %v3738_v52, 2  ;;  %v14541_v52 = vld [vmem:[#allocation6_spill] sm:$0xff] }
  0xc9   : > { %v6998_v38 = vsel %vm8551_vm4, %v7925_v30, %v6997_v41  ;;  %v14531_v29 = vrot.slane %v14530_v31, 2  ;;  %v8991_v25 = vmul.f32 %v14532_v10, %v8197_v13  ;;  %v14535_v15 = vrot.slane %v14534_v39, 2 }
  0xca   : > { %v5537_v62 = vadd.f32 %v14527_v43, %v4901_v44  ;;  %v5538_v17 = vadd.f32 %v14529_v7, %v4902_v59  ;;  %v5994_v27 = vrot.slane %v5695_v56, 2  ;;  %7702 = vst [vmem:[%s8571_s28 + $0x20] sm:$0xf] %v6998_v38  ;;  %v14536_v53 = vrot.slane %v8906_v3, 2  ;;  %v14539_v44 = vld [vmem:[#allocation9_spill] sm:$0xff] }
  0xcb   : > { %v2082_v50 = vsel %vm2052_vm1, %v14531_v29, %v2081_v34  ;;  %14533 = vst [vmem:[#allocation28_spill] sm:$0xff] %v8991_v25  ;;  %v4038_v12 = vsel %vm2052_vm1, %v14535_v15, %v4037_v9  ;;  %v9002_v24 = vmul.f32 %v14532_v10, %v14480_v28  ;;  %v848_v26 = vmul.f32 %v14538_v16, %v8197_v13 }
  0xcc   : > { %v6365_v47 = vadd.f32 %v5991_v40, %v5537_v62  ;;  %v6366_v33 = vadd.f32 %v5993_v11, %v5538_v17  ;;  %v2454_v51 = vadd.f32 %v2082_v50, %v1625_v19  ;;  %v5995_v30 = vsel %vm2052_vm1, %v14536_v53, %v5994_v27  ;;  %v14542_v62 = vld [vmem:[#allocation24_spill] sm:$0xff] }
  0xcd   : > { %14537 = vst [vmem:[#allocation12_spill] sm:$0xff] %v9002_v24  ;;  %v849_v40 = vmul.f32 %v14539_v44, %v14480_v28  ;;  %v1139_v19 = vmul.f32 %v14538_v16, %v14540_v32  ;;  %v1140_v3 = vmul.f32 %v14539_v44, %v14541_v52  ;;  %v9014_v41 = vmul.f32 %v8722_v63, %v14540_v32 }
  0xce   : > { %v7966_v11 = vpack.c.bf16 %v6366_v33, %v6365_v47  ;;  %v2946_v59 = vadd.f32 %v2802_v4, %v2454_v51  ;;  %v9018_v34 = vmul.f32 %v8724_v46, %v14541_v52  ;;  %v1782_v56 = vmul.f32 %v14538_v16, %v8216_v20 }
  0xcf   : > { %v1783_v4 = vmul.f32 %v14539_v44, %v8220_v21  ;;  %v14543_v55 = vrot.slane %v14542_v62, 1  ;;  %v1338_v17 = vrot.slane %v1139_v19, 1  ;;  %v1339_v9 = vrot.slane %v1140_v3, 1 }
  0xd0   : > { %v7001_v8 = vshrl.u32 %v7966_v11, 16  ;;  %v7004_v43 = vshll.u32 %v7966_v11, 16  ;;  %v13797_v38 = vrot.slane %v9014_v41, 1  ;;  %v13796_v31 = vrot.slane %v9018_v34, 1 }
  0xd1   : > { %v3582_v7 = vadd.f32 %v14543_v55, %v2946_v59  ;;  %v9030_v29 = vmul.f32 %v8722_v63, %v8216_v20  ;;  %v1626_v47 = vadd.f32 %v1338_v17, %v8991_v25  ;;  %v9035_v33 = vmul.f32 %v8724_v46, %v8220_v21  ;;  %v14544_v55 = vld [vmem:[#allocation26_spill] sm:$0xff] }
  0xd2   : > { %v7003_v50 = vrot.slane %v7001_v8, 7  ;;  %v1342_v51 = vsel %vm1319_vm0, %v1338_v17, %v13797_v38  ;;  %v1344_v39 = vsel %vm1319_vm0, %v1339_v9, %v13796_v31  ;;  %v1627_v15 = vadd.f32 %v1339_v9, %v9002_v24  ;;  %v9106_v31 = vld [vmem:[#allocation2 + $0x198] sm:$0xff] }
  0xd3   : > { %v4410_v27 = vadd.f32 %v4038_v12, %v3582_v7  ;;  %v2083_v53 = vrot.slane %v1782_v56, 2  ;;  %v1629_v44 = vadd.f32 %v1342_v51, %v848_v26  ;;  %v1630_v11 = vadd.f32 %v1344_v39, %v849_v40  ;;  %v14548_v40 = vld [vmem:[#allocation10_spill] sm:$0xff]  ;;  %14552 = vst [vmem:[#allocation31_spill] sm:$0xff] %v9106_v31 }
  0xd4   : > { %v7006_v16 = vor.u32 %v7004_v43, %v7003_v50  ;;  %v2084_v59 = vrot.slane %v1783_v4, 2  ;;  %v13795_v19 = vrot.slane %v9030_v29, 2  ;;  %v13794_v3 = vrot.slane %v9035_v33, 2 }
  0xd5   : > { %v4903_v12 = vadd.f32 %v4759_v42, %v4410_v27  ;;  %v2455_v8 = vadd.f32 %v2083_v53, %v1626_v47  ;;  %v14545_v7 = vrot.slane %v14544_v55, 1  ;;  %v9054_v56 = vmul.f32 %v14532_v10, %v8224_v22  ;;  %v14549_v27 = vld [vmem:[#allocation11_spill] sm:$0xff] }
  0xd6   : > { %v7007_v62 = vsel %vm8551_vm4, %v6999_v45, %v7006_v16  ;;  %v9058_v42 = vmul.f32 %v14532_v10, %v8228_v23  ;;  %v2087_v26 = vsel %vm2052_vm1, %v2083_v53, %v13795_v19  ;;  %v2089_v0 = vsel %vm2052_vm1, %v2084_v59, %v13794_v3  ;;  %v14550_v16 = vld [vmem:[#allocation13_spill] sm:$0xff] }
  0xd7   : > { %v5539_v17 = vadd.f32 %v14545_v7, %v4903_v12  ;;  %14546 = vst [vmem:[#allocation18_spill] sm:$0xff] %v9054_v56  ;;  %7703 = vst [vmem:[%s8571_s28 + $0x24] sm:$0xff] %v7007_v62  ;;  %v2456_v45 = vadd.f32 %v2084_v59, %v1627_v15  ;;  %v2806_v4 = vmul.f32 %v14548_v40, %v8224_v22  ;;  %v14551_v12 = vld [vmem:[#allocation14_spill] sm:$0xff] }
  0xd8   : > { %14547 = vst [vmem:[#allocation22_spill] sm:$0xff] %v9058_v42  ;;  %v2458_v9 = vadd.f32 %v2087_v26, %v1629_v44  ;;  %v2459_v50 = vadd.f32 %v2089_v0, %v1630_v11  ;;  %v2807_v47 = vmul.f32 %v14549_v27, %v8228_v23  ;;  %v2947_v51 = vadd.f32 %v9054_v56, %v2455_v8 }
  0xd9   : > { %v6367_v43 = vadd.f32 %v5995_v30, %v5539_v17  ;;  %v2948_v39 = vadd.f32 %v9058_v42, %v2456_v45  ;;  %v3097_v53 = vmul.f32 %v14548_v40, %v14550_v16  ;;  %v3098_v62 = vmul.f32 %v14549_v27, %v14551_v12 }
  0xda   : > { %v2950_v59 = vadd.f32 %v2806_v4, %v2458_v9  ;;  %v2951_v55 = vadd.f32 %v2807_v47, %v2459_v50  ;;  %v9079_v30 = vmul.f32 %v8779_v14, %v14550_v16  ;;  %v9083_v44 = vmul.f32 %v8781_v58, %v14551_v12 }
  0xdb   : > { %v7967_v15 = vpack.c.bf16 %v6367_v43, %v6367_v43  ;;  %v3295_v11 = vrot.slane %v3097_v53, 1  ;;  %v3296_v8 = vrot.slane %v3098_v62, 1  ;;  %v3739_v7 = vmul.f32 %v14548_v40, %v8375_v1 }
  0xdc   : > { %v13798_v0 = vrot.slane %v9079_v30, 1  ;;  %v3740_v45 = vmul.f32 %v14549_v27, %v8379_v2  ;;  %v13800_v4 = vrot.slane %v9083_v44, 1  ;;  %v9093_v50 = vmul.f32 %v8779_v14, %v8375_v1 }
  0xdd   : > { %v7010_v17 = vshrl.u32 %v7967_v15, 16  ;;  %v7013_v26 = vshll.u32 %v7967_v15, 16  ;;  %v3583_v43 = vadd.f32 %v3295_v11, %v2947_v51  ;;  %v3584_v9 = vadd.f32 %v3296_v8, %v2948_v39 }
  0xde   : > { %v3299_v53 = vsel %vm1319_vm0, %v3295_v11, %v13798_v0  ;;  %v9100_v62 = vmul.f32 %v8781_v58, %v8379_v2  ;;  %v4039_v15 = vrot.slane %v3739_v7, 2  ;;  %v3301_v3 = vsel %vm1319_vm0, %v3296_v8, %v13800_v4  ;;  %v9114_v8 = vld [vmem:[#allocation2 + $0x1b0] sm:$0xff] }
  0xdf   : > { %v7012_v47 = vrot.slane %v7010_v17, 7  ;;  %v3586_v51 = vadd.f32 %v3299_v53, %v2950_v59  ;;  %v4040_v39 = vrot.slane %v3740_v45, 2  ;;  %v13801_v19 = vrot.slane %v9093_v50, 2 }
  0xe0   : > { %v3587_v38 = vadd.f32 %v3301_v3, %v2951_v55  ;;  %v13802_v11 = vrot.slane %v9100_v62, 2  ;;  %v4411_v0 = vadd.f32 %v4039_v15, %v3583_v43  ;;  %v9118_v59 = vmul.f32 %v14532_v10, %v8389_v35 }
  0xe1   : > { %v7015_v17 = vor.u32 %v7013_v26, %v7012_v47  ;;  %v4043_v7 = vsel %vm2052_vm1, %v4039_v15, %v13801_v19  ;;  %v4412_v12 = vadd.f32 %v4040_v39, %v3584_v9  ;;  %v9122_v26 = vmul.f32 %v14532_v10, %v8393_v36  ;;  %v9131_v9 = vld [vmem:[#allocation2 + $0x1b8] sm:$0xff] }
  0xe2   : > { %14554 = vst [vmem:[#allocation27_spill] sm:$0xff] %v9118_v59  ;;  %v14556_v3 = vrot.slane %v8964_v57, 4  ;;  %v4045_v45 = vsel %vm2052_vm1, %v4040_v39, %v13802_v11  ;;  %v4414_v43 = vadd.f32 %v4043_v7, %v3586_v51  ;;  %v4763_v47 = vmul.f32 %v8389_v35, %v9106_v31  ;;  %v14558_v51 = vld [vmem:[#allocation21_spill] sm:$0xff] }
  0xe3   : > { %14555 = vst [vmem:[#allocation9_spill] sm:$0xff] %v9122_v26  ;;  %v4415_v53 = vadd.f32 %v4045_v45, %v3587_v38  ;;  %v4764_v15 = vmul.f32 %v8393_v36, %v9109_v18  ;;  %v4904_v57 = vadd.f32 %v9118_v59, %v4411_v0  ;;  %v4905_v4 = vadd.f32 %v9122_v26, %v4412_v12  ;;  %v9155_v12 = vld [vmem:[%s13700_s1 + $0x18] ss:$0 sm:$0xff]  ;;  %v9162_v45 = vld [vmem:[%s13700_s1 + $0x20] ss:$0 sm:$0xff] }
  0xe4   : > { %v7016_v55 = vsel %vm8551_vm4, %v14556_v3, %v7015_v17  ;;  %v4907_v17 = vadd.f32 %v4763_v47, %v4414_v43  ;;  %v14557_v3 = vld [vmem:[#allocation20_spill] sm:$0xff]  ;;  %v5055_v39 = vmul.f32 %v14558_v51, %v9109_v18  ;;  %v9150_v38 = vmul.f32 %v14558_v51, %v9131_v9 }
  0xe5   : > { %7704 = vst [vmem:[%s8571_s28 + $0x2c] sm:$0xf] %v7016_v55  ;;  %v5054_v19 = vmul.f32 %v14557_v3, %v9106_v31  ;;  %v9146_v7 = vmul.f32 %v14557_v3, %v9114_v8  ;;  %v4908_v55 = vadd.f32 %v4764_v15, %v4415_v53  ;;  %v5696_v0 = vmul.f32 %v9155_v12, %v9106_v31 }
  0xe6   : > { %14559 = vst [vmem:[#allocation24_spill] sm:$0xff] %v9150_v38  ;;  %v5697_v43 = vmul.f32 %v9162_v45, %v9109_v18  ;;  %v5253_v53 = vrot.slane %v5055_v39, 1  ;;  %v9169_v11 = vmul.f32 %v9155_v12, %v9114_v8  ;;  %v13816_v26 = vrot.slane %v9150_v38, 1 }
  0xe7   : > { %v5252_v47 = vrot.slane %v5054_v19, 1  ;;  %v13815_v15 = vrot.slane %v9146_v7, 1  ;;  %v9174_v51 = vmul.f32 %v9162_v45, %v9131_v9  ;;  %v5996_v59 = vrot.slane %v5696_v0, 2 }
  0xe8   : > { %v5997_v3 = vrot.slane %v5697_v43, 2  ;;  %v5541_v39 = vadd.f32 %v5253_v53, %v4905_v4  ;;  %v13820_v42 = vrot.slane %v9169_v11, 2  ;;  %v5258_v56 = vsel %vm1319_vm0, %v5253_v53, %v13816_v26  ;;  %v14562_v53 = vld [vmem:[#allocation23_spill] sm:$0xff] }
  0xe9   : > { %v5256_v16 = vsel %vm1319_vm0, %v5252_v47, %v13815_v15  ;;  %v5540_v19 = vadd.f32 %v5252_v47, %v4904_v57  ;;  %v13819_v31 = vrot.slane %v9174_v51, 2  ;;  %v9186_v24 = vmul.f32 %v14532_v10, %v14502_v6 }
  0xea   : > { %v5543_v18 = vadd.f32 %v5256_v16, %v4907_v17  ;;  %v5544_v0 = vadd.f32 %v5258_v56, %v4908_v55  ;;  %v6000_v43 = vsel %vm2052_vm1, %v5996_v59, %v13820_v42  ;;  %v6369_v4 = vadd.f32 %v5997_v3, %v5541_v39  ;;  %v14561_v16 = vld [vmem:[#allocation19_spill] sm:$0xff] }
  0xeb   : > { %14560 = vst [vmem:[#allocation26_spill] sm:$0xff] %v9186_v24  ;;  %v6368_v57 = vadd.f32 %v5996_v59, %v5540_v19  ;;  %v6002_v47 = vsel %vm2052_vm1, %v5997_v3, %v13819_v31  ;;  %v850_v17 = vmul.f32 %v14561_v16, %v14502_v6  ;;  %v1141_v26 = vmul.f32 %v14561_v16, %v14562_v53  ;;  %v14565_v19 = vld [vmem:[#allocation32_spill] sm:$0xff] }
  0xec   : > { %v6371_v15 = vadd.f32 %v6000_v43, %v5543_v18  ;;  %v6372_v25 = vadd.f32 %v6002_v47, %v5544_v0  ;;  %v9200_v56 = vmul.f32 %v8853_v54, %v14562_v53  ;;  %v1784_v59 = vmul.f32 %v14561_v16, %v8499_v60  ;;  %v14566_v16 = vld [vmem:[#allocation25_spill] sm:$0xff] }
  0xed   : > { %v7968_v52 = vpack.c.bf16 %v6369_v4, %v6368_v57  ;;  %v1340_v55 = vrot.slane %v1141_v26, 1  ;;  %v9206_v3 = vmul.f32 %v8853_v54, %v8499_v60  ;;  %v9210_v18 = vmul.f32 %v14532_v10, %v8502_v61 }
  0xee   : > { %v2808_v39 = vmul.f32 %v14565_v19, %v8502_v61  ;;  %v7970_v0 = vpack.c.bf16 %v6372_v25, %v6371_v15  ;;  %v13827_v57 = vrot.slane %v9200_v56, 1  ;;  %v2085_v4 = vrot.slane %v1784_v59, 2 }
  0xef   : > { %14563 = vst [vmem:[#allocation19_spill] sm:$0xff] %v9206_v3  ;;  %14564 = vst [vmem:[#allocation34_spill] sm:$0xff] %v9210_v18  ;;  %v7018_v43 = vshrl.u32 %v7968_v52, 16  ;;  %v1628_v47 = vadd.f32 %v1340_v55, %v9186_v24  ;;  %v13828_v26 = vrot.slane %v9206_v3, 2  ;;  %v3099_v31 = vmul.f32 %v14565_v19, %v14566_v16  ;;  %v9226_v52 = vld [vmem:[#allocation2 + $0x1a8] sm:$0xff] }
  0xf0   : > { %v9221_v42 = vmul.f32 %v8881_v5, %v14566_v16  ;;  %v7023_v53 = vshrl.u32 %v7970_v0, 16  ;;  %v7026_v32 = vshll.u32 %v7970_v0, 16  ;;  %v1346_v25 = vsel %vm1319_vm0, %v1340_v55, %v13827_v57  ;;  %14568 = vst [vmem:[#allocation35_spill] sm:$0xff] %v9226_v52  ;;  %v9240_v55 = vld [vmem:[#allocation2 + $0x1c0] sm:$0xff]  ;;  %v9243_v57 = vld [vmem:[#allocation2 + $0x18] sm:$0xff] }
  0xf1   : > { %v7926_v10 = vrot.slane %v7018_v43, 11  ;;  %v1631_v15 = vadd.f32 %v1346_v25, %v850_v17  ;;  %v2091_v59 = vsel %vm2052_vm1, %v2085_v4, %v13828_v26  ;;  %v2457_v24 = vadd.f32 %v2085_v4, %v1628_v47  ;;  %14570 = vst [vmem:[#allocation37_spill] sm:$0xff] %v9243_v57  ;;  %v14572_v26 = vld [vmem:[#allocation29_spill] sm:$0xff] }
  0xf2   : > { %14567 = vst [vmem:[#allocation32_spill] sm:$0xff] %v9221_v42  ;;  %v3297_v27 = vrot.slane %v3099_v31, 1  ;;  %v9231_v38 = vrot.slane %v7023_v53, 7  ;;  %v13833_v16 = vrot.slane %v9221_v42, 1  ;;  %v3741_v0 = vmul.f32 %v14565_v19, %v8508_v49 }
  0xf3   : > { %v9238_v43 = vmul.f32 %v8881_v5, %v8508_v49  ;;  %v2460_v17 = vadd.f32 %v2091_v59, %v1631_v15  ;;  %v2949_v25 = vadd.f32 %v9210_v18, %v2457_v24  ;;  %v9247_v31 = vmul.f32 %v9243_v57, %v14525_v37 }
  0xf4   : > { %v4765_v53 = vmul.f32 %v14525_v37, %v9226_v52  ;;  %v7028_v19 = vor.u32 %v7026_v32, %v9231_v38  ;;  %v3303_v4 = vsel %vm1319_vm0, %v3297_v27, %v13833_v16  ;;  %v4041_v47 = vrot.slane %v3741_v0, 2  ;;  %v9270_v0 = vld [vmem:[%s13700_s1 + $0x28] ss:$0 sm:$0xff] }
  0xf5   : > { %14569 = vst [vmem:[#allocation36_spill] sm:$0xff] %v9238_v43  ;;  %14571 = vst [vmem:[#allocation38_spill] sm:$0xff] %v9247_v31  ;;  %v13834_v15 = vrot.slane %v9238_v43, 2  ;;  %v2952_v24 = vadd.f32 %v2808_v39, %v2460_v17  ;;  %v3585_v59 = vadd.f32 %v3297_v27, %v2949_v25  ;;  %v5056_v18 = vmul.f32 %v14572_v26, %v9226_v52  ;;  %v656_v17 = vld [vmem:[#allocation2 + $0x108] sm:$0x1] }
  0xf6   : > { %v9260_v57 = vmul.f32 %v14572_v26, %v9240_v55  ;;  %v7029_v3 = vsel %vm8551_vm4, %v7926_v10, %v7028_v19  ;;  %v5698_v27 = vmul.f32 %v9270_v0, %v9226_v52  ;;  %v9276_v39 = vmul.f32 %v9270_v0, %v9240_v55 }
  0xf7   : > { %v4047_v32 = vsel %vm2052_vm1, %v4041_v47, %v13834_v15  ;;  %7705 = vst [vmem:[%s8571_s28 + $0x30] sm:$0xff] %v7029_v3  ;;  %v3588_v25 = vadd.f32 %v3303_v4, %v2952_v24  ;;  %v4413_v10 = vadd.f32 %v4041_v47, %v3585_v59  ;;  %v5254_v19 = vrot.slane %v5056_v18, 1  ;;  %v657_v15 = vld [vmem:[#allocation2 + $0x110] sm:$0x1]  ;;  %v2614_v4 = vld [vmem:[#allocation2 + $0x168] sm:$0x1] }
  0xf8   : > { %14573 = vst [vmem:[#allocation39_spill] sm:$0xff] %v9260_v57  ;;  %v13844_v16 = vrot.slane %v9260_v57, 1  ;;  %v5998_v26 = vrot.slane %v5698_v27, 2  ;;  %v13846_v42 = vrot.slane %v9276_v39, 2  ;;  %v851_v43 = vmul.f32 %v8722_v63, %v8197_v13  ;;  %v2615_v47 = vld [vmem:[#allocation2 + $0x170] sm:$0x1] }
  0xf9   : > { %v852_v52 = vmul.f32 %v8724_v46, %v14480_v28  ;;  %v4416_v48 = vadd.f32 %v4047_v32, %v3588_v25  ;;  %v4906_v40 = vadd.f32 %v9247_v31, %v4413_v10  ;;  %v1788_v18 = vmul.f32 %v8216_v20, %v656_v17 }
  0xfa   : > { %v5260_v3 = vsel %vm1319_vm0, %v5254_v19, %v13844_v16  ;;  %v6004_v24 = vsel %vm2052_vm1, %v5998_v26, %v13846_v42  ;;  %v14574_v63 = vrot.slane %v9014_v41, 1  ;;  %v14575_v46 = vrot.slane %v9018_v34, 1 }
  0xfb   : > { %v1789_v27 = vmul.f32 %v8220_v21, %v657_v15  ;;  %v4909_v25 = vadd.f32 %v4765_v53, %v4416_v48  ;;  %v5542_v10 = vadd.f32 %v5254_v19, %v4906_v40  ;;  %v2092_v31 = vrot.slane %v1788_v18, 2  ;;  %v4571_v48 = vld [vmem:[#allocation2 + $0x1c8] sm:$0x1] }
  0xfc   : > { %v1632_v59 = vadd.f32 %v14574_v63, %v851_v43  ;;  %v1633_v32 = vadd.f32 %v14575_v46, %v852_v52  ;;  %v2809_v17 = vmul.f32 %v8779_v14, %v8224_v22  ;;  %v2810_v57 = vmul.f32 %v8781_v58, %v8228_v23 }
  0xfd   : > { %v2094_v16 = vrot.slane %v1789_v27, 2  ;;  %v3745_v42 = vmul.f32 %v8375_v1, %v2614_v4  ;;  %v3746_v41 = vmul.f32 %v8379_v2, %v2615_v47  ;;  %v5545_v43 = vadd.f32 %v5260_v3, %v4909_v25  ;;  %v4572_v4 = vld [vmem:[#allocation2 + $0x1d0] sm:$0x1] }
  0xfe   : > { %v6370_v63 = vadd.f32 %v5998_v26, %v5542_v10  ;;  %v14576_v34 = vrot.slane %v9030_v29, 2  ;;  %v4766_v40 = vmul.f32 %v8389_v35, %v9114_v8  ;;  %v14577_v53 = vrot.slane %v9035_v33, 2 }
  0xff   : > { %v4048_v18 = vrot.slane %v3745_v42, 2  ;;  %v4050_v46 = vrot.slane %v3746_v41, 2  ;;  %v6373_v27 = vadd.f32 %v6004_v24, %v5545_v43  ;;  %v4767_v29 = vmul.f32 %v8393_v36, %v9131_v9 }
 0x100   : > { %v2093_v52 = vsel %vm2052_vm1, %v14576_v34, %v2092_v31  ;;  %v2095_v15 = vsel %vm2052_vm1, %v14577_v53, %v2094_v16  ;;  %v7969_v47 = vpack.c.bf16 %v6370_v63, %v6370_v63  ;;  %v14578_v31 = vrot.slane %v9093_v50, 2  ;;  %v658_v50 = vld [vmem:[#allocation2 + $0x118] sm:$0x1] }
 0x101   : > { %v2461_v19 = vadd.f32 %v2093_v52, %v1632_v59  ;;  %v2462_v3 = vadd.f32 %v2095_v15, %v1633_v32  ;;  %v14579_v10 = vrot.slane %v9100_v62, 2  ;;  %v5702_v16 = vmul.f32 %v9155_v12, %v4571_v48 }
 0x102   : > { %v4049_v25 = vsel %vm2052_vm1, %v14578_v31, %v4048_v18  ;;  %v7971_v42 = vpack.c.bf16 %v6373_v27, %v6373_v27  ;;  %v7031_v59 = vshrl.u32 %v7969_v47, 16  ;;  %v5703_v24 = vmul.f32 %v9162_v45, %v4572_v4  ;;  %v4573_v47 = vld [vmem:[#allocation2 + $0x1d8] sm:$0x1] }
 0x103   : > { %v2953_v26 = vadd.f32 %v2809_v17, %v2461_v19  ;;  %v4051_v33 = vsel %vm2052_vm1, %v14579_v10, %v4050_v46  ;;  %v2954_v41 = vadd.f32 %v2810_v57, %v2462_v3  ;;  %v14580_v32 = vrot.slane %v9079_v30, 1  ;;  %v2616_v19 = vld [vmem:[#allocation2 + $0x178] sm:$0x1] }
 0x104   : > { %v6005_v63 = vrot.slane %v5702_v16, 2  ;;  %v7043_v17 = vrot.slane %v9231_v38, 4  ;;  %v853_v34 = vmul.f32 %v8853_v54, %v14502_v6  ;;  %v7927_v62 = vrot.slane %v7031_v59, 11 }
 0x105   : > { %v3589_v43 = vadd.f32 %v14580_v32, %v2953_v26  ;;  %v7036_v52 = vshrl.u32 %v7971_v42, 16  ;;  %v7039_v53 = vshll.u32 %v7971_v42, 16  ;;  %v14581_v48 = vrot.slane %v9083_v44, 1 }
 0x106   : > { %v14582_v18 = vrot.slane %v9169_v11, 2  ;;  %v6007_v46 = vrot.slane %v5703_v24, 2  ;;  %v14583_v4 = vrot.slane %v9200_v56, 1  ;;  %v1790_v26 = vmul.f32 %v8499_v60, %v658_v50  ;;  %v14586_v24 = vld [vmem:[#allocation10_spill] sm:$0xff]  ;;  %v14588_v50 = vld [vmem:[#allocation24_spill] sm:$0xff] }
 0x107   : > { %v3590_v15 = vadd.f32 %v14581_v48, %v2954_v41  ;;  %v4417_v57 = vadd.f32 %v4049_v25, %v3589_v43  ;;  %v9334_v3 = vrot.slane %v7036_v52, 7  ;;  %v2811_v44 = vmul.f32 %v8881_v5, %v8502_v61 }
 0x108   : > { %v6006_v30 = vsel %vm2052_vm1, %v14582_v18, %v6005_v63  ;;  %v1634_v27 = vadd.f32 %v14583_v4, %v853_v34  ;;  %v14584_v25 = vrot.slane %v9174_v51, 2  ;;  %v3747_v10 = vmul.f32 %v8508_v49, %v2616_v19  ;;  %v14594_v4 = vld [vmem:[#allocation11_spill] sm:$0xff] }
 0x109   : > { %v4418_v54 = vadd.f32 %v4051_v33, %v3590_v15  ;;  %v4910_v31 = vadd.f32 %v4766_v40, %v4417_v57  ;;  %v4768_v56 = vmul.f32 %v14525_v37, %v9240_v55  ;;  %v7041_v16 = vor.u32 %v7039_v53, %v9334_v3  ;;  %v14590_v53 = vld [vmem:[#allocation19_spill] sm:$0xff]  ;;  %v14592_v57 = vld [vmem:[#allocation36_spill] sm:$0xff] }
 0x10a   : > { %v6008_v11 = vsel %vm2052_vm1, %v14584_v25, %v6007_v46  ;;  %v2096_v33 = vrot.slane %v1790_v26, 2  ;;  %v5704_v59 = vmul.f32 %v9270_v0, %v4573_v47  ;;  %v14585_v41 = vrot.slane %v9146_v7, 1 }
 0x10b   : > { %v4911_v42 = vadd.f32 %v4767_v29, %v4418_v54  ;;  %v4052_v40 = vrot.slane %v3747_v10, 2  ;;  %v7052_v51 = vrot.slane %v9334_v3, 4  ;;  %v857_v32 = vmul.f32 %v14586_v24, %v8197_v13  ;;  %v14597_v10 = vld [vmem:[#allocation6_spill] sm:$0xff] }
 0x10c   : > { %v5546_v5 = vadd.f32 %v14585_v41, %v4910_v31  ;;  %v7042_v63 = vsel %vm8551_vm4, %v7927_v62, %v7041_v16  ;;  %v14589_v34 = vrot.slane %v14588_v50, 1  ;;  %v14591_v29 = vrot.slane %v14590_v53, 2  ;;  %v14596_v31 = vld [vmem:[#allocation5_spill] sm:$0xff] }
 0x10d   : > { %v6009_v15 = vrot.slane %v5704_v59, 2  ;;  %7706 = vst [vmem:[%s8571_s28 + $0x38] sm:$0xf] %v7042_v63  ;;  %v14593_v18 = vrot.slane %v14592_v57, 2  ;;  %v858_v47 = vmul.f32 %v14594_v4, %v14480_v28  ;;  %v14595_v62 = vrot.slane %v9276_v39, 2 }
 0x10e   : > { %v5547_v52 = vadd.f32 %v14589_v34, %v4911_v42  ;;  %v2097_v48 = vsel %vm2052_vm1, %v14591_v29, %v2096_v33  ;;  %v6374_v7 = vadd.f32 %v6006_v30, %v5546_v5  ;;  %v1145_v25 = vmul.f32 %v14586_v24, %v14596_v31  ;;  %v14598_v5 = vld [vmem:[#allocation32_spill] sm:$0xff] }
 0x10f   : > { %v2463_v19 = vadd.f32 %v2097_v48, %v1634_v27  ;;  %v4053_v46 = vsel %vm2052_vm1, %v14593_v18, %v4052_v40  ;;  %v6010_v26 = vsel %vm2052_vm1, %v14595_v62, %v6009_v15  ;;  %v1146_v16 = vmul.f32 %v14594_v4, %v14597_v10  ;;  %v14601_v48 = vld [vmem:[#allocation12_spill] sm:$0xff] }
 0x110   : > { %v6375_v54 = vadd.f32 %v6008_v11, %v5547_v52  ;;  %v9374_v27 = vmul.f32 %v8779_v14, %v14596_v31  ;;  %v9378_v42 = vmul.f32 %v8781_v58, %v14597_v10  ;;  %v1791_v39 = vmul.f32 %v14586_v24, %v8216_v20  ;;  %v14600_v24 = vld [vmem:[#allocation28_spill] sm:$0xff]  ;;  %v14621_v31 = vld [vmem:[#allocation25_spill] sm:$0xff] }
 0x111   : > { %v2955_v30 = vadd.f32 %v2811_v44, %v2463_v19  ;;  %v1347_v33 = vrot.slane %v1145_v25, 1  ;;  %v1348_v59 = vrot.slane %v1146_v16, 1  ;;  %v1792_v41 = vmul.f32 %v14594_v4, %v8220_v21 }
 0x112   : > { %v7972_v11 = vpack.c.bf16 %v6375_v54, %v6374_v7  ;;  %v14599_v40 = vrot.slane %v14598_v5, 1  ;;  %v13852_v63 = vrot.slane %v9374_v27, 1  ;;  %v13851_v50 = vrot.slane %v9378_v42, 1  ;;  %v14602_v5 = vld [vmem:[#allocation31_spill] sm:$0xff] }
 0x113   : > { %v9390_v34 = vmul.f32 %v8779_v14, %v8216_v20  ;;  %v1635_v29 = vadd.f32 %v1347_v33, %v14600_v24  ;;  %v1636_v15 = vadd.f32 %v1348_v59, %v14601_v48  ;;  %v9402_v18 = vmul.f32 %v8781_v58, %v8220_v21 }
 0x114   : > { %v3591_v44 = vadd.f32 %v14599_v40, %v2955_v30  ;;  %v7045_v52 = vshrl.u32 %v7972_v11, 16  ;;  %v7048_v53 = vshll.u32 %v7972_v11, 16  ;;  %v1351_v19 = vsel %vm1319_vm0, %v1347_v33, %v13852_v63  ;;  %v14603_v40 = vld [vmem:[#allocation33_spill] sm:$0xff] }
 0x115   : > { %v1353_v57 = vsel %vm1319_vm0, %v1348_v59, %v13851_v50  ;;  %v1638_v4 = vadd.f32 %v1351_v19, %v857_v32  ;;  %v2098_v62 = vrot.slane %v1791_v39, 2  ;;  %v2099_v16 = vrot.slane %v1792_v41, 2  ;;  %v14607_v19 = vld [vmem:[#allocation22_spill] sm:$0xff] }
 0x116   : > { %v4419_v7 = vadd.f32 %v4053_v46, %v3591_v44  ;;  %v7047_v14 = vrot.slane %v7045_v52, 7  ;;  %v1639_v54 = vadd.f32 %v1353_v57, %v858_v47  ;;  %v13850_v46 = vrot.slane %v9390_v34, 2  ;;  %v14604_v44 = vld [vmem:[#allocation39_spill] sm:$0xff] }
 0x117   : > { %v13847_v30 = vrot.slane %v9402_v18, 2  ;;  %v2464_v33 = vadd.f32 %v2098_v62, %v1635_v29  ;;  %v2815_v59 = vmul.f32 %v14602_v5, %v8224_v22  ;;  %v2816_v58 = vmul.f32 %v14603_v40, %v8228_v23  ;;  %v14606_v29 = vld [vmem:[#allocation18_spill] sm:$0xff] }
 0x118   : > { %v4912_v25 = vadd.f32 %v4768_v56, %v4419_v7  ;;  %v7050_v11 = vor.u32 %v7048_v53, %v7047_v14  ;;  %v14605_v52 = vrot.slane %v14604_v44, 1  ;;  %v2102_v56 = vsel %vm2052_vm1, %v2098_v62, %v13850_v46  ;;  %v14608_v14 = vld [vmem:[#allocation13_spill] sm:$0xff] }
 0x119   : > { %v2104_v47 = vsel %vm2052_vm1, %v2099_v16, %v13847_v30  ;;  %v2465_v39 = vadd.f32 %v2099_v16, %v1636_v15  ;;  %v2467_v53 = vadd.f32 %v2102_v56, %v1638_v4  ;;  %v2956_v48 = vadd.f32 %v14606_v29, %v2464_v33  ;;  %v9465_v46 = vld [vmem:[#allocation2 + $0x210] sm:$0xff] }
 0x11a   : > { %v5548_v32 = vadd.f32 %v14605_v52, %v4912_v25  ;;  %v7051_v41 = vsel %vm8551_vm4, %v7043_v17, %v7050_v11  ;;  %v2468_v24 = vadd.f32 %v2104_v47, %v1639_v54  ;;  %v3103_v62 = vmul.f32 %v14602_v5, %v14608_v14  ;;  %v14609_v25 = vld [vmem:[#allocation14_spill] sm:$0xff] }
 0x11b   : > { %7707 = vst [vmem:[%s8571_s28 + $0x3c] sm:$0xff] %v7051_v41  ;;  %v2957_v57 = vadd.f32 %v14607_v19, %v2465_v39  ;;  %v3104_v44 = vmul.f32 %v14603_v40, %v14609_v25  ;;  %v2959_v15 = vadd.f32 %v2815_v59, %v2467_v53  ;;  %v9431_v38 = vmul.f32 %v9114_v8, %v14608_v14  ;;  %v9447_v41 = vld [vmem:[#allocation2 + $0x1f8] sm:$0xff]  ;;  %v9459_v19 = vld [vmem:[#allocation2 + $0x200] sm:$0xff] }
 0x11c   : > { %v6376_v7 = vadd.f32 %v6010_v26, %v5548_v32  ;;  %v2960_v16 = vadd.f32 %v2816_v58, %v2468_v24  ;;  %v9435_v17 = vmul.f32 %v9131_v9, %v14609_v25  ;;  %v3304_v26 = vrot.slane %v3103_v62, 1  ;;  %14610 = vst [vmem:[#allocation10_spill] sm:$0xff] %v9447_v41  ;;  %14611 = vst [vmem:[#allocation24_spill] sm:$0xff] %v9459_v19  ;;  %v14615_v25 = vld [vmem:[#allocation9_spill] sm:$0xff] }
 0x11d   : > { %v3305_v54 = vrot.slane %v3104_v44, 1  ;;  %v3748_v11 = vmul.f32 %v14602_v5, %v8375_v1  ;;  %v13849_v33 = vrot.slane %v9431_v38, 1  ;;  %v3749_v59 = vmul.f32 %v14603_v40, %v8379_v2 }
 0x11e   : > { %v7973_v4 = vpack.c.bf16 %v6376_v7, %v6376_v7  ;;  %v13848_v52 = vrot.slane %v9435_v17, 1  ;;  %v9445_v58 = vmul.f32 %v9114_v8, %v8375_v1  ;;  %v3592_v47 = vadd.f32 %v3304_v26, %v2956_v48 }
 0x11f   : > { %v3593_v39 = vadd.f32 %v3305_v54, %v2957_v57  ;;  %v3308_v53 = vsel %vm1319_vm0, %v3304_v26, %v13849_v33  ;;  %v9457_v29 = vmul.f32 %v9131_v9, %v8379_v2  ;;  %v4054_v7 = vrot.slane %v3748_v11, 2  ;;  %v9467_v11 = vld [vmem:[#allocation2 + $0x218] sm:$0xff] }
 0x120   : > { %v7054_v32 = vshrl.u32 %v7973_v4, 16  ;;  %v7057_v56 = vshll.u32 %v7973_v4, 16  ;;  %v3310_v24 = vsel %vm1319_vm0, %v3305_v54, %v13848_v52  ;;  %v3595_v48 = vadd.f32 %v3308_v53, %v2959_v15  ;;  %v14614_v53 = vld [vmem:[#allocation21_spill] sm:$0xff] }
 0x121   : > { %v3596_v57 = vadd.f32 %v3310_v24, %v2960_v16  ;;  %v4055_v44 = vrot.slane %v3749_v59, 2  ;;  %v13856_v4 = vrot.slane %v9445_v58, 2  ;;  %v13855_v30 = vrot.slane %v9457_v29, 2  ;;  %v14612_v16 = vld [vmem:[#allocation20_spill] sm:$0xff] }
 0x122   : > { %v7056_v62 = vrot.slane %v7054_v32, 7  ;;  %v4420_v26 = vadd.f32 %v4054_v7, %v3592_v47  ;;  %v4772_v54 = vmul.f32 %v8389_v35, %v9447_v41  ;;  %v4773_v15 = vmul.f32 %v8393_v36, %v9459_v19 }
 0x123   : > { %v4421_v33 = vadd.f32 %v4055_v44, %v3593_v39  ;;  %v5060_v59 = vmul.f32 %v14612_v16, %v9447_v41  ;;  %v4058_v32 = vsel %vm2052_vm1, %v4054_v7, %v13856_v4  ;;  %v4060_v47 = vsel %vm2052_vm1, %v4055_v44, %v13855_v30 }
 0x124   : > { %v7059_v52 = vor.u32 %v7057_v56, %v7056_v62  ;;  %v14613_v56 = vld [vmem:[#allocation27_spill] sm:$0xff]  ;;  %v5061_v24 = vmul.f32 %v14614_v53, %v9459_v19  ;;  %v4423_v50 = vadd.f32 %v4058_v32, %v3595_v48  ;;  %v4424_v63 = vadd.f32 %v4060_v47, %v3596_v57 }
 0x125   : > { %v4913_v39 = vadd.f32 %v14613_v56, %v4420_v26  ;;  %v4914_v14 = vadd.f32 %v14615_v25, %v4421_v33  ;;  %v9490_v7 = vmul.f32 %v14612_v16, %v9465_v46  ;;  %v9494_v44 = vmul.f32 %v14614_v53, %v9467_v11  ;;  %v664_v25 = vld [vmem:[#allocation2 + $0x148] sm:$0xff] }
 0x126   : > { %v7060_v62 = vsel %vm8551_vm4, %v7052_v51, %v7059_v52  ;;  %v5261_v26 = vrot.slane %v5060_v59, 1  ;;  %v5262_v56 = vrot.slane %v5061_v24, 1  ;;  %v4916_v30 = vadd.f32 %v4772_v54, %v4423_v50  ;;  %v14617_v24 = vld [vmem:[#allocation23_spill] sm:$0xff] }
 0x127   : > { %7708 = vst [vmem:[%s8571_s28 + $0x44] sm:$0xf] %v7060_v62  ;;  %14616 = vst [vmem:[#allocation19_spill] sm:$0xff] %v9494_v44  ;;  %v4917_v3 = vadd.f32 %v4773_v15, %v4424_v63  ;;  %v5705_v51 = vmul.f32 %v9155_v12, %v9447_v41  ;;  %v5706_v52 = vmul.f32 %v9162_v45, %v9459_v19  ;;  %v13864_v33 = vrot.slane %v9490_v7, 1  ;;  %v9510_v15 = vld [vmem:[#allocation2 + $0x160] sm:$0xff] }
 0x128   : > { %v13863_v48 = vrot.slane %v9494_v44, 1  ;;  %v5549_v57 = vadd.f32 %v5261_v26, %v4913_v39  ;;  %v5550_v32 = vadd.f32 %v5262_v56, %v4914_v14  ;;  %v9504_v47 = vmul.f32 %v9155_v12, %v9465_v46 }
 0x129   : > { %v9508_v63 = vmul.f32 %v9162_v45, %v9467_v11  ;;  %v6011_v50 = vrot.slane %v5705_v51, 2  ;;  %v6012_v54 = vrot.slane %v5706_v52, 2  ;;  %v5265_v59 = vsel %vm1319_vm0, %v5261_v26, %v13864_v33 }
 0x12a   : > { %v5267_v14 = vsel %vm1319_vm0, %v5262_v56, %v13863_v48  ;;  %v859_v39 = vmul.f32 %v14502_v6, %v664_v25  ;;  %v1147_v62 = vmul.f32 %v14617_v24, %v664_v25  ;;  %v5552_v4 = vadd.f32 %v5265_v59, %v4916_v30 }
 0x12b   : > { %v5553_v53 = vadd.f32 %v5267_v14, %v4917_v3  ;;  %v13866_v16 = vrot.slane %v9504_v47, 2  ;;  %v13868_v51 = vrot.slane %v9508_v63, 2  ;;  %v6377_v52 = vadd.f32 %v6011_v50, %v5549_v57 }
 0x12c   : > { %v6378_v19 = vadd.f32 %v6012_v54, %v5550_v32  ;;  %v9524_v41 = vmul.f32 %v14617_v24, %v9510_v15  ;;  %v1349_v26 = vrot.slane %v1147_v62, 1  ;;  %v1793_v3 = vmul.f32 %v8499_v60, %v664_v25  ;;  %v14619_v62 = vld [vmem:[#allocation26_spill] sm:$0xff] }
 0x12d   : > { %v6015_v56 = vsel %vm2052_vm1, %v6011_v50, %v13866_v16  ;;  %v6017_v30 = vsel %vm2052_vm1, %v6012_v54, %v13868_v51  ;;  %v9535_v59 = vmul.f32 %v8499_v60, %v9510_v15  ;;  %v14620_v16 = vld [vmem:[#allocation35_spill] sm:$0xff] }
 0x12e   : > { %v6380_v57 = vadd.f32 %v6015_v56, %v5552_v4  ;;  %v6381_v32 = vadd.f32 %v6017_v30, %v5553_v53  ;;  %v7974_v14 = vpack.c.bf16 %v6378_v19, %v6377_v52  ;;  %v13870_v48 = vrot.slane %v9524_v41, 1  ;;  %v9554_v30 = vld [vmem:[#allocation2 + $0x208] sm:$0xff] }
 0x12f   : > { %14618 = vst [vmem:[#allocation36_spill] sm:$0xff] %v9535_v59  ;;  %v1637_v33 = vadd.f32 %v1349_v26, %v14619_v62  ;;  %v2100_v24 = vrot.slane %v1793_v3, 2  ;;  %v13871_v50 = vrot.slane %v9535_v59, 2  ;;  %v2817_v10 = vmul.f32 %v14620_v16, %v8502_v61  ;;  %14623 = vst [vmem:[#allocation32_spill] sm:$0xff] %v9554_v30  ;;  %v14624_v62 = vld [vmem:[#allocation34_spill] sm:$0xff] }
 0x130   : > { %v7976_v54 = vpack.c.bf16 %v6381_v32, %v6380_v57  ;;  %v7062_v51 = vshrl.u32 %v7974_v14, 16  ;;  %v1355_v25 = vsel %vm1319_vm0, %v1349_v26, %v13870_v48  ;;  %v3105_v4 = vmul.f32 %v14620_v16, %v14621_v31 }
 0x131   : > { %v1640_v19 = vadd.f32 %v1355_v25, %v859_v39  ;;  %v2106_v53 = vsel %vm2052_vm1, %v2100_v24, %v13871_v50  ;;  %v2466_v52 = vadd.f32 %v2100_v24, %v1637_v33  ;;  %v9552_v56 = vmul.f32 %v9240_v55, %v14621_v31  ;;  %v9560_v50 = vld [vmem:[#allocation2 + $0x220] sm:$0xff] }
 0x132   : > { %v7928_v3 = vrot.slane %v7062_v51, 11  ;;  %v7067_v57 = vshrl.u32 %v7976_v54, 16  ;;  %v7070_v32 = vshll.u32 %v7976_v54, 16  ;;  %v3306_v14 = vrot.slane %v3105_v4, 1  ;;  %v14626_v54 = vld [vmem:[#allocation29_spill] sm:$0xff] }
 0x133   : > { %14622 = vst [vmem:[#allocation11_spill] sm:$0xff] %v9552_v56  ;;  %v2469_v26 = vadd.f32 %v2106_v53, %v1640_v19  ;;  %v2958_v48 = vadd.f32 %v14624_v62, %v2466_v52  ;;  %v13876_v39 = vrot.slane %v9552_v56, 1  ;;  %v3750_v25 = vmul.f32 %v14620_v16, %v8508_v49 }
 0x134   : > { %v9562_v33 = vrot.slane %v7067_v57, 7  ;;  %v9566_v24 = vmul.f32 %v9240_v55, %v8508_v49  ;;  %v4774_v51 = vmul.f32 %v14525_v37, %v9554_v30  ;;  %v5062_v4 = vmul.f32 %v14626_v54, %v9554_v30 }
 0x135   : > { %v2961_v19 = vadd.f32 %v2817_v10, %v2469_v26  ;;  %v3312_v53 = vsel %vm1319_vm0, %v3306_v14, %v13876_v39  ;;  %v3594_v16 = vadd.f32 %v3306_v14, %v2958_v48  ;;  %v4056_v52 = vrot.slane %v3750_v25, 2  ;;  %v668_v48 = vld [vmem:[#allocation2 + $0x168] sm:$0x1]  ;;  %v14628_v39 = vld [vmem:[#allocation38_spill] sm:$0xff] }
 0x136   : > { %14625 = vst [vmem:[#allocation28_spill] sm:$0xff] %v9566_v24  ;;  %v7072_v57 = vor.u32 %v7070_v32, %v9562_v33  ;;  %v13881_v62 = vrot.slane %v9566_v24, 2  ;;  %v9579_v31 = vmul.f32 %v14626_v54, %v9560_v50  ;;  %v5263_v40 = vrot.slane %v5062_v4, 1  ;;  %v669_v4 = vld [vmem:[#allocation2 + $0x170] sm:$0x1] }
 0x137   : > { %v3597_v5 = vadd.f32 %v3312_v53, %v2961_v19  ;;  %v4422_v44 = vadd.f32 %v4056_v52, %v3594_v16  ;;  %v5707_v10 = vmul.f32 %v9270_v0, %v9554_v30  ;;  %v9585_v26 = vmul.f32 %v9270_v0, %v9560_v50  ;;  %v8067_v19 = vld [vmem:[#allocation2 + $0x150] sm:$0xff] }
 0x138   : > { %14627 = vst [vmem:[#allocation12_spill] sm:$0xff] %v9579_v31  ;;  %v7073_v32 = vsel %vm8551_vm4, %v7928_v3, %v7072_v57  ;;  %v4062_v14 = vsel %vm2052_vm1, %v4056_v52, %v13881_v62  ;;  %v13884_v25 = vrot.slane %v9579_v31, 1  ;;  %v860_v53 = vmul.f32 %v8067_v19, %v8197_v13  ;;  %v8068_v57 = vld [vmem:[#allocation2 + $0x158] sm:$0xff]  ;;  %v2626_v19 = vld [vmem:[#allocation2 + $0x1c8] sm:$0x1] }
 0x139   : > { %7709 = vst [vmem:[%s8571_s28 + $0x48] sm:$0xff] %v7073_v32  ;;  %v4425_v16 = vadd.f32 %v4062_v14, %v3597_v5  ;;  %v4915_v54 = vadd.f32 %v14628_v39, %v4422_v44  ;;  %v6013_v30 = vrot.slane %v5707_v10, 2  ;;  %v13886_v56 = vrot.slane %v9585_v26, 2  ;;  %v2627_v10 = vld [vmem:[#allocation2 + $0x1d0] sm:$0x1] }
 0x13a   : > { %v5269_v3 = vsel %vm1319_vm0, %v5263_v40, %v13884_v25  ;;  %v861_v52 = vmul.f32 %v8068_v57, %v14480_v28  ;;  %v14629_v62 = vrot.slane %v9374_v27, 1  ;;  %v1797_v59 = vmul.f32 %v8216_v20, %v668_v48  ;;  %v4584_v57 = vld [vmem:[#allocation2 + $0x230] sm:$0x1] }
 0x13b   : > { %v4918_v32 = vadd.f32 %v4774_v51, %v4425_v16  ;;  %v5551_v5 = vadd.f32 %v5263_v40, %v4915_v54  ;;  %v6019_v44 = vsel %vm2052_vm1, %v6013_v30, %v13886_v56  ;;  %v1798_v39 = vmul.f32 %v8220_v21, %v669_v4 }
 0x13c   : > { %v1641_v24 = vadd.f32 %v14629_v62, %v860_v53  ;;  %v14630_v14 = vrot.slane %v9378_v42, 1  ;;  %v2107_v31 = vrot.slane %v1797_v59, 2  ;;  %v2818_v27 = vmul.f32 %v9114_v8, %v8224_v22  ;;  %v4583_v53 = vld [vmem:[#allocation2 + $0x228] sm:$0x1] }
 0x13d   : > { %v2819_v62 = vmul.f32 %v9131_v9, %v8228_v23  ;;  %v5554_v48 = vadd.f32 %v5269_v3, %v4918_v32  ;;  %v6379_v51 = vadd.f32 %v6013_v30, %v5551_v5  ;;  %v2109_v40 = vrot.slane %v1798_v39, 2 }
 0x13e   : > { %v1642_v25 = vadd.f32 %v14630_v14, %v861_v52  ;;  %v3754_v54 = vmul.f32 %v8375_v1, %v2626_v19  ;;  %v14631_v16 = vrot.slane %v9390_v34, 2  ;;  %v3755_v42 = vmul.f32 %v8379_v2, %v2627_v10 }
 0x13f   : > { %v4775_v59 = vmul.f32 %v8389_v35, %v9465_v46  ;;  %v4776_v52 = vmul.f32 %v8393_v36, %v9467_v11  ;;  %v6382_v14 = vadd.f32 %v6019_v44, %v5554_v48  ;;  %v7975_v3 = vpack.c.bf16 %v6379_v51, %v6379_v51 }
 0x140   : > { %v2108_v4 = vsel %vm2052_vm1, %v14631_v16, %v2107_v31  ;;  %v14632_v30 = vrot.slane %v9402_v18, 2  ;;  %v4063_v34 = vrot.slane %v3754_v54, 2  ;;  %v4065_v39 = vrot.slane %v3755_v42, 2 }
 0x141   : > { %v2470_v32 = vadd.f32 %v2108_v4, %v1641_v24  ;;  %v5711_v31 = vmul.f32 %v9155_v12, %v4583_v53  ;;  %v7977_v10 = vpack.c.bf16 %v6382_v14, %v6382_v14  ;;  %v7075_v16 = vshrl.u32 %v7975_v3, 16 }
 0x142   : > { %v2110_v19 = vsel %vm2052_vm1, %v14632_v30, %v2109_v40  ;;  %v5712_v35 = vmul.f32 %v9162_v45, %v4584_v57  ;;  %v14633_v36 = vrot.slane %v9445_v58, 2  ;;  %v14634_v18 = vrot.slane %v9457_v29, 2 }
 0x143   : > { %v2471_v5 = vadd.f32 %v2110_v19, %v1642_v25  ;;  %v2962_v56 = vadd.f32 %v2818_v27, %v2470_v32  ;;  %v6020_v24 = vrot.slane %v5711_v31, 2  ;;  %v670_v25 = vld [vmem:[#allocation2 + $0x178] sm:$0x1]  ;;  %v7929_v51 = vrot.slane %v7075_v16, 11 }
 0x144   : > { %v4064_v44 = vsel %vm2052_vm1, %v14633_v36, %v4063_v34  ;;  %v4066_v48 = vsel %vm2052_vm1, %v14634_v18, %v4065_v39  ;;  %v7080_v40 = vshrl.u32 %v7977_v10, 16  ;;  %v7083_v54 = vshll.u32 %v7977_v10, 16  ;;  %v2628_v27 = vld [vmem:[#allocation2 + $0x1d8] sm:$0x1] }
 0x145   : > { %v2963_v2 = vadd.f32 %v2819_v62, %v2471_v5  ;;  %v14635_v12 = vrot.slane %v9431_v38, 1  ;;  %v14636_v45 = vrot.slane %v9435_v17, 1  ;;  %v14637_v58 = vrot.slane %v9504_v47, 2 }
 0x146   : > { %v6022_v4 = vrot.slane %v5712_v35, 2  ;;  %v7087_v29 = vrot.slane %v9562_v33, 4  ;;  %v9642_v42 = vrot.slane %v7080_v40, 7  ;;  %v862_v14 = vmul.f32 %v14502_v6, %v9510_v15  ;;  %v14645_v40 = vld [vmem:[#allocation28_spill] sm:$0xff] }
 0x147   : > { %v3598_v53 = vadd.f32 %v14635_v12, %v2962_v56  ;;  %v3599_v62 = vadd.f32 %v14636_v45, %v2963_v2  ;;  %v6021_v36 = vsel %vm2052_vm1, %v14637_v58, %v6020_v24  ;;  %v1799_v38 = vmul.f32 %v8499_v60, %v670_v25  ;;  %v4585_v56 = vld [vmem:[#allocation2 + $0x238] sm:$0x1]  ;;  %v14650_v45 = vld [vmem:[#allocation31_spill] sm:$0xff] }
 0x148   : > { %v14638_v17 = vrot.slane %v9508_v63, 2  ;;  %v2820_v35 = vmul.f32 %v9240_v55, %v8502_v61  ;;  %v3756_v47 = vmul.f32 %v8508_v49, %v2628_v27  ;;  %v7085_v30 = vor.u32 %v7083_v54, %v9642_v42 }
 0x149   : > { %v4426_v57 = vadd.f32 %v4064_v44, %v3598_v53  ;;  %v4427_v3 = vadd.f32 %v4066_v48, %v3599_v62  ;;  %v14639_v32 = vrot.slane %v9524_v41, 1  ;;  %v2111_v5 = vrot.slane %v1799_v38, 2  ;;  %v14641_v44 = vld [vmem:[#allocation36_spill] sm:$0xff]  ;;  %v14652_v38 = vld [vmem:[#allocation33_spill] sm:$0xff] }
 0x14a   : > { %v6023_v2 = vsel %vm2052_vm1, %v14638_v17, %v6022_v4  ;;  %v4067_v39 = vrot.slane %v3756_v47, 2  ;;  %v4777_v63 = vmul.f32 %v14525_v37, %v9560_v50  ;;  %v5713_v31 = vmul.f32 %v9270_v0, %v4585_v56  ;;  %v14653_v56 = vld [vmem:[#allocation5_spill] sm:$0xff]  ;;  %v14654_v17 = vld [vmem:[#allocation6_spill] sm:$0xff] }
 0x14b   : > { %v4919_v19 = vadd.f32 %v4775_v59, %v4426_v57  ;;  %v1643_v15 = vadd.f32 %v14639_v32, %v862_v14  ;;  %v4920_v34 = vadd.f32 %v4776_v52, %v4427_v3  ;;  %v7086_v10 = vsel %vm8551_vm4, %v7929_v51, %v7085_v30  ;;  %v14643_v52 = vld [vmem:[#allocation19_spill] sm:$0xff] }
 0x14c   : > { %v14640_v55 = vrot.slane %v9490_v7, 1  ;;  %v14642_v18 = vrot.slane %v14641_v44, 2  ;;  %v7096_v41 = vrot.slane %v9642_v42, 4  ;;  %7710 = vst [vmem:[%s8571_s28 + $0x50] sm:$0xf] %v7086_v10  ;;  %v14644_v48 = vrot.slane %v14643_v52, 1 }
 0x14d   : > { %v14646_v54 = vrot.slane %v14645_v40, 2  ;;  %v6024_v12 = vrot.slane %v5713_v31, 2  ;;  %v14647_v7 = vld [vmem:[#allocation37_spill] sm:$0xff]  ;;  %v866_v62 = vmul.f32 %v14650_v45, %v8197_v13  ;;  %v14651_v57 = vrot.slane %v9585_v26, 2 }
 0x14e   : > { %v5555_v16 = vadd.f32 %v14640_v55, %v4919_v19  ;;  %v2112_v59 = vsel %vm2052_vm1, %v14642_v18, %v2111_v5  ;;  %v5556_v24 = vadd.f32 %v14644_v48, %v4920_v34  ;;  %v9675_v53 = vmul.f32 %v14647_v7, %v8197_v13 }
 0x14f   : > { %v2472_v25 = vadd.f32 %v2112_v59, %v1643_v15  ;;  %v4068_v0 = vsel %vm2052_vm1, %v14646_v54, %v4067_v39  ;;  %v9679_v27 = vmul.f32 %v14647_v7, %v14480_v28  ;;  %v6025_v14 = vsel %vm2052_vm1, %v14651_v57, %v6024_v12 }
 0x150   : > { %v6383_v51 = vadd.f32 %v6021_v36, %v5555_v16  ;;  %14648 = vst [vmem:[#allocation39_spill] sm:$0xff] %v9675_v53  ;;  %v6384_v58 = vadd.f32 %v6023_v2, %v5556_v24  ;;  %v867_v36 = vmul.f32 %v14652_v38, %v14480_v28  ;;  %v1151_v3 = vmul.f32 %v14650_v45, %v14653_v56 }
 0x151   : > { %14649 = vst [vmem:[#allocation18_spill] sm:$0xff] %v9679_v27  ;;  %v2964_v4 = vadd.f32 %v2820_v35, %v2472_v25  ;;  %v1152_v47 = vmul.f32 %v14652_v38, %v14654_v17  ;;  %v9694_v30 = vmul.f32 %v9114_v8, %v14653_v56  ;;  %v9698_v2 = vmul.f32 %v9131_v9, %v14654_v17  ;;  %v14655_v35 = vld [vmem:[#allocation11_spill] sm:$0xff] }
 0x152   : > { %v7978_v26 = vpack.c.bf16 %v6384_v58, %v6383_v51  ;;  %v14656_v19 = vrot.slane %v14655_v35, 1  ;;  %v1800_v15 = vmul.f32 %v14650_v45, %v8216_v20  ;;  %v1801_v5 = vmul.f32 %v14652_v38, %v8220_v21 }
 0x153   : > { %v1356_v34 = vrot.slane %v1151_v3, 1  ;;  %v1357_v39 = vrot.slane %v1152_v47, 1  ;;  %v13898_v31 = vrot.slane %v9694_v30, 1  ;;  %v13896_v10 = vrot.slane %v9698_v2, 1 }
 0x154   : > { %v3600_v32 = vadd.f32 %v14656_v19, %v2964_v4  ;;  %v7089_v55 = vshrl.u32 %v7978_v26, 16  ;;  %v7092_v16 = vshll.u32 %v7978_v26, 16  ;;  %v9710_v18 = vmul.f32 %v9114_v8, %v8216_v20  ;;  %v14657_v4 = vld [vmem:[#allocation12_spill] sm:$0xff] }
 0x155   : > { %v1360_v59 = vsel %vm1319_vm0, %v1356_v34, %v13898_v31  ;;  %v1362_v52 = vsel %vm1319_vm0, %v1357_v39, %v13896_v10  ;;  %v1644_v48 = vadd.f32 %v1356_v34, %v9675_v53  ;;  %v1645_v24 = vadd.f32 %v1357_v39, %v9679_v27  ;;  %v14662_v34 = vld [vmem:[#allocation24_spill] sm:$0xff] }
 0x156   : > { %v4428_v44 = vadd.f32 %v4068_v0, %v3600_v32  ;;  %v7091_v25 = vrot.slane %v7089_v55, 7  ;;  %v1647_v54 = vadd.f32 %v1360_v59, %v866_v62  ;;  %v1648_v0 = vadd.f32 %v1362_v52, %v867_v36  ;;  %v14661_v32 = vld [vmem:[#allocation10_spill] sm:$0xff] }
 0x157   : > { %v9722_v8 = vmul.f32 %v9131_v9, %v8220_v21  ;;  %v2113_v12 = vrot.slane %v1800_v15, 2  ;;  %v2114_v51 = vrot.slane %v1801_v5, 2  ;;  %v13894_v45 = vrot.slane %v9710_v18, 2  ;;  %v14664_v52 = vld [vmem:[#allocation14_spill] sm:$0xff] }
 0x158   : > { %v4921_v40 = vadd.f32 %v4777_v63, %v4428_v44  ;;  %v7094_v58 = vor.u32 %v7092_v16, %v7091_v25  ;;  %v14658_v57 = vrot.slane %v14657_v4, 1  ;;  %v9729_v3 = vmul.f32 %v14647_v7, %v8224_v22 }
 0x159   : > { %v9733_v63 = vmul.f32 %v14647_v7, %v8228_v23  ;;  %v2117_v9 = vsel %vm2052_vm1, %v2113_v12, %v13894_v45  ;;  %v13893_v62 = vrot.slane %v9722_v8, 2  ;;  %v2473_v36 = vadd.f32 %v2113_v12, %v1644_v48 }
 0x15a   : > { %v5557_v38 = vadd.f32 %v14658_v57, %v4921_v40  ;;  %14659 = vst [vmem:[#allocation22_spill] sm:$0xff] %v9729_v3  ;;  %v2474_v47 = vadd.f32 %v2114_v51, %v1645_v24  ;;  %v7095_v26 = vsel %vm8551_vm4, %v7087_v29, %v7094_v58  ;;  %v2476_v19 = vadd.f32 %v2117_v9, %v1647_v54 }
 0x15b   : > { %14660 = vst [vmem:[#allocation27_spill] sm:$0xff] %v9733_v63  ;;  %v2824_v15 = vmul.f32 %v14661_v32, %v8224_v22  ;;  %7711 = vst [vmem:[%s8571_s28 + $0x54] sm:$0xff] %v7095_v26  ;;  %v2119_v5 = vsel %vm2052_vm1, %v2114_v51, %v13893_v62  ;;  %v2825_v39 = vmul.f32 %v14662_v34, %v8228_v23 }
 0x15c   : > { %v6385_v35 = vadd.f32 %v6025_v14, %v5557_v38  ;;  %v2965_v55 = vadd.f32 %v9729_v3, %v2473_v36  ;;  %v2966_v33 = vadd.f32 %v9733_v63, %v2474_v47  ;;  %v2477_v44 = vadd.f32 %v2119_v5, %v1648_v0  ;;  %v14663_v14 = vld [vmem:[#allocation13_spill] sm:$0xff]  ;;  %v14665_v38 = vld [vmem:[#allocation15_spill] sm:$0xff] }
 0x15d   : > { %v2968_v29 = vadd.f32 %v2824_v15, %v2476_v19  ;;  %v3109_v59 = vmul.f32 %v14661_v32, %v14663_v14  ;;  %v3110_v48 = vmul.f32 %v14662_v34, %v14664_v52  ;;  %v9759_v24 = vmul.f32 %v9465_v46, %v14663_v14  ;;  %v9863_v3 = vld [vmem:[#allocation2 + $0x1c0] sm:$0xff] }
 0x15e   : > { %v7979_v16 = vpack.c.bf16 %v6385_v35, %v6385_v35  ;;  %v9763_v25 = vmul.f32 %v9467_v11, %v14664_v52  ;;  %v3757_v40 = vmul.f32 %v14661_v32, %v8375_v1  ;;  %v2969_v12 = vadd.f32 %v2825_v39, %v2477_v44 }
 0x15f   : > { %v3313_v51 = vrot.slane %v3109_v59, 1  ;;  %v3314_v58 = vrot.slane %v3110_v48, 1  ;;  %v13895_v4 = vrot.slane %v9759_v24, 1  ;;  %v3758_v9 = vmul.f32 %v14662_v34, %v14665_v38 }
 0x160   : > { %v7098_v54 = vshrl.u32 %v7979_v16, 16  ;;  %v7101_v0 = vshll.u32 %v7979_v16, 16  ;;  %v13897_v57 = vrot.slane %v9763_v25, 1  ;;  %v9773_v26 = vmul.f32 %v9465_v46, %v8375_v1  ;;  %v9785_v16 = vld [vmem:[#allocation2 + $0x258] sm:$0xff] }
 0x161   : > { %v3601_v47 = vadd.f32 %v3313_v51, %v2965_v55  ;;  %v9777_v35 = vmul.f32 %v9467_v11, %v14665_v38  ;;  %v3317_v19 = vsel %vm1319_vm0, %v3313_v51, %v13895_v4  ;;  %v3602_v5 = vadd.f32 %v3314_v58, %v2966_v33  ;;  %14666 = vst [vmem:[#allocation9_spill] sm:$0xff] %v9785_v16  ;;  %v14668_v4 = vld [vmem:[#allocation16_spill] sm:$0xff] }
 0x162   : > { %v7100_v36 = vrot.slane %v7098_v54, 7  ;;  %v3319_v15 = vsel %vm1319_vm0, %v3314_v58, %v13897_v57  ;;  %v4069_v39 = vrot.slane %v3757_v40, 2  ;;  %v3604_v44 = vadd.f32 %v3317_v19, %v2968_v29  ;;  %v9787_v54 = vld [vmem:[#allocation2 + $0x260] sm:$0xff]  ;;  %v9799_v29 = vld [vmem:[#allocation2 + $0x270] sm:$0xff] }
 0x163   : > { %v3605_v59 = vadd.f32 %v3319_v15, %v2969_v12  ;;  %v4070_v48 = vrot.slane %v3758_v9, 2  ;;  %14667 = vst [vmem:[#allocation26_spill] sm:$0xff] %v9787_v54  ;;  %v13900_v62 = vrot.slane %v9773_v26, 2  ;;  %v13899_v45 = vrot.slane %v9777_v35, 2  ;;  %v14670_v12 = vld [vmem:[#allocation17_spill] sm:$0xff] }
 0x164   : > { %v7103_v55 = vor.u32 %v7101_v0, %v7100_v36  ;;  %v4429_v51 = vadd.f32 %v4069_v39, %v3601_v47  ;;  %v9793_v10 = vmul.f32 %v14647_v7, %v14668_v4  ;;  %v9801_v0 = vld [vmem:[#allocation2 + $0x278] sm:$0xff]  ;;  %v9805_v58 = vmul.f32 %v14647_v7, %v14670_v12  ;;  %v14673_v57 = vld [vmem:[#allocation21_spill] sm:$0xff] }
 0x165   : > { %v4430_v40 = vadd.f32 %v4070_v48, %v3602_v5  ;;  %v4781_v9 = vmul.f32 %v14668_v4, %v9785_v16  ;;  %v4073_v42 = vsel %vm2052_vm1, %v4069_v39, %v13900_v62  ;;  %v4782_v36 = vmul.f32 %v14670_v12, %v9787_v54 }
 0x166   : > { %14669 = vst [vmem:[#allocation35_spill] sm:$0xff] %v9793_v10  ;;  %v7104_v33 = vsel %vm8551_vm4, %v7096_v41, %v7103_v55  ;;  %14671 = vst [vmem:[#allocation34_spill] sm:$0xff] %v9805_v58  ;;  %v4075_v41 = vsel %vm2052_vm1, %v4070_v48, %v13899_v45  ;;  %v4922_v47 = vadd.f32 %v9793_v10, %v4429_v51  ;;  %v14672_v55 = vld [vmem:[#allocation20_spill] sm:$0xff] }
 0x167   : > { %7712 = vst [vmem:[%s8571_s28 + $0x5c] sm:$0xf] %v7104_v33  ;;  %v4432_v19 = vadd.f32 %v4073_v42, %v3604_v44  ;;  %v4433_v15 = vadd.f32 %v4075_v41, %v3605_v59  ;;  %v4923_v5 = vadd.f32 %v9805_v58, %v4430_v40  ;;  %v5066_v33 = vmul.f32 %v14672_v55, %v9785_v16  ;;  %v9835_v44 = vld [vmem:[%s13700_s1 + $0x18] ss:$0 sm:$0xff]  ;;  %v9842_v41 = vld [vmem:[%s13700_s1 + $0x20] ss:$0 sm:$0xff] }
 0x168   : > { %v5067_v31 = vmul.f32 %v14673_v57, %v9787_v54  ;;  %v9826_v39 = vmul.f32 %v14672_v55, %v9799_v29  ;;  %v9830_v48 = vmul.f32 %v14673_v57, %v9801_v0  ;;  %v5714_v59 = vmul.f32 %v9835_v44, %v9785_v16 }
 0x169   : > { %v4925_v51 = vadd.f32 %v4781_v9, %v4432_v19  ;;  %v4926_v40 = vadd.f32 %v4782_v36, %v4433_v15  ;;  %v5270_v42 = vrot.slane %v5066_v33, 1  ;;  %v5715_v45 = vmul.f32 %v9842_v41, %v9787_v54  ;;  %v676_v33 = vld [vmem:[#allocation2 + $0x1a8] sm:$0xff] }
 0x16a   : > { %v5271_v62 = vrot.slane %v5067_v31, 1  ;;  %v13914_v58 = vrot.slane %v9826_v39, 1  ;;  %v13913_v57 = vrot.slane %v9830_v48, 1  ;;  %v9850_v10 = vmul.f32 %v9835_v44, %v9799_v29 }
 0x16b   : > { %v5558_v9 = vadd.f32 %v5270_v42, %v4922_v47  ;;  %v9854_v36 = vmul.f32 %v9842_v41, %v9801_v0  ;;  %v6026_v19 = vrot.slane %v5714_v59, 2  ;;  %v6027_v15 = vrot.slane %v5715_v45, 2 }
 0x16c   : > { %v5274_v31 = vsel %vm1319_vm0, %v5270_v42, %v13914_v58  ;;  %v5276_v55 = vsel %vm1319_vm0, %v5271_v62, %v13913_v57  ;;  %v5559_v52 = vadd.f32 %v5271_v62, %v4923_v5  ;;  %v13915_v63 = vrot.slane %v9850_v10, 2 }
 0x16d   : > { %v5561_v47 = vadd.f32 %v5274_v31, %v4925_v51  ;;  %v5562_v14 = vadd.f32 %v5276_v55, %v4926_v40  ;;  %v13916_v54 = vrot.slane %v9854_v36, 2  ;;  %v6386_v59 = vadd.f32 %v6026_v19, %v5558_v9  ;;  %v14675_v55 = vld [vmem:[#allocation23_spill] sm:$0xff] }
 0x16e   : > { %v6030_v45 = vsel %vm2052_vm1, %v6026_v19, %v13915_v63  ;;  %v6387_v16 = vadd.f32 %v6027_v15, %v5559_v52  ;;  %v9871_v42 = vmul.f32 %v14647_v7, %v14502_v6  ;;  %v868_v62 = vmul.f32 %v14502_v6, %v676_v33 }
 0x16f   : > { %v6032_v5 = vsel %vm2052_vm1, %v6027_v15, %v13916_v54  ;;  %v6389_v51 = vadd.f32 %v6030_v45, %v5561_v47  ;;  %v1153_v40 = vmul.f32 %v14675_v55, %v676_v33  ;;  %v9880_v9 = vmul.f32 %v14675_v55, %v9863_v3  ;;  %v14678_v47 = vld [vmem:[#allocation32_spill] sm:$0xff] }
 0x170   : > { %14674 = vst [vmem:[#allocation38_spill] sm:$0xff] %v9871_v42  ;;  %v6390_v31 = vadd.f32 %v6032_v5, %v5562_v14  ;;  %v7980_v19 = vpack.c.bf16 %v6387_v16, %v6386_v59  ;;  %v1802_v52 = vmul.f32 %v8499_v60, %v676_v33  ;;  %v9885_v57 = vmul.f32 %v8499_v60, %v9863_v3  ;;  %v14679_v5 = vld [vmem:[#allocation25_spill] sm:$0xff] }
 0x171   : > { %v1358_v58 = vrot.slane %v1153_v40, 1  ;;  %v13920_v63 = vrot.slane %v9880_v9, 1  ;;  %v9890_v15 = vmul.f32 %v14647_v7, %v8502_v61  ;;  %v2826_v45 = vmul.f32 %v14678_v47, %v8502_v61 }
 0x172   : > { %14676 = vst [vmem:[#allocation36_spill] sm:$0xff] %v9885_v57  ;;  %v7982_v54 = vpack.c.bf16 %v6390_v31, %v6389_v51  ;;  %v7106_v55 = vshrl.u32 %v7980_v19, 16  ;;  %v2115_v14 = vrot.slane %v1802_v52, 2  ;;  %v13925_v16 = vrot.slane %v9885_v57, 2  ;;  %v9905_v19 = vld [vmem:[#allocation2 + $0x268] sm:$0xff] }
 0x173   : > { %14677 = vst [vmem:[#allocation19_spill] sm:$0xff] %v9890_v15  ;;  %v1364_v33 = vsel %vm1319_vm0, %v1358_v58, %v13920_v63  ;;  %v1646_v59 = vadd.f32 %v1358_v58, %v9871_v42  ;;  %v3111_v40 = vmul.f32 %v14678_v47, %v14679_v5  ;;  %v9903_v7 = vmul.f32 %v9560_v50, %v14679_v5 }
 0x174   : > { %v7930_v27 = vrot.slane %v7106_v55, 11  ;;  %v7111_v53 = vshrl.u32 %v7982_v54, 16  ;;  %v7114_v51 = vshll.u32 %v7982_v54, 16  ;;  %v1649_v31 = vadd.f32 %v1364_v33, %v868_v62  ;;  %14681 = vst [vmem:[#allocation37_spill] sm:$0xff] %v9905_v19  ;;  %v9919_v62 = vld [vmem:[#allocation2 + $0x280] sm:$0xff]  ;;  %v9925_v33 = vld [vmem:[#allocation2 + $0x18] sm:$0xff] }
 0x175   : > { %14680 = vst [vmem:[#allocation28_spill] sm:$0xff] %v9903_v7  ;;  %v2121_v52 = vsel %vm2052_vm1, %v2115_v14, %v13925_v16  ;;  %v2475_v63 = vadd.f32 %v2115_v14, %v1646_v59  ;;  %v3315_v17 = vrot.slane %v3111_v40, 1  ;;  %v13926_v58 = vrot.slane %v9903_v7, 1  ;;  %14683 = vst [vmem:[#allocation33_spill] sm:$0xff] %v9925_v33  ;;  %v14685_v16 = vld [vmem:[#allocation29_spill] sm:$0xff] }
 0x176   : > { %v9911_v42 = vrot.slane %v7111_v53, 7  ;;  %v2478_v56 = vadd.f32 %v2121_v52, %v1649_v31  ;;  %v3759_v5 = vmul.f32 %v14678_v47, %v8508_v49  ;;  %v9917_v54 = vmul.f32 %v9560_v50, %v8508_v49 }
 0x177   : > { %v2967_v55 = vadd.f32 %v9890_v15, %v2475_v63  ;;  %v3321_v14 = vsel %vm1319_vm0, %v3315_v17, %v13926_v58  ;;  %v9929_v53 = vmul.f32 %v9925_v33, %v14525_v37  ;;  %v4783_v47 = vmul.f32 %v14525_v37, %v9905_v19  ;;  %v9944_v33 = vld [vmem:[%s13700_s1 + $0x28] ss:$0 sm:$0xff] }
 0x178   : > { %14682 = vst [vmem:[#allocation31_spill] sm:$0xff] %v9917_v54  ;;  %v7116_v59 = vor.u32 %v7114_v51, %v9911_v42  ;;  %v2970_v40 = vadd.f32 %v2826_v45, %v2478_v56  ;;  %v4071_v31 = vrot.slane %v3759_v5, 2  ;;  %v13937_v63 = vrot.slane %v9917_v54, 2 }
 0x179   : > { %14684 = vst [vmem:[#allocation11_spill] sm:$0xff] %v9929_v53  ;;  %v3603_v52 = vadd.f32 %v3315_v17, %v2967_v55  ;;  %v5068_v58 = vmul.f32 %v14685_v16, %v9905_v19  ;;  %v9939_v15 = vmul.f32 %v14685_v16, %v9919_v62  ;;  %v5716_v51 = vmul.f32 %v9944_v33, %v9905_v19  ;;  %v680_v55 = vld [vmem:[#allocation2 + $0x1c8] sm:$0x1]  ;;  %v681_v16 = vld [vmem:[#allocation2 + $0x1d0] sm:$0x1] }
 0x17a   : > { %v7117_v56 = vsel %vm8551_vm4, %v7930_v27, %v7116_v59  ;;  %v3606_v45 = vadd.f32 %v3321_v14, %v2970_v40  ;;  %v4077_v17 = vsel %vm2052_vm1, %v4071_v31, %v13937_v63  ;;  %v9955_v5 = vmul.f32 %v9944_v33, %v9919_v62  ;;  %v8073_v14 = vld [vmem:[#allocation2 + $0x1b0] sm:$0xff]  ;;  %v8074_v40 = vld [vmem:[#allocation2 + $0x1b8] sm:$0xff] }
 0x17b   : > { %14686 = vst [vmem:[#allocation12_spill] sm:$0xff] %v9939_v15  ;;  %7713 = vst [vmem:[%s8571_s28 + $0x60] sm:$0xff] %v7117_v56  ;;  %v4431_v7 = vadd.f32 %v4071_v31, %v3603_v52  ;;  %v5272_v34 = vrot.slane %v5068_v58, 1  ;;  %v13942_v32 = vrot.slane %v9939_v15, 1  ;;  %v6028_v19 = vrot.slane %v5716_v51, 2 }
 0x17c   : > { %v4434_v57 = vadd.f32 %v4077_v17, %v3606_v45  ;;  %v13943_v27 = vrot.slane %v9955_v5, 2  ;;  %v869_v59 = vmul.f32 %v8073_v14, %v8197_v13  ;;  %v870_v63 = vmul.f32 %v8074_v40, %v14480_v28  ;;  %v2638_v52 = vld [vmem:[#allocation2 + $0x228] sm:$0x1]  ;;  %v2639_v51 = vld [vmem:[#allocation2 + $0x230] sm:$0x1] }
 0x17d   : > { %v4924_v54 = vadd.f32 %v9929_v53, %v4431_v7  ;;  %v5278_v56 = vsel %vm1319_vm0, %v5272_v34, %v13942_v32  ;;  %v1806_v58 = vmul.f32 %v8216_v20, %v680_v55  ;;  %v1807_v31 = vmul.f32 %v8220_v21, %v681_v16  ;;  %v4595_v21 = vld [vmem:[#allocation2 + $0x288] sm:$0x1] }
 0x17e   : > { %v4927_v45 = vadd.f32 %v4783_v47, %v4434_v57  ;;  %v6034_v17 = vsel %vm2052_vm1, %v6028_v19, %v13943_v27  ;;  %v14687_v14 = vrot.slane %v9694_v30, 1  ;;  %v14688_v7 = vrot.slane %v9698_v2, 1 }
 0x17f   : > { %v5560_v15 = vadd.f32 %v5272_v34, %v4924_v54  ;;  %v2122_v28 = vrot.slane %v1806_v58, 2  ;;  %v2124_v32 = vrot.slane %v1807_v31, 2  ;;  %v2827_v55 = vmul.f32 %v9465_v46, %v8224_v22 }
 0x180   : > { %v1650_v40 = vadd.f32 %v14687_v14, %v869_v59  ;;  %v1651_v53 = vadd.f32 %v14688_v7, %v870_v63  ;;  %v5563_v16 = vadd.f32 %v5278_v56, %v4927_v45  ;;  %v2828_v57 = vmul.f32 %v9467_v11, %v8228_v23 }
 0x181   : > { %v3763_v47 = vmul.f32 %v8375_v1, %v2638_v52  ;;  %v3764_v27 = vmul.f32 %v14665_v38, %v2639_v51  ;;  %v6388_v30 = vadd.f32 %v6028_v19, %v5560_v15  ;;  %v14689_v59 = vrot.slane %v9710_v18, 2  ;;  %v4596_v52 = vld [vmem:[#allocation2 + $0x290] sm:$0x1] }
 0x182   : > { %v14690_v34 = vrot.slane %v9722_v8, 2  ;;  %v4784_v63 = vmul.f32 %v14668_v4, %v9799_v29  ;;  %v6391_v56 = vadd.f32 %v6034_v17, %v5563_v16  ;;  %v4785_v15 = vmul.f32 %v14670_v12, %v9801_v0 }
 0x183   : > { %v2123_v2 = vsel %vm2052_vm1, %v14689_v59, %v2122_v28  ;;  %v4078_v45 = vrot.slane %v3763_v47, 2  ;;  %v7981_v14 = vpack.c.bf16 %v6388_v30, %v6388_v30  ;;  %v4080_v51 = vrot.slane %v3764_v27, 2 }
 0x184   : > { %v2125_v54 = vsel %vm2052_vm1, %v14690_v34, %v2124_v32  ;;  %v2479_v58 = vadd.f32 %v2123_v2, %v1650_v40  ;;  %v5720_v18 = vmul.f32 %v9835_v44, %v4595_v21  ;;  %v7983_v28 = vpack.c.bf16 %v6391_v56, %v6391_v56  ;;  %v682_v2 = vld [vmem:[#allocation2 + $0x1d8] sm:$0x1] }
 0x185   : > { %v2480_v31 = vadd.f32 %v2125_v54, %v1651_v53  ;;  %v14691_v32 = vrot.slane %v9773_v26, 2  ;;  %v7119_v59 = vshrl.u32 %v7981_v14, 16  ;;  %v14692_v17 = vrot.slane %v9777_v35, 2  ;;  %v2640_v26 = vld [vmem:[#allocation2 + $0x238] sm:$0x1] }
 0x186   : > { %v2971_v19 = vadd.f32 %v2827_v55, %v2479_v58  ;;  %v5721_v40 = vmul.f32 %v9842_v41, %v4596_v52  ;;  %v6035_v27 = vrot.slane %v5720_v18, 2  ;;  %v7124_v16 = vshrl.u32 %v7983_v28, 16  ;;  %v4597_v14 = vld [vmem:[#allocation2 + $0x298] sm:$0x1] }
 0x187   : > { %v2972_v8 = vadd.f32 %v2828_v57, %v2480_v31  ;;  %v4079_v7 = vsel %vm2052_vm1, %v14691_v32, %v4078_v45  ;;  %v4081_v53 = vsel %vm2052_vm1, %v14692_v17, %v4080_v51  ;;  %v7127_v47 = vshll.u32 %v7983_v28, 16 }
 0x188   : > { %v14693_v30 = vrot.slane %v9759_v24, 1  ;;  %v14694_v55 = vrot.slane %v9763_v25, 1  ;;  %v7931_v34 = vrot.slane %v7119_v59, 11  ;;  %v14695_v54 = vrot.slane %v9850_v10, 2 }
 0x189   : > { %v6037_v56 = vrot.slane %v5721_v40, 2  ;;  %v7131_v58 = vrot.slane %v9911_v42, 4  ;;  %v10007_v31 = vrot.slane %v7124_v16, 7  ;;  %v871_v24 = vmul.f32 %v14502_v6, %v9863_v3  ;;  %v14720_v42 = vld [vmem:[#allocation22_spill] sm:$0xff] }
 0x18a   : > { %v3607_v21 = vadd.f32 %v14693_v30, %v2971_v19  ;;  %v3608_v57 = vadd.f32 %v14694_v55, %v2972_v8  ;;  %v6036_v35 = vsel %vm2052_vm1, %v14695_v54, %v6035_v27  ;;  %v14696_v25 = vrot.slane %v9854_v36, 2 }
 0x18b   : > { %v1808_v10 = vmul.f32 %v8499_v60, %v682_v2  ;;  %v2829_v18 = vmul.f32 %v9560_v50, %v8502_v61  ;;  %v3765_v28 = vmul.f32 %v8508_v49, %v2640_v26  ;;  %v7129_v19 = vor.u32 %v7127_v47, %v10007_v31  ;;  %v14704_v26 = vld [vmem:[#allocation10_spill] sm:$0xff] }
 0x18c   : > { %v4435_v45 = vadd.f32 %v4079_v7, %v3607_v21  ;;  %v4436_v52 = vadd.f32 %v4081_v53, %v3608_v57  ;;  %v6038_v51 = vsel %vm2052_vm1, %v14696_v25, %v6037_v56  ;;  %v14697_v7 = vrot.slane %v9880_v9, 1  ;;  %v14700_v9 = vld [vmem:[#allocation36_spill] sm:$0xff]  ;;  %v14702_v21 = vld [vmem:[#allocation31_spill] sm:$0xff]  ;;  %v14708_v25 = vld [vmem:[#allocation5_spill] sm:$0xff] }
 0x18d   : > { %v2126_v59 = vrot.slane %v1808_v10, 2  ;;  %v4082_v17 = vrot.slane %v3765_v28, 2  ;;  %v4786_v36 = vmul.f32 %v14525_v37, %v9919_v62  ;;  %v5722_v53 = vmul.f32 %v9944_v33, %v4597_v14  ;;  %v14709_v28 = vld [vmem:[#allocation6_spill] sm:$0xff] }
 0x18e   : > { %v4928_v8 = vadd.f32 %v4784_v63, %v4435_v45  ;;  %v4929_v32 = vadd.f32 %v4785_v15, %v4436_v52  ;;  %v1652_v3 = vadd.f32 %v14697_v7, %v871_v24  ;;  %v7130_v40 = vsel %vm8551_vm4, %v7931_v34, %v7129_v19  ;;  %v14706_v45 = vld [vmem:[#allocation24_spill] sm:$0xff] }
 0x18f   : > { %v14698_v50 = vrot.slane %v9826_v39, 1  ;;  %v14699_v16 = vrot.slane %v9830_v48, 1  ;;  %v7140_v15 = vrot.slane %v10007_v31, 4  ;;  %7714 = vst [vmem:[%s8571_s28 + $0x68] sm:$0xf] %v7130_v40  ;;  %v14701_v47 = vrot.slane %v14700_v9, 2 }
 0x190   : > { %v14703_v55 = vrot.slane %v14702_v21, 2  ;;  %v6039_v2 = vrot.slane %v5722_v53, 2  ;;  %v875_v34 = vmul.f32 %v14704_v26, %v8197_v13  ;;  %v14705_v48 = vld [vmem:[#allocation4_spill] sm:$0xff]  ;;  %v14707_v24 = vrot.slane %v9955_v5, 2  ;;  %v14714_v21 = vld [vmem:[#allocation18_spill] sm:$0xff] }
 0x191   : > { %v5564_v27 = vadd.f32 %v14698_v50, %v4928_v8  ;;  %v5565_v63 = vadd.f32 %v14699_v16, %v4929_v32  ;;  %v2127_v30 = vsel %vm2052_vm1, %v14701_v47, %v2126_v59  ;;  %v876_v52 = vmul.f32 %v14706_v45, %v14705_v48  ;;  %v14713_v47 = vld [vmem:[#allocation39_spill] sm:$0xff] }
 0x192   : > { %v4083_v57 = vsel %vm2052_vm1, %v14703_v55, %v4082_v17  ;;  %v2481_v56 = vadd.f32 %v2127_v30, %v1652_v3  ;;  %v6040_v14 = vsel %vm2052_vm1, %v14707_v24, %v6039_v2  ;;  %v1157_v10 = vmul.f32 %v14704_v26, %v14708_v25  ;;  %v14710_v17 = vld [vmem:[#allocation8_spill] sm:$0xff] }
 0x193   : > { %v6392_v39 = vadd.f32 %v6036_v35, %v5564_v27  ;;  %v6393_v54 = vadd.f32 %v6038_v51, %v5565_v63  ;;  %v1158_v19 = vmul.f32 %v14706_v45, %v14709_v28  ;;  %v10051_v8 = vmul.f32 %v9465_v46, %v14708_v25  ;;  %v14711_v27 = vld [vmem:[#allocation28_spill] sm:$0xff] }
 0x194   : > { %v2973_v51 = vadd.f32 %v2829_v18, %v2481_v56  ;;  %v10055_v32 = vmul.f32 %v9467_v11, %v14709_v28  ;;  %v1809_v5 = vmul.f32 %v14704_v26, %v8216_v20  ;;  %v1365_v7 = vrot.slane %v1157_v10, 1  ;;  %v14734_v28 = vld [vmem:[#allocation25_spill] sm:$0xff] }
 0x195   : > { %v7984_v35 = vpack.c.bf16 %v6393_v54, %v6392_v39  ;;  %v1366_v3 = vrot.slane %v1158_v19, 1  ;;  %v13951_v59 = vrot.slane %v10051_v8, 1  ;;  %v1810_v53 = vmul.f32 %v14706_v45, %v14710_v17 }
 0x196   : > { %v14712_v16 = vrot.slane %v14711_v27, 1  ;;  %v13950_v18 = vrot.slane %v10055_v32, 1  ;;  %v1653_v30 = vadd.f32 %v1365_v7, %v14713_v47  ;;  %v10072_v2 = vmul.f32 %v9465_v46, %v8216_v20 }
 0x197   : > { %v7133_v40 = vshrl.u32 %v7984_v35, 16  ;;  %v7136_v50 = vshll.u32 %v7984_v35, 16  ;;  %v1369_v9 = vsel %vm1319_vm0, %v1365_v7, %v13951_v59  ;;  %v1654_v55 = vadd.f32 %v1366_v3, %v14714_v21  ;;  %v14715_v7 = vld [vmem:[#allocation9_spill] sm:$0xff]  ;;  %v14721_v21 = vld [vmem:[#allocation27_spill] sm:$0xff] }
 0x198   : > { %v3609_v63 = vadd.f32 %v14712_v16, %v2973_v51  ;;  %v1371_v54 = vsel %vm1319_vm0, %v1366_v3, %v13950_v18  ;;  %v1656_v56 = vadd.f32 %v1369_v9, %v875_v34  ;;  %v10079_v24 = vmul.f32 %v9467_v11, %v14710_v17  ;;  %v14716_v34 = vld [vmem:[#allocation26_spill] sm:$0xff]  ;;  %v14719_v16 = vld [vmem:[#allocation13_spill] sm:$0xff] }
 0x199   : > { %v7135_v26 = vrot.slane %v7133_v40, 7  ;;  %v1657_v45 = vadd.f32 %v1371_v54, %v876_v52  ;;  %v2128_v10 = vrot.slane %v1809_v5, 2  ;;  %v2129_v19 = vrot.slane %v1810_v53, 2  ;;  %v14717_v5 = vld [vmem:[#allocation12_spill] sm:$0xff]  ;;  %v14727_v59 = vld [vmem:[#allocation21_spill] sm:$0xff] }
 0x19a   : > { %v4437_v39 = vadd.f32 %v4083_v57, %v3609_v63  ;;  %v13949_v46 = vrot.slane %v10072_v2, 2  ;;  %v2833_v57 = vmul.f32 %v14715_v7, %v8224_v22  ;;  %v13947_v40 = vrot.slane %v10079_v24, 2 }
 0x19b   : > { %v7138_v35 = vor.u32 %v7136_v50, %v7135_v26  ;;  %v2482_v27 = vadd.f32 %v2128_v10, %v1653_v30  ;;  %v2483_v3 = vadd.f32 %v2129_v19, %v1654_v55  ;;  %v2834_v52 = vmul.f32 %v14716_v34, %v8228_v23 }
 0x19c   : > { %v4930_v51 = vadd.f32 %v4786_v36, %v4437_v39  ;;  %v14718_v53 = vrot.slane %v14717_v5, 1  ;;  %v2132_v50 = vsel %vm2052_vm1, %v2128_v10, %v13949_v46  ;;  %v3115_v63 = vmul.f32 %v14715_v7, %v14719_v16  ;;  %v14722_v39 = vld [vmem:[#allocation14_spill] sm:$0xff]  ;;  %v14726_v46 = vld [vmem:[#allocation35_spill] sm:$0xff] }
 0x19d   : > { %v7139_v11 = vsel %vm8551_vm4, %v7131_v58, %v7138_v35  ;;  %v2134_v9 = vsel %vm2052_vm1, %v2129_v19, %v13947_v40  ;;  %v2485_v47 = vadd.f32 %v2132_v50, %v1656_v56  ;;  %v2974_v30 = vadd.f32 %v14720_v42, %v2482_v27  ;;  %v10140_v40 = vld [vmem:[#allocation2 + $0x2d0] sm:$0xff] }
 0x19e   : > { %v5566_v36 = vadd.f32 %v14718_v53, %v4930_v51  ;;  %7715 = vst [vmem:[%s8571_s28 + $0x6c] sm:$0xff] %v7139_v11  ;;  %v2975_v58 = vadd.f32 %v14721_v21, %v2483_v3  ;;  %v2486_v26 = vadd.f32 %v2134_v9, %v1657_v45  ;;  %v3116_v54 = vmul.f32 %v14716_v34, %v14722_v39  ;;  %v10127_v9 = vld [vmem:[#allocation2 + $0x2b8] sm:$0xff] }
 0x19f   : > { %v10108_v10 = vmul.f32 %v9799_v29, %v14719_v16  ;;  %v2977_v35 = vadd.f32 %v2833_v57, %v2485_v47  ;;  %v10112_v51 = vmul.f32 %v9801_v0, %v14722_v39  ;;  %v3322_v19 = vrot.slane %v3115_v63, 1  ;;  %14723 = vst [vmem:[#allocation32_spill] sm:$0xff] %v10127_v9  ;;  %v10129_v47 = vld [vmem:[#allocation2 + $0x2c0] sm:$0xff] }
 0x1a0   : > { %v6394_v55 = vadd.f32 %v6040_v14, %v5566_v36  ;;  %v3766_v56 = vmul.f32 %v14715_v7, %v8375_v1  ;;  %v2978_v3 = vadd.f32 %v2834_v52, %v2486_v26  ;;  %v3323_v14 = vrot.slane %v3116_v54, 1  ;;  %14724 = vst [vmem:[#allocation36_spill] sm:$0xff] %v10129_v47 }
 0x1a1   : > { %v13946_v45 = vrot.slane %v10108_v10, 1  ;;  %v13948_v11 = vrot.slane %v10112_v51, 1  ;;  %v3610_v5 = vadd.f32 %v3322_v19, %v2974_v30  ;;  %v3767_v53 = vmul.f32 %v14716_v34, %v14665_v38  ;;  %v10234_v34 = vld [vmem:[#allocation2 + $0x2e0] sm:$0xff] }
 0x1a2   : > { %v7985_v27 = vpack.c.bf16 %v6394_v55, %v6394_v55  ;;  %v10122_v57 = vmul.f32 %v9799_v29, %v8375_v1  ;;  %v3611_v52 = vadd.f32 %v3323_v14, %v2975_v58  ;;  %v10136_v21 = vmul.f32 %v9801_v0, %v14665_v38 }
 0x1a3   : > { %v3326_v63 = vsel %vm1319_vm0, %v3322_v19, %v13946_v45  ;;  %v3328_v42 = vsel %vm1319_vm0, %v3323_v14, %v13948_v11  ;;  %v4084_v55 = vrot.slane %v3766_v56, 2  ;;  %v4790_v14 = vmul.f32 %v14668_v4, %v10127_v9 }
 0x1a4   : > { %v7142_v36 = vshrl.u32 %v7985_v27, 16  ;;  %v7145_v50 = vshll.u32 %v7985_v27, 16  ;;  %v3613_v30 = vadd.f32 %v3326_v63, %v2977_v35  ;;  %v3614_v54 = vadd.f32 %v3328_v42, %v2978_v3 }
 0x1a5   : > { %v4085_v27 = vrot.slane %v3767_v53, 2  ;;  %v13952_v19 = vrot.slane %v10122_v57, 2  ;;  %v13954_v58 = vrot.slane %v10136_v21, 2  ;;  %v4438_v45 = vadd.f32 %v4084_v55, %v3610_v5  ;;  %v10149_v53 = vld [vmem:[#allocation2 + $0x2d8] sm:$0xff] }
 0x1a6   : > { %v7144_v26 = vrot.slane %v7142_v36, 7  ;;  %v4791_v35 = vmul.f32 %v14670_v12, %v10129_v47  ;;  %v14725_v36 = vld [vmem:[#allocation20_spill] sm:$0xff] }
 0x1a7   : > { %v4088_v56 = vsel %vm2052_vm1, %v4084_v55, %v13952_v19  ;;  %v4439_v3 = vadd.f32 %v4085_v27, %v3611_v52  ;;  %v5072_v5 = vmul.f32 %v14725_v36, %v10127_v9  ;;  %v4090_v42 = vsel %vm2052_vm1, %v4085_v27, %v13954_v58 }
 0x1a8   : > { %v7147_v63 = vor.u32 %v7145_v50, %v7144_v26  ;;  %v4441_v11 = vadd.f32 %v4088_v56, %v3613_v30  ;;  %v4931_v18 = vadd.f32 %v14726_v46, %v4438_v45  ;;  %v5073_v50 = vmul.f32 %v14727_v59, %v10129_v47  ;;  %v14728_v26 = vld [vmem:[#allocation34_spill] sm:$0xff] }
 0x1a9   : > { %v4442_v55 = vadd.f32 %v4090_v42, %v3614_v54  ;;  %v4932_v19 = vadd.f32 %v14728_v26, %v4439_v3  ;;  %v10166_v39 = vmul.f32 %v14725_v36, %v10140_v40  ;;  %v10171_v46 = vmul.f32 %v14727_v59, %v10149_v53 }
 0x1aa   : > { %v7148_v52 = vsel %vm8551_vm4, %v7140_v15, %v7147_v63  ;;  %v4934_v27 = vadd.f32 %v4790_v14, %v4441_v11  ;;  %v5279_v45 = vrot.slane %v5072_v5, 1  ;;  %v5280_v30 = vrot.slane %v5073_v50, 1  ;;  %v688_v63 = vld [vmem:[#allocation2 + $0x208] sm:$0xff] }
 0x1ab   : > { %14729 = vst [vmem:[#allocation31_spill] sm:$0xff] %v10166_v39  ;;  %7716 = vst [vmem:[%s8571_s28 + $0x74] sm:$0xf] %v7148_v52  ;;  %v4935_v56 = vadd.f32 %v4791_v35, %v4442_v55  ;;  %v13956_v31 = vrot.slane %v10166_v39, 1  ;;  %v5723_v15 = vmul.f32 %v9835_v44, %v10127_v9  ;;  %v5724_v54 = vmul.f32 %v9842_v41, %v10129_v47  ;;  %v10190_v55 = vld [vmem:[#allocation2 + $0x220] sm:$0xff] }
 0x1ac   : > { %14730 = vst [vmem:[#allocation10_spill] sm:$0xff] %v10171_v46  ;;  %v13961_v3 = vrot.slane %v10171_v46, 1  ;;  %v5567_v42 = vadd.f32 %v5279_v45, %v4931_v18  ;;  %v5568_v11 = vadd.f32 %v5280_v30, %v4932_v19  ;;  %v10181_v14 = vmul.f32 %v9835_v44, %v10140_v40  ;;  %v14741_v46 = vld [vmem:[#allocation11_spill] sm:$0xff] }
 0x1ad   : > { %v5283_v35 = vsel %vm1319_vm0, %v5279_v45, %v13956_v31  ;;  %v10188_v5 = vmul.f32 %v9842_v41, %v10149_v53  ;;  %v6041_v50 = vrot.slane %v5723_v15, 2  ;;  %v6042_v52 = vrot.slane %v5724_v54, 2  ;;  %v14731_v54 = vld [vmem:[#allocation23_spill] sm:$0xff] }
 0x1ae   : > { %v5285_v18 = vsel %vm1319_vm0, %v5280_v30, %v13961_v3  ;;  %v5570_v19 = vadd.f32 %v5283_v35, %v4934_v27  ;;  %v13962_v26 = vrot.slane %v10181_v14, 2  ;;  %v877_v58 = vmul.f32 %v14502_v6, %v688_v63 }
 0x1af   : > { %v5571_v59 = vadd.f32 %v5285_v18, %v4935_v56  ;;  %v13967_v45 = vrot.slane %v10188_v5, 2  ;;  %v6395_v31 = vadd.f32 %v6041_v50, %v5567_v42  ;;  %v6396_v36 = vadd.f32 %v6042_v52, %v5568_v11 }
 0x1b0   : > { %v6045_v15 = vsel %vm2052_vm1, %v6041_v50, %v13962_v26  ;;  %v1159_v16 = vmul.f32 %v14731_v54, %v688_v63  ;;  %v10204_v47 = vmul.f32 %v14731_v54, %v10190_v55  ;;  %v1811_v27 = vmul.f32 %v8499_v60, %v688_v63  ;;  %v14733_v63 = vld [vmem:[#allocation37_spill] sm:$0xff] }
 0x1b1   : > { %v6047_v30 = vsel %vm2052_vm1, %v6042_v52, %v13967_v45  ;;  %v6398_v56 = vadd.f32 %v6045_v15, %v5570_v19  ;;  %v7986_v35 = vpack.c.bf16 %v6396_v36, %v6395_v31  ;;  %v10212_v42 = vmul.f32 %v8499_v60, %v10190_v55  ;;  %v14735_v31 = vld [vmem:[#allocation38_spill] sm:$0xff]  ;;  %v10228_v15 = vld [vmem:[#allocation2 + $0x2c8] sm:$0xff] }
 0x1b2   : > { %v6399_v11 = vadd.f32 %v6047_v30, %v5571_v59  ;;  %v1367_v50 = vrot.slane %v1159_v16, 1  ;;  %v13969_v18 = vrot.slane %v10204_v47, 1  ;;  %v2130_v3 = vrot.slane %v1811_v27, 2  ;;  %14737 = vst [vmem:[#allocation39_spill] sm:$0xff] %v10228_v15 }
 0x1b3   : > { %14732 = vst [vmem:[#allocation24_spill] sm:$0xff] %v10212_v42  ;;  %v7150_v26 = vshrl.u32 %v7986_v35, 16  ;;  %v13971_v54 = vrot.slane %v10212_v42, 2  ;;  %v2835_v9 = vmul.f32 %v14733_v63, %v8502_v61  ;;  %v3117_v52 = vmul.f32 %v14733_v63, %v14734_v28 }
 0x1b4   : > { %v7988_v19 = vpack.c.bf16 %v6399_v11, %v6398_v56  ;;  %v1373_v36 = vsel %vm1319_vm0, %v1367_v50, %v13969_v18  ;;  %v1655_v59 = vadd.f32 %v1367_v50, %v14735_v31  ;;  %v10226_v16 = vmul.f32 %v9919_v62, %v14734_v28 }
 0x1b5   : > { %v7932_v27 = vrot.slane %v7150_v26, 11  ;;  %v1658_v30 = vadd.f32 %v1373_v36, %v877_v58  ;;  %v2136_v35 = vsel %vm2052_vm1, %v2130_v3, %v13971_v54  ;;  %v3324_v45 = vrot.slane %v3117_v52, 1  ;;  %v14739_v52 = vld [vmem:[#allocation19_spill] sm:$0xff] }
 0x1b6   : > { %14736 = vst [vmem:[#allocation28_spill] sm:$0xff] %v10226_v16  ;;  %v7155_v56 = vshrl.u32 %v7988_v19, 16  ;;  %v7158_v11 = vshll.u32 %v7988_v19, 16  ;;  %v2484_v25 = vadd.f32 %v2130_v3, %v1655_v59  ;;  %v13974_v18 = vrot.slane %v10226_v16, 1  ;;  %v14740_v59 = vld [vmem:[#allocation29_spill] sm:$0xff] }
 0x1b7   : > { %v2487_v50 = vadd.f32 %v2136_v35, %v1658_v30  ;;  %v3768_v31 = vmul.f32 %v14733_v63, %v8508_v49  ;;  %v10240_v26 = vmul.f32 %v9919_v62, %v8508_v49  ;;  %v4792_v58 = vmul.f32 %v14525_v37, %v10228_v15  ;;  %v693_v16 = vld [vmem:[#allocation2 + $0x230] sm:$0x1] }
 0x1b8   : > { %v10244_v36 = vrot.slane %v7155_v56, 7  ;;  %v2976_v19 = vadd.f32 %v14739_v52, %v2484_v25  ;;  %v3330_v3 = vsel %vm1319_vm0, %v3324_v45, %v13974_v18  ;;  %v5074_v30 = vmul.f32 %v14740_v59, %v10228_v15 }
 0x1b9   : > { %14738 = vst [vmem:[#allocation18_spill] sm:$0xff] %v10240_v26  ;;  %v2979_v35 = vadd.f32 %v2835_v9, %v2487_v50  ;;  %v4086_v63 = vrot.slane %v3768_v31, 2  ;;  %v13977_v54 = vrot.slane %v10240_v26, 2  ;;  %v10255_v28 = vmul.f32 %v14740_v59, %v10234_v34  ;;  %v692_v59 = vld [vmem:[#allocation2 + $0x228] sm:$0x1]  ;;  %v8076_v26 = vld [vmem:[#allocation2 + $0x218] sm:$0xff] }
 0x1ba   : > { %v7160_v56 = vor.u32 %v7158_v11, %v10244_v36  ;;  %v3612_v7 = vadd.f32 %v3324_v45, %v2976_v19  ;;  %v5281_v25 = vrot.slane %v5074_v30, 1  ;;  %v5725_v52 = vmul.f32 %v9944_v33, %v10228_v15  ;;  %v8075_v30 = vld [vmem:[#allocation2 + $0x210] sm:$0xff] }
 0x1bb   : > { %v3615_v18 = vadd.f32 %v3330_v3, %v2979_v35  ;;  %v4092_v9 = vsel %vm2052_vm1, %v4086_v63, %v13977_v54  ;;  %v13984_v50 = vrot.slane %v10255_v28, 1  ;;  %v10266_v31 = vmul.f32 %v9944_v33, %v10234_v34 }
 0x1bc   : > { %v7161_v45 = vsel %vm8551_vm4, %v7932_v27, %v7160_v56  ;;  %v4440_v11 = vadd.f32 %v4086_v63, %v3612_v7  ;;  %v6043_v19 = vrot.slane %v5725_v52, 2  ;;  %v878_v3 = vmul.f32 %v8075_v30, %v8197_v13  ;;  %v2650_v52 = vld [vmem:[#allocation2 + $0x288] sm:$0x1] }
 0x1bd   : > { %7717 = vst [vmem:[%s8571_s28 + $0x78] sm:$0xff] %v7161_v45  ;;  %v4443_v35 = vadd.f32 %v4092_v9, %v3615_v18  ;;  %v5287_v54 = vsel %vm1319_vm0, %v5281_v25, %v13984_v50  ;;  %v13985_v15 = vrot.slane %v10266_v31, 2  ;;  %v879_v42 = vmul.f32 %v8076_v26, %v14705_v48  ;;  %v2651_v18 = vld [vmem:[#allocation2 + $0x290] sm:$0x1] }
 0x1be   : > { %v4933_v39 = vadd.f32 %v14741_v46, %v4440_v11  ;;  %v14742_v27 = vrot.slane %v10051_v8, 1  ;;  %v1815_v63 = vmul.f32 %v8216_v20, %v692_v59  ;;  %v1816_v56 = vmul.f32 %v14710_v17, %v693_v16 }
 0x1bf   : > { %v4936_v9 = vadd.f32 %v4792_v58, %v4443_v35  ;;  %v6049_v45 = vsel %vm2052_vm1, %v6043_v19, %v13985_v15  ;;  %v14743_v30 = vrot.slane %v10055_v32, 1  ;;  %v2836_v46 = vmul.f32 %v9799_v29, %v8224_v22  ;;  %v4607_v35 = vld [vmem:[#allocation2 + $0x2e8] sm:$0x1] }
 0x1c0   : > { %v1659_v7 = vadd.f32 %v14742_v27, %v878_v3  ;;  %v5569_v26 = vadd.f32 %v5281_v25, %v4933_v39  ;;  %v2137_v8 = vrot.slane %v1815_v63, 2  ;;  %v2139_v11 = vrot.slane %v1816_v56, 2  ;;  %v4608_v27 = vld [vmem:[#allocation2 + $0x2f0] sm:$0x1] }
 0x1c1   : > { %v1660_v50 = vadd.f32 %v14743_v30, %v879_v42  ;;  %v2837_v59 = vmul.f32 %v9801_v0, %v8228_v23  ;;  %v5572_v16 = vadd.f32 %v5287_v54, %v4936_v9  ;;  %v3772_v3 = vmul.f32 %v8375_v1, %v2650_v52 }
 0x1c2   : > { %v3773_v58 = vmul.f32 %v14665_v38, %v2651_v18  ;;  %v4793_v32 = vmul.f32 %v14668_v4, %v10140_v40  ;;  %v6397_v42 = vadd.f32 %v6043_v19, %v5569_v26  ;;  %v14744_v30 = vrot.slane %v10072_v2, 2 }
 0x1c3   : > { %v14745_v25 = vrot.slane %v10079_v24, 2  ;;  %v4794_v54 = vmul.f32 %v14670_v12, %v10149_v53  ;;  %v6400_v56 = vadd.f32 %v6049_v45, %v5572_v16  ;;  %v4093_v9 = vrot.slane %v3772_v3, 2 }
 0x1c4   : > { %v2138_v39 = vsel %vm2052_vm1, %v14744_v30, %v2137_v8  ;;  %v7987_v15 = vpack.c.bf16 %v6397_v42, %v6397_v42  ;;  %v4095_v38 = vrot.slane %v3773_v58, 2  ;;  %v5729_v4 = vmul.f32 %v9835_v44, %v4607_v35  ;;  %v2652_v35 = vld [vmem:[#allocation2 + $0x298] sm:$0x1] }
 0x1c5   : > { %v2140_v63 = vsel %vm2052_vm1, %v14745_v25, %v2139_v11  ;;  %v2488_v52 = vadd.f32 %v2138_v39, %v1659_v7  ;;  %v5730_v19 = vmul.f32 %v9842_v41, %v4608_v27  ;;  %v7989_v2 = vpack.c.bf16 %v6400_v56, %v6400_v56 }
 0x1c6   : > { %v2489_v18 = vadd.f32 %v2140_v63, %v1660_v50  ;;  %v14746_v24 = vrot.slane %v10122_v57, 2  ;;  %v7163_v30 = vshrl.u32 %v7987_v15, 16  ;;  %v14747_v25 = vrot.slane %v10136_v21, 2  ;;  %v4609_v63 = vld [vmem:[#allocation2 + $0x2f8] sm:$0x1] }
 0x1c7   : > { %v2980_v26 = vadd.f32 %v2836_v46, %v2488_v52  ;;  %v6050_v50 = vrot.slane %v5729_v4, 2  ;;  %v6052_v45 = vrot.slane %v5730_v19, 2  ;;  %v7168_v16 = vshrl.u32 %v7989_v2, 16 }
 0x1c8   : > { %v2981_v8 = vadd.f32 %v2837_v59, %v2489_v18  ;;  %v4094_v11 = vsel %vm2052_vm1, %v14746_v24, %v4093_v9  ;;  %v4096_v7 = vsel %vm2052_vm1, %v14747_v25, %v4095_v38  ;;  %v7171_v3 = vshll.u32 %v7989_v2, 16  ;;  %v694_v59 = vld [vmem:[#allocation2 + $0x238] sm:$0x1] }
 0x1c9   : > { %v14748_v44 = vrot.slane %v10108_v10, 1  ;;  %v14749_v41 = vrot.slane %v10112_v51, 1  ;;  %v7933_v57 = vrot.slane %v7163_v30, 11  ;;  %v14750_v27 = vrot.slane %v10181_v14, 2  ;;  %v14753_v30 = vld [vmem:[#allocation31_spill] sm:$0xff] }
 0x1ca   : > { %v14751_v21 = vrot.slane %v10188_v5, 2  ;;  %v7175_v38 = vrot.slane %v10244_v36, 4  ;;  %v10322_v42 = vrot.slane %v7168_v16, 7  ;;  %v880_v51 = vmul.f32 %v14502_v6, %v10190_v55 }
 0x1cb   : > { %v3616_v58 = vadd.f32 %v14748_v44, %v2980_v26  ;;  %v3617_v46 = vadd.f32 %v14749_v41, %v2981_v8  ;;  %v6051_v15 = vsel %vm2052_vm1, %v14750_v27, %v6050_v50  ;;  %v1817_v56 = vmul.f32 %v8499_v60, %v694_v59  ;;  %v14755_v50 = vld [vmem:[#allocation10_spill] sm:$0xff] }
 0x1cc   : > { %v6053_v4 = vsel %vm2052_vm1, %v14751_v21, %v6052_v45  ;;  %v2838_v14 = vmul.f32 %v9919_v62, %v8502_v61  ;;  %v3774_v5 = vmul.f32 %v8508_v49, %v2652_v35  ;;  %v4795_v52 = vmul.f32 %v14525_v37, %v10234_v34  ;;  %v14761_v44 = vld [vmem:[#allocation18_spill] sm:$0xff]  ;;  %v14764_v21 = vld [vmem:[#allocation9_spill] sm:$0xff] }
 0x1cd   : > { %v4444_v10 = vadd.f32 %v4094_v11, %v3616_v58  ;;  %v4445_v39 = vadd.f32 %v4096_v7, %v3617_v46  ;;  %v7173_v18 = vor.u32 %v7171_v3, %v10322_v42  ;;  %v14752_v2 = vrot.slane %v10204_v47, 1  ;;  %v14759_v47 = vld [vmem:[#allocation24_spill] sm:$0xff] }
 0x1ce   : > { %v2141_v55 = vrot.slane %v1817_v56, 2  ;;  %v4097_v8 = vrot.slane %v3774_v5, 2  ;;  %v5731_v24 = vmul.f32 %v9944_v33, %v4609_v63  ;;  %v7184_v11 = vrot.slane %v10322_v42, 4  ;;  %v14766_v63 = vld [vmem:[#allocation26_spill] sm:$0xff]  ;;  %v14767_v5 = vld [vmem:[#allocation5_spill] sm:$0xff] }
 0x1cf   : > { %v4937_v9 = vadd.f32 %v4793_v32, %v4444_v10  ;;  %v4938_v19 = vadd.f32 %v4794_v54, %v4445_v39  ;;  %v1661_v26 = vadd.f32 %v14752_v2, %v880_v51  ;;  %v7174_v62 = vsel %vm8551_vm4, %v7933_v57, %v7173_v18  ;;  %v14757_v32 = vld [vmem:[#allocation33_spill] sm:$0xff] }
 0x1d0   : > { %v14754_v25 = vrot.slane %v14753_v30, 1  ;;  %v14756_v45 = vrot.slane %v14755_v50, 1  ;;  %v10345_v54 = vmul.f32 %v14757_v32, %v8197_v13  ;;  %7718 = vst [vmem:[%s8571_s28 + $0x80] sm:$0xf] %v7174_v62  ;;  %v14760_v3 = vrot.slane %v14759_v47, 2 }
 0x1d1   : > { %v14762_v58 = vrot.slane %v14761_v44, 2  ;;  %v6054_v46 = vrot.slane %v5731_v24, 2  ;;  %v10356_v59 = vmul.f32 %v14757_v32, %v14705_v48  ;;  %v884_v10 = vmul.f32 %v14764_v21, %v8197_v13 }
 0x1d2   : > { %v5573_v7 = vadd.f32 %v14754_v25, %v4937_v9  ;;  %v5574_v16 = vadd.f32 %v14756_v45, %v4938_v19  ;;  %14758 = vst [vmem:[#allocation12_spill] sm:$0xff] %v10345_v54  ;;  %v2142_v33 = vsel %vm2052_vm1, %v14760_v3, %v2141_v55  ;;  %v14765_v39 = vrot.slane %v10266_v31, 2  ;;  %v14768_v9 = vld [vmem:[#allocation6_spill] sm:$0xff]  ;;  %v14769_v25 = vld [vmem:[#allocation28_spill] sm:$0xff] }
 0x1d3   : > { %v4098_v41 = vsel %vm2052_vm1, %v14762_v58, %v4097_v8  ;;  %14763 = vst [vmem:[#allocation22_spill] sm:$0xff] %v10356_v59  ;;  %v2490_v27 = vadd.f32 %v2142_v33, %v1661_v26  ;;  %v885_v56 = vmul.f32 %v14766_v63, %v14705_v48  ;;  %v1163_v18 = vmul.f32 %v14764_v21, %v14767_v5 }
 0x1d4   : > { %v6401_v35 = vadd.f32 %v6051_v15, %v5573_v7  ;;  %v6402_v57 = vadd.f32 %v6053_v4, %v5574_v16  ;;  %v6055_v51 = vsel %vm2052_vm1, %v14765_v39, %v6054_v46  ;;  %v1164_v19 = vmul.f32 %v14766_v63, %v14768_v9 }
 0x1d5   : > { %v2982_v15 = vadd.f32 %v2838_v14, %v2490_v27  ;;  %v10371_v4 = vmul.f32 %v9799_v29, %v14767_v5  ;;  %v10375_v31 = vmul.f32 %v9801_v0, %v14768_v9  ;;  %v1374_v26 = vrot.slane %v1163_v18, 1  ;;  %v10575_v9 = vld [vmem:[#allocation2 + $0x328] sm:$0xff]  ;;  %v10591_v5 = vld [vmem:[#allocation2 + $0x340] sm:$0xff] }
 0x1d6   : > { %v7990_v2 = vpack.c.bf16 %v6402_v57, %v6401_v35  ;;  %v1375_v55 = vrot.slane %v1164_v19, 1  ;;  %v1818_v8 = vmul.f32 %v14764_v21, %v8216_v20  ;;  %v1819_v24 = vmul.f32 %v14766_v63, %v14710_v17  ;;  %14793 = vst [vmem:[#allocation24_spill] sm:$0xff] %v10575_v9 }
 0x1d7   : > { %v14770_v14 = vrot.slane %v14769_v25, 1  ;;  %v13995_v50 = vrot.slane %v10371_v4, 1  ;;  %v13991_v45 = vrot.slane %v10375_v31, 1  ;;  %v1662_v16 = vadd.f32 %v1374_v26, %v10345_v54 }
 0x1d8   : > { %v7177_v62 = vshrl.u32 %v7990_v2, 16  ;;  %v7180_v30 = vshll.u32 %v7990_v2, 16  ;;  %v1663_v47 = vadd.f32 %v1375_v55, %v10356_v59  ;;  %v10389_v3 = vmul.f32 %v9799_v29, %v8216_v20 }
 0x1d9   : > { %v3618_v7 = vadd.f32 %v14770_v14, %v2982_v15  ;;  %v1378_v58 = vsel %vm1319_vm0, %v1374_v26, %v13995_v50  ;;  %v10396_v46 = vmul.f32 %v9801_v0, %v14710_v17  ;;  %v1380_v35 = vsel %vm1319_vm0, %v1375_v55, %v13991_v45 }
 0x1da   : > { %v7179_v33 = vrot.slane %v7177_v62, 7  ;;  %v1665_v57 = vadd.f32 %v1378_v58, %v884_v10  ;;  %v2143_v27 = vrot.slane %v1818_v8, 2  ;;  %v2144_v21 = vrot.slane %v1819_v24, 2  ;;  %v14774_v8 = vld [vmem:[#allocation32_spill] sm:$0xff] }
 0x1db   : > { %v4446_v44 = vadd.f32 %v4098_v41, %v3618_v7  ;;  %v1666_v63 = vadd.f32 %v1380_v35, %v885_v56  ;;  %v13989_v41 = vrot.slane %v10389_v3, 2  ;;  %v13988_v18 = vrot.slane %v10396_v46, 2 }
 0x1dc   : > { %v7182_v29 = vor.u32 %v7180_v30, %v7179_v33  ;;  %v2491_v19 = vadd.f32 %v2143_v27, %v1662_v16  ;;  %v2492_v2 = vadd.f32 %v2144_v21, %v1663_v47  ;;  %v10405_v0 = vmul.f32 %v14757_v32, %v8224_v22  ;;  %v14776_v16 = vld [vmem:[#allocation13_spill] sm:$0xff]  ;;  %v14777_v33 = vld [vmem:[#allocation14_spill] sm:$0xff] }
 0x1dd   : > { %v4939_v39 = vadd.f32 %v4795_v52, %v4446_v44  ;;  %v14772_v15 = vrot.slane %v10255_v28, 1  ;;  %v2147_v52 = vsel %vm2052_vm1, %v2143_v27, %v13989_v41  ;;  %v10418_v56 = vmul.f32 %v14757_v32, %v8228_v23  ;;  %v14775_v28 = vld [vmem:[#allocation36_spill] sm:$0xff] }
 0x1de   : > { %14771 = vst [vmem:[#allocation27_spill] sm:$0xff] %v10405_v0  ;;  %v7183_v10 = vsel %vm8551_vm4, %v7175_v38, %v7182_v29  ;;  %v2149_v55 = vsel %vm2052_vm1, %v2144_v21, %v13988_v18  ;;  %v2494_v36 = vadd.f32 %v2147_v52, %v1665_v57  ;;  %v2842_v38 = vmul.f32 %v14774_v8, %v8224_v22 }
 0x1df   : > { %v5575_v26 = vadd.f32 %v14772_v15, %v4939_v39  ;;  %14773 = vst [vmem:[#allocation35_spill] sm:$0xff] %v10418_v56  ;;  %7719 = vst [vmem:[%s8571_s28 + $0x84] sm:$0xff] %v7183_v10  ;;  %v2843_v24 = vmul.f32 %v14775_v28, %v8228_v23  ;;  %v2495_v30 = vadd.f32 %v2149_v55, %v1666_v63  ;;  %v14778_v63 = vld [vmem:[#allocation15_spill] sm:$0xff] }
 0x1e0   : > { %v2983_v25 = vadd.f32 %v10405_v0, %v2491_v19  ;;  %v2984_v14 = vadd.f32 %v10418_v56, %v2492_v2  ;;  %v2986_v7 = vadd.f32 %v2842_v38, %v2494_v36  ;;  %v3121_v47 = vmul.f32 %v14774_v8, %v14776_v16 }
 0x1e1   : > { %v6403_v62 = vadd.f32 %v6055_v51, %v5575_v26  ;;  %v3122_v44 = vmul.f32 %v14775_v28, %v14777_v33  ;;  %v10436_v58 = vmul.f32 %v10140_v40, %v14776_v16  ;;  %v2987_v57 = vadd.f32 %v2843_v24, %v2495_v30 }
 0x1e2   : > { %v10440_v51 = vmul.f32 %v10149_v53, %v14777_v33  ;;  %v3775_v27 = vmul.f32 %v14774_v8, %v8375_v1  ;;  %v3331_v21 = vrot.slane %v3121_v47, 1  ;;  %v3776_v19 = vmul.f32 %v14775_v28, %v14778_v63  ;;  %v14798_v28 = vld [vmem:[#allocation29_spill] sm:$0xff] }
 0x1e3   : > { %v7991_v35 = vpack.c.bf16 %v6403_v62, %v6403_v62  ;;  %v3332_v29 = vrot.slane %v3122_v44, 1  ;;  %v13990_v39 = vrot.slane %v10436_v58, 1  ;;  %v10450_v26 = vmul.f32 %v10140_v40, %v8375_v1  ;;  %v10462_v44 = vld [vmem:[#allocation2 + $0x318] sm:$0xff] }
 0x1e4   : > { %v13992_v15 = vrot.slane %v10440_v51, 1  ;;  %v3619_v55 = vadd.f32 %v3331_v21, %v2983_v25  ;;  %v10457_v38 = vmul.f32 %v10149_v53, %v14778_v63  ;;  %v4099_v47 = vrot.slane %v3775_v27, 2  ;;  %14779 = vst [vmem:[#allocation34_spill] sm:$0xff] %v10462_v44 }
 0x1e5   : > { %v7186_v2 = vshrl.u32 %v7991_v35, 16  ;;  %v7189_v10 = vshll.u32 %v7991_v35, 16  ;;  %v3335_v52 = vsel %vm1319_vm0, %v3331_v21, %v13990_v39  ;;  %v3620_v36 = vadd.f32 %v3332_v29, %v2984_v14  ;;  %v10466_v14 = vld [vmem:[#allocation2 + $0x320] sm:$0xff] }
 0x1e6   : > { %v3337_v62 = vsel %vm1319_vm0, %v3332_v29, %v13992_v15  ;;  %v3622_v30 = vadd.f32 %v3335_v52, %v2986_v7  ;;  %v4100_v18 = vrot.slane %v3776_v19, 2  ;;  %v13994_v41 = vrot.slane %v10450_v26, 2  ;;  %14780 = vst [vmem:[#allocation37_spill] sm:$0xff] %v10466_v14  ;;  %v10482_v19 = vld [vmem:[#allocation2 + $0x330] sm:$0xff]  ;;  %v14784_v15 = vld [vmem:[#allocation20_spill] sm:$0xff] }
 0x1e7   : > { %v7188_v24 = vrot.slane %v7186_v2, 7  ;;  %v3623_v35 = vadd.f32 %v3337_v62, %v2987_v57  ;;  %v13993_v25 = vrot.slane %v10457_v38, 2  ;;  %v4447_v39 = vadd.f32 %v4099_v47, %v3619_v55  ;;  %v14781_v2 = vld [vmem:[#allocation16_spill] sm:$0xff] }
 0x1e8   : > { %v10470_v45 = vmul.f32 %v14757_v32, %v14781_v2  ;;  %v10474_v7 = vmul.f32 %v14757_v32, %v14670_v12  ;;  %v4103_v57 = vsel %vm2052_vm1, %v4099_v47, %v13994_v41  ;;  %v4448_v29 = vadd.f32 %v4100_v18, %v3620_v36  ;;  %v14785_v41 = vld [vmem:[#allocation21_spill] sm:$0xff] }
 0x1e9   : > { %v7191_v21 = vor.u32 %v7189_v10, %v7188_v24  ;;  %v4105_v27 = vsel %vm2052_vm1, %v4100_v18, %v13993_v25  ;;  %v10484_v10 = vld [vmem:[#allocation2 + $0x338] sm:$0xff]  ;;  %v4799_v52 = vmul.f32 %v14781_v2, %v10462_v44  ;;  %v4450_v24 = vadd.f32 %v4103_v57, %v3622_v30 }
 0x1ea   : > { %14782 = vst [vmem:[#allocation38_spill] sm:$0xff] %v10470_v45  ;;  %14783 = vst [vmem:[#allocation19_spill] sm:$0xff] %v10474_v7  ;;  %v4451_v62 = vadd.f32 %v4105_v27, %v3623_v35  ;;  %v4800_v47 = vmul.f32 %v14670_v12, %v10466_v14  ;;  %v4940_v18 = vadd.f32 %v10470_v45, %v4447_v39  ;;  %v10519_v27 = vld [vmem:[%s13700_s1 + $0x20] ss:$0 sm:$0xff] }
 0x1eb   : > { %v7192_v55 = vsel %vm8551_vm4, %v7184_v11, %v7191_v21  ;;  %v4941_v36 = vadd.f32 %v10474_v7, %v4448_v29  ;;  %v5078_v25 = vmul.f32 %v14784_v15, %v10462_v44  ;;  %v5079_v50 = vmul.f32 %v14785_v41, %v10466_v14  ;;  %v10512_v21 = vld [vmem:[%s13700_s1 + $0x18] ss:$0 sm:$0xff]  ;;  %v700_v7 = vld [vmem:[#allocation2 + $0x268] sm:$0xff] }
 0x1ec   : > { %7720 = vst [vmem:[%s8571_s28 + $0x8c] sm:$0xf] %v7192_v55  ;;  %v4943_v42 = vadd.f32 %v4799_v52, %v4450_v24  ;;  %v4944_v33 = vadd.f32 %v4800_v47, %v4451_v62  ;;  %v10503_v11 = vmul.f32 %v14784_v15, %v10482_v19  ;;  %v10507_v30 = vmul.f32 %v14785_v41, %v10484_v10 }
 0x1ed   : > { %v5288_v35 = vrot.slane %v5078_v25, 1  ;;  %v5289_v39 = vrot.slane %v5079_v50, 1  ;;  %v5732_v57 = vmul.f32 %v10512_v21, %v10462_v44  ;;  %v5733_v29 = vmul.f32 %v10519_v27, %v10466_v14 }
 0x1ee   : > { %14786 = vst [vmem:[#allocation11_spill] sm:$0xff] %v10507_v30  ;;  %v14009_v52 = vrot.slane %v10503_v11, 1  ;;  %v14008_v50 = vrot.slane %v10507_v30, 1  ;;  %v10527_v25 = vmul.f32 %v10512_v21, %v10482_v19  ;;  %v10531_v55 = vmul.f32 %v10519_v27, %v10484_v10 }
 0x1ef   : > { %v5576_v24 = vadd.f32 %v5288_v35, %v4940_v18  ;;  %v5577_v62 = vadd.f32 %v5289_v39, %v4941_v36  ;;  %v6056_v47 = vrot.slane %v5732_v57, 2  ;;  %v6057_v41 = vrot.slane %v5733_v29, 2  ;;  %v10541_v36 = vld [vmem:[#allocation2 + $0x280] sm:$0xff] }
 0x1f0   : > { %v5292_v45 = vsel %vm1319_vm0, %v5288_v35, %v14009_v52  ;;  %v5294_v15 = vsel %vm1319_vm0, %v5289_v39, %v14008_v50  ;;  %v14011_v56 = vrot.slane %v10527_v25, 2  ;;  %v14010_v0 = vrot.slane %v10531_v55, 2 }
 0x1f1   : > { %v5579_v16 = vadd.f32 %v5292_v45, %v4943_v42  ;;  %v5580_v14 = vadd.f32 %v5294_v15, %v4944_v33  ;;  %v6404_v44 = vadd.f32 %v6056_v47, %v5576_v24  ;;  %v6405_v18 = vadd.f32 %v6057_v41, %v5577_v62  ;;  %v14788_v42 = vld [vmem:[#allocation23_spill] sm:$0xff] }
 0x1f2   : > { %v6060_v57 = vsel %vm2052_vm1, %v6056_v47, %v14011_v56  ;;  %v6062_v35 = vsel %vm2052_vm1, %v6057_v41, %v14010_v0  ;;  %v10551_v39 = vmul.f32 %v14757_v32, %v14502_v6  ;;  %v886_v29 = vmul.f32 %v14502_v6, %v700_v7 }
 0x1f3   : > { %v6407_v45 = vadd.f32 %v6060_v57, %v5579_v16  ;;  %v6408_v33 = vadd.f32 %v6062_v35, %v5580_v14  ;;  %v7992_v15 = vpack.c.bf16 %v6405_v18, %v6404_v44  ;;  %v1165_v24 = vmul.f32 %v14788_v42, %v700_v7  ;;  %v14791_v44 = vld [vmem:[#allocation39_spill] sm:$0xff] }
 0x1f4   : > { %14787 = vst [vmem:[#allocation31_spill] sm:$0xff] %v10551_v39  ;;  %v10557_v62 = vmul.f32 %v14788_v42, %v10541_v36  ;;  %v1820_v47 = vmul.f32 %v8499_v60, %v700_v7  ;;  %v10562_v41 = vmul.f32 %v8499_v60, %v10541_v36  ;;  %v10566_v50 = vmul.f32 %v14757_v32, %v8502_v61  ;;  %v14792_v7 = vld [vmem:[#allocation25_spill] sm:$0xff] }
 0x1f5   : > { %v7994_v52 = vpack.c.bf16 %v6408_v33, %v6407_v45  ;;  %v7194_v16 = vshrl.u32 %v7992_v15, 16  ;;  %v1376_v14 = vrot.slane %v1165_v24, 1  ;;  %v2844_v18 = vmul.f32 %v14791_v44, %v8502_v61 }
 0x1f6   : > { %14789 = vst [vmem:[#allocation10_spill] sm:$0xff] %v10562_v41  ;;  %14790 = vst [vmem:[#allocation33_spill] sm:$0xff] %v10566_v50  ;;  %v14018_v57 = vrot.slane %v10557_v62, 1  ;;  %v2145_v35 = vrot.slane %v1820_v47, 2  ;;  %v14019_v0 = vrot.slane %v10562_v41, 2  ;;  %v3123_v56 = vmul.f32 %v14791_v44, %v14792_v7 }
 0x1f7   : > { %v7934_v42 = vrot.slane %v7194_v16, 11  ;;  %v7199_v59 = vshrl.u32 %v7994_v52, 16  ;;  %v7202_v54 = vshll.u32 %v7994_v52, 16  ;;  %v1664_v32 = vadd.f32 %v1376_v14, %v10551_v39 }
 0x1f8   : > { %v1382_v45 = vsel %vm1319_vm0, %v1376_v14, %v14018_v57  ;;  %v2151_v33 = vsel %vm2052_vm1, %v2145_v35, %v14019_v0  ;;  %v10585_v15 = vmul.f32 %v10234_v34, %v14792_v7  ;;  %v3333_v24 = vrot.slane %v3123_v56, 1  ;;  %v10598_v0 = vld [vmem:[#allocation2 + $0x18] sm:$0xff] }
 0x1f9   : > { %v10587_v47 = vrot.slane %v7199_v59, 7  ;;  %v1667_v52 = vadd.f32 %v1382_v45, %v886_v29  ;;  %v2493_v16 = vadd.f32 %v2145_v35, %v1664_v32  ;;  %v3777_v39 = vmul.f32 %v14791_v44, %v8508_v49  ;;  %14796 = vst [vmem:[#allocation26_spill] sm:$0xff] %v10598_v0 }
 0x1fa   : > { %14794 = vst [vmem:[#allocation18_spill] sm:$0xff] %v10585_v15  ;;  %v14025_v14 = vrot.slane %v10585_v15, 1  ;;  %v10596_v57 = vmul.f32 %v10234_v34, %v8508_v49  ;;  %v10602_v56 = vmul.f32 %v10598_v0, %v14525_v37  ;;  %v4801_v59 = vmul.f32 %v14525_v37, %v10575_v9 }
 0x1fb   : > { %v7204_v29 = vor.u32 %v7202_v54, %v10587_v47  ;;  %v2496_v44 = vadd.f32 %v2151_v33, %v1667_v52  ;;  %v2985_v35 = vadd.f32 %v10566_v50, %v2493_v16  ;;  %v4101_v32 = vrot.slane %v3777_v39, 2  ;;  %v10623_v39 = vld [vmem:[%s13700_s1 + $0x28] ss:$0 sm:$0xff] }
 0x1fc   : > { %14795 = vst [vmem:[#allocation9_spill] sm:$0xff] %v10596_v57  ;;  %14797 = vst [vmem:[#allocation28_spill] sm:$0xff] %v10602_v56  ;;  %v3339_v45 = vsel %vm1319_vm0, %v3333_v24, %v14025_v14  ;;  %v14031_v7 = vrot.slane %v10596_v57, 2  ;;  %v5080_v0 = vmul.f32 %v14798_v28, %v10575_v9  ;;  %v10616_v41 = vmul.f32 %v14798_v28, %v10591_v5  ;;  %v704_v14 = vld [vmem:[#allocation2 + $0x288] sm:$0x1] }
 0x1fd   : > { %v7205_v54 = vsel %vm8551_vm4, %v7934_v42, %v7204_v29  ;;  %v2988_v33 = vadd.f32 %v2844_v18, %v2496_v44  ;;  %v3621_v52 = vadd.f32 %v3333_v24, %v2985_v35  ;;  %v5734_v16 = vmul.f32 %v10623_v39, %v10575_v9  ;;  %v705_v18 = vld [vmem:[#allocation2 + $0x290] sm:$0x1] }
 0x1fe   : > { %14799 = vst [vmem:[#allocation39_spill] sm:$0xff] %v10616_v41  ;;  %7721 = vst [vmem:[%s8571_s28 + $0x90] sm:$0xff] %v7205_v54  ;;  %v4107_v28 = vsel %vm2052_vm1, %v4101_v32, %v14031_v7  ;;  %v5290_v50 = vrot.slane %v5080_v0, 1  ;;  %v14036_v15 = vrot.slane %v10616_v41, 1  ;;  %v10634_v42 = vmul.f32 %v10623_v39, %v10591_v5  ;;  %v8081_v35 = vld [vmem:[#allocation2 + $0x270] sm:$0xff]  ;;  %v8082_v0 = vld [vmem:[#allocation2 + $0x278] sm:$0xff] }
 0x1ff   : > { %v3624_v24 = vadd.f32 %v3339_v45, %v2988_v33  ;;  %v4449_v29 = vadd.f32 %v4101_v32, %v3621_v52  ;;  %v6058_v44 = vrot.slane %v5734_v16, 2  ;;  %v887_v9 = vmul.f32 %v8081_v35, %v8197_v13  ;;  %v2662_v52 = vld [vmem:[#allocation2 + $0x2e8] sm:$0x1]  ;;  %v2663_v16 = vld [vmem:[#allocation2 + $0x2f0] sm:$0x1] }
 0x200   : > { %v5296_v54 = vsel %vm1319_vm0, %v5290_v50, %v14036_v15  ;;  %v14038_v7 = vrot.slane %v10634_v42, 2  ;;  %v888_v57 = vmul.f32 %v8082_v0, %v14705_v48  ;;  %v1824_v43 = vmul.f32 %v8216_v20, %v704_v14 }
 0x201   : > { %v4452_v8 = vadd.f32 %v4107_v28, %v3624_v24  ;;  %v4942_v30 = vadd.f32 %v10602_v56, %v4449_v29  ;;  %v14800_v32 = vrot.slane %v10371_v4, 1  ;;  %v1825_v33 = vmul.f32 %v14710_v17, %v705_v18 }
 0x202   : > { %v6064_v35 = vsel %vm2052_vm1, %v6058_v44, %v14038_v7  ;;  %v14801_v15 = vrot.slane %v10375_v31, 1  ;;  %v2152_v0 = vrot.slane %v1824_v43, 2  ;;  %v2845_v28 = vmul.f32 %v10140_v40, %v8224_v22  ;;  %v4619_v31 = vld [vmem:[#allocation2 + $0x348] sm:$0x1] }
 0x203   : > { %v1668_v45 = vadd.f32 %v14800_v32, %v887_v9  ;;  %v4945_v14 = vadd.f32 %v4801_v59, %v4452_v8  ;;  %v5578_v24 = vadd.f32 %v5290_v50, %v4942_v30  ;;  %v2154_v29 = vrot.slane %v1825_v33, 2  ;;  %v4620_v59 = vld [vmem:[#allocation2 + $0x350] sm:$0x1] }
 0x204   : > { %v1669_v41 = vadd.f32 %v14801_v15, %v888_v57  ;;  %v2846_v9 = vmul.f32 %v10149_v53, %v8228_v23  ;;  %v14802_v4 = vrot.slane %v10389_v3, 2  ;;  %v3781_v32 = vmul.f32 %v8375_v1, %v2662_v52 }
 0x205   : > { %v3782_v7 = vmul.f32 %v14778_v63, %v2663_v16  ;;  %v4802_v43 = vmul.f32 %v14781_v2, %v10482_v19  ;;  %v5581_v57 = vadd.f32 %v5296_v54, %v4945_v14  ;;  %v6406_v15 = vadd.f32 %v6058_v44, %v5578_v24 }
 0x206   : > { %v2153_v18 = vsel %vm2052_vm1, %v14802_v4, %v2152_v0  ;;  %v14803_v8 = vrot.slane %v10396_v46, 2  ;;  %v4108_v3 = vrot.slane %v3781_v32, 2  ;;  %v4803_v52 = vmul.f32 %v14670_v12, %v10484_v10  ;;  %v706_v32 = vld [vmem:[#allocation2 + $0x298] sm:$0x1] }
 0x207   : > { %v2497_v50 = vadd.f32 %v2153_v18, %v1668_v45  ;;  %v4110_v56 = vrot.slane %v3782_v7, 2  ;;  %v6409_v0 = vadd.f32 %v6064_v35, %v5581_v57  ;;  %v7993_v16 = vpack.c.bf16 %v6406_v15, %v6406_v15 }
 0x208   : > { %v2155_v30 = vsel %vm2052_vm1, %v14803_v8, %v2154_v29  ;;  %v5738_v63 = vmul.f32 %v10512_v21, %v4619_v31  ;;  %v14804_v44 = vrot.slane %v10450_v26, 2  ;;  %v14805_v54 = vrot.slane %v10457_v38, 2  ;;  %v2664_v31 = vld [vmem:[#allocation2 + $0x2f8] sm:$0x1] }
 0x209   : > { %v2498_v33 = vadd.f32 %v2155_v30, %v1669_v41  ;;  %v2989_v4 = vadd.f32 %v2845_v28, %v2497_v50  ;;  %v5739_v41 = vmul.f32 %v10519_v27, %v4620_v59  ;;  %v7995_v7 = vpack.c.bf16 %v6409_v0, %v6409_v0  ;;  %v4621_v30 = vld [vmem:[#allocation2 + $0x358] sm:$0x1] }
 0x20a   : > { %v4109_v46 = vsel %vm2052_vm1, %v14804_v44, %v4108_v3  ;;  %v4111_v45 = vsel %vm2052_vm1, %v14805_v54, %v4110_v56  ;;  %v7207_v14 = vshrl.u32 %v7993_v16, 16  ;;  %v14806_v24 = vrot.slane %v10436_v58, 1 }
 0x20b   : > { %v2990_v2 = vadd.f32 %v2846_v9, %v2498_v33  ;;  %v6065_v29 = vrot.slane %v5738_v63, 2  ;;  %v14807_v28 = vrot.slane %v10440_v51, 1  ;;  %v6067_v9 = vrot.slane %v5739_v41, 2  ;;  %v14812_v41 = vld [vmem:[#allocation11_spill] sm:$0xff] }
 0x20c   : > { %v3625_v35 = vadd.f32 %v14806_v24, %v2989_v4  ;;  %v7219_v26 = vrot.slane %v10587_v47, 4  ;;  %v889_v38 = vmul.f32 %v14502_v6, %v10541_v36  ;;  %v7935_v56 = vrot.slane %v7207_v14, 11  ;;  %v14814_v24 = vld [vmem:[#allocation32_spill] sm:$0xff]  ;;  %v14835_v47 = vld [vmem:[#allocation14_spill] sm:$0xff] }
 0x20d   : > { %v3626_v18 = vadd.f32 %v14807_v28, %v2990_v2  ;;  %v7212_v57 = vshrl.u32 %v7995_v7, 16  ;;  %v7215_v15 = vshll.u32 %v7995_v7, 16  ;;  %v14808_v58 = vrot.slane %v10527_v25, 2 }
 0x20e   : > { %v4453_v8 = vadd.f32 %v4109_v46, %v3625_v35  ;;  %v14809_v51 = vrot.slane %v10531_v55, 2  ;;  %v14810_v59 = vrot.slane %v10557_v62, 1  ;;  %v1826_v0 = vmul.f32 %v8499_v60, %v706_v32 }
 0x20f   : > { %v4454_v50 = vadd.f32 %v4111_v45, %v3626_v18  ;;  %v6066_v63 = vsel %vm2052_vm1, %v14808_v58, %v6065_v29  ;;  %v10691_v3 = vrot.slane %v7212_v57, 7  ;;  %v2847_v16 = vmul.f32 %v10234_v34, %v8502_v61 }
 0x210   : > { %v6068_v2 = vsel %vm2052_vm1, %v14809_v51, %v6067_v9  ;;  %v1670_v33 = vadd.f32 %v14810_v59, %v889_v38  ;;  %v4946_v36 = vadd.f32 %v4802_v43, %v4453_v8  ;;  %v3783_v25 = vmul.f32 %v8508_v49, %v2664_v31  ;;  %v14816_v9 = vld [vmem:[#allocation10_spill] sm:$0xff]  ;;  %v14818_v38 = vld [vmem:[#allocation36_spill] sm:$0xff]  ;;  %v14819_v8 = vld [vmem:[#allocation9_spill] sm:$0xff] }
 0x211   : > { %v4947_v4 = vadd.f32 %v4803_v52, %v4454_v50  ;;  %v4804_v55 = vmul.f32 %v14525_v37, %v10591_v5  ;;  %v5740_v44 = vmul.f32 %v10623_v39, %v4621_v30  ;;  %v7217_v62 = vor.u32 %v7215_v15, %v10691_v3  ;;  %v14823_v59 = vld [vmem:[#allocation6_spill] sm:$0xff] }
 0x212   : > { %v14811_v46 = vrot.slane %v10503_v11, 1  ;;  %v2156_v43 = vrot.slane %v1826_v0, 2  ;;  %v14813_v7 = vrot.slane %v14812_v41, 1  ;;  %v4112_v52 = vrot.slane %v3783_v25, 2 }
 0x213   : > { %v6069_v14 = vrot.slane %v5740_v44, 2  ;;  %v893_v35 = vmul.f32 %v14814_v24, %v8197_v13  ;;  %v7218_v28 = vsel %vm8551_vm4, %v7935_v56, %v7217_v62  ;;  %v14817_v32 = vrot.slane %v14816_v9, 2  ;;  %v14822_v56 = vld [vmem:[#allocation5_spill] sm:$0xff]  ;;  %v14827_v9 = vld [vmem:[#allocation22_spill] sm:$0xff] }
 0x214   : > { %v5582_v54 = vadd.f32 %v14811_v46, %v4946_v36  ;;  %v5583_v34 = vadd.f32 %v14813_v7, %v4947_v4  ;;  %v894_v31 = vmul.f32 %v14818_v38, %v14705_v48  ;;  %7722 = vst [vmem:[%s8571_s28 + $0x98] sm:$0xf] %v7218_v28  ;;  %v14820_v30 = vrot.slane %v14819_v8, 2  ;;  %v14824_v7 = vld [vmem:[#allocation18_spill] sm:$0xff]  ;;  %v14826_v28 = vld [vmem:[#allocation12_spill] sm:$0xff] }
 0x215   : > { %v2157_v11 = vsel %vm2052_vm1, %v14817_v32, %v2156_v43  ;;  %v14821_v58 = vrot.slane %v10634_v42, 2  ;;  %v1170_v36 = vmul.f32 %v14818_v38, %v14823_v59  ;;  %v10728_v0 = vmul.f32 %v10140_v40, %v14822_v56 }
 0x216   : > { %v6410_v18 = vadd.f32 %v6066_v63, %v5582_v54  ;;  %v6411_v57 = vadd.f32 %v6068_v2, %v5583_v34  ;;  %v2499_v15 = vadd.f32 %v2157_v11, %v1670_v33  ;;  %v4113_v50 = vsel %vm2052_vm1, %v14820_v30, %v4112_v52 }
 0x217   : > { %v6070_v51 = vsel %vm2052_vm1, %v14821_v58, %v6069_v14  ;;  %v1169_v63 = vmul.f32 %v14814_v24, %v14822_v56  ;;  %v10732_v2 = vmul.f32 %v10149_v53, %v14823_v59  ;;  %v1827_v42 = vmul.f32 %v14814_v24, %v8216_v20  ;;  %v14850_v56 = vld [vmem:[#allocation25_spill] sm:$0xff] }
 0x218   : > { %v7996_v33 = vpack.c.bf16 %v6411_v57, %v6410_v18  ;;  %v2991_v4 = vadd.f32 %v2847_v16, %v2499_v15  ;;  %v1828_v25 = vmul.f32 %v14818_v38, %v14710_v17  ;;  %v1384_v62 = vrot.slane %v1170_v36, 1 }
 0x219   : > { %v1383_v44 = vrot.slane %v1169_v63, 1  ;;  %v14046_v46 = vrot.slane %v10728_v0, 1  ;;  %v14045_v54 = vrot.slane %v10732_v2, 1  ;;  %v14825_v34 = vrot.slane %v14824_v7, 1  ;;  %v14832_v7 = vld [vmem:[#allocation13_spill] sm:$0xff] }
 0x21a   : > { %v7221_v43 = vshrl.u32 %v7996_v33, 16  ;;  %v7224_v41 = vshll.u32 %v7996_v33, 16  ;;  %v10744_v16 = vmul.f32 %v10140_v40, %v8216_v20  ;;  %v1672_v32 = vadd.f32 %v1384_v62, %v14827_v9  ;;  %v14828_v33 = vld [vmem:[#allocation34_spill] sm:$0xff] }
 0x21b   : > { %v3627_v52 = vadd.f32 %v14825_v34, %v2991_v4  ;;  %v1387_v14 = vsel %vm1319_vm0, %v1383_v44, %v14046_v46  ;;  %v1389_v24 = vsel %vm1319_vm0, %v1384_v62, %v14045_v54  ;;  %v1671_v18 = vadd.f32 %v1383_v44, %v14826_v28  ;;  %v14829_v44 = vld [vmem:[#allocation37_spill] sm:$0xff]  ;;  %v14834_v28 = vld [vmem:[#allocation35_spill] sm:$0xff]  ;;  %v14839_v54 = vld [vmem:[#allocation16_spill] sm:$0xff] }
 0x21c   : > { %v7223_v11 = vrot.slane %v7221_v43, 7  ;;  %v1674_v57 = vadd.f32 %v1387_v14, %v893_v35  ;;  %v1675_v15 = vadd.f32 %v1389_v24, %v894_v31  ;;  %v10756_v40 = vmul.f32 %v10149_v53, %v14710_v17  ;;  %v14833_v14 = vld [vmem:[#allocation27_spill] sm:$0xff] }
 0x21d   : > { %v4455_v38 = vadd.f32 %v4113_v50, %v3627_v52  ;;  %v2158_v8 = vrot.slane %v1827_v42, 2  ;;  %v2159_v30 = vrot.slane %v1828_v25, 2  ;;  %v14044_v58 = vrot.slane %v10744_v16, 2 }
 0x21e   : > { %v7226_v63 = vor.u32 %v7224_v41, %v7223_v11  ;;  %v2851_v4 = vmul.f32 %v14828_v33, %v8224_v22  ;;  %v2852_v62 = vmul.f32 %v14829_v44, %v8228_v23  ;;  %v14043_v53 = vrot.slane %v10756_v40, 2 }
 0x21f   : > { %v4948_v36 = vadd.f32 %v4804_v55, %v4455_v38  ;;  %v2162_v35 = vsel %vm2052_vm1, %v2158_v8, %v14044_v58  ;;  %v2500_v31 = vadd.f32 %v2158_v8, %v1671_v18  ;;  %v2501_v50 = vadd.f32 %v2159_v30, %v1672_v32  ;;  %v14830_v55 = vld [vmem:[#allocation39_spill] sm:$0xff]  ;;  %v10819_v58 = vld [vmem:[#allocation2 + $0x398] sm:$0xff] }
 0x220   : > { %v7227_v42 = vsel %vm8551_vm4, %v7219_v26, %v7226_v63  ;;  %v14831_v25 = vrot.slane %v14830_v55, 1  ;;  %v2503_v41 = vadd.f32 %v2162_v35, %v1674_v57  ;;  %v3127_v34 = vmul.f32 %v14828_v33, %v14832_v7 }
 0x221   : > { %7723 = vst [vmem:[%s8571_s28 + $0x9c] sm:$0xff] %v7227_v42  ;;  %v2164_v52 = vsel %vm2052_vm1, %v2159_v30, %v14043_v53  ;;  %v2992_v24 = vadd.f32 %v14833_v14, %v2500_v31  ;;  %v2993_v18 = vadd.f32 %v14834_v28, %v2501_v50  ;;  %v3128_v9 = vmul.f32 %v14829_v44, %v14835_v47  ;;  %v10817_v53 = vld [vmem:[#allocation2 + $0x390] sm:$0xff] }
 0x222   : > { %v5584_v43 = vadd.f32 %v14831_v25, %v4948_v36  ;;  %v2504_v32 = vadd.f32 %v2164_v52, %v1675_v15  ;;  %v2995_v11 = vadd.f32 %v2851_v4, %v2503_v41  ;;  %v10785_v38 = vmul.f32 %v10482_v19, %v14832_v7  ;;  %v10810_v52 = vld [vmem:[#allocation2 + $0x380] sm:$0xff] }
 0x223   : > { %v10789_v57 = vmul.f32 %v10484_v10, %v14835_v47  ;;  %v3340_v8 = vrot.slane %v3127_v34, 1  ;;  %v3341_v30 = vrot.slane %v3128_v9, 1  ;;  %v3784_v63 = vmul.f32 %v14828_v33, %v8375_v1  ;;  %v10808_v34 = vld [vmem:[#allocation2 + $0x378] sm:$0xff]  ;;  %14838 = vst [vmem:[#allocation32_spill] sm:$0xff] %v10810_v52  ;;  %v8083_v33 = vld [vmem:[#allocation2 + $0x2d0] sm:$0xff] }
 0x224   : > { %v6412_v26 = vadd.f32 %v6070_v51, %v5584_v43  ;;  %v2996_v35 = vadd.f32 %v2852_v62, %v2504_v32  ;;  %v14042_v31 = vrot.slane %v10785_v38, 1  ;;  %v14836_v51 = vld [vmem:[#allocation15_spill] sm:$0xff]  ;;  %v10799_v55 = vmul.f32 %v10482_v19, %v8375_v1  ;;  %14837 = vst [vmem:[#allocation11_spill] sm:$0xff] %v10808_v34 }
 0x225   : > { %v3785_v15 = vmul.f32 %v14829_v44, %v14836_v51  ;;  %v14047_v4 = vrot.slane %v10789_v57, 1  ;;  %v3628_v50 = vadd.f32 %v3340_v8, %v2992_v24  ;;  %v3629_v42 = vadd.f32 %v3341_v30, %v2993_v18 }
 0x226   : > { %v7997_v36 = vpack.c.bf16 %v6412_v26, %v6412_v26  ;;  %v3344_v41 = vsel %vm1319_vm0, %v3340_v8, %v14042_v31  ;;  %v10806_v62 = vmul.f32 %v10484_v10, %v14836_v51  ;;  %v4114_v28 = vrot.slane %v3784_v63, 2 }
 0x227   : > { %v3346_v14 = vsel %vm1319_vm0, %v3341_v30, %v14047_v4  ;;  %v3631_v24 = vadd.f32 %v3344_v41, %v2995_v11  ;;  %v4115_v18 = vrot.slane %v3785_v15, 2  ;;  %v14050_v32 = vrot.slane %v10799_v55, 2  ;;  %v14840_v15 = vld [vmem:[#allocation20_spill] sm:$0xff]  ;;  %v14841_v41 = vld [vmem:[#allocation38_spill] sm:$0xff]  ;;  %v14842_v4 = vld [vmem:[#allocation19_spill] sm:$0xff] }
 0x228   : > { %v7230_v25 = vshrl.u32 %v7997_v36, 16  ;;  %v7233_v43 = vshll.u32 %v7997_v36, 16  ;;  %v3632_v26 = vadd.f32 %v3346_v14, %v2996_v35  ;;  %v14049_v8 = vrot.slane %v10806_v62, 2 }
 0x229   : > { %v4456_v36 = vadd.f32 %v4114_v28, %v3628_v50  ;;  %v4457_v31 = vadd.f32 %v4115_v18, %v3629_v42  ;;  %v4808_v46 = vmul.f32 %v14839_v54, %v10808_v34  ;;  %v4809_v11 = vmul.f32 %v14670_v12, %v10810_v52 }
 0x22a   : > { %v7232_v9 = vrot.slane %v7230_v25, 7  ;;  %v4118_v63 = vsel %vm2052_vm1, %v4114_v28, %v14050_v32  ;;  %v4120_v35 = vsel %vm2052_vm1, %v4115_v18, %v14049_v8  ;;  %v5084_v50 = vmul.f32 %v14840_v15, %v10808_v34  ;;  %v14844_v28 = vld [vmem:[#allocation21_spill] sm:$0xff] }
 0x22b   : > { %v4459_v42 = vadd.f32 %v4118_v63, %v3631_v24  ;;  %v4460_v25 = vadd.f32 %v4120_v35, %v3632_v26  ;;  %v4949_v14 = vadd.f32 %v14841_v41, %v4456_v36  ;;  %v4950_v45 = vadd.f32 %v14842_v4, %v4457_v31 }
 0x22c   : > { %v7235_v30 = vor.u32 %v7233_v43, %v7232_v9  ;;  %v14843_v47 = vrot.slane %v10691_v3, 4  ;;  %v5085_v9 = vmul.f32 %v14844_v28, %v10810_v52  ;;  %v10843_v18 = vmul.f32 %v14840_v15, %v10817_v53 }
 0x22d   : > { %v10847_v24 = vmul.f32 %v14844_v28, %v10819_v58  ;;  %v4952_v26 = vadd.f32 %v4808_v46, %v4459_v42  ;;  %v4953_v36 = vadd.f32 %v4809_v11, %v4460_v25  ;;  %v5297_v31 = vrot.slane %v5084_v50, 1  ;;  %v712_v50 = vld [vmem:[#allocation2 + $0x2c8] sm:$0xff] }
 0x22e   : > { %v7236_v43 = vsel %vm8551_vm4, %v14843_v47, %v7235_v30  ;;  %v5741_v3 = vmul.f32 %v10512_v21, %v10808_v34  ;;  %v5298_v4 = vrot.slane %v5085_v9, 1  ;;  %v14059_v47 = vrot.slane %v10843_v18, 1  ;;  %v10870_v9 = vld [vmem:[#allocation2 + $0x2e0] sm:$0xff] }
 0x22f   : > { %14845 = vst [vmem:[#allocation10_spill] sm:$0xff] %v10847_v24  ;;  %7724 = vst [vmem:[%s8571_s28 + $0xa4] sm:$0xf] %v7236_v43  ;;  %v14058_v30 = vrot.slane %v10847_v24, 1  ;;  %v5742_v63 = vmul.f32 %v10519_v27, %v10810_v52  ;;  %v5585_v35 = vadd.f32 %v5297_v31, %v4949_v14  ;;  %v10858_v41 = vmul.f32 %v10512_v21, %v10817_v53  ;;  %v14846_v34 = vld [vmem:[#allocation23_spill] sm:$0xff] }
 0x230   : > { %v10862_v46 = vmul.f32 %v10519_v27, %v10819_v58  ;;  %v6071_v11 = vrot.slane %v5741_v3, 2  ;;  %v5301_v42 = vsel %vm1319_vm0, %v5297_v31, %v14059_v47  ;;  %v5586_v43 = vadd.f32 %v5298_v4, %v4950_v45  ;;  %v14848_v47 = vld [vmem:[#allocation24_spill] sm:$0xff] }
 0x231   : > { %v5303_v25 = vsel %vm1319_vm0, %v5298_v4, %v14058_v30  ;;  %v6072_v14 = vrot.slane %v5742_v63, 2  ;;  %v5588_v8 = vadd.f32 %v5301_v42, %v4952_v26  ;;  %v14061_v28 = vrot.slane %v10858_v41, 2 }
 0x232   : > { %v5589_v32 = vadd.f32 %v5303_v25, %v4953_v36  ;;  %v14060_v15 = vrot.slane %v10862_v46, 2  ;;  %v6413_v3 = vadd.f32 %v6071_v11, %v5585_v35  ;;  %v895_v52 = vmul.f32 %v14502_v6, %v712_v50 }
 0x233   : > { %v6414_v7 = vadd.f32 %v6072_v14, %v5586_v43  ;;  %v1171_v31 = vmul.f32 %v14846_v34, %v712_v50  ;;  %v6075_v30 = vsel %vm2052_vm1, %v6071_v11, %v14061_v28  ;;  %v10884_v26 = vmul.f32 %v14846_v34, %v10870_v9  ;;  %v14849_v34 = vld [vmem:[#allocation31_spill] sm:$0xff] }
 0x234   : > { %v6077_v45 = vsel %vm2052_vm1, %v6072_v14, %v14060_v15  ;;  %v1829_v36 = vmul.f32 %v8499_v60, %v712_v50  ;;  %v6416_v4 = vadd.f32 %v6075_v30, %v5588_v8  ;;  %v10890_v43 = vmul.f32 %v8499_v60, %v10870_v9 }
 0x235   : > { %v6417_v63 = vadd.f32 %v6077_v45, %v5589_v32  ;;  %v7998_v35 = vpack.c.bf16 %v6414_v7, %v6413_v3  ;;  %v1385_v42 = vrot.slane %v1171_v31, 1  ;;  %v14065_v25 = vrot.slane %v10884_v26, 1 }
 0x236   : > { %14847 = vst [vmem:[#allocation36_spill] sm:$0xff] %v10890_v43  ;;  %v2160_v11 = vrot.slane %v1829_v36, 2  ;;  %v2853_v14 = vmul.f32 %v14848_v47, %v8502_v61  ;;  %v3129_v8 = vmul.f32 %v14848_v47, %v14850_v56  ;;  %v14069_v32 = vrot.slane %v10890_v43, 2  ;;  %v10907_v36 = vld [vmem:[#allocation2 + $0x388] sm:$0xff] }
 0x237   : > { %v8000_v15 = vpack.c.bf16 %v6417_v63, %v6416_v4  ;;  %v7238_v28 = vshrl.u32 %v7998_v35, 16  ;;  %v1673_v59 = vadd.f32 %v1385_v42, %v14849_v34  ;;  %v1391_v7 = vsel %vm1319_vm0, %v1385_v42, %v14065_v25  ;;  %14852 = vst [vmem:[#allocation18_spill] sm:$0xff] %v10907_v36  ;;  %v10913_v25 = vld [vmem:[#allocation2 + $0x3a0] sm:$0xff] }
 0x238   : > { %v10903_v30 = vmul.f32 %v10591_v5, %v14850_v56  ;;  %v3786_v50 = vmul.f32 %v14848_v47, %v8508_v49  ;;  %v1676_v34 = vadd.f32 %v1391_v7, %v895_v52  ;;  %v2166_v4 = vsel %vm2052_vm1, %v2160_v11, %v14069_v32 }
 0x239   : > { %v7936_v3 = vrot.slane %v7238_v28, 11  ;;  %v7243_v31 = vshrl.u32 %v8000_v15, 16  ;;  %v7246_v45 = vshll.u32 %v8000_v15, 16  ;;  %v2502_v63 = vadd.f32 %v2160_v11, %v1673_v59  ;;  %v14854_v15 = vld [vmem:[#allocation33_spill] sm:$0xff] }
 0x23a   : > { %14851 = vst [vmem:[#allocation9_spill] sm:$0xff] %v10903_v30  ;;  %v3342_v35 = vrot.slane %v3129_v8, 1  ;;  %v14068_v42 = vrot.slane %v10903_v30, 1  ;;  %v2505_v44 = vadd.f32 %v2166_v4, %v1676_v34  ;;  %v10919_v28 = vmul.f32 %v10591_v5, %v8508_v49  ;;  %v14855_v11 = vld [vmem:[#allocation29_spill] sm:$0xff]  ;;  %v716_v30 = vld [vmem:[#allocation2 + $0x2e8] sm:$0x1] }
 0x23b   : > { %v10915_v56 = vrot.slane %v7243_v31, 7  ;;  %v4116_v52 = vrot.slane %v3786_v50, 2  ;;  %v2994_v47 = vadd.f32 %v14854_v15, %v2502_v63  ;;  %v4810_v59 = vmul.f32 %v14525_v37, %v10907_v36 }
 0x23c   : > { %14853 = vst [vmem:[#allocation12_spill] sm:$0xff] %v10919_v28  ;;  %v3348_v7 = vsel %vm1319_vm0, %v3342_v35, %v14068_v42  ;;  %v5086_v8 = vmul.f32 %v14855_v11, %v10907_v36  ;;  %v2997_v34 = vadd.f32 %v2853_v14, %v2505_v44  ;;  %v14077_v4 = vrot.slane %v10919_v28, 2  ;;  %v14857_v28 = vld [vmem:[#allocation28_spill] sm:$0xff] }
 0x23d   : > { %v7248_v31 = vor.u32 %v7246_v45, %v10915_v56  ;;  %v10933_v50 = vmul.f32 %v14855_v11, %v10913_v25  ;;  %v3630_v63 = vadd.f32 %v3342_v35, %v2994_v47  ;;  %v5743_v42 = vmul.f32 %v10623_v39, %v10907_v36  ;;  %v717_v35 = vld [vmem:[#allocation2 + $0x2f0] sm:$0x1] }
 0x23e   : > { %v5299_v15 = vrot.slane %v5086_v8, 1  ;;  %v10939_v32 = vmul.f32 %v10623_v39, %v10913_v25  ;;  %v3633_v44 = vadd.f32 %v3348_v7, %v2997_v34  ;;  %v4122_v14 = vsel %vm2052_vm1, %v4116_v52, %v14077_v4  ;;  %v8084_v7 = vld [vmem:[#allocation2 + $0x2d8] sm:$0xff]  ;;  %v2674_v4 = vld [vmem:[#allocation2 + $0x348] sm:$0x1] }
 0x23f   : > { %14856 = vst [vmem:[#allocation22_spill] sm:$0xff] %v10933_v50  ;;  %v7249_v45 = vsel %vm8551_vm4, %v7936_v3, %v7248_v31  ;;  %v14079_v11 = vrot.slane %v10933_v50, 1  ;;  %v4458_v47 = vadd.f32 %v4116_v52, %v3630_v63  ;;  %v6073_v8 = vrot.slane %v5743_v42, 2 }
 0x240   : > { %7725 = vst [vmem:[%s8571_s28 + $0xa8] sm:$0xff] %v7249_v45  ;;  %v14083_v36 = vrot.slane %v10939_v32, 2  ;;  %v896_v43 = vmul.f32 %v8083_v33, %v8197_v13  ;;  %v4461_v24 = vadd.f32 %v4122_v14, %v3633_v44  ;;  %v897_v31 = vmul.f32 %v8084_v7, %v14705_v48  ;;  %v2675_v44 = vld [vmem:[#allocation2 + $0x350] sm:$0x1] }
 0x241   : > { %v5305_v3 = vsel %vm1319_vm0, %v5299_v15, %v14079_v11  ;;  %v1833_v34 = vmul.f32 %v8216_v20, %v716_v30  ;;  %v4951_v45 = vadd.f32 %v14857_v28, %v4458_v47  ;;  %v14858_v52 = vrot.slane %v10728_v0, 1 }
 0x242   : > { %v6079_v42 = vsel %vm2052_vm1, %v6073_v8, %v14083_v36  ;;  %v1834_v63 = vmul.f32 %v14710_v17, %v717_v35  ;;  %v4954_v14 = vadd.f32 %v4810_v59, %v4461_v24  ;;  %v14859_v11 = vrot.slane %v10732_v2, 1  ;;  %v4631_v2 = vld [vmem:[#allocation2 + $0x3a8] sm:$0x1] }
 0x243   : > { %v1677_v33 = vadd.f32 %v14858_v52, %v896_v43  ;;  %v2167_v7 = vrot.slane %v1833_v34, 2  ;;  %v2854_v30 = vmul.f32 %v10482_v19, %v8224_v22  ;;  %v5587_v20 = vadd.f32 %v5299_v15, %v4951_v45  ;;  %v4632_v52 = vld [vmem:[#allocation2 + $0x3b0] sm:$0x1] }
 0x244   : > { %v1678_v50 = vadd.f32 %v14859_v11, %v897_v31  ;;  %v2169_v28 = vrot.slane %v1834_v63, 2  ;;  %v2855_v47 = vmul.f32 %v10484_v10, %v8228_v23  ;;  %v3790_v36 = vmul.f32 %v8375_v1, %v2674_v4 }
 0x245   : > { %v5590_v0 = vadd.f32 %v5305_v3, %v4954_v14  ;;  %v14860_v43 = vrot.slane %v10744_v16, 2  ;;  %v3791_v24 = vmul.f32 %v14836_v51, %v2675_v44  ;;  %v4811_v59 = vmul.f32 %v14839_v54, %v10817_v53 }
 0x246   : > { %v6415_v11 = vadd.f32 %v6073_v8, %v5587_v20  ;;  %v14861_v15 = vrot.slane %v10756_v40, 2  ;;  %v4123_v45 = vrot.slane %v3790_v36, 2  ;;  %v4812_v16 = vmul.f32 %v14670_v12, %v10819_v58 }
 0x247   : > { %v2168_v35 = vsel %vm2052_vm1, %v14860_v43, %v2167_v7  ;;  %v6418_v4 = vadd.f32 %v6079_v42, %v5590_v0  ;;  %v4125_v63 = vrot.slane %v3791_v24, 2  ;;  %v14862_v7 = vrot.slane %v10799_v55, 2  ;;  %v718_v55 = vld [vmem:[#allocation2 + $0x2f8] sm:$0x1] }
 0x248   : > { %v2170_v31 = vsel %vm2052_vm1, %v14861_v15, %v2169_v28  ;;  %v2506_v34 = vadd.f32 %v2168_v35, %v1677_v33  ;;  %v7999_v14 = vpack.c.bf16 %v6415_v11, %v6415_v11  ;;  %v5747_v20 = vmul.f32 %v10512_v21, %v4631_v2  ;;  %v2676_v15 = vld [vmem:[#allocation2 + $0x358] sm:$0x1] }
 0x249   : > { %v2507_v3 = vadd.f32 %v2170_v31, %v1678_v50  ;;  %v4124_v43 = vsel %vm2052_vm1, %v14862_v7, %v4123_v45  ;;  %v8001_v40 = vpack.c.bf16 %v6418_v4, %v6418_v4  ;;  %v14863_v33 = vrot.slane %v10806_v62, 2 }
 0x24a   : > { %v2998_v44 = vadd.f32 %v2854_v30, %v2506_v34  ;;  %v5748_v50 = vmul.f32 %v10519_v27, %v4632_v52  ;;  %v7251_v42 = vshrl.u32 %v7999_v14, 16  ;;  %v14864_v28 = vrot.slane %v10785_v38, 1 }
 0x24b   : > { %v2999_v8 = vadd.f32 %v2855_v47, %v2507_v3  ;;  %v4126_v36 = vsel %vm2052_vm1, %v14863_v33, %v4125_v63  ;;  %v6080_v35 = vrot.slane %v5747_v20, 2  ;;  %v7263_v30 = vrot.slane %v10915_v56, 4  ;;  %v4633_v63 = vld [vmem:[#allocation2 + $0x3b8] sm:$0x1]  ;;  %v14892_v56 = vld [vmem:[#allocation32_spill] sm:$0xff] }
 0x24c   : > { %v3634_v0 = vadd.f32 %v14864_v28, %v2998_v44  ;;  %v7256_v24 = vshrl.u32 %v8001_v40, 16  ;;  %v7259_v11 = vshll.u32 %v8001_v40, 16  ;;  %v14865_v21 = vrot.slane %v10789_v57, 1 }
 0x24d   : > { %v6082_v47 = vrot.slane %v5748_v50, 2  ;;  %v7937_v62 = vrot.slane %v7251_v42, 11  ;;  %v14866_v34 = vrot.slane %v10858_v41, 2  ;;  %v898_v38 = vmul.f32 %v14502_v6, %v10870_v9  ;;  %v14870_v50 = vld [vmem:[#allocation10_spill] sm:$0xff] }
 0x24e   : > { %v3635_v2 = vadd.f32 %v14865_v21, %v2999_v8  ;;  %v4462_v31 = vadd.f32 %v4124_v43, %v3634_v0  ;;  %v10998_v45 = vrot.slane %v7256_v24, 7  ;;  %v14867_v4 = vrot.slane %v10862_v46, 2  ;;  %v14872_v0 = vld [vmem:[#allocation36_spill] sm:$0xff] }
 0x24f   : > { %v6081_v27 = vsel %vm2052_vm1, %v14866_v34, %v6080_v35  ;;  %v1835_v57 = vmul.f32 %v8499_v60, %v718_v55  ;;  %v14868_v44 = vrot.slane %v10884_v26, 1  ;;  %v2856_v7 = vmul.f32 %v10591_v5, %v8502_v61  ;;  %v14874_v55 = vld [vmem:[#allocation26_spill] sm:$0xff] }
 0x250   : > { %v4463_v52 = vadd.f32 %v4126_v36, %v3635_v2  ;;  %v6083_v3 = vsel %vm2052_vm1, %v14867_v4, %v6082_v47  ;;  %v4955_v14 = vadd.f32 %v4811_v59, %v4462_v31  ;;  %v3792_v9 = vmul.f32 %v8508_v49, %v2676_v15  ;;  %v14879_v31 = vld [vmem:[#allocation34_spill] sm:$0xff] }
 0x251   : > { %v1679_v41 = vadd.f32 %v14868_v44, %v898_v38  ;;  %v7261_v43 = vor.u32 %v7259_v11, %v10998_v45  ;;  %v2171_v40 = vrot.slane %v1835_v57, 2  ;;  %v4813_v46 = vmul.f32 %v14525_v37, %v10913_v25  ;;  %v14880_v38 = vld [vmem:[#allocation37_spill] sm:$0xff]  ;;  %v14883_v44 = vld [vmem:[#allocation6_spill] sm:$0xff] }
 0x252   : > { %v4956_v20 = vadd.f32 %v4812_v16, %v4463_v52  ;;  %v14869_v8 = vrot.slane %v10843_v18, 1  ;;  %v4127_v59 = vrot.slane %v3792_v9, 2  ;;  %v5749_v26 = vmul.f32 %v10623_v39, %v4633_v63  ;;  %v14876_v39 = vld [vmem:[#allocation12_spill] sm:$0xff]  ;;  %v14882_v63 = vld [vmem:[#allocation5_spill] sm:$0xff] }
 0x253   : > { %v7272_v36 = vrot.slane %v10998_v45, 4  ;;  %v7262_v5 = vsel %vm8551_vm4, %v7937_v62, %v7261_v43  ;;  %v14871_v42 = vrot.slane %v14870_v50, 1  ;;  %v14873_v16 = vrot.slane %v14872_v0, 2 }
 0x254   : > { %v5591_v33 = vadd.f32 %v14869_v8, %v4955_v14  ;;  %v11025_v24 = vmul.f32 %v14874_v55, %v8197_v13  ;;  %7726 = vst [vmem:[%s8571_s28 + $0xb0] sm:$0xf] %v7262_v5  ;;  %v14877_v21 = vrot.slane %v14876_v39, 2  ;;  %v6084_v47 = vrot.slane %v5749_v26, 2 }
 0x255   : > { %v5592_v28 = vadd.f32 %v14871_v42, %v4956_v20  ;;  %v2172_v35 = vsel %vm2052_vm1, %v14873_v16, %v2171_v40  ;;  %v11033_v62 = vmul.f32 %v14874_v55, %v14705_v48  ;;  %v902_v34 = vmul.f32 %v14879_v31, %v8197_v13  ;;  %v14885_v20 = vld [vmem:[#allocation9_spill] sm:$0xff] }
 0x256   : > { %14875 = vst [vmem:[#allocation39_spill] sm:$0xff] %v11025_v24  ;;  %v6419_v18 = vadd.f32 %v6081_v27, %v5591_v33  ;;  %v2508_v11 = vadd.f32 %v2172_v35, %v1679_v41  ;;  %v4128_v2 = vsel %vm2052_vm1, %v14877_v21, %v4127_v59  ;;  %v903_v52 = vmul.f32 %v14880_v38, %v14705_v48 }
 0x257   : > { %v6420_v15 = vadd.f32 %v6083_v3, %v5592_v28  ;;  %14878 = vst [vmem:[#allocation27_spill] sm:$0xff] %v11033_v62  ;;  %v14881_v27 = vrot.slane %v10939_v32, 2  ;;  %v1175_v14 = vmul.f32 %v14879_v31, %v14882_v63  ;;  %v1176_v3 = vmul.f32 %v14880_v38, %v14883_v44 }
 0x258   : > { %v3000_v4 = vadd.f32 %v2856_v7, %v2508_v11  ;;  %v11048_v9 = vmul.f32 %v10482_v19, %v14882_v63  ;;  %v11052_v43 = vmul.f32 %v10484_v10, %v14883_v44  ;;  %v14884_v7 = vld [vmem:[#allocation7_spill] sm:$0xff]  ;;  %v14886_v40 = vrot.slane %v14885_v20, 1 }
 0x259   : > { %v6085_v57 = vsel %vm2052_vm1, %v14881_v27, %v6084_v47  ;;  %v8002_v41 = vpack.c.bf16 %v6420_v15, %v6419_v18  ;;  %v1836_v32 = vmul.f32 %v14879_v31, %v14884_v7  ;;  %v1392_v33 = vrot.slane %v1175_v14, 1 }
 0x25a   : > { %v3636_v8 = vadd.f32 %v14886_v40, %v3000_v4  ;;  %v1393_v59 = vrot.slane %v1176_v3, 1  ;;  %v1837_v26 = vmul.f32 %v14880_v38, %v14710_v17  ;;  %v14088_v42 = vrot.slane %v11048_v9, 1  ;;  %v14887_v3 = vld [vmem:[#allocation22_spill] sm:$0xff] }
 0x25b   : > { %v7265_v5 = vshrl.u32 %v8002_v41, 16  ;;  %v7268_v50 = vshll.u32 %v8002_v41, 16  ;;  %v14087_v28 = vrot.slane %v11052_v43, 1  ;;  %v1680_v16 = vadd.f32 %v1392_v33, %v11025_v24 }
 0x25c   : > { %v4464_v0 = vadd.f32 %v4128_v2, %v3636_v8  ;;  %v1681_v35 = vadd.f32 %v1393_v59, %v11033_v62  ;;  %v11066_v18 = vmul.f32 %v10482_v19, %v14884_v7  ;;  %v1396_v39 = vsel %vm1319_vm0, %v1392_v33, %v14088_v42  ;;  %v11145_v42 = vld [vmem:[#allocation2 + $0x3f0] sm:$0xff] }
 0x25d   : > { %v7267_v11 = vrot.slane %v7265_v5, 7  ;;  %v1398_v21 = vsel %vm1319_vm0, %v1393_v59, %v14087_v28  ;;  %v11076_v2 = vmul.f32 %v10484_v10, %v14710_v17  ;;  %v1683_v15 = vadd.f32 %v1396_v39, %v902_v34  ;;  %v14891_v5 = vld [vmem:[#allocation11_spill] sm:$0xff] }
 0x25e   : > { %v4957_v47 = vadd.f32 %v4813_v46, %v4464_v0  ;;  %v1684_v31 = vadd.f32 %v1398_v21, %v903_v52  ;;  %v2173_v38 = vrot.slane %v1836_v32, 2  ;;  %v2174_v4 = vrot.slane %v1837_v26, 2 }
 0x25f   : > { %v7270_v19 = vor.u32 %v7268_v50, %v7267_v11  ;;  %v14085_v27 = vrot.slane %v11066_v18, 2  ;;  %v14084_v14 = vrot.slane %v11076_v2, 2  ;;  %v14888_v41 = vrot.slane %v14887_v3, 1  ;;  %v14893_v11 = vld [vmem:[#allocation13_spill] sm:$0xff] }
 0x260   : > { %v2509_v40 = vadd.f32 %v2173_v38, %v1680_v16  ;;  %v11084_v8 = vmul.f32 %v14874_v55, %v8224_v22  ;;  %v11088_v10 = vmul.f32 %v14874_v55, %v8228_v23  ;;  %v2510_v32 = vadd.f32 %v2174_v4, %v1681_v35  ;;  %v14894_v35 = vld [vmem:[#allocation14_spill] sm:$0xff] }
 0x261   : > { %v5593_v20 = vadd.f32 %v14888_v41, %v4957_v47  ;;  %v7271_v46 = vsel %vm8551_vm4, %v7263_v30, %v7270_v19  ;;  %v2177_v34 = vsel %vm2052_vm1, %v2173_v38, %v14085_v27  ;;  %v2179_v52 = vsel %vm2052_vm1, %v2174_v4, %v14084_v14 }
 0x262   : > { %14889 = vst [vmem:[#allocation35_spill] sm:$0xff] %v11084_v8  ;;  %14890 = vst [vmem:[#allocation38_spill] sm:$0xff] %v11088_v10  ;;  %v2512_v59 = vadd.f32 %v2177_v34, %v1683_v15  ;;  %v2513_v26 = vadd.f32 %v2179_v52, %v1684_v31  ;;  %v2860_v50 = vmul.f32 %v14891_v5, %v8224_v22 }
 0x263   : > { %7727 = vst [vmem:[%s8571_s28 + $0xb4] sm:$0xff] %v7271_v46  ;;  %v6421_v33 = vadd.f32 %v6085_v57, %v5593_v20  ;;  %v2861_v0 = vmul.f32 %v14892_v56, %v8228_v23  ;;  %v3001_v30 = vadd.f32 %v11084_v8, %v2509_v40  ;;  %v3002_v16 = vadd.f32 %v11088_v10, %v2510_v32 }
 0x264   : > { %v3133_v39 = vmul.f32 %v14891_v5, %v14893_v11  ;;  %v3004_v47 = vadd.f32 %v2860_v50, %v2512_v59  ;;  %v3134_v57 = vmul.f32 %v14892_v56, %v14894_v35  ;;  %v11113_v15 = vmul.f32 %v10817_v53, %v14893_v11 }
 0x265   : > { %v8003_v21 = vpack.c.bf16 %v6421_v33, %v6421_v33  ;;  %v3005_v31 = vadd.f32 %v2861_v0, %v2513_v26  ;;  %v11117_v38 = vmul.f32 %v10819_v58, %v14894_v35  ;;  %v3793_v4 = vmul.f32 %v14891_v5, %v8375_v1  ;;  %v8090_v5 = vld [vmem:[#allocation2 + $0x338] sm:$0xff] }
 0x266   : > { %v3349_v19 = vrot.slane %v3133_v39, 1  ;;  %v3350_v20 = vrot.slane %v3134_v57, 1  ;;  %v14086_v40 = vrot.slane %v11113_v15, 1  ;;  %v3794_v52 = vmul.f32 %v14892_v56, %v14836_v51  ;;  %v11139_v57 = vld [vmem:[#allocation2 + $0x3d8] sm:$0xff]  ;;  %v8089_v56 = vld [vmem:[#allocation2 + $0x330] sm:$0xff] }
 0x267   : > { %v7274_v3 = vshrl.u32 %v8003_v21, 16  ;;  %v7277_v41 = vshll.u32 %v8003_v21, 16  ;;  %v14089_v46 = vrot.slane %v11117_v38, 1  ;;  %v11127_v32 = vmul.f32 %v10817_v53, %v8375_v1  ;;  %14895 = vst [vmem:[#allocation19_spill] sm:$0xff] %v11139_v57 }
 0x268   : > { %v3637_v34 = vadd.f32 %v3349_v19, %v3001_v30  ;;  %v3353_v59 = vsel %vm1319_vm0, %v3349_v19, %v14086_v40  ;;  %v3638_v26 = vadd.f32 %v3350_v20, %v3002_v16  ;;  %v11134_v50 = vmul.f32 %v10819_v58, %v14836_v51  ;;  %v11143_v19 = vld [vmem:[#allocation2 + $0x3e0] sm:$0xff] }
 0x269   : > { %v7276_v33 = vrot.slane %v7274_v3, 7  ;;  %v3355_v0 = vsel %vm1319_vm0, %v3350_v20, %v14089_v46  ;;  %v3640_v30 = vadd.f32 %v3353_v59, %v3004_v47  ;;  %v4129_v39 = vrot.slane %v3793_v4, 2  ;;  %14896 = vst [vmem:[#allocation24_spill] sm:$0xff] %v11143_v19 }
 0x26a   : > { %v4130_v21 = vrot.slane %v3794_v52, 2  ;;  %v3641_v14 = vadd.f32 %v3355_v0, %v3005_v31  ;;  %v14091_v27 = vrot.slane %v11127_v32, 2  ;;  %v14090_v16 = vrot.slane %v11134_v50, 2  ;;  %v14899_v0 = vld [vmem:[#allocation20_spill] sm:$0xff] }
 0x26b   : > { %v7279_v3 = vor.u32 %v7277_v41, %v7276_v33  ;;  %v4465_v40 = vadd.f32 %v4129_v39, %v3637_v34  ;;  %v11149_v47 = vmul.f32 %v14874_v55, %v14839_v54  ;;  %v11153_v4 = vmul.f32 %v14874_v55, %v14670_v12  ;;  %v11165_v34 = vld [vmem:[#allocation2 + $0x3f8] sm:$0xff] }
 0x26c   : > { %v4466_v28 = vadd.f32 %v4130_v21, %v3638_v26  ;;  %v4133_v41 = vsel %vm2052_vm1, %v4129_v39, %v14091_v27  ;;  %v4135_v20 = vsel %vm2052_vm1, %v4130_v21, %v14090_v16  ;;  %v4817_v52 = vmul.f32 %v14839_v54, %v11139_v57  ;;  %v14900_v21 = vld [vmem:[#allocation21_spill] sm:$0xff] }
 0x26d   : > { %14897 = vst [vmem:[#allocation31_spill] sm:$0xff] %v11149_v47  ;;  %14898 = vst [vmem:[#allocation33_spill] sm:$0xff] %v11153_v4  ;;  %v7280_v31 = vsel %vm8551_vm4, %v7272_v36, %v7279_v3  ;;  %v4468_v33 = vadd.f32 %v4133_v41, %v3640_v30  ;;  %v4469_v59 = vadd.f32 %v4135_v20, %v3641_v14 }
 0x26e   : > { %7728 = vst [vmem:[%s8571_s28 + $0xbc] sm:$0xf] %v7280_v31  ;;  %v4818_v45 = vmul.f32 %v14670_v12, %v11143_v19  ;;  %v4958_v36 = vadd.f32 %v11149_v47, %v4465_v40  ;;  %v4959_v26 = vadd.f32 %v11153_v4, %v4466_v28  ;;  %v5090_v39 = vmul.f32 %v14899_v0, %v11139_v57  ;;  %v11189_v28 = vld [vmem:[%s13700_s1 + $0x18] ss:$0 sm:$0xff] }
 0x26f   : > { %v5091_v3 = vmul.f32 %v14900_v21, %v11143_v19  ;;  %v11180_v46 = vmul.f32 %v14899_v0, %v11145_v42  ;;  %v4961_v31 = vadd.f32 %v4817_v52, %v4468_v33  ;;  %v11184_v14 = vmul.f32 %v14900_v21, %v11165_v34  ;;  %v11197_v52 = vld [vmem:[%s13700_s1 + $0x20] ss:$0 sm:$0xff]  ;;  %v724_v0 = vld [vmem:[#allocation2 + $0x328] sm:$0xff] }
 0x270   : > { %v4962_v30 = vadd.f32 %v4818_v45, %v4469_v59  ;;  %v5750_v40 = vmul.f32 %v11189_v28, %v11139_v57  ;;  %v5306_v41 = vrot.slane %v5090_v39, 1  ;;  %v5751_v33 = vmul.f32 %v11197_v52, %v11143_v19  ;;  %v11218_v19 = vld [vmem:[#allocation2 + $0x340] sm:$0xff] }
 0x271   : > { %v5307_v20 = vrot.slane %v5091_v3, 1  ;;  %v14106_v16 = vrot.slane %v11180_v46, 1  ;;  %v14105_v59 = vrot.slane %v11184_v14, 1  ;;  %v11204_v45 = vmul.f32 %v11189_v28, %v11145_v42 }
 0x272   : > { %v11208_v39 = vmul.f32 %v11197_v52, %v11165_v34  ;;  %v6086_v3 = vrot.slane %v5750_v40, 2  ;;  %v5594_v4 = vadd.f32 %v5306_v41, %v4958_v36  ;;  %v6087_v21 = vrot.slane %v5751_v33, 2 }
 0x273   : > { %v5310_v27 = vsel %vm1319_vm0, %v5306_v41, %v14106_v16  ;;  %v5595_v47 = vadd.f32 %v5307_v20, %v4959_v26  ;;  %v5312_v35 = vsel %vm1319_vm0, %v5307_v20, %v14105_v59  ;;  %v14108_v8 = vrot.slane %v11204_v45, 2  ;;  %v14902_v41 = vld [vmem:[#allocation23_spill] sm:$0xff] }
 0x274   : > { %v5597_v10 = vadd.f32 %v5310_v27, %v4961_v31  ;;  %v14107_v11 = vrot.slane %v11208_v39, 2  ;;  %v5598_v40 = vadd.f32 %v5312_v35, %v4962_v30  ;;  %v6422_v57 = vadd.f32 %v6086_v3, %v5594_v4 }
 0x275   : > { %v6423_v62 = vadd.f32 %v6087_v21, %v5595_v47  ;;  %v11222_v36 = vmul.f32 %v14874_v55, %v14502_v6  ;;  %v6090_v26 = vsel %vm2052_vm1, %v6086_v3, %v14108_v8  ;;  %v904_v31 = vmul.f32 %v14502_v6, %v724_v0 }
 0x276   : > { %v6092_v27 = vsel %vm2052_vm1, %v6087_v21, %v14107_v11  ;;  %v1177_v20 = vmul.f32 %v14902_v41, %v724_v0  ;;  %v6425_v33 = vadd.f32 %v6090_v26, %v5597_v10  ;;  %v11234_v47 = vmul.f32 %v14902_v41, %v11218_v19 }
 0x277   : > { %14901 = vst [vmem:[#allocation28_spill] sm:$0xff] %v11222_v36  ;;  %v6426_v35 = vadd.f32 %v6092_v27, %v5598_v40  ;;  %v8004_v4 = vpack.c.bf16 %v6423_v62, %v6422_v57  ;;  %v1838_v59 = vmul.f32 %v8499_v60, %v724_v0  ;;  %v11239_v3 = vmul.f32 %v8499_v60, %v11218_v19  ;;  %v14905_v62 = vld [vmem:[#allocation18_spill] sm:$0xff]  ;;  %v14906_v27 = vld [vmem:[#allocation25_spill] sm:$0xff] }
 0x278   : > { %v1394_v30 = vrot.slane %v1177_v20, 1  ;;  %v11243_v21 = vmul.f32 %v14874_v55, %v8502_v61  ;;  %v14114_v10 = vrot.slane %v11234_v47, 1  ;;  %v2862_v57 = vmul.f32 %v14905_v62, %v8502_v61 }
 0x279   : > { %14903 = vst [vmem:[#allocation10_spill] sm:$0xff] %v11239_v3  ;;  %v8006_v16 = vpack.c.bf16 %v6426_v35, %v6425_v33  ;;  %v7282_v11 = vshrl.u32 %v8004_v4, 16  ;;  %v2175_v26 = vrot.slane %v1838_v59, 2  ;;  %v14113_v0 = vrot.slane %v11239_v3, 2 }
 0x27a   : > { %14904 = vst [vmem:[#allocation36_spill] sm:$0xff] %v11243_v21  ;;  %v1682_v40 = vadd.f32 %v1394_v30, %v11222_v36  ;;  %v3135_v20 = vmul.f32 %v14905_v62, %v14906_v27  ;;  %v1400_v55 = vsel %vm1319_vm0, %v1394_v30, %v14114_v10  ;;  %v11260_v59 = vmul.f32 %v10913_v25, %v14906_v27  ;;  %v11262_v36 = vld [vmem:[#allocation2 + $0x3e8] sm:$0xff]  ;;  %v14912_v27 = vld [vmem:[#allocation29_spill] sm:$0xff] }
 0x27b   : > { %v7938_v8 = vrot.slane %v7282_v11, 11  ;;  %v7287_v41 = vshrl.u32 %v8006_v16, 16  ;;  %v7290_v24 = vshll.u32 %v8006_v16, 16  ;;  %v1685_v33 = vadd.f32 %v1400_v55, %v904_v31  ;;  %14908 = vst [vmem:[#allocation12_spill] sm:$0xff] %v11262_v36 }
 0x27c   : > { %v2181_v35 = vsel %vm2052_vm1, %v2175_v26, %v14113_v0  ;;  %v2511_v4 = vadd.f32 %v2175_v26, %v1682_v40  ;;  %14907 = vst [vmem:[#allocation26_spill] sm:$0xff] %v11260_v59  ;;  %v3351_v11 = vrot.slane %v3135_v20, 1  ;;  %v3795_v16 = vmul.f32 %v14905_v62, %v8508_v49  ;;  %v11274_v26 = vld [vmem:[#allocation2 + $0x400] sm:$0xff]  ;;  %v11276_v0 = vld [vmem:[#allocation2 + $0x18] sm:$0xff] }
 0x27d   : > { %v11264_v44 = vrot.slane %v7287_v41, 7  ;;  %v11270_v31 = vmul.f32 %v10913_v25, %v8508_v49  ;;  %v2514_v30 = vadd.f32 %v2181_v35, %v1685_v33  ;;  %v14120_v40 = vrot.slane %v11260_v59, 1  ;;  %14910 = vst [vmem:[#allocation37_spill] sm:$0xff] %v11276_v0 }
 0x27e   : > { %v3003_v55 = vadd.f32 %v11243_v21, %v2511_v4  ;;  %v11280_v41 = vmul.f32 %v11276_v0, %v14525_v37  ;;  %v4131_v20 = vrot.slane %v3795_v16, 2  ;;  %v4819_v33 = vmul.f32 %v14525_v37, %v11262_v36 }
 0x27f   : > { %14909 = vst [vmem:[#allocation34_spill] sm:$0xff] %v11270_v31  ;;  %v7292_v62 = vor.u32 %v7290_v24, %v11264_v44  ;;  %v14121_v10 = vrot.slane %v11270_v31, 2  ;;  %v3006_v35 = vadd.f32 %v2862_v57, %v2514_v30  ;;  %v3357_v4 = vsel %vm1319_vm0, %v3351_v11, %v14120_v40  ;;  %v11303_v57 = vld [vmem:[%s13700_s1 + $0x28] ss:$0 sm:$0xff] }
 0x280   : > { %14911 = vst [vmem:[#allocation9_spill] sm:$0xff] %v11280_v41  ;;  %v3639_v21 = vadd.f32 %v3351_v11, %v3003_v55  ;;  %v5092_v63 = vmul.f32 %v14912_v27, %v11262_v36  ;;  %v11298_v16 = vmul.f32 %v14912_v27, %v11274_v26  ;;  %v5752_v11 = vmul.f32 %v11303_v57, %v11262_v36  ;;  %v728_v30 = vld [vmem:[#allocation2 + $0x348] sm:$0x1] }
 0x281   : > { %v7293_v0 = vsel %vm8551_vm4, %v7938_v8, %v7292_v62  ;;  %v4137_v24 = vsel %vm2052_vm1, %v4131_v20, %v14121_v10  ;;  %v3642_v55 = vadd.f32 %v3357_v4, %v3006_v35  ;;  %v11310_v40 = vmul.f32 %v11303_v57, %v11274_v26  ;;  %v729_v10 = vld [vmem:[#allocation2 + $0x350] sm:$0x1] }
 0x282   : > { %7729 = vst [vmem:[%s8571_s28 + $0xc0] sm:$0xff] %v7293_v0  ;;  %v4467_v8 = vadd.f32 %v4131_v20, %v3639_v21  ;;  %v5308_v62 = vrot.slane %v5092_v63, 1  ;;  %v14134_v27 = vrot.slane %v11298_v16, 1  ;;  %v6088_v59 = vrot.slane %v5752_v11, 2  ;;  %v2686_v20 = vld [vmem:[#allocation2 + $0x3a8] sm:$0x1] }
 0x283   : > { %v905_v31 = vmul.f32 %v8089_v56, %v8197_v13  ;;  %v906_v3 = vmul.f32 %v8090_v5, %v14705_v48  ;;  %v4470_v36 = vadd.f32 %v4137_v24, %v3642_v55  ;;  %v14135_v21 = vrot.slane %v11310_v40, 2  ;;  %v2687_v24 = vld [vmem:[#allocation2 + $0x3b0] sm:$0x1] }
 0x284   : > { %v4960_v0 = vadd.f32 %v11280_v41, %v4467_v8  ;;  %v1842_v63 = vmul.f32 %v14884_v7, %v728_v30  ;;  %v5314_v35 = vsel %vm1319_vm0, %v5308_v62, %v14134_v27  ;;  %v14913_v4 = vrot.slane %v11048_v9, 1 }
 0x285   : > { %v14914_v56 = vrot.slane %v11052_v43, 1  ;;  %v1843_v5 = vmul.f32 %v14710_v17, %v729_v10  ;;  %v4963_v55 = vadd.f32 %v4819_v33, %v4470_v36  ;;  %v6094_v30 = vsel %vm2052_vm1, %v6088_v59, %v14135_v21 }
 0x286   : > { %v1686_v11 = vadd.f32 %v14913_v4, %v905_v31  ;;  %v5596_v8 = vadd.f32 %v5308_v62, %v4960_v0  ;;  %v2182_v41 = vrot.slane %v1842_v63, 2  ;;  %v2863_v27 = vmul.f32 %v10817_v53, %v8224_v22  ;;  %v4643_v62 = vld [vmem:[#allocation2 + $0x408] sm:$0x1] }
 0x287   : > { %v1687_v13 = vadd.f32 %v14914_v56, %v906_v3  ;;  %v2184_v7 = vrot.slane %v1843_v5, 2  ;;  %v2864_v9 = vmul.f32 %v10819_v58, %v8228_v23  ;;  %v3799_v43 = vmul.f32 %v8375_v1, %v2686_v20 }
 0x288   : > { %v5599_v3 = vadd.f32 %v5314_v35, %v4963_v55  ;;  %v6424_v31 = vadd.f32 %v6088_v59, %v5596_v8  ;;  %v14915_v10 = vrot.slane %v11066_v18, 2  ;;  %v3800_v33 = vmul.f32 %v14836_v51, %v2687_v24  ;;  %v4644_v55 = vld [vmem:[#allocation2 + $0x410] sm:$0x1] }
 0x289   : > { %v14916_v0 = vrot.slane %v11076_v2, 2  ;;  %v4138_v56 = vrot.slane %v3799_v43, 2  ;;  %v4820_v5 = vmul.f32 %v14839_v54, %v11145_v42  ;;  %v4821_v2 = vmul.f32 %v14670_v12, %v11165_v34 }
 0x28a   : > { %v2183_v36 = vsel %vm2052_vm1, %v14915_v10, %v2182_v41  ;;  %v6427_v21 = vadd.f32 %v6094_v30, %v5599_v3  ;;  %v8005_v20 = vpack.c.bf16 %v6424_v31, %v6424_v31  ;;  %v4140_v59 = vrot.slane %v3800_v33, 2 }
 0x28b   : > { %v2185_v63 = vsel %vm2052_vm1, %v14916_v0, %v2184_v7  ;;  %v2515_v4 = vadd.f32 %v2183_v36, %v1686_v11  ;;  %v14917_v41 = vrot.slane %v11127_v32, 2  ;;  %v5756_v7 = vmul.f32 %v11189_v28, %v4643_v62  ;;  %v730_v36 = vld [vmem:[#allocation2 + $0x358] sm:$0x1] }
 0x28c   : > { %v2516_v35 = vadd.f32 %v2185_v63, %v1687_v13  ;;  %v8007_v11 = vpack.c.bf16 %v6427_v21, %v6427_v21  ;;  %v7295_v8 = vshrl.u32 %v8005_v20, 16  ;;  %v14918_v10 = vrot.slane %v11134_v50, 2 }
 0x28d   : > { %v3007_v18 = vadd.f32 %v2863_v27, %v2515_v4  ;;  %v4139_v24 = vsel %vm2052_vm1, %v14917_v41, %v4138_v56  ;;  %v14919_v13 = vrot.slane %v11113_v15, 1  ;;  %v5757_v27 = vmul.f32 %v11197_v52, %v4644_v55 }
 0x28e   : > { %v3008_v43 = vadd.f32 %v2864_v9, %v2516_v35  ;;  %v4141_v30 = vsel %vm2052_vm1, %v14918_v10, %v4140_v59  ;;  %v6095_v32 = vrot.slane %v5756_v7, 2  ;;  %v7307_v31 = vrot.slane %v11264_v44, 4  ;;  %v2688_v9 = vld [vmem:[#allocation2 + $0x3b8] sm:$0x1] }
 0x28f   : > { %v3643_v3 = vadd.f32 %v14919_v13, %v3007_v18  ;;  %v7939_v33 = vrot.slane %v7295_v8, 11  ;;  %v7300_v0 = vshrl.u32 %v8007_v11, 16  ;;  %v7303_v63 = vshll.u32 %v8007_v11, 16  ;;  %v14947_v44 = vld [vmem:[#allocation14_spill] sm:$0xff] }
 0x290   : > { %v14920_v21 = vrot.slane %v11117_v38, 1  ;;  %v14921_v50 = vrot.slane %v11204_v45, 2  ;;  %v6097_v15 = vrot.slane %v5757_v27, 2  ;;  %v907_v20 = vmul.f32 %v14502_v6, %v11218_v19  ;;  %v4645_v38 = vld [vmem:[#allocation2 + $0x418] sm:$0x1] }
 0x291   : > { %v4471_v4 = vadd.f32 %v4139_v24, %v3643_v3  ;;  %v11363_v35 = vrot.slane %v7300_v0, 7  ;;  %v1844_v55 = vmul.f32 %v8499_v60, %v730_v36  ;;  %v2865_v18 = vmul.f32 %v10913_v25, %v8502_v61  ;;  %v14926_v36 = vld [vmem:[#allocation10_spill] sm:$0xff] }
 0x292   : > { %v3644_v62 = vadd.f32 %v14920_v21, %v3008_v43  ;;  %v6096_v56 = vsel %vm2052_vm1, %v14921_v50, %v6095_v32  ;;  %v14922_v24 = vrot.slane %v11208_v39, 2  ;;  %v14923_v7 = vrot.slane %v11234_v47, 1  ;;  %v14929_v21 = vld [vmem:[#allocation11_spill] sm:$0xff] }
 0x293   : > { %v4964_v41 = vadd.f32 %v4820_v5, %v4471_v4  ;;  %v3801_v19 = vmul.f32 %v8508_v49, %v2688_v9  ;;  %v7305_v8 = vor.u32 %v7303_v63, %v11363_v35  ;;  %v2186_v10 = vrot.slane %v1844_v55, 2  ;;  %v14928_v63 = vld [vmem:[#allocation3_spill] sm:$0xff]  ;;  %v14930_v4 = vld [vmem:[#allocation34_spill] sm:$0xff]  ;;  %v14933_v55 = vld [vmem:[#allocation5_spill] sm:$0xff] }
 0x294   : > { %v4472_v59 = vadd.f32 %v4141_v30, %v3644_v62  ;;  %v6098_v45 = vsel %vm2052_vm1, %v14922_v24, %v6097_v15  ;;  %v1688_v11 = vadd.f32 %v14923_v7, %v907_v20  ;;  %v4822_v30 = vmul.f32 %v14525_v37, %v11274_v26 }
 0x295   : > { %v14924_v25 = vrot.slane %v11180_v46, 1  ;;  %v4142_v13 = vrot.slane %v3801_v19, 2  ;;  %v5758_v39 = vmul.f32 %v11303_v57, %v4645_v38  ;;  %v7316_v3 = vrot.slane %v11363_v35, 4 }
 0x296   : > { %v4965_v43 = vadd.f32 %v4821_v2, %v4472_v59  ;;  %v7306_v47 = vsel %vm8551_vm4, %v7939_v33, %v7305_v8  ;;  %v14925_v27 = vrot.slane %v11184_v14, 1  ;;  %v14927_v2 = vrot.slane %v14926_v36, 2  ;;  %v14932_v33 = vld [vmem:[#allocation32_spill] sm:$0xff] }
 0x297   : > { %v5600_v5 = vadd.f32 %v14924_v25, %v4964_v41  ;;  %v911_v62 = vmul.f32 %v14929_v21, %v14928_v63  ;;  %7730 = vst [vmem:[%s8571_s28 + $0xc8] sm:$0xf] %v7306_v47  ;;  %v14931_v50 = vrot.slane %v14930_v4, 2  ;;  %v6099_v20 = vrot.slane %v5758_v39, 2  ;;  %v14934_v41 = vld [vmem:[#allocation6_spill] sm:$0xff]  ;;  %v14936_v25 = vld [vmem:[#allocation7_spill] sm:$0xff] }
 0x298   : > { %v5601_v32 = vadd.f32 %v14925_v27, %v4965_v43  ;;  %v2187_v0 = vsel %vm2052_vm1, %v14927_v2, %v2186_v10  ;;  %v912_v14 = vmul.f32 %v14932_v33, %v14705_v48  ;;  %v1181_v38 = vmul.f32 %v14929_v21, %v14933_v55  ;;  %v14939_v2 = vld [vmem:[#allocation39_spill] sm:$0xff] }
 0x299   : > { %v6428_v46 = vadd.f32 %v6096_v56, %v5600_v5  ;;  %v2517_v9 = vadd.f32 %v2187_v0, %v1688_v11  ;;  %v4143_v15 = vsel %vm2052_vm1, %v14931_v50, %v4142_v13  ;;  %v1182_v24 = vmul.f32 %v14932_v33, %v14934_v41  ;;  %v14937_v13 = vld [vmem:[#allocation26_spill] sm:$0xff] }
 0x29a   : > { %v6429_v59 = vadd.f32 %v6098_v45, %v5601_v32  ;;  %v14935_v19 = vrot.slane %v11310_v40, 2  ;;  %v11405_v11 = vmul.f32 %v10817_v53, %v14933_v55  ;;  %v11409_v45 = vmul.f32 %v10819_v58, %v14934_v41  ;;  %v14959_v55 = vld [vmem:[#allocation25_spill] sm:$0xff] }
 0x29b   : > { %v3009_v7 = vadd.f32 %v2865_v18, %v2517_v9  ;;  %v1401_v43 = vrot.slane %v1181_v38, 1  ;;  %v1402_v10 = vrot.slane %v1182_v24, 1  ;;  %v1845_v5 = vmul.f32 %v14929_v21, %v14936_v25 }
 0x29c   : > { %v6100_v56 = vsel %vm2052_vm1, %v14935_v19, %v6099_v20  ;;  %v8008_v8 = vpack.c.bf16 %v6429_v59, %v6428_v46  ;;  %v14938_v18 = vrot.slane %v14937_v13, 1  ;;  %v14141_v40 = vrot.slane %v11405_v11, 1  ;;  %v14940_v46 = vld [vmem:[#allocation27_spill] sm:$0xff] }
 0x29d   : > { %v14140_v47 = vrot.slane %v11409_v45, 1  ;;  %v1846_v27 = vmul.f32 %v14932_v33, %v14710_v17  ;;  %v1689_v0 = vadd.f32 %v1401_v43, %v14939_v2  ;;  %v1690_v9 = vadd.f32 %v1402_v10, %v14940_v46  ;;  %v14941_v13 = vld [vmem:[#allocation19_spill] sm:$0xff]  ;;  %v14944_v2 = vld [vmem:[#allocation13_spill] sm:$0xff] }
 0x29e   : > { %v3645_v39 = vadd.f32 %v14938_v18, %v3009_v7  ;;  %v7309_v32 = vshrl.u32 %v8008_v8, 16  ;;  %v7312_v36 = vshll.u32 %v8008_v8, 16  ;;  %v1405_v21 = vsel %vm1319_vm0, %v1401_v43, %v14141_v40  ;;  %v14942_v18 = vld [vmem:[#allocation24_spill] sm:$0xff]  ;;  %v14952_v40 = vld [vmem:[#allocation31_spill] sm:$0xff] }
 0x29f   : > { %v1407_v50 = vsel %vm1319_vm0, %v1402_v10, %v14140_v47  ;;  %v11429_v20 = vmul.f32 %v10817_v53, %v14936_v25  ;;  %v1692_v33 = vadd.f32 %v1405_v21, %v911_v62  ;;  %v11433_v24 = vmul.f32 %v10819_v58, %v14710_v17  ;;  %v14945_v21 = vld [vmem:[#allocation35_spill] sm:$0xff] }
 0x2a0   : > { %v4473_v4 = vadd.f32 %v4143_v15, %v3645_v39  ;;  %v7311_v59 = vrot.slane %v7309_v32, 7  ;;  %v1693_v38 = vadd.f32 %v1407_v50, %v912_v14  ;;  %v2188_v7 = vrot.slane %v1845_v5, 2 }
 0x2a1   : > { %v2189_v19 = vrot.slane %v1846_v27, 2  ;;  %v14139_v8 = vrot.slane %v11429_v20, 2  ;;  %v14136_v10 = vrot.slane %v11433_v24, 2  ;;  %v2869_v53 = vmul.f32 %v14941_v13, %v8224_v22 }
 0x2a2   : > { %v4966_v15 = vadd.f32 %v4822_v30, %v4473_v4  ;;  %v7314_v43 = vor.u32 %v7312_v36, %v7311_v59  ;;  %v2870_v62 = vmul.f32 %v14942_v18, %v8228_v23  ;;  %v14943_v14 = vrot.slane %v11298_v16, 1 }
 0x2a3   : > { %v2192_v58 = vsel %vm2052_vm1, %v2188_v7, %v14139_v8  ;;  %v2518_v30 = vadd.f32 %v2188_v7, %v1689_v0  ;;  %v2519_v5 = vadd.f32 %v2189_v19, %v1690_v9  ;;  %v2194_v32 = vsel %vm2052_vm1, %v2189_v19, %v14136_v10  ;;  %v14946_v0 = vld [vmem:[#allocation38_spill] sm:$0xff] }
 0x2a4   : > { %v5602_v39 = vadd.f32 %v14943_v14, %v4966_v15  ;;  %v7315_v27 = vsel %vm8551_vm4, %v7307_v31, %v7314_v43  ;;  %v2521_v36 = vadd.f32 %v2192_v58, %v1692_v33  ;;  %v3139_v16 = vmul.f32 %v14941_v13, %v14944_v2  ;;  %v11498_v8 = vld [vmem:[#allocation2 + $0x458] sm:$0xff] }
 0x2a5   : > { %7731 = vst [vmem:[%s8571_s28 + $0xcc] sm:$0xff] %v7315_v27  ;;  %v2522_v4 = vadd.f32 %v2194_v32, %v1693_v38  ;;  %v3010_v50 = vadd.f32 %v14945_v21, %v2518_v30  ;;  %v3011_v9 = vadd.f32 %v14946_v0, %v2519_v5  ;;  %v3140_v15 = vmul.f32 %v14942_v18, %v14947_v44 }
 0x2a6   : > { %v6430_v46 = vadd.f32 %v6100_v56, %v5602_v39  ;;  %v3013_v59 = vadd.f32 %v2869_v53, %v2521_v36  ;;  %v11462_v31 = vmul.f32 %v11145_v42, %v14944_v2  ;;  %v11466_v33 = vmul.f32 %v11165_v34, %v14947_v44  ;;  %v14953_v2 = vld [vmem:[#allocation33_spill] sm:$0xff] }
 0x2a7   : > { %v3014_v19 = vadd.f32 %v2870_v62, %v2522_v4  ;;  %v3358_v56 = vrot.slane %v3139_v16, 1  ;;  %v3802_v38 = vmul.f32 %v14941_v13, %v8375_v1  ;;  %v3359_v43 = vrot.slane %v3140_v15, 1  ;;  %v11478_v62 = vld [vmem:[#allocation2 + $0x438] sm:$0xff]  ;;  %v11490_v4 = vld [vmem:[#allocation2 + $0x440] sm:$0xff]  ;;  %v14963_v13 = vld [vmem:[#allocation36_spill] sm:$0xff] }
 0x2a8   : > { %v8009_v7 = vpack.c.bf16 %v6430_v46, %v6430_v46  ;;  %v14138_v53 = vrot.slane %v11462_v31, 1  ;;  %v14137_v14 = vrot.slane %v11466_v33, 1  ;;  %v3803_v39 = vmul.f32 %v14942_v18, %v14836_v51  ;;  %14948 = vst [vmem:[#allocation22_spill] sm:$0xff] %v11478_v62  ;;  %14949 = vst [vmem:[#allocation18_spill] sm:$0xff] %v11490_v4 }
 0x2a9   : > { %v3646_v5 = vadd.f32 %v3358_v56, %v3010_v50  ;;  %v11476_v27 = vmul.f32 %v11145_v42, %v8375_v1  ;;  %v3647_v16 = vadd.f32 %v3359_v43, %v3011_v9  ;;  %v11488_v46 = vmul.f32 %v11165_v34, %v14836_v51 }
 0x2aa   : > { %v7318_v58 = vshrl.u32 %v8009_v7, 16  ;;  %v7321_v30 = vshll.u32 %v8009_v7, 16  ;;  %v3362_v32 = vsel %vm1319_vm0, %v3358_v56, %v14138_v53  ;;  %v3364_v36 = vsel %vm1319_vm0, %v3359_v43, %v14137_v14  ;;  %v11496_v53 = vld [vmem:[#allocation2 + $0x450] sm:$0xff] }
 0x2ab   : > { %v3649_v50 = vadd.f32 %v3362_v32, %v3013_v59  ;;  %v3650_v0 = vadd.f32 %v3364_v36, %v3014_v19  ;;  %v4144_v15 = vrot.slane %v3802_v38, 2  ;;  %v4145_v7 = vrot.slane %v3803_v39, 2  ;;  %v14950_v19 = vld [vmem:[#allocation20_spill] sm:$0xff] }
 0x2ac   : > { %v7320_v21 = vrot.slane %v7318_v58, 7  ;;  %v14144_v10 = vrot.slane %v11476_v27, 2  ;;  %v14145_v56 = vrot.slane %v11488_v46, 2  ;;  %v4826_v14 = vmul.f32 %v14839_v54, %v11478_v62 }
 0x2ad   : > { %v4474_v43 = vadd.f32 %v4144_v15, %v3646_v5  ;;  %v4827_v59 = vmul.f32 %v14670_v12, %v11490_v4  ;;  %v5096_v38 = vmul.f32 %v14950_v19, %v11478_v62  ;;  %v14951_v5 = vld [vmem:[#allocation21_spill] sm:$0xff] }
 0x2ae   : > { %v7323_v9 = vor.u32 %v7321_v30, %v7320_v21  ;;  %v4148_v39 = vsel %vm2052_vm1, %v4144_v15, %v14144_v10  ;;  %v4150_v58 = vsel %vm2052_vm1, %v4145_v7, %v14145_v56  ;;  %v4475_v30 = vadd.f32 %v4145_v7, %v3647_v16 }
 0x2af   : > { %v5097_v32 = vmul.f32 %v14951_v5, %v11490_v4  ;;  %v4477_v21 = vadd.f32 %v4148_v39, %v3649_v50  ;;  %v4478_v47 = vadd.f32 %v4150_v58, %v3650_v0  ;;  %v4967_v44 = vadd.f32 %v14952_v40, %v4474_v43  ;;  %v736_v50 = vld [vmem:[#allocation2 + $0x388] sm:$0xff] }
 0x2b0   : > { %v7324_v36 = vsel %vm8551_vm4, %v7316_v3, %v7323_v9  ;;  %v4968_v15 = vadd.f32 %v14953_v2, %v4475_v30  ;;  %v11521_v10 = vmul.f32 %v14950_v19, %v11496_v53  ;;  %v11525_v16 = vmul.f32 %v14951_v5, %v11498_v8  ;;  %v14955_v19 = vld [vmem:[#allocation23_spill] sm:$0xff] }
 0x2b1   : > { %7732 = vst [vmem:[%s8571_s28 + $0xd4] sm:$0xf] %v7324_v36  ;;  %v5315_v7 = vrot.slane %v5096_v38, 1  ;;  %v4970_v35 = vadd.f32 %v4826_v14, %v4477_v21  ;;  %v4971_v56 = vadd.f32 %v4827_v59, %v4478_v47  ;;  %v5316_v41 = vrot.slane %v5097_v32, 1  ;;  %v11541_v59 = vld [vmem:[#allocation2 + $0x3a0] sm:$0xff] }
 0x2b2   : > { %14954 = vst [vmem:[#allocation10_spill] sm:$0xff] %v11525_v16  ;;  %v5759_v3 = vmul.f32 %v11189_v28, %v11478_v62  ;;  %v14152_v40 = vrot.slane %v11521_v10, 1  ;;  %v14151_v2 = vrot.slane %v11525_v16, 1  ;;  %v5760_v9 = vmul.f32 %v11197_v52, %v11490_v4 }
 0x2b3   : > { %v5603_v0 = vadd.f32 %v5315_v7, %v4967_v44  ;;  %v5604_v43 = vadd.f32 %v5316_v41, %v4968_v15  ;;  %v11535_v39 = vmul.f32 %v11189_v28, %v11496_v53  ;;  %v11539_v47 = vmul.f32 %v11197_v52, %v11498_v8 }
 0x2b4   : > { %v6101_v14 = vrot.slane %v5759_v3, 2  ;;  %v5319_v38 = vsel %vm1319_vm0, %v5315_v7, %v14152_v40  ;;  %v5321_v44 = vsel %vm1319_vm0, %v5316_v41, %v14151_v2  ;;  %v6102_v58 = vrot.slane %v5760_v9, 2 }
 0x2b5   : > { %v913_v30 = vmul.f32 %v14502_v6, %v736_v50  ;;  %v5606_v32 = vadd.f32 %v5319_v38, %v4970_v35  ;;  %v5607_v36 = vadd.f32 %v5321_v44, %v4971_v56  ;;  %v14154_v21 = vrot.slane %v11535_v39, 2 }
 0x2b6   : > { %v14157_v15 = vrot.slane %v11539_v47, 2  ;;  %v6431_v3 = vadd.f32 %v6101_v14, %v5603_v0  ;;  %v6432_v5 = vadd.f32 %v6102_v58, %v5604_v43  ;;  %v1183_v4 = vmul.f32 %v14955_v19, %v736_v50 }
 0x2b7   : > { %v11555_v7 = vmul.f32 %v14955_v19, %v11541_v59  ;;  %v6105_v41 = vsel %vm2052_vm1, %v6101_v14, %v14154_v21  ;;  %v1847_v35 = vmul.f32 %v8499_v60, %v736_v50  ;;  %v11566_v0 = vmul.f32 %v8499_v60, %v11541_v59  ;;  %v14957_v14 = vld [vmem:[#allocation12_spill] sm:$0xff] }
 0x2b8   : > { %v6107_v56 = vsel %vm2052_vm1, %v6102_v58, %v14157_v15  ;;  %v6434_v9 = vadd.f32 %v6105_v41, %v5606_v32  ;;  %v8010_v38 = vpack.c.bf16 %v6432_v5, %v6431_v3  ;;  %v1403_v44 = vrot.slane %v1183_v4, 1  ;;  %v14958_v15 = vld [vmem:[#allocation28_spill] sm:$0xff] }
 0x2b9   : > { %14956 = vst [vmem:[#allocation3_spill] sm:$0xff] %v11566_v0  ;;  %v6435_v43 = vadd.f32 %v6107_v56, %v5607_v36  ;;  %v14161_v2 = vrot.slane %v11555_v7, 1  ;;  %v2190_v40 = vrot.slane %v1847_v35, 2  ;;  %v14160_v19 = vrot.slane %v11566_v0, 2  ;;  %v11587_v3 = vld [vmem:[#allocation2 + $0x448] sm:$0xff] }
 0x2ba   : > { %v2871_v21 = vmul.f32 %v14957_v14, %v8502_v61  ;;  %v7326_v58 = vshrl.u32 %v8010_v38, 16  ;;  %v1691_v50 = vadd.f32 %v1403_v44, %v14958_v15  ;;  %v3141_v18 = vmul.f32 %v14957_v14, %v14959_v55  ;;  %14961 = vst [vmem:[#allocation34_spill] sm:$0xff] %v11587_v3 }
 0x2bb   : > { %v8012_v62 = vpack.c.bf16 %v6435_v43, %v6434_v9  ;;  %v1409_v5 = vsel %vm1319_vm0, %v1403_v44, %v14161_v2  ;;  %v2196_v4 = vsel %vm2052_vm1, %v2190_v40, %v14160_v19  ;;  %v11583_v32 = vmul.f32 %v11274_v26, %v14959_v55  ;;  %v11594_v19 = vld [vmem:[#allocation2 + $0x460] sm:$0xff] }
 0x2bc   : > { %v3804_v36 = vmul.f32 %v14957_v14, %v8508_v49  ;;  %v7940_v15 = vrot.slane %v7326_v58, 11  ;;  %v1694_v35 = vadd.f32 %v1409_v5, %v913_v30  ;;  %v2520_v9 = vadd.f32 %v2190_v40, %v1691_v50  ;;  %v14964_v30 = vld [vmem:[#allocation29_spill] sm:$0xff] }
 0x2bd   : > { %14960 = vst [vmem:[#allocation11_spill] sm:$0xff] %v11583_v32  ;;  %v7331_v41 = vshrl.u32 %v8012_v62, 16  ;;  %v7334_v56 = vshll.u32 %v8012_v62, 16  ;;  %v3360_v43 = vrot.slane %v3141_v18, 1  ;;  %v14164_v38 = vrot.slane %v11583_v32, 1 }
 0x2be   : > { %v11592_v44 = vmul.f32 %v11274_v26, %v8508_v49  ;;  %v2523_v55 = vadd.f32 %v2196_v4, %v1694_v35  ;;  %v4146_v14 = vrot.slane %v3804_v36, 2  ;;  %v4828_v58 = vmul.f32 %v14525_v37, %v11587_v3  ;;  %v740_v32 = vld [vmem:[#allocation2 + $0x3a8] sm:$0x1] }
 0x2bf   : > { %v11596_v2 = vrot.slane %v7331_v41, 7  ;;  %v3012_v62 = vadd.f32 %v14963_v13, %v2520_v9  ;;  %v3366_v18 = vsel %vm1319_vm0, %v3360_v43, %v14164_v38  ;;  %v5098_v50 = vmul.f32 %v14964_v30, %v11587_v3 }
 0x2c0   : > { %14962 = vst [vmem:[#allocation32_spill] sm:$0xff] %v11592_v44  ;;  %v14170_v40 = vrot.slane %v11592_v44, 2  ;;  %v3015_v41 = vadd.f32 %v2871_v21, %v2523_v55  ;;  %v11610_v4 = vmul.f32 %v14964_v30, %v11594_v19  ;;  %v5761_v13 = vmul.f32 %v11303_v57, %v11587_v3  ;;  %v8091_v3 = vld [vmem:[#allocation2 + $0x390] sm:$0xff] }
 0x2c1   : > { %v7336_v5 = vor.u32 %v7334_v56, %v11596_v2  ;;  %v3648_v36 = vadd.f32 %v3360_v43, %v3012_v62  ;;  %v5317_v9 = vrot.slane %v5098_v50, 1  ;;  %v11619_v38 = vmul.f32 %v11303_v57, %v11594_v19  ;;  %v741_v56 = vld [vmem:[#allocation2 + $0x3b0] sm:$0x1] }
 0x2c2   : > { %14965 = vst [vmem:[#allocation7_spill] sm:$0xff] %v11610_v4  ;;  %v4152_v35 = vsel %vm2052_vm1, %v4146_v14, %v14170_v40  ;;  %v3651_v21 = vadd.f32 %v3366_v18, %v3015_v41  ;;  %v14174_v30 = vrot.slane %v11610_v4, 1  ;;  %v6103_v0 = vrot.slane %v5761_v13, 2  ;;  %v8092_v40 = vld [vmem:[#allocation2 + $0x398] sm:$0xff]  ;;  %v2699_v41 = vld [vmem:[#allocation2 + $0x410] sm:$0x1] }
 0x2c3   : > { %v7337_v55 = vsel %vm8551_vm4, %v7940_v15, %v7336_v5  ;;  %v4476_v43 = vadd.f32 %v4146_v14, %v3648_v36  ;;  %v14176_v62 = vrot.slane %v11619_v38, 2  ;;  %v914_v50 = vmul.f32 %v8091_v3, %v14928_v63  ;;  %v2698_v5 = vld [vmem:[#allocation2 + $0x408] sm:$0x1]  ;;  %v14966_v14 = vld [vmem:[#allocation9_spill] sm:$0xff] }
 0x2c4   : > { %7733 = vst [vmem:[%s8571_s28 + $0xd8] sm:$0xff] %v7337_v55  ;;  %v915_v44 = vmul.f32 %v8092_v40, %v14705_v48  ;;  %v4479_v16 = vadd.f32 %v4152_v35, %v3651_v21  ;;  %v5323_v29 = vsel %vm1319_vm0, %v5317_v9, %v14174_v30  ;;  %v1851_v15 = vmul.f32 %v14936_v25, %v740_v32 }
 0x2c5   : > { %v1852_v18 = vmul.f32 %v14710_v17, %v741_v56  ;;  %v4969_v13 = vadd.f32 %v14966_v14, %v4476_v43  ;;  %v6109_v3 = vsel %vm2052_vm1, %v6103_v0, %v14176_v62  ;;  %v14967_v36 = vrot.slane %v11405_v11, 1  ;;  %v4655_v17 = vld [vmem:[#allocation2 + $0x468] sm:$0x1] }
 0x2c6   : > { %v14968_v35 = vrot.slane %v11409_v45, 1  ;;  %v4972_v21 = vadd.f32 %v4828_v58, %v4479_v16  ;;  %v2197_v30 = vrot.slane %v1851_v15, 2  ;;  %v2872_v32 = vmul.f32 %v11145_v42, %v8224_v22 }
 0x2c7   : > { %v1695_v40 = vadd.f32 %v14967_v36, %v914_v50  ;;  %v2199_v4 = vrot.slane %v1852_v18, 2  ;;  %v5605_v56 = vadd.f32 %v5317_v9, %v4969_v13  ;;  %v2873_v43 = vmul.f32 %v11165_v34, %v8228_v23 }
 0x2c8   : > { %v1696_v55 = vadd.f32 %v14968_v35, %v915_v44  ;;  %v3808_v14 = vmul.f32 %v8375_v1, %v2698_v5  ;;  %v3809_v62 = vmul.f32 %v14836_v51, %v2699_v41  ;;  %v5608_v11 = vadd.f32 %v5323_v29, %v4972_v21  ;;  %v4656_v5 = vld [vmem:[#allocation2 + $0x470] sm:$0x1] }
 0x2c9   : > { %v14969_v50 = vrot.slane %v11429_v20, 2  ;;  %v14970_v16 = vrot.slane %v11433_v24, 2  ;;  %v4829_v58 = vmul.f32 %v14839_v54, %v11496_v53  ;;  %v6433_v9 = vadd.f32 %v6103_v0, %v5605_v56 }
 0x2ca   : > { %v4153_v13 = vrot.slane %v3808_v14, 2  ;;  %v6436_v36 = vadd.f32 %v6109_v3, %v5608_v11  ;;  %v4155_v41 = vrot.slane %v3809_v62, 2  ;;  %v4830_v29 = vmul.f32 %v14670_v12, %v11498_v8 }
 0x2cb   : > { %v2198_v45 = vsel %vm2052_vm1, %v14969_v50, %v2197_v30  ;;  %v2200_v44 = vsel %vm2052_vm1, %v14970_v16, %v2199_v4  ;;  %v5765_v20 = vmul.f32 %v11189_v28, %v4655_v17  ;;  %v8011_v30 = vpack.c.bf16 %v6433_v9, %v6433_v9 }
 0x2cc   : > { %v2524_v15 = vadd.f32 %v2198_v45, %v1695_v40  ;;  %v2525_v18 = vadd.f32 %v2200_v44, %v1696_v55  ;;  %v14971_v4 = vrot.slane %v11476_v27, 2  ;;  %v8013_v50 = vpack.c.bf16 %v6436_v36, %v6436_v36  ;;  %v742_v27 = vld [vmem:[#allocation2 + $0x3b8] sm:$0x1] }
 0x2cd   : > { %v14972_v0 = vrot.slane %v11488_v46, 2  ;;  %v5766_v3 = vmul.f32 %v11197_v52, %v4656_v5  ;;  %v6110_v62 = vrot.slane %v5765_v20, 2  ;;  %v7339_v55 = vshrl.u32 %v8011_v30, 16  ;;  %v2700_v44 = vld [vmem:[#allocation2 + $0x418] sm:$0x1] }
 0x2ce   : > { %v3016_v35 = vadd.f32 %v2872_v32, %v2524_v15  ;;  %v3017_v24 = vadd.f32 %v2873_v43, %v2525_v18  ;;  %v4154_v21 = vsel %vm2052_vm1, %v14971_v4, %v4153_v13  ;;  %v14973_v56 = vrot.slane %v11462_v31, 1  ;;  %v4657_v18 = vld [vmem:[#allocation2 + $0x478] sm:$0x1] }
 0x2cf   : > { %v4156_v40 = vsel %vm2052_vm1, %v14972_v0, %v4155_v41  ;;  %v14974_v17 = vrot.slane %v11466_v33, 1  ;;  %v7351_v32 = vrot.slane %v11596_v2, 4  ;;  %v7344_v43 = vshrl.u32 %v8013_v50, 16 }
 0x2d0   : > { %v3652_v14 = vadd.f32 %v14973_v56, %v3016_v35  ;;  %v7347_v11 = vshll.u32 %v8013_v50, 16  ;;  %v14975_v45 = vrot.slane %v11535_v39, 2  ;;  %v6112_v16 = vrot.slane %v5766_v3, 2 }
 0x2d1   : > { %v3653_v28 = vadd.f32 %v14974_v17, %v3017_v24  ;;  %v7941_v52 = vrot.slane %v7339_v55, 11  ;;  %v916_v31 = vmul.f32 %v14502_v6, %v11541_v59  ;;  %v11675_v33 = vrot.slane %v7344_v43, 7  ;;  %v14982_v55 = vld [vmem:[#allocation3_spill] sm:$0xff] }
 0x2d2   : > { %v6111_v46 = vsel %vm2052_vm1, %v14975_v45, %v6110_v62  ;;  %v4480_v9 = vadd.f32 %v4154_v21, %v3652_v14  ;;  %v14976_v13 = vrot.slane %v11539_v47, 2  ;;  %v1853_v36 = vmul.f32 %v8499_v60, %v742_v27 }
 0x2d3   : > { %v4481_v15 = vadd.f32 %v4156_v40, %v3653_v28  ;;  %v2874_v39 = vmul.f32 %v11274_v26, %v8502_v61  ;;  %v14977_v30 = vrot.slane %v11555_v7, 1  ;;  %v3810_v59 = vmul.f32 %v8508_v49, %v2700_v44  ;;  %v14979_v26 = vld [vmem:[#allocation10_spill] sm:$0xff]  ;;  %v14984_v28 = vld [vmem:[#allocation37_spill] sm:$0xff] }
 0x2d4   : > { %v6113_v5 = vsel %vm2052_vm1, %v14976_v13, %v6112_v16  ;;  %v4973_v41 = vadd.f32 %v4829_v58, %v4480_v9  ;;  %v7349_v24 = vor.u32 %v7347_v11, %v11675_v33  ;;  %v2201_v4 = vrot.slane %v1853_v36, 2  ;;  %v14986_v11 = vld [vmem:[#allocation32_spill] sm:$0xff]  ;;  %v14992_v36 = vld [vmem:[#allocation5_spill] sm:$0xff] }
 0x2d5   : > { %v4974_v20 = vadd.f32 %v4830_v29, %v4481_v15  ;;  %v1697_v35 = vadd.f32 %v14977_v30, %v916_v31  ;;  %v4831_v47 = vmul.f32 %v14525_v37, %v11594_v19  ;;  %v5767_v21 = vmul.f32 %v11303_v57, %v4657_v18  ;;  %v14990_v15 = vld [vmem:[#allocation19_spill] sm:$0xff]  ;;  %v14991_v18 = vld [vmem:[#allocation24_spill] sm:$0xff] }
 0x2d6   : > { %v14978_v50 = vrot.slane %v11521_v10, 1  ;;  %v14980_v58 = vrot.slane %v14979_v26, 1  ;;  %v4157_v29 = vrot.slane %v3810_v59, 2  ;;  %v7360_v7 = vrot.slane %v11675_v33, 4 }
 0x2d7   : > { %v7350_v62 = vsel %vm8551_vm4, %v7941_v52, %v7349_v24  ;;  %v14983_v56 = vrot.slane %v14982_v55, 2  ;;  %v6114_v17 = vrot.slane %v5767_v21, 2  ;;  %v11702_v57 = vmul.f32 %v14984_v28, %v14928_v63  ;;  %v14994_v24 = vld [vmem:[#allocation8_spill] sm:$0xff] }
 0x2d8   : > { %v5609_v0 = vadd.f32 %v14978_v50, %v4973_v41  ;;  %v5610_v40 = vadd.f32 %v14980_v58, %v4974_v20  ;;  %7734 = vst [vmem:[%s8571_s28 + $0xe0] sm:$0xf] %v7350_v62  ;;  %v14987_v45 = vrot.slane %v14986_v11, 2  ;;  %v14988_v44 = vrot.slane %v11619_v38, 2  ;;  %v14993_v20 = vld [vmem:[#allocation6_spill] sm:$0xff]  ;;  %v14995_v50 = vld [vmem:[#allocation11_spill] sm:$0xff] }
 0x2d9   : > { %v2202_v14 = vsel %vm2052_vm1, %v14983_v56, %v2201_v4  ;;  %14985 = vst [vmem:[#allocation26_spill] sm:$0xff] %v11702_v57  ;;  %v11713_v9 = vmul.f32 %v14984_v28, %v14705_v48  ;;  %v920_v31 = vmul.f32 %v14990_v15, %v14928_v63  ;;  %v1187_v41 = vmul.f32 %v14990_v15, %v14992_v36 }
 0x2da   : > { %v6437_v10 = vadd.f32 %v6111_v46, %v5609_v0  ;;  %v6438_v27 = vadd.f32 %v6113_v5, %v5610_v40  ;;  %v2526_v43 = vadd.f32 %v2202_v14, %v1697_v35  ;;  %v4158_v16 = vsel %vm2052_vm1, %v14987_v45, %v4157_v29 }
 0x2db   : > { %v6115_v52 = vsel %vm2052_vm1, %v14988_v44, %v6114_v17  ;;  %14989 = vst [vmem:[#allocation39_spill] sm:$0xff] %v11713_v9  ;;  %v921_v46 = vmul.f32 %v14991_v18, %v14705_v48  ;;  %v1188_v38 = vmul.f32 %v14991_v18, %v14993_v20  ;;  %v11725_v30 = vmul.f32 %v11145_v42, %v14992_v36 }
 0x2dc   : > { %v8014_v13 = vpack.c.bf16 %v6438_v27, %v6437_v10  ;;  %v3018_v5 = vadd.f32 %v2874_v39, %v2526_v43  ;;  %v11729_v35 = vmul.f32 %v11165_v34, %v14993_v20  ;;  %v1854_v59 = vmul.f32 %v14990_v15, %v14936_v25 }
 0x2dd   : > { %v1855_v39 = vmul.f32 %v14991_v18, %v14994_v24  ;;  %v14996_v0 = vrot.slane %v14995_v50, 1  ;;  %v1410_v58 = vrot.slane %v1187_v41, 1  ;;  %v1411_v40 = vrot.slane %v1188_v38, 1  ;;  %v14997_v38 = vld [vmem:[#allocation7_spill] sm:$0xff] }
 0x2de   : > { %v7353_v4 = vshrl.u32 %v8014_v13, 16  ;;  %v7356_v21 = vshll.u32 %v8014_v13, 16  ;;  %v14185_v29 = vrot.slane %v11725_v30, 1  ;;  %v14181_v62 = vrot.slane %v11729_v35, 1 }
 0x2df   : > { %v3654_v26 = vadd.f32 %v14996_v0, %v3018_v5  ;;  %v11741_v55 = vmul.f32 %v11145_v42, %v14936_v25  ;;  %v1698_v17 = vadd.f32 %v1410_v58, %v11702_v57  ;;  %v11746_v10 = vmul.f32 %v11165_v34, %v14994_v24 }
 0x2e0   : > { %v7355_v56 = vrot.slane %v7353_v4, 7  ;;  %v1414_v27 = vsel %vm1319_vm0, %v1410_v58, %v14185_v29  ;;  %v1416_v43 = vsel %vm1319_vm0, %v1411_v40, %v14181_v62  ;;  %v1699_v42 = vadd.f32 %v1411_v40, %v11713_v9  ;;  %v15002_v58 = vld [vmem:[#allocation18_spill] sm:$0xff] }
 0x2e1   : > { %v4482_v14 = vadd.f32 %v4158_v16, %v3654_v26  ;;  %v2203_v11 = vrot.slane %v1854_v59, 2  ;;  %v1701_v44 = vadd.f32 %v1414_v27, %v920_v31  ;;  %v1702_v15 = vadd.f32 %v1416_v43, %v921_v46  ;;  %v15001_v46 = vld [vmem:[#allocation22_spill] sm:$0xff] }
 0x2e2   : > { %v7358_v45 = vor.u32 %v7356_v21, %v7355_v56  ;;  %v2204_v18 = vrot.slane %v1855_v39, 2  ;;  %v14180_v34 = vrot.slane %v11741_v55, 2  ;;  %v14178_v13 = vrot.slane %v11746_v10, 2  ;;  %v15004_v43 = vld [vmem:[#allocation14_spill] sm:$0xff] }
 0x2e3   : > { %v4975_v16 = vadd.f32 %v4831_v47, %v4482_v14  ;;  %v2527_v5 = vadd.f32 %v2203_v11, %v1698_v17  ;;  %v14998_v4 = vrot.slane %v14997_v38, 1  ;;  %v11765_v59 = vmul.f32 %v14984_v28, %v8224_v22  ;;  %v15003_v17 = vld [vmem:[#allocation13_spill] sm:$0xff] }
 0x2e4   : > { %v7359_v41 = vsel %vm8551_vm4, %v7351_v32, %v7358_v45  ;;  %v11769_v47 = vmul.f32 %v14984_v28, %v8228_v23  ;;  %v2207_v31 = vsel %vm2052_vm1, %v2203_v11, %v14180_v34  ;;  %v2209_v2 = vsel %vm2052_vm1, %v2204_v18, %v14178_v13  ;;  %v11820_v34 = vld [vmem:[#allocation2 + $0x4a0] sm:$0xff] }
 0x2e5   : > { %v5611_v50 = vadd.f32 %v14998_v4, %v4975_v16  ;;  %14999 = vst [vmem:[#allocation27_spill] sm:$0xff] %v11765_v59  ;;  %7735 = vst [vmem:[%s8571_s28 + $0xe4] sm:$0xff] %v7359_v41  ;;  %v2528_v32 = vadd.f32 %v2204_v18, %v1699_v42  ;;  %v2878_v39 = vmul.f32 %v15001_v46, %v8224_v22 }
 0x2e6   : > { %15000 = vst [vmem:[#allocation35_spill] sm:$0xff] %v11769_v47  ;;  %v2530_v0 = vadd.f32 %v2207_v31, %v1701_v44  ;;  %v2531_v26 = vadd.f32 %v2209_v2, %v1702_v15  ;;  %v2879_v40 = vmul.f32 %v15002_v58, %v8228_v23  ;;  %v3019_v56 = vadd.f32 %v11765_v59, %v2527_v5 }
 0x2e7   : > { %v6439_v21 = vadd.f32 %v6115_v52, %v5611_v50  ;;  %v3020_v14 = vadd.f32 %v11769_v47, %v2528_v32  ;;  %v3145_v27 = vmul.f32 %v15001_v46, %v15003_v17  ;;  %v3146_v11 = vmul.f32 %v15002_v58, %v15004_v43  ;;  %15006 = vst [vmem:[#allocation31_spill] sm:$0xff] %v11820_v34 }
 0x2e8   : > { %v3022_v45 = vadd.f32 %v2878_v39, %v2530_v0  ;;  %v3023_v16 = vadd.f32 %v2879_v40, %v2531_v26  ;;  %v11790_v52 = vmul.f32 %v11496_v53, %v15003_v17  ;;  %v11794_v44 = vmul.f32 %v11498_v8, %v15004_v43  ;;  %v748_v43 = vld [vmem:[#allocation2 + $0x3e8] sm:$0xff] }
 0x2e9   : > { %v8015_v42 = vpack.c.bf16 %v6439_v21, %v6439_v21  ;;  %v3367_v15 = vrot.slane %v3145_v27, 1  ;;  %v3368_v18 = vrot.slane %v3146_v11, 1  ;;  %v3811_v5 = vmul.f32 %v15001_v46, %v8375_v1 }
 0x2ea   : > { %v14179_v4 = vrot.slane %v11790_v52, 1  ;;  %v3812_v50 = vmul.f32 %v15002_v58, %v14836_v51  ;;  %v14182_v31 = vrot.slane %v11794_v44, 1  ;;  %v11804_v39 = vmul.f32 %v11496_v53, %v8375_v1 }
 0x2eb   : > { %v7362_v41 = vshrl.u32 %v8015_v42, 16  ;;  %v7365_v38 = vshll.u32 %v8015_v42, 16  ;;  %v3655_v2 = vadd.f32 %v3367_v15, %v3019_v56  ;;  %v3656_v32 = vadd.f32 %v3368_v18, %v3020_v14  ;;  %v11817_v42 = vld [vmem:[#allocation2 + $0x498] sm:$0xff] }
 0x2ec   : > { %v3371_v0 = vsel %vm1319_vm0, %v3367_v15, %v14179_v4  ;;  %v11811_v26 = vmul.f32 %v11498_v8, %v14836_v51  ;;  %v4159_v40 = vrot.slane %v3811_v5, 2  ;;  %v3373_v27 = vsel %vm1319_vm0, %v3368_v18, %v14182_v31  ;;  %15005 = vst [vmem:[#allocation38_spill] sm:$0xff] %v11817_v42  ;;  %v11825_v18 = vld [vmem:[#allocation2 + $0x4b0] sm:$0xff] }
 0x2ed   : > { %v7364_v21 = vrot.slane %v7362_v41, 7  ;;  %v3658_v56 = vadd.f32 %v3371_v0, %v3022_v45  ;;  %v4160_v14 = vrot.slane %v3812_v50, 2  ;;  %v14184_v11 = vrot.slane %v11804_v39, 2 }
 0x2ee   : > { %v3659_v13 = vadd.f32 %v3373_v27, %v3023_v16  ;;  %v14183_v15 = vrot.slane %v11811_v26, 2  ;;  %v4483_v4 = vadd.f32 %v4159_v40, %v3655_v2  ;;  %v11829_v45 = vmul.f32 %v14984_v28, %v14839_v54 }
 0x2ef   : > { %v7367_v41 = vor.u32 %v7365_v38, %v7364_v21  ;;  %v4163_v5 = vsel %vm2052_vm1, %v4159_v40, %v14184_v11  ;;  %v4484_v62 = vadd.f32 %v4160_v14, %v3656_v32  ;;  %v11833_v38 = vmul.f32 %v14984_v28, %v14670_v12  ;;  %v11842_v32 = vld [vmem:[#allocation2 + $0x4b8] sm:$0xff] }
 0x2f0   : > { %15007 = vst [vmem:[#allocation33_spill] sm:$0xff] %v11829_v45  ;;  %v4165_v50 = vsel %vm2052_vm1, %v4160_v14, %v14183_v15  ;;  %v4486_v2 = vadd.f32 %v4163_v5, %v3658_v56  ;;  %v4835_v21 = vmul.f32 %v14839_v54, %v11817_v42  ;;  %v4836_v40 = vmul.f32 %v14670_v12, %v11820_v34  ;;  %v15010_v56 = vld [vmem:[#allocation21_spill] sm:$0xff] }
 0x2f1   : > { %15008 = vst [vmem:[#allocation12_spill] sm:$0xff] %v11833_v38  ;;  %v7368_v16 = vsel %vm8551_vm4, %v7360_v7, %v7367_v41  ;;  %v4487_v0 = vadd.f32 %v4165_v50, %v3659_v13  ;;  %v4976_v33 = vadd.f32 %v11829_v45, %v4483_v4  ;;  %v4977_v27 = vadd.f32 %v11833_v38, %v4484_v62  ;;  %v15009_v41 = vld [vmem:[#allocation20_spill] sm:$0xff]  ;;  %v11866_v62 = vld [vmem:[%s13700_s1 + $0x18] ss:$0 sm:$0xff]  ;;  %v11873_v50 = vld [vmem:[%s13700_s1 + $0x20] ss:$0 sm:$0xff] }
 0x2f2   : > { %7736 = vst [vmem:[%s8571_s28 + $0xec] sm:$0xf] %v7368_v16  ;;  %v4979_v7 = vadd.f32 %v4835_v21, %v4486_v2  ;;  %v5102_v31 = vmul.f32 %v15009_v41, %v11817_v42  ;;  %v5103_v14 = vmul.f32 %v15010_v56, %v11820_v34  ;;  %v11857_v5 = vmul.f32 %v15009_v41, %v11825_v18 }
 0x2f3   : > { %v4980_v16 = vadd.f32 %v4836_v40, %v4487_v0  ;;  %v11861_v13 = vmul.f32 %v15010_v56, %v11842_v32  ;;  %v5768_v4 = vmul.f32 %v11866_v62, %v11817_v42  ;;  %v5769_v2 = vmul.f32 %v11873_v50, %v11820_v34  ;;  %v11895_v34 = vld [vmem:[#allocation2 + $0x400] sm:$0xff] }
 0x2f4   : > { %v5324_v21 = vrot.slane %v5102_v31, 1  ;;  %v5325_v0 = vrot.slane %v5103_v14, 1  ;;  %v14197_v40 = vrot.slane %v11857_v5, 1  ;;  %v11880_v15 = vmul.f32 %v11866_v62, %v11825_v18 }
 0x2f5   : > { %15011 = vst [vmem:[#allocation28_spill] sm:$0xff] %v11861_v13  ;;  %v14196_v11 = vrot.slane %v11861_v13, 1  ;;  %v11885_v29 = vmul.f32 %v11873_v50, %v11842_v32  ;;  %v6116_v38 = vrot.slane %v5768_v4, 2  ;;  %v6117_v56 = vrot.slane %v5769_v2, 2  ;;  %v8098_v13 = vld [vmem:[#allocation2 + $0x3f8] sm:$0xff] }
 0x2f6   : > { %v5328_v45 = vsel %vm1319_vm0, %v5324_v21, %v14197_v40  ;;  %v5612_v31 = vadd.f32 %v5324_v21, %v4976_v33  ;;  %v5613_v14 = vadd.f32 %v5325_v0, %v4977_v27  ;;  %v14201_v41 = vrot.slane %v11880_v15, 2 }
 0x2f7   : > { %v5330_v17 = vsel %vm1319_vm0, %v5325_v0, %v14196_v11  ;;  %v5615_v47 = vadd.f32 %v5328_v45, %v4979_v7  ;;  %v14202_v59 = vrot.slane %v11885_v29, 2  ;;  %v11899_v4 = vmul.f32 %v14984_v28, %v14502_v6  ;;  %v15013_v11 = vld [vmem:[#allocation23_spill] sm:$0xff] }
 0x2f8   : > { %v5616_v2 = vadd.f32 %v5330_v17, %v4980_v16  ;;  %v6120_v33 = vsel %vm2052_vm1, %v6116_v38, %v14201_v41  ;;  %v6440_v27 = vadd.f32 %v6116_v38, %v5612_v31  ;;  %v6441_v21 = vadd.f32 %v6117_v56, %v5613_v14 }
 0x2f9   : > { %15012 = vst [vmem:[#allocation36_spill] sm:$0xff] %v11899_v4  ;;  %v6122_v0 = vsel %vm2052_vm1, %v6117_v56, %v14202_v59  ;;  %v6443_v45 = vadd.f32 %v6120_v33, %v5615_v47  ;;  %v922_v7 = vmul.f32 %v14502_v6, %v748_v43  ;;  %v1189_v40 = vmul.f32 %v15013_v11, %v748_v43  ;;  %v15016_v56 = vld [vmem:[#allocation34_spill] sm:$0xff] }
 0x2fa   : > { %v6444_v42 = vadd.f32 %v6122_v0, %v5616_v2  ;;  %v8016_v9 = vpack.c.bf16 %v6441_v21, %v6440_v27  ;;  %v11911_v17 = vmul.f32 %v15013_v11, %v11895_v34  ;;  %v1856_v16 = vmul.f32 %v8499_v60, %v748_v43 }
 0x2fb   : > { %v1412_v41 = vrot.slane %v1189_v40, 1  ;;  %v11916_v38 = vmul.f32 %v8499_v60, %v11895_v34  ;;  %v11920_v47 = vmul.f32 %v14984_v28, %v8502_v61  ;;  %v2880_v31 = vmul.f32 %v15016_v56, %v8502_v61  ;;  %v15017_v40 = vld [vmem:[#allocation25_spill] sm:$0xff] }
 0x2fc   : > { %v8018_v14 = vpack.c.bf16 %v6444_v42, %v6443_v45  ;;  %v7370_v2 = vshrl.u32 %v8016_v9, 16  ;;  %v14209_v33 = vrot.slane %v11911_v17, 1  ;;  %v2205_v27 = vrot.slane %v1856_v16, 2  ;;  %v11936_v42 = vld [vmem:[#allocation2 + $0x4a8] sm:$0xff] }
 0x2fd   : > { %15014 = vst [vmem:[#allocation9_spill] sm:$0xff] %v11916_v38  ;;  %15015 = vst [vmem:[#allocation10_spill] sm:$0xff] %v11920_v47  ;;  %v1700_v21 = vadd.f32 %v1412_v41, %v11899_v4  ;;  %v14210_v43 = vrot.slane %v11916_v38, 2  ;;  %v3147_v0 = vmul.f32 %v15016_v56, %v15017_v40  ;;  %v11931_v59 = vmul.f32 %v11594_v19, %v15017_v40 }
 0x2fe   : > { %v7942_v28 = vrot.slane %v7370_v2, 11  ;;  %v7375_v11 = vshrl.u32 %v8018_v14, 16  ;;  %v7378_v57 = vshll.u32 %v8018_v14, 16  ;;  %v1418_v9 = vsel %vm1319_vm0, %v1412_v41, %v14209_v33  ;;  %15019 = vst [vmem:[#allocation37_spill] sm:$0xff] %v11936_v42  ;;  %v11950_v41 = vld [vmem:[#allocation2 + $0x4c0] sm:$0xff]  ;;  %v11953_v33 = vld [vmem:[#allocation2 + $0x18] sm:$0xff] }
 0x2ff   : > { %15018 = vst [vmem:[#allocation3_spill] sm:$0xff] %v11931_v59  ;;  %v1703_v45 = vadd.f32 %v1418_v9, %v922_v7  ;;  %v2211_v16 = vsel %vm2052_vm1, %v2205_v27, %v14210_v43  ;;  %v2529_v4 = vadd.f32 %v2205_v27, %v1700_v21  ;;  %v3369_v20 = vrot.slane %v3147_v0, 1  ;;  %15021 = vst [vmem:[#allocation19_spill] sm:$0xff] %v11953_v33  ;;  %v15023_v43 = vld [vmem:[#allocation29_spill] sm:$0xff] }
 0x300   : > { %v11941_v36 = vrot.slane %v7375_v11, 7  ;;  %v14215_v40 = vrot.slane %v11931_v59, 1  ;;  %v3813_v14 = vmul.f32 %v15016_v56, %v8508_v49  ;;  %v11948_v2 = vmul.f32 %v11594_v19, %v8508_v49 }
 0x301   : > { %v2532_v7 = vadd.f32 %v2211_v16, %v1703_v45  ;;  %v3021_v9 = vadd.f32 %v11920_v47, %v2529_v4  ;;  %v11957_v11 = vmul.f32 %v11953_v33, %v14525_v37  ;;  %v4837_v27 = vmul.f32 %v14525_v37, %v11936_v42 }
 0x302   : > { %15020 = vst [vmem:[#allocation32_spill] sm:$0xff] %v11948_v2  ;;  %v7380_v56 = vor.u32 %v7378_v57, %v11941_v36  ;;  %v3375_v21 = vsel %vm1319_vm0, %v3369_v20, %v14215_v40  ;;  %v4161_v0 = vrot.slane %v3813_v14, 2  ;;  %v14216_v45 = vrot.slane %v11948_v2, 2  ;;  %v11980_v14 = vld [vmem:[%s13700_s1 + $0x28] ss:$0 sm:$0xff]  ;;  %v8097_v2 = vld [vmem:[#allocation2 + $0x3f0] sm:$0xff] }
 0x303   : > { %15022 = vst [vmem:[#allocation24_spill] sm:$0xff] %v11957_v11  ;;  %v3024_v4 = vadd.f32 %v2880_v31, %v2532_v7  ;;  %v3657_v16 = vadd.f32 %v3369_v20, %v3021_v9  ;;  %v5104_v47 = vmul.f32 %v15023_v43, %v11936_v42  ;;  %v11970_v33 = vmul.f32 %v15023_v43, %v11950_v41  ;;  %v752_v7 = vld [vmem:[#allocation2 + $0x408] sm:$0x1] }
 0x304   : > { %v7381_v58 = vsel %vm8551_vm4, %v7942_v28, %v7380_v56  ;;  %v4167_v57 = vsel %vm2052_vm1, %v4161_v0, %v14216_v45  ;;  %v5770_v20 = vmul.f32 %v11980_v14, %v11936_v42  ;;  %v11986_v31 = vmul.f32 %v11980_v14, %v11950_v41  ;;  %v753_v45 = vld [vmem:[#allocation2 + $0x410] sm:$0x1] }
 0x305   : > { %15024 = vst [vmem:[#allocation11_spill] sm:$0xff] %v11970_v33  ;;  %7737 = vst [vmem:[%s8571_s28 + $0xf0] sm:$0xff] %v7381_v58  ;;  %v3660_v9 = vadd.f32 %v3375_v21, %v3024_v4  ;;  %v4485_v28 = vadd.f32 %v4161_v0, %v3657_v16  ;;  %v5326_v56 = vrot.slane %v5104_v47, 1  ;;  %v14227_v40 = vrot.slane %v11970_v33, 1  ;;  %v2710_v21 = vld [vmem:[#allocation2 + $0x468] sm:$0x1] }
 0x306   : > { %v6118_v43 = vrot.slane %v5770_v20, 2  ;;  %v14229_v59 = vrot.slane %v11986_v31, 2  ;;  %v923_v38 = vmul.f32 %v8097_v2, %v14928_v63  ;;  %v924_v42 = vmul.f32 %v8098_v13, %v14705_v48  ;;  %v2711_v0 = vld [vmem:[#allocation2 + $0x470] sm:$0x1] }
 0x307   : > { %v4488_v3 = vadd.f32 %v4167_v57, %v3660_v9  ;;  %v4978_v46 = vadd.f32 %v11957_v11, %v4485_v28  ;;  %v5332_v58 = vsel %vm1319_vm0, %v5326_v56, %v14227_v40  ;;  %v1860_v47 = vmul.f32 %v14936_v25, %v752_v7 }
 0x308   : > { %v6124_v4 = vsel %vm2052_vm1, %v6118_v43, %v14229_v59  ;;  %v15025_v2 = vrot.slane %v11725_v30, 1  ;;  %v15026_v13 = vrot.slane %v11729_v35, 1  ;;  %v1861_v20 = vmul.f32 %v14994_v24, %v753_v45 }
 0x309   : > { %v4981_v9 = vadd.f32 %v4837_v27, %v4488_v3  ;;  %v5614_v28 = vadd.f32 %v5326_v56, %v4978_v46  ;;  %v2212_v11 = vrot.slane %v1860_v47, 2  ;;  %v2881_v7 = vmul.f32 %v11496_v53, %v8224_v22  ;;  %v4667_v3 = vld [vmem:[#allocation2 + $0x4c8] sm:$0x1] }
 0x30a   : > { %v1704_v16 = vadd.f32 %v15025_v2, %v923_v38  ;;  %v1705_v57 = vadd.f32 %v15026_v13, %v924_v42  ;;  %v2214_v40 = vrot.slane %v1861_v20, 2  ;;  %v2882_v33 = vmul.f32 %v11498_v8, %v8228_v23 }
 0x30b   : > { %v3817_v59 = vmul.f32 %v8375_v1, %v2710_v21  ;;  %v3818_v30 = vmul.f32 %v14836_v51, %v2711_v0  ;;  %v5617_v38 = vadd.f32 %v5332_v58, %v4981_v9  ;;  %v6442_v2 = vadd.f32 %v6118_v43, %v5614_v28  ;;  %v4668_v21 = vld [vmem:[#allocation2 + $0x4d0] sm:$0x1] }
 0x30c   : > { %v15027_v35 = vrot.slane %v11741_v55, 2  ;;  %v4838_v46 = vmul.f32 %v14839_v54, %v11825_v18  ;;  %v15028_v27 = vrot.slane %v11746_v10, 2  ;;  %v4839_v55 = vmul.f32 %v14670_v12, %v11842_v32 }
 0x30d   : > { %v4168_v47 = vrot.slane %v3817_v59, 2  ;;  %v4170_v13 = vrot.slane %v3818_v30, 2  ;;  %v6445_v20 = vadd.f32 %v6124_v4, %v5617_v38  ;;  %v8017_v0 = vpack.c.bf16 %v6442_v2, %v6442_v2 }
 0x30e   : > { %v2213_v42 = vsel %vm2052_vm1, %v15027_v35, %v2212_v11  ;;  %v2215_v45 = vsel %vm2052_vm1, %v15028_v27, %v2214_v40  ;;  %v15029_v11 = vrot.slane %v11804_v39, 2  ;;  %v15030_v28 = vrot.slane %v11811_v26, 2  ;;  %v754_v39 = vld [vmem:[#allocation2 + $0x418] sm:$0x1] }
 0x30f   : > { %v2533_v56 = vadd.f32 %v2213_v42, %v1704_v16  ;;  %v2534_v58 = vadd.f32 %v2215_v45, %v1705_v57  ;;  %v5774_v40 = vmul.f32 %v11866_v62, %v4667_v3  ;;  %v8019_v59 = vpack.c.bf16 %v6445_v20, %v6445_v20 }
 0x310   : > { %v4169_v9 = vsel %vm2052_vm1, %v15029_v11, %v4168_v47  ;;  %v4171_v10 = vsel %vm2052_vm1, %v15030_v28, %v4170_v13  ;;  %v7383_v16 = vshrl.u32 %v8017_v0, 16  ;;  %v5775_v4 = vmul.f32 %v11873_v50, %v4668_v21  ;;  %v4669_v0 = vld [vmem:[#allocation2 + $0x4d8] sm:$0x1] }
 0x311   : > { %v3025_v43 = vadd.f32 %v2881_v7, %v2533_v56  ;;  %v3026_v30 = vadd.f32 %v2882_v33, %v2534_v58  ;;  %v15031_v57 = vrot.slane %v11790_v52, 1  ;;  %v6125_v2 = vrot.slane %v5774_v40, 2  ;;  %v2712_v56 = vld [vmem:[#allocation2 + $0x478] sm:$0x1] }
 0x312   : > { %v7395_v7 = vrot.slane %v11941_v36, 4  ;;  %v925_v35 = vmul.f32 %v14502_v6, %v11895_v34  ;;  %v7943_v26 = vrot.slane %v7383_v16, 11  ;;  %v7388_v42 = vshrl.u32 %v8019_v59, 16 }
 0x313   : > { %v3661_v38 = vadd.f32 %v15031_v57, %v3025_v43  ;;  %v7391_v27 = vshll.u32 %v8019_v59, 16  ;;  %v15032_v3 = vrot.slane %v11794_v44, 1  ;;  %v15033_v47 = vrot.slane %v11880_v15, 2 }
 0x314   : > { %v6127_v13 = vrot.slane %v5775_v4, 2  ;;  %v15034_v21 = vrot.slane %v11911_v17, 1  ;;  %v12042_v58 = vrot.slane %v7388_v42, 7  ;;  %v1862_v43 = vmul.f32 %v8499_v60, %v754_v39  ;;  %v15037_v4 = vld [vmem:[#allocation22_spill] sm:$0xff]  ;;  %v15039_v39 = vld [vmem:[#allocation28_spill] sm:$0xff] }
 0x315   : > { %v3662_v45 = vadd.f32 %v15032_v3, %v3026_v30  ;;  %v4489_v33 = vadd.f32 %v4169_v9, %v3661_v38  ;;  %v6126_v52 = vsel %vm2052_vm1, %v15033_v47, %v6125_v2  ;;  %v2883_v44 = vmul.f32 %v11594_v19, %v8502_v61 }
 0x316   : > { %v1706_v20 = vadd.f32 %v15034_v21, %v925_v35  ;;  %v15035_v9 = vrot.slane %v11885_v29, 2  ;;  %v3819_v28 = vmul.f32 %v8508_v49, %v2712_v56  ;;  %v4840_v17 = vmul.f32 %v14525_v37, %v11950_v41  ;;  %v15045_v21 = vld [vmem:[#allocation18_spill] sm:$0xff] }
 0x317   : > { %v4490_v34 = vadd.f32 %v4171_v10, %v3662_v45  ;;  %v4982_v11 = vadd.f32 %v4838_v46, %v4489_v33  ;;  %v7393_v40 = vor.u32 %v7391_v27, %v12042_v58  ;;  %v2216_v10 = vrot.slane %v1862_v43, 2  ;;  %v15041_v27 = vld [vmem:[#allocation9_spill] sm:$0xff]  ;;  %v15043_v33 = vld [vmem:[#allocation32_spill] sm:$0xff] }
 0x318   : > { %v6128_v15 = vsel %vm2052_vm1, %v15035_v9, %v6127_v13  ;;  %v5776_v16 = vmul.f32 %v11980_v14, %v4669_v0  ;;  %v15036_v30 = vrot.slane %v11857_v5, 1  ;;  %v4172_v46 = vrot.slane %v3819_v28, 2  ;;  %v15048_v28 = vld [vmem:[#allocation6_spill] sm:$0xff] }
 0x319   : > { %v4983_v59 = vadd.f32 %v4839_v55, %v4490_v34  ;;  %v7404_v29 = vrot.slane %v12042_v58, 4  ;;  %v929_v57 = vmul.f32 %v15037_v4, %v14928_v63  ;;  %v7394_v2 = vsel %vm8551_vm4, %v7943_v26, %v7393_v40 }
 0x31a   : > { %v5618_v19 = vadd.f32 %v15036_v30, %v4982_v11  ;;  %v15040_v35 = vrot.slane %v15039_v39, 1  ;;  %v15042_v55 = vrot.slane %v15041_v27, 2  ;;  %v6129_v45 = vrot.slane %v5776_v16, 2  ;;  %7738 = vst [vmem:[%s8571_s28 + $0xf8] sm:$0xf] %v7394_v2  ;;  %v15047_v11 = vld [vmem:[#allocation5_spill] sm:$0xff] }
 0x31b   : > { %v15044_v47 = vrot.slane %v15043_v33, 2  ;;  %v930_v0 = vmul.f32 %v15045_v21, %v14705_v48  ;;  %v15046_v26 = vrot.slane %v11986_v31, 2  ;;  %v1193_v9 = vmul.f32 %v15037_v4, %v15047_v11 }
 0x31c   : > { %v5619_v42 = vadd.f32 %v15040_v35, %v4983_v59  ;;  %v2217_v3 = vsel %vm2052_vm1, %v15042_v55, %v2216_v10  ;;  %v6446_v5 = vadd.f32 %v6126_v52, %v5618_v19  ;;  %v1194_v40 = vmul.f32 %v15045_v21, %v15048_v28  ;;  %v15049_v19 = vld [vmem:[#allocation3_spill] sm:$0xff] }
 0x31d   : > { %v2535_v56 = vadd.f32 %v2217_v3, %v1706_v20  ;;  %v4173_v13 = vsel %vm2052_vm1, %v15044_v47, %v4172_v46  ;;  %v6130_v43 = vsel %vm2052_vm1, %v15046_v26, %v6129_v45  ;;  %v12082_v20 = vmul.f32 %v11496_v53, %v15047_v11  ;;  %v15052_v3 = vld [vmem:[#allocation39_spill] sm:$0xff]  ;;  %v15072_v11 = vld [vmem:[#allocation25_spill] sm:$0xff] }
 0x31e   : > { %v6447_v34 = vadd.f32 %v6128_v15, %v5619_v42  ;;  %v12086_v59 = vmul.f32 %v11498_v8, %v15048_v28  ;;  %v1863_v31 = vmul.f32 %v15037_v4, %v14936_v25  ;;  %v1419_v10 = vrot.slane %v1193_v9, 1  ;;  %v15051_v4 = vld [vmem:[#allocation26_spill] sm:$0xff] }
 0x31f   : > { %v3027_v52 = vadd.f32 %v2883_v44, %v2535_v56  ;;  %v1420_v16 = vrot.slane %v1194_v40, 1  ;;  %v1864_v30 = vmul.f32 %v15045_v21, %v14994_v24  ;;  %v15050_v46 = vrot.slane %v15049_v19, 1  ;;  %v15053_v19 = vld [vmem:[#allocation38_spill] sm:$0xff] }
 0x320   : > { %v8020_v15 = vpack.c.bf16 %v6447_v34, %v6446_v5  ;;  %v14235_v2 = vrot.slane %v12082_v20, 1  ;;  %v14234_v39 = vrot.slane %v12086_v59, 1  ;;  %v12098_v35 = vmul.f32 %v11496_v53, %v14936_v25 }
 0x321   : > { %v3663_v44 = vadd.f32 %v15050_v46, %v3027_v52  ;;  %v1707_v55 = vadd.f32 %v1419_v10, %v15051_v4  ;;  %v1708_v45 = vadd.f32 %v1420_v16, %v15052_v3  ;;  %v12110_v47 = vmul.f32 %v11498_v8, %v14994_v24  ;;  %v15054_v46 = vld [vmem:[#allocation31_spill] sm:$0xff] }
 0x322   : > { %v7397_v42 = vshrl.u32 %v8020_v15, 16  ;;  %v7400_v27 = vshll.u32 %v8020_v15, 16  ;;  %v1423_v56 = vsel %vm1319_vm0, %v1419_v10, %v14235_v2  ;;  %v1425_v33 = vsel %vm1319_vm0, %v1420_v16, %v14234_v39 }
 0x323   : > { %v4491_v5 = vadd.f32 %v4173_v13, %v3663_v44  ;;  %v1710_v21 = vadd.f32 %v1423_v56, %v929_v57  ;;  %v1711_v34 = vadd.f32 %v1425_v33, %v930_v0  ;;  %v2218_v26 = vrot.slane %v1863_v31, 2  ;;  %v15055_v44 = vld [vmem:[#allocation11_spill] sm:$0xff] }
 0x324   : > { %v7399_v53 = vrot.slane %v7397_v42, 7  ;;  %v2219_v40 = vrot.slane %v1864_v30, 2  ;;  %v14233_v13 = vrot.slane %v12098_v35, 2  ;;  %v14230_v52 = vrot.slane %v12110_v47, 2  ;;  %v15058_v56 = vld [vmem:[#allocation35_spill] sm:$0xff] }
 0x325   : > { %v4984_v9 = vadd.f32 %v4840_v17, %v4491_v5  ;;  %v2536_v10 = vadd.f32 %v2218_v26, %v1707_v55  ;;  %v2887_v16 = vmul.f32 %v15053_v19, %v8224_v22  ;;  %v2888_v8 = vmul.f32 %v15054_v46, %v8228_v23  ;;  %v15057_v55 = vld [vmem:[#allocation27_spill] sm:$0xff] }
 0x326   : > { %v7402_v15 = vor.u32 %v7400_v27, %v7399_v53  ;;  %v15056_v42 = vrot.slane %v15055_v44, 1  ;;  %v2222_v17 = vsel %vm2052_vm1, %v2218_v26, %v14233_v13  ;;  %v2224_v0 = vsel %vm2052_vm1, %v2219_v40, %v14230_v52  ;;  %v15059_v53 = vld [vmem:[#allocation13_spill] sm:$0xff] }
 0x327   : > { %v2537_v31 = vadd.f32 %v2219_v40, %v1708_v45  ;;  %v2539_v27 = vadd.f32 %v2222_v17, %v1710_v21  ;;  %v2540_v4 = vadd.f32 %v2224_v0, %v1711_v34  ;;  %v3028_v3 = vadd.f32 %v15057_v55, %v2536_v10  ;;  %v12173_v13 = vld [vmem:[#allocation2 + $0x510] sm:$0xff] }
 0x328   : > { %v5620_v57 = vadd.f32 %v15056_v42, %v4984_v9  ;;  %v7403_v30 = vsel %vm8551_vm4, %v7395_v7, %v7402_v15  ;;  %v3151_v26 = vmul.f32 %v15053_v19, %v15059_v53  ;;  %v15060_v9 = vld [vmem:[#allocation14_spill] sm:$0xff]  ;;  %v12139_v36 = vmul.f32 %v11825_v18, %v15059_v53 }
 0x329   : > { %7739 = vst [vmem:[%s8571_s28 + $0xfc] sm:$0xff] %v7403_v30  ;;  %v3029_v33 = vadd.f32 %v15058_v56, %v2537_v31  ;;  %v3152_v44 = vmul.f32 %v15054_v46, %v15060_v9  ;;  %v3031_v45 = vadd.f32 %v2887_v16, %v2539_v27  ;;  %v3032_v40 = vadd.f32 %v2888_v8, %v2540_v4  ;;  %v12155_v30 = vld [vmem:[#allocation2 + $0x4f8] sm:$0xff]  ;;  %v12167_v56 = vld [vmem:[#allocation2 + $0x500] sm:$0xff] }
 0x32a   : > { %v6448_v5 = vadd.f32 %v6130_v43, %v5620_v57  ;;  %v12143_v7 = vmul.f32 %v11842_v32, %v15060_v9  ;;  %v3376_v43 = vrot.slane %v3151_v26, 1  ;;  %v3820_v15 = vmul.f32 %v15053_v19, %v8375_v1  ;;  %15061 = vst [vmem:[#allocation7_spill] sm:$0xff] %v12155_v30  ;;  %15062 = vst [vmem:[#allocation34_spill] sm:$0xff] %v12167_v56  ;;  %v15066_v9 = vld [vmem:[#allocation12_spill] sm:$0xff] }
 0x32b   : > { %v3377_v34 = vrot.slane %v3152_v44, 1  ;;  %v14232_v10 = vrot.slane %v12139_v36, 1  ;;  %v3821_v16 = vmul.f32 %v15054_v46, %v14836_v51  ;;  %v12153_v8 = vmul.f32 %v11825_v18, %v8375_v1 }
 0x32c   : > { %v8021_v21 = vpack.c.bf16 %v6448_v5, %v6448_v5  ;;  %v14231_v42 = vrot.slane %v12143_v7, 1  ;;  %v3664_v0 = vadd.f32 %v3376_v43, %v3028_v3  ;;  %v12165_v55 = vmul.f32 %v11842_v32, %v14836_v51 }
 0x32d   : > { %v3665_v31 = vadd.f32 %v3377_v34, %v3029_v33  ;;  %v3380_v27 = vsel %vm1319_vm0, %v3376_v43, %v14232_v10  ;;  %v4174_v5 = vrot.slane %v3820_v15, 2  ;;  %v4175_v44 = vrot.slane %v3821_v16, 2  ;;  %v12175_v15 = vld [vmem:[#allocation2 + $0x518] sm:$0xff] }
 0x32e   : > { %v7406_v57 = vshrl.u32 %v8021_v21, 16  ;;  %v7409_v17 = vshll.u32 %v8021_v21, 16  ;;  %v3382_v4 = vsel %vm1319_vm0, %v3377_v34, %v14231_v42  ;;  %v3667_v3 = vadd.f32 %v3380_v27, %v3031_v45  ;;  %v15065_v27 = vld [vmem:[#allocation21_spill] sm:$0xff] }
 0x32f   : > { %v3668_v33 = vadd.f32 %v3382_v4, %v3032_v40  ;;  %v14239_v21 = vrot.slane %v12153_v8, 2  ;;  %v14238_v52 = vrot.slane %v12165_v55, 2  ;;  %v4492_v43 = vadd.f32 %v4174_v5, %v3664_v0  ;;  %v15063_v40 = vld [vmem:[#allocation20_spill] sm:$0xff] }
 0x330   : > { %v7408_v26 = vrot.slane %v7406_v57, 7  ;;  %v4844_v34 = vmul.f32 %v14839_v54, %v12155_v30  ;;  %v4493_v10 = vadd.f32 %v4175_v44, %v3665_v31  ;;  %v4845_v45 = vmul.f32 %v14670_v12, %v12167_v56 }
 0x331   : > { %v5108_v16 = vmul.f32 %v15063_v40, %v12155_v30  ;;  %v4178_v57 = vsel %vm2052_vm1, %v4174_v5, %v14239_v21  ;;  %v4180_v0 = vsel %vm2052_vm1, %v4175_v44, %v14238_v52  ;;  %v5109_v4 = vmul.f32 %v15065_v27, %v12167_v56 }
 0x332   : > { %v7411_v42 = vor.u32 %v7409_v17, %v7408_v26  ;;  %v15064_v17 = vld [vmem:[#allocation33_spill] sm:$0xff]  ;;  %v4495_v39 = vadd.f32 %v4178_v57, %v3667_v3  ;;  %v4496_v2 = vadd.f32 %v4180_v0, %v3668_v33  ;;  %v4986_v53 = vadd.f32 %v15066_v9, %v4493_v10  ;;  %v760_v9 = vld [vmem:[#allocation2 + $0x448] sm:$0xff] }
 0x333   : > { %v4985_v31 = vadd.f32 %v15064_v17, %v4492_v43  ;;  %v12198_v5 = vmul.f32 %v15063_v40, %v12173_v13  ;;  %v12202_v44 = vmul.f32 %v15065_v27, %v12175_v15  ;;  %v5333_v43 = vrot.slane %v5108_v16, 1 }
 0x334   : > { %v7412_v26 = vsel %vm8551_vm4, %v7404_v29, %v7411_v42  ;;  %v5334_v17 = vrot.slane %v5109_v4, 1  ;;  %v4988_v52 = vadd.f32 %v4844_v34, %v4495_v39  ;;  %v4989_v58 = vadd.f32 %v4845_v45, %v4496_v2  ;;  %v12218_v45 = vld [vmem:[#allocation2 + $0x460] sm:$0xff] }
 0x335   : > { %7740 = vst [vmem:[%s8571_s28 + $0x104] sm:$0xf] %v7412_v26  ;;  %15067 = vst [vmem:[#allocation22_spill] sm:$0xff] %v12202_v44  ;;  %v5777_v29 = vmul.f32 %v11866_v62, %v12155_v30  ;;  %v5778_v42 = vmul.f32 %v11873_v50, %v12167_v56  ;;  %v14247_v10 = vrot.slane %v12198_v5, 1  ;;  %v14246_v3 = vrot.slane %v12202_v44, 1  ;;  %v15068_v4 = vld [vmem:[#allocation23_spill] sm:$0xff] }
 0x336   : > { %v5621_v33 = vadd.f32 %v5333_v43, %v4985_v31  ;;  %v5622_v57 = vadd.f32 %v5334_v17, %v4986_v53  ;;  %v12212_v0 = vmul.f32 %v11866_v62, %v12173_v13  ;;  %v12216_v2 = vmul.f32 %v11873_v50, %v12175_v15 }
 0x337   : > { %v6131_v39 = vrot.slane %v5777_v29, 2  ;;  %v6132_v34 = vrot.slane %v5778_v42, 2  ;;  %v5337_v16 = vsel %vm1319_vm0, %v5333_v43, %v14247_v10  ;;  %v5339_v53 = vsel %vm1319_vm0, %v5334_v17, %v14246_v3 }
 0x338   : > { %v931_v31 = vmul.f32 %v14502_v6, %v760_v9  ;;  %v1195_v26 = vmul.f32 %v15068_v4, %v760_v9  ;;  %v5624_v21 = vadd.f32 %v5337_v16, %v4988_v52  ;;  %v5625_v27 = vadd.f32 %v5339_v53, %v4989_v58 }
 0x339   : > { %v14249_v40 = vrot.slane %v12212_v0, 2  ;;  %v14251_v29 = vrot.slane %v12216_v2, 2  ;;  %v6449_v42 = vadd.f32 %v6131_v39, %v5621_v33  ;;  %v6450_v56 = vadd.f32 %v6132_v34, %v5622_v57 }
 0x33a   : > { %v12232_v30 = vmul.f32 %v15068_v4, %v12218_v45  ;;  %v1421_v43 = vrot.slane %v1195_v26, 1  ;;  %v1865_v58 = vmul.f32 %v8499_v60, %v760_v9  ;;  %v12243_v16 = vmul.f32 %v8499_v60, %v12218_v45  ;;  %v15070_v26 = vld [vmem:[#allocation36_spill] sm:$0xff] }
 0x33b   : > { %v6135_v17 = vsel %vm2052_vm1, %v6131_v39, %v14249_v40  ;;  %v6137_v52 = vsel %vm2052_vm1, %v6132_v34, %v14251_v29  ;;  %v8022_v53 = vpack.c.bf16 %v6450_v56, %v6449_v42  ;;  %v15071_v40 = vld [vmem:[#allocation37_spill] sm:$0xff] }
 0x33c   : > { %15069 = vst [vmem:[#allocation28_spill] sm:$0xff] %v12243_v16  ;;  %v6452_v33 = vadd.f32 %v6135_v17, %v5624_v21  ;;  %v6453_v57 = vadd.f32 %v6137_v52, %v5625_v27  ;;  %v14253_v3 = vrot.slane %v12232_v30, 1  ;;  %v1709_v10 = vadd.f32 %v1421_v43, %v15070_v26  ;;  %v12262_v52 = vld [vmem:[#allocation2 + $0x508] sm:$0xff]  ;;  %v15075_v26 = vld [vmem:[#allocation10_spill] sm:$0xff] }
 0x33d   : > { %v2220_v4 = vrot.slane %v1865_v58, 2  ;;  %v14254_v39 = vrot.slane %v12243_v16, 2  ;;  %v2889_v28 = vmul.f32 %v15071_v40, %v8502_v61  ;;  %v7414_v29 = vshrl.u32 %v8022_v53, 16  ;;  %15074 = vst [vmem:[#allocation32_spill] sm:$0xff] %v12262_v52 }
 0x33e   : > { %v8024_v34 = vpack.c.bf16 %v6453_v57, %v6452_v33  ;;  %v1427_v9 = vsel %vm1319_vm0, %v1421_v43, %v14253_v3  ;;  %v3153_v21 = vmul.f32 %v15071_v40, %v15072_v11  ;;  %v12260_v17 = vmul.f32 %v11950_v41, %v15072_v11 }
 0x33f   : > { %v1712_v56 = vadd.f32 %v1427_v9, %v931_v31  ;;  %v2226_v27 = vsel %vm2052_vm1, %v2220_v4, %v14254_v39  ;;  %v2538_v42 = vadd.f32 %v2220_v4, %v1709_v10  ;;  %v7944_v58 = vrot.slane %v7414_v29, 11  ;;  %v12268_v39 = vld [vmem:[#allocation2 + $0x520] sm:$0xff] }
 0x340   : > { %15073 = vst [vmem:[#allocation9_spill] sm:$0xff] %v12260_v17  ;;  %v7419_v33 = vshrl.u32 %v8024_v34, 16  ;;  %v7422_v57 = vshll.u32 %v8024_v34, 16  ;;  %v3378_v53 = vrot.slane %v3153_v21, 1  ;;  %v14259_v31 = vrot.slane %v12260_v17, 1  ;;  %v15077_v34 = vld [vmem:[#allocation29_spill] sm:$0xff] }
 0x341   : > { %v2541_v43 = vadd.f32 %v2226_v27, %v1712_v56  ;;  %v3030_v3 = vadd.f32 %v15075_v26, %v2538_v42  ;;  %v3822_v9 = vmul.f32 %v15071_v40, %v8508_v49  ;;  %v12274_v4 = vmul.f32 %v11950_v41, %v8508_v49 }
 0x342   : > { %v12270_v10 = vrot.slane %v7419_v33, 7  ;;  %v4846_v29 = vmul.f32 %v14525_v37, %v12262_v52  ;;  %v5110_v21 = vmul.f32 %v15077_v34, %v12262_v52  ;;  %v3384_v27 = vsel %vm1319_vm0, %v3378_v53, %v14259_v31  ;;  %v15079_v31 = vld [vmem:[#allocation24_spill] sm:$0xff] }
 0x343   : > { %15076 = vst [vmem:[#allocation18_spill] sm:$0xff] %v12274_v4  ;;  %v3033_v56 = vadd.f32 %v2889_v28, %v2541_v43  ;;  %v3666_v40 = vadd.f32 %v3378_v53, %v3030_v3  ;;  %v4176_v42 = vrot.slane %v3822_v9, 2  ;;  %v14264_v26 = vrot.slane %v12274_v4, 2  ;;  %v764_v3 = vld [vmem:[#allocation2 + $0x468] sm:$0x1] }
 0x344   : > { %v7424_v33 = vor.u32 %v7422_v57, %v12270_v10  ;;  %v12287_v11 = vmul.f32 %v15077_v34, %v12268_v39  ;;  %v5335_v46 = vrot.slane %v5110_v21, 1  ;;  %v5779_v28 = vmul.f32 %v11980_v14, %v12262_v52  ;;  %v765_v21 = vld [vmem:[#allocation2 + $0x470] sm:$0x1] }
 0x345   : > { %v3669_v19 = vadd.f32 %v3384_v27, %v3033_v56  ;;  %v4494_v44 = vadd.f32 %v4176_v42, %v3666_v40  ;;  %v12293_v43 = vmul.f32 %v11980_v14, %v12268_v39  ;;  %v4182_v53 = vsel %vm2052_vm1, %v4176_v42, %v14264_v26  ;;  %v8099_v56 = vld [vmem:[#allocation2 + $0x450] sm:$0xff] }
 0x346   : > { %15078 = vst [vmem:[#allocation3_spill] sm:$0xff] %v12287_v11  ;;  %v7425_v57 = vsel %vm8551_vm4, %v7944_v58, %v7424_v33  ;;  %v14267_v9 = vrot.slane %v12287_v11, 1  ;;  %v932_v27 = vmul.f32 %v8099_v56, %v14928_v63  ;;  %v6133_v52 = vrot.slane %v5779_v28, 2  ;;  %v8100_v33 = vld [vmem:[#allocation2 + $0x458] sm:$0xff]  ;;  %v2722_v56 = vld [vmem:[#allocation2 + $0x4c8] sm:$0x1] }
 0x347   : > { %7741 = vst [vmem:[%s8571_s28 + $0x108] sm:$0xff] %v7425_v57  ;;  %v4497_v40 = vadd.f32 %v4182_v53, %v3669_v19  ;;  %v4987_v34 = vadd.f32 %v15079_v31, %v4494_v44  ;;  %v14269_v17 = vrot.slane %v12293_v43, 2  ;;  %v933_v42 = vmul.f32 %v8100_v33, %v14705_v48  ;;  %v2723_v28 = vld [vmem:[#allocation2 + $0x4d0] sm:$0x1] }
 0x348   : > { %v5341_v58 = vsel %vm1319_vm0, %v5335_v46, %v14267_v9  ;;  %v15080_v26 = vrot.slane %v12082_v20, 1  ;;  %v1869_v16 = vmul.f32 %v14936_v25, %v764_v3  ;;  %v1870_v31 = vmul.f32 %v14994_v24, %v765_v21  ;;  %v4680_v33 = vld [vmem:[#allocation2 + $0x530] sm:$0x1] }
 0x349   : > { %v4990_v57 = vadd.f32 %v4846_v29, %v4497_v40  ;;  %v5623_v19 = vadd.f32 %v5335_v46, %v4987_v34  ;;  %v6139_v44 = vsel %vm2052_vm1, %v6133_v52, %v14269_v17  ;;  %v15081_v53 = vrot.slane %v12086_v59, 1 }
 0x34a   : > { %v1713_v4 = vadd.f32 %v15080_v26, %v932_v27  ;;  %v2227_v11 = vrot.slane %v1869_v16, 2  ;;  %v2890_v20 = vmul.f32 %v11825_v18, %v8224_v22  ;;  %v2891_v26 = vmul.f32 %v11842_v32, %v8228_v23  ;;  %v4679_v27 = vld [vmem:[#allocation2 + $0x528] sm:$0x1] }
 0x34b   : > { %v1714_v9 = vadd.f32 %v15081_v53, %v933_v42  ;;  %v5626_v3 = vadd.f32 %v5341_v58, %v4990_v57  ;;  %v6451_v29 = vadd.f32 %v6133_v52, %v5623_v19  ;;  %v2229_v46 = vrot.slane %v1870_v31, 2 }
 0x34c   : > { %v3826_v34 = vmul.f32 %v8375_v1, %v2722_v56  ;;  %v15082_v40 = vrot.slane %v12098_v35, 2  ;;  %v3827_v59 = vmul.f32 %v14836_v51, %v2723_v28  ;;  %v4847_v16 = vmul.f32 %v14839_v54, %v12173_v13 }
 0x34d   : > { %v4848_v42 = vmul.f32 %v14670_v12, %v12175_v15  ;;  %v6454_v53 = vadd.f32 %v6139_v44, %v5626_v3  ;;  %v8023_v58 = vpack.c.bf16 %v6451_v29, %v6451_v29  ;;  %v15083_v52 = vrot.slane %v12110_v47, 2 }
 0x34e   : > { %v2228_v21 = vsel %vm2052_vm1, %v15082_v40, %v2227_v11  ;;  %v4183_v35 = vrot.slane %v3826_v34, 2  ;;  %v4185_v31 = vrot.slane %v3827_v59, 2  ;;  %v5783_v11 = vmul.f32 %v11866_v62, %v4679_v27 }
 0x34f   : > { %v2230_v56 = vsel %vm2052_vm1, %v15083_v52, %v2229_v46  ;;  %v2542_v57 = vadd.f32 %v2228_v21, %v1713_v4  ;;  %v8025_v28 = vpack.c.bf16 %v6454_v53, %v6454_v53  ;;  %v7427_v40 = vshrl.u32 %v8023_v58, 16 }
 0x350   : > { %v2543_v19 = vadd.f32 %v2230_v56, %v1714_v9  ;;  %v5784_v54 = vmul.f32 %v11873_v50, %v4680_v33  ;;  %v15084_v12 = vrot.slane %v12153_v8, 2  ;;  %v15085_v47 = vrot.slane %v12165_v55, 2  ;;  %v766_v9 = vld [vmem:[#allocation2 + $0x478] sm:$0x1] }
 0x351   : > { %v3034_v17 = vadd.f32 %v2890_v20, %v2542_v57  ;;  %v6140_v4 = vrot.slane %v5783_v11, 2  ;;  %v7945_v29 = vrot.slane %v7427_v40, 11  ;;  %v7432_v46 = vshrl.u32 %v8025_v28, 16  ;;  %v2724_v20 = vld [vmem:[#allocation2 + $0x4d8] sm:$0x1] }
 0x352   : > { %v3035_v51 = vadd.f32 %v2891_v26, %v2543_v19  ;;  %v4184_v44 = vsel %vm2052_vm1, %v15084_v12, %v4183_v35  ;;  %v4186_v3 = vsel %vm2052_vm1, %v15085_v47, %v4185_v31  ;;  %v7435_v34 = vshll.u32 %v8025_v28, 16 }
 0x353   : > { %v15086_v62 = vrot.slane %v12139_v36, 1  ;;  %v15087_v50 = vrot.slane %v12143_v7, 1  ;;  %v15088_v8 = vrot.slane %v12212_v0, 2  ;;  %v6142_v21 = vrot.slane %v5784_v54, 2 }
 0x354   : > { %v7439_v55 = vrot.slane %v12270_v10, 4  ;;  %v12350_v59 = vrot.slane %v7432_v46, 7  ;;  %v934_v53 = vmul.f32 %v14502_v6, %v12218_v45  ;;  %v1871_v36 = vmul.f32 %v8499_v60, %v766_v9  ;;  %v15096_v46 = vld [vmem:[#allocation18_spill] sm:$0xff] }
 0x355   : > { %v3670_v27 = vadd.f32 %v15086_v62, %v3034_v17  ;;  %v3671_v26 = vadd.f32 %v15087_v50, %v3035_v51  ;;  %v6141_v12 = vsel %vm2052_vm1, %v15088_v8, %v6140_v4  ;;  %v4681_v17 = vld [vmem:[#allocation2 + $0x538] sm:$0x1]  ;;  %v15089_v7 = vrot.slane %v12216_v2, 2 }
 0x356   : > { %v2892_v54 = vmul.f32 %v11950_v41, %v8502_v61  ;;  %v3828_v0 = vmul.f32 %v8508_v49, %v2724_v20  ;;  %v7437_v52 = vor.u32 %v7435_v34, %v12350_v59  ;;  %v15090_v57 = vrot.slane %v12232_v30, 1  ;;  %v15101_v50 = vld [vmem:[#allocation38_spill] sm:$0xff] }
 0x357   : > { %v4498_v33 = vadd.f32 %v4184_v44, %v3670_v27  ;;  %v4499_v58 = vadd.f32 %v4186_v3, %v3671_v26  ;;  %v6143_v51 = vsel %vm2052_vm1, %v15089_v7, %v6142_v21  ;;  %v2231_v19 = vrot.slane %v1871_v36, 2  ;;  %v15092_v44 = vld [vmem:[#allocation28_spill] sm:$0xff]  ;;  %v15103_v36 = vld [vmem:[#allocation31_spill] sm:$0xff]  ;;  %v15105_v7 = vld [vmem:[#allocation6_spill] sm:$0xff] }
 0x358   : > { %v1715_v45 = vadd.f32 %v15090_v57, %v934_v53  ;;  %v4187_v31 = vrot.slane %v3828_v0, 2  ;;  %v4849_v2 = vmul.f32 %v14525_v37, %v12268_v39  ;;  %v5785_v11 = vmul.f32 %v11980_v14, %v4681_v17  ;;  %v15104_v17 = vld [vmem:[#allocation5_spill] sm:$0xff] }
 0x359   : > { %v4991_v56 = vadd.f32 %v4847_v16, %v4498_v33  ;;  %v4992_v35 = vadd.f32 %v4848_v42, %v4499_v58  ;;  %v7438_v28 = vsel %vm8551_vm4, %v7945_v29, %v7437_v52  ;;  %v15091_v41 = vrot.slane %v12198_v5, 1  ;;  %v15094_v42 = vld [vmem:[#allocation22_spill] sm:$0xff]  ;;  %v15098_v5 = vld [vmem:[#allocation19_spill] sm:$0xff] }
 0x35a   : > { %v15093_v47 = vrot.slane %v15092_v44, 2  ;;  %v7448_v30 = vrot.slane %v12350_v59, 4  ;;  %7742 = vst [vmem:[%s8571_s28 + $0x110] sm:$0xf] %v7438_v28  ;;  %v15095_v3 = vrot.slane %v15094_v42, 1  ;;  %v15097_v34 = vrot.slane %v15096_v46, 2 }
 0x35b   : > { %v5627_v40 = vadd.f32 %v15091_v41, %v4991_v56  ;;  %v6144_v62 = vrot.slane %v5785_v11, 2  ;;  %v12383_v27 = vmul.f32 %v15098_v5, %v14928_v63  ;;  %v12387_v20 = vmul.f32 %v15098_v5, %v14705_v48 }
 0x35c   : > { %v2232_v16 = vsel %vm2052_vm1, %v15093_v47, %v2231_v19  ;;  %v5628_v4 = vadd.f32 %v15095_v3, %v4992_v35  ;;  %v4188_v14 = vsel %vm2052_vm1, %v15097_v34, %v4187_v31  ;;  %v938_v26 = vmul.f32 %v15101_v50, %v14928_v63 }
 0x35d   : > { %v2544_v9 = vadd.f32 %v2232_v16, %v1715_v45  ;;  %v6455_v29 = vadd.f32 %v6141_v12, %v5627_v40  ;;  %15099 = vst [vmem:[#allocation26_spill] sm:$0xff] %v12383_v27  ;;  %15100 = vst [vmem:[#allocation39_spill] sm:$0xff] %v12387_v20  ;;  %v15102_v33 = vrot.slane %v12293_v43, 2  ;;  %v939_v12 = vmul.f32 %v15103_v36, %v14705_v48 }
 0x35e   : > { %v6456_v8 = vadd.f32 %v6143_v51, %v5628_v4  ;;  %v1199_v58 = vmul.f32 %v15101_v50, %v15104_v17  ;;  %v1200_v0 = vmul.f32 %v15103_v36, %v15105_v7  ;;  %v12402_v52 = vmul.f32 %v11825_v18, %v15104_v17 }
 0x35f   : > { %v3036_v21 = vadd.f32 %v2892_v54, %v2544_v9  ;;  %v6145_v53 = vsel %vm2052_vm1, %v15102_v33, %v6144_v62  ;;  %v12406_v51 = vmul.f32 %v11842_v32, %v15105_v7  ;;  %v15106_v54 = vld [vmem:[#allocation9_spill] sm:$0xff]  ;;  %v1872_v45 = vmul.f32 %v15101_v50, %v14936_v25 }
 0x360   : > { %v8026_v43 = vpack.c.bf16 %v6456_v8, %v6455_v29  ;;  %v15107_v56 = vrot.slane %v15106_v54, 1  ;;  %v1873_v19 = vmul.f32 %v15103_v36, %v14994_v24  ;;  %v1428_v35 = vrot.slane %v1199_v58, 1 }
 0x361   : > { %v1429_v31 = vrot.slane %v1200_v0, 1  ;;  %v14278_v11 = vrot.slane %v12402_v52, 1  ;;  %v14276_v28 = vrot.slane %v12406_v51, 1  ;;  %v12418_v47 = vmul.f32 %v11825_v18, %v14936_v25 }
 0x362   : > { %v3672_v57 = vadd.f32 %v15107_v56, %v3036_v21  ;;  %v7441_v41 = vshrl.u32 %v8026_v43, 16  ;;  %v7444_v40 = vshll.u32 %v8026_v43, 16  ;;  %v1716_v3 = vadd.f32 %v1428_v35, %v12383_v27  ;;  %v15108_v21 = vld [vmem:[#allocation3_spill] sm:$0xff] }
 0x363   : > { %v1432_v16 = vsel %vm1319_vm0, %v1428_v35, %v14278_v11  ;;  %v1434_v42 = vsel %vm1319_vm0, %v1429_v31, %v14276_v28  ;;  %v1717_v4 = vadd.f32 %v1429_v31, %v12387_v20  ;;  %v12430_v18 = vmul.f32 %v11842_v32, %v14994_v24  ;;  %v15113_v35 = vld [vmem:[#allocation34_spill] sm:$0xff] }
 0x364   : > { %v4500_v44 = vadd.f32 %v4188_v14, %v3672_v57  ;;  %v7443_v9 = vrot.slane %v7441_v41, 7  ;;  %v1719_v34 = vadd.f32 %v1432_v16, %v938_v26  ;;  %v1720_v14 = vadd.f32 %v1434_v42, %v939_v12  ;;  %v15112_v57 = vld [vmem:[#allocation7_spill] sm:$0xff]  ;;  %v15115_v42 = vld [vmem:[#allocation14_spill] sm:$0xff] }
 0x365   : > { %v2233_v62 = vrot.slane %v1872_v45, 2  ;;  %v2234_v29 = vrot.slane %v1873_v19, 2  ;;  %v14274_v50 = vrot.slane %v12418_v47, 2  ;;  %v15109_v33 = vrot.slane %v15108_v21, 1 }
 0x366   : > { %v4993_v46 = vadd.f32 %v4849_v2, %v4500_v44  ;;  %v7446_v8 = vor.u32 %v7444_v40, %v7443_v9  ;;  %v12437_v58 = vmul.f32 %v15098_v5, %v8224_v22  ;;  %v12441_v2 = vmul.f32 %v15098_v5, %v8228_v23 }
 0x367   : > { %v2237_v32 = vsel %vm2052_vm1, %v2233_v62, %v14274_v50  ;;  %v14273_v26 = vrot.slane %v12430_v18, 2  ;;  %v2545_v12 = vadd.f32 %v2233_v62, %v1716_v3  ;;  %v2546_v0 = vadd.f32 %v2234_v29, %v1717_v4 }
 0x368   : > { %v5629_v36 = vadd.f32 %v15109_v33, %v4993_v46  ;;  %15110 = vst [vmem:[#allocation11_spill] sm:$0xff] %v12437_v58  ;;  %15111 = vst [vmem:[#allocation27_spill] sm:$0xff] %v12441_v2  ;;  %v7447_v43 = vsel %vm8551_vm4, %v7439_v55, %v7446_v8  ;;  %v2548_v56 = vadd.f32 %v2237_v32, %v1719_v34 }
 0x369   : > { %v2896_v45 = vmul.f32 %v15112_v57, %v8224_v22  ;;  %7743 = vst [vmem:[%s8571_s28 + $0x114] sm:$0xff] %v7447_v43  ;;  %v2239_v19 = vsel %vm2052_vm1, %v2234_v29, %v14273_v26  ;;  %v2897_v31 = vmul.f32 %v15113_v35, %v8228_v23  ;;  %v3037_v41 = vadd.f32 %v12437_v58, %v2545_v12  ;;  %v12571_v58 = vld [vmem:[#allocation2 + $0x4c0] sm:$0xff] }
 0x36a   : > { %v6457_v54 = vadd.f32 %v6145_v53, %v5629_v36  ;;  %v3038_v10 = vadd.f32 %v12441_v2, %v2546_v0  ;;  %v2549_v44 = vadd.f32 %v2239_v19, %v1720_v14  ;;  %v15114_v53 = vld [vmem:[#allocation13_spill] sm:$0xff]  ;;  %v3158_v3 = vmul.f32 %v15113_v35, %v15115_v42  ;;  %v15116_v36 = vld [vmem:[#allocation15_spill] sm:$0xff] }
 0x36b   : > { %v3040_v55 = vadd.f32 %v2896_v45, %v2548_v56  ;;  %v3157_v16 = vmul.f32 %v15112_v57, %v15114_v53  ;;  %v12467_v4 = vmul.f32 %v12173_v13, %v15114_v53  ;;  %v12471_v9 = vmul.f32 %v12175_v15, %v15115_v42 }
 0x36c   : > { %v8027_v40 = vpack.c.bf16 %v6457_v54, %v6457_v54  ;;  %v3829_v46 = vmul.f32 %v15112_v57, %v8375_v1  ;;  %v3041_v62 = vadd.f32 %v2897_v31, %v2549_v44  ;;  %v3386_v8 = vrot.slane %v3158_v3, 1 }
 0x36d   : > { %v3385_v29 = vrot.slane %v3157_v16, 1  ;;  %v14275_v21 = vrot.slane %v12467_v4, 1  ;;  %v14277_v33 = vrot.slane %v12471_v9, 1  ;;  %v3830_v32 = vmul.f32 %v15113_v35, %v15116_v36 }
 0x36e   : > { %v7450_v34 = vshrl.u32 %v8027_v40, 16  ;;  %v7453_v14 = vshll.u32 %v8027_v40, 16  ;;  %v12481_v43 = vmul.f32 %v12173_v13, %v8375_v1  ;;  %v12485_v54 = vmul.f32 %v12175_v15, %v15116_v36  ;;  %v12493_v40 = vld [vmem:[#allocation2 + $0x558] sm:$0xff] }
 0x36f   : > { %v3673_v0 = vadd.f32 %v3385_v29, %v3037_v41  ;;  %v3389_v56 = vsel %vm1319_vm0, %v3385_v29, %v14275_v21  ;;  %v3391_v45 = vsel %vm1319_vm0, %v3386_v8, %v14277_v33  ;;  %v3674_v19 = vadd.f32 %v3386_v8, %v3038_v10  ;;  %15117 = vst [vmem:[#allocation35_spill] sm:$0xff] %v12493_v40  ;;  %v15119_v21 = vld [vmem:[#allocation16_spill] sm:$0xff]  ;;  %v15124_v33 = vld [vmem:[#allocation21_spill] sm:$0xff] }
 0x370   : > { %v7452_v12 = vrot.slane %v7450_v34, 7  ;;  %v4189_v31 = vrot.slane %v3829_v46, 2  ;;  %v3676_v44 = vadd.f32 %v3389_v56, %v3040_v55  ;;  %v3677_v16 = vadd.f32 %v3391_v45, %v3041_v62  ;;  %v12495_v34 = vld [vmem:[#allocation2 + $0x560] sm:$0xff]  ;;  %v12507_v55 = vld [vmem:[#allocation2 + $0x570] sm:$0xff] }
 0x371   : > { %v4190_v3 = vrot.slane %v3830_v32, 2  ;;  %15118 = vst [vmem:[#allocation33_spill] sm:$0xff] %v12495_v34  ;;  %v14280_v26 = vrot.slane %v12481_v43, 2  ;;  %v14279_v50 = vrot.slane %v12485_v54, 2  ;;  %v12501_v28 = vmul.f32 %v15098_v5, %v15119_v21  ;;  %v15121_v62 = vld [vmem:[#allocation17_spill] sm:$0xff] }
 0x372   : > { %v7455_v41 = vor.u32 %v7453_v14, %v7452_v12  ;;  %v4501_v29 = vadd.f32 %v4189_v31, %v3673_v0  ;;  %v12509_v14 = vld [vmem:[#allocation2 + $0x578] sm:$0xff]  ;;  %v12513_v8 = vmul.f32 %v15098_v5, %v15121_v62  ;;  %v4853_v32 = vmul.f32 %v15119_v21, %v12493_v40 }
 0x373   : > { %15120 = vst [vmem:[#allocation12_spill] sm:$0xff] %v12501_v28  ;;  %v4502_v46 = vadd.f32 %v4190_v3, %v3674_v19  ;;  %v4193_v59 = vsel %vm2052_vm1, %v4189_v31, %v14280_v26  ;;  %v4854_v12 = vmul.f32 %v15121_v62, %v12495_v34  ;;  %v5115_v11 = vmul.f32 %v15124_v33, %v12495_v34 }
 0x374   : > { %v7456_v10 = vsel %vm8551_vm4, %v7448_v30, %v7455_v41  ;;  %15122 = vst [vmem:[#allocation36_spill] sm:$0xff] %v12513_v8  ;;  %v4195_v30 = vsel %vm2052_vm1, %v4190_v3, %v14279_v50  ;;  %v4994_v0 = vadd.f32 %v12501_v28, %v4501_v29  ;;  %v4504_v56 = vadd.f32 %v4193_v59, %v3676_v44  ;;  %v15123_v41 = vld [vmem:[#allocation20_spill] sm:$0xff]  ;;  %v12543_v44 = vld [vmem:[%s13700_s1 + $0x18] ss:$0 sm:$0xff] }
 0x375   : > { %7744 = vst [vmem:[%s8571_s28 + $0x11c] sm:$0xf] %v7456_v10  ;;  %v4505_v45 = vadd.f32 %v4195_v30, %v3677_v16  ;;  %v4995_v19 = vadd.f32 %v12513_v8, %v4502_v46  ;;  %v5114_v10 = vmul.f32 %v15123_v41, %v12493_v40  ;;  %v12534_v31 = vmul.f32 %v15123_v41, %v12507_v55  ;;  %v12550_v30 = vld [vmem:[%s13700_s1 + $0x20] ss:$0 sm:$0xff] }
 0x376   : > { %v12538_v3 = vmul.f32 %v15124_v33, %v12509_v14  ;;  %v5786_v16 = vmul.f32 %v12543_v44, %v12493_v40  ;;  %v4997_v29 = vadd.f32 %v4853_v32, %v4504_v56  ;;  %v5787_v50 = vmul.f32 %v12550_v30, %v12495_v34 }
 0x377   : > { %v4998_v46 = vadd.f32 %v4854_v12, %v4505_v45  ;;  %v5342_v59 = vrot.slane %v5114_v10, 1  ;;  %v5343_v26 = vrot.slane %v5115_v11, 1  ;;  %v14294_v8 = vrot.slane %v12534_v31, 1  ;;  %v772_v10 = vld [vmem:[#allocation2 + $0x4a8] sm:$0xff] }
 0x378   : > { %v14293_v33 = vrot.slane %v12538_v3, 1  ;;  %v12558_v28 = vmul.f32 %v12543_v44, %v12507_v55  ;;  %v12562_v12 = vmul.f32 %v12550_v30, %v12509_v14  ;;  %v6146_v56 = vrot.slane %v5786_v16, 2 }
 0x379   : > { %v5630_v32 = vadd.f32 %v5342_v59, %v4994_v0  ;;  %v6147_v45 = vrot.slane %v5787_v50, 2  ;;  %v5346_v11 = vsel %vm1319_vm0, %v5342_v59, %v14294_v8  ;;  %v5631_v42 = vadd.f32 %v5343_v26, %v4995_v19 }
 0x37a   : > { %v5348_v41 = vsel %vm1319_vm0, %v5343_v26, %v14293_v33  ;;  %v14295_v2 = vrot.slane %v12558_v28, 2  ;;  %v5633_v0 = vadd.f32 %v5346_v11, %v4997_v29  ;;  %v14296_v34 = vrot.slane %v12562_v12, 2 }
 0x37b   : > { %v5634_v53 = vadd.f32 %v5348_v41, %v4998_v46  ;;  %v6458_v16 = vadd.f32 %v6146_v56, %v5630_v32  ;;  %v6459_v40 = vadd.f32 %v6147_v45, %v5631_v42  ;;  %v12579_v59 = vmul.f32 %v15098_v5, %v14502_v6  ;;  %v15126_v41 = vld [vmem:[#allocation23_spill] sm:$0xff] }
 0x37c   : > { %v6150_v50 = vsel %vm2052_vm1, %v6146_v56, %v14295_v2  ;;  %v940_v26 = vmul.f32 %v14502_v6, %v772_v10  ;;  %v6152_v19 = vsel %vm2052_vm1, %v6147_v45, %v14296_v34  ;;  %v1201_v46 = vmul.f32 %v15126_v41, %v772_v10 }
 0x37d   : > { %15125 = vst [vmem:[#allocation37_spill] sm:$0xff] %v12579_v59  ;;  %v6461_v29 = vadd.f32 %v6150_v50, %v5633_v0  ;;  %v12588_v32 = vmul.f32 %v15126_v41, %v12571_v58  ;;  %v6462_v11 = vadd.f32 %v6152_v19, %v5634_v53  ;;  %v8028_v56 = vpack.c.bf16 %v6459_v40, %v6458_v16  ;;  %v15129_v0 = vld [vmem:[#allocation32_spill] sm:$0xff]  ;;  %v15130_v19 = vld [vmem:[#allocation25_spill] sm:$0xff] }
 0x37e   : > { %v1874_v42 = vmul.f32 %v8499_v60, %v772_v10  ;;  %v12593_v33 = vmul.f32 %v8499_v60, %v12571_v58  ;;  %v1430_v8 = vrot.slane %v1201_v46, 1  ;;  %v12598_v45 = vmul.f32 %v15098_v5, %v8502_v61 }
 0x37f   : > { %v14300_v2 = vrot.slane %v12588_v32, 1  ;;  %v2898_v50 = vmul.f32 %v15129_v0, %v8502_v61  ;;  %v8030_v34 = vpack.c.bf16 %v6462_v11, %v6461_v29  ;;  %v7458_v41 = vshrl.u32 %v8028_v56, 16  ;;  %v12613_v56 = vld [vmem:[#allocation2 + $0x568] sm:$0xff] }
 0x380   : > { %15127 = vst [vmem:[#allocation10_spill] sm:$0xff] %v12593_v33  ;;  %15128 = vst [vmem:[#allocation24_spill] sm:$0xff] %v12598_v45  ;;  %v2235_v53 = vrot.slane %v1874_v42, 2  ;;  %v14305_v40 = vrot.slane %v12593_v33, 2  ;;  %v1718_v16 = vadd.f32 %v1430_v8, %v12579_v59  ;;  %v3159_v46 = vmul.f32 %v15129_v0, %v15130_v19 }
 0x381   : > { %v1436_v10 = vsel %vm1319_vm0, %v1430_v8, %v14300_v2  ;;  %v12611_v5 = vmul.f32 %v12268_v39, %v15130_v19  ;;  %v7946_v20 = vrot.slane %v7458_v41, 11  ;;  %v7463_v27 = vshrl.u32 %v8030_v34, 16  ;;  %15132 = vst [vmem:[#allocation22_spill] sm:$0xff] %v12613_v56 }
 0x382   : > { %v7466_v29 = vshll.u32 %v8030_v34, 16  ;;  %v1721_v11 = vadd.f32 %v1436_v10, %v940_v26  ;;  %v2241_v42 = vsel %vm2052_vm1, %v2235_v53, %v14305_v40  ;;  %v2547_v2 = vadd.f32 %v2235_v53, %v1718_v16  ;;  %v12627_v26 = vld [vmem:[#allocation2 + $0x580] sm:$0xff]  ;;  %v12633_v10 = vld [vmem:[#allocation2 + $0x18] sm:$0xff]  ;;  %v15136_v40 = vld [vmem:[#allocation29_spill] sm:$0xff] }
 0x383   : > { %15131 = vst [vmem:[#allocation28_spill] sm:$0xff] %v12611_v5  ;;  %v3387_v7 = vrot.slane %v3159_v46, 1  ;;  %v14306_v8 = vrot.slane %v12611_v5, 1  ;;  %v12619_v59 = vrot.slane %v7463_v27, 7  ;;  %v3831_v19 = vmul.f32 %v15129_v0, %v8508_v49  ;;  %15134 = vst [vmem:[#allocation19_spill] sm:$0xff] %v12633_v10 }
 0x384   : > { %v2550_v17 = vadd.f32 %v2241_v42, %v1721_v11  ;;  %v12625_v34 = vmul.f32 %v12268_v39, %v8508_v49  ;;  %v3039_v41 = vadd.f32 %v12598_v45, %v2547_v2  ;;  %v12637_v27 = vmul.f32 %v12633_v10, %v14525_v37  ;;  %v12652_v10 = vld [vmem:[%s13700_s1 + $0x28] ss:$0 sm:$0xff] }
 0x385   : > { %v3393_v53 = vsel %vm1319_vm0, %v3387_v7, %v14306_v8  ;;  %v4855_v0 = vmul.f32 %v14525_v37, %v12613_v56  ;;  %v7468_v16 = vor.u32 %v7466_v29, %v12619_v59  ;;  %v4191_v11 = vrot.slane %v3831_v19, 2 }
 0x386   : > { %15133 = vst [vmem:[#allocation18_spill] sm:$0xff] %v12625_v34  ;;  %15135 = vst [vmem:[#allocation38_spill] sm:$0xff] %v12637_v27  ;;  %v3042_v46 = vadd.f32 %v2898_v50, %v2550_v17  ;;  %v14317_v2 = vrot.slane %v12625_v34, 2  ;;  %v3675_v42 = vadd.f32 %v3387_v7, %v3039_v41  ;;  %v5116_v8 = vmul.f32 %v15136_v40, %v12613_v56  ;;  %v776_v41 = vld [vmem:[#allocation2 + $0x4c8] sm:$0x1] }
 0x387   : > { %v12647_v45 = vmul.f32 %v15136_v40, %v12627_v26  ;;  %v5788_v29 = vmul.f32 %v12652_v10, %v12613_v56  ;;  %v7469_v17 = vsel %vm8551_vm4, %v7946_v20, %v7468_v16  ;;  %v12663_v19 = vmul.f32 %v12652_v10, %v12627_v26  ;;  %v777_v40 = vld [vmem:[#allocation2 + $0x4d0] sm:$0x1] }
 0x388   : > { %v3678_v50 = vadd.f32 %v3393_v53, %v3042_v46  ;;  %v4197_v7 = vsel %vm2052_vm1, %v4191_v11, %v14317_v2  ;;  %7745 = vst [vmem:[%s8571_s28 + $0x120] sm:$0xff] %v7469_v17  ;;  %v4503_v5 = vadd.f32 %v4191_v11, %v3675_v42  ;;  %v5344_v35 = vrot.slane %v5116_v8, 1  ;;  %v8105_v53 = vld [vmem:[#allocation2 + $0x4b0] sm:$0xff]  ;;  %v8106_v46 = vld [vmem:[#allocation2 + $0x4b8] sm:$0xff]  ;;  %v2734_v42 = vld [vmem:[#allocation2 + $0x528] sm:$0x1] }
 0x389   : > { %15137 = vst [vmem:[#allocation31_spill] sm:$0xff] %v12647_v45  ;;  %v14322_v57 = vrot.slane %v12647_v45, 1  ;;  %v6148_v56 = vrot.slane %v5788_v29, 2  ;;  %v14323_v20 = vrot.slane %v12663_v19, 2  ;;  %v941_v16 = vmul.f32 %v8105_v53, %v14928_v63  ;;  %v2735_v29 = vld [vmem:[#allocation2 + $0x530] sm:$0x1] }
 0x38a   : > { %v4506_v33 = vadd.f32 %v4197_v7, %v3678_v50  ;;  %v942_v2 = vmul.f32 %v8106_v46, %v14705_v48  ;;  %v4996_v34 = vadd.f32 %v12637_v27, %v4503_v5  ;;  %v1878_v8 = vmul.f32 %v14936_v25, %v776_v41 }
 0x38b   : > { %v5350_v17 = vsel %vm1319_vm0, %v5344_v35, %v14322_v57  ;;  %v1879_v11 = vmul.f32 %v14994_v24, %v777_v40  ;;  %v6154_v7 = vsel %vm2052_vm1, %v6148_v56, %v14323_v20  ;;  %v15138_v53 = vrot.slane %v12402_v52, 1  ;;  %v4691_v24 = vld [vmem:[#allocation2 + $0x588] sm:$0x1] }
 0x38c   : > { %v4999_v50 = vadd.f32 %v4855_v0, %v4506_v33  ;;  %v15139_v5 = vrot.slane %v12406_v51, 1  ;;  %v5632_v45 = vadd.f32 %v5344_v35, %v4996_v34  ;;  %v2242_v48 = vrot.slane %v1878_v8, 2 }
 0x38d   : > { %v1722_v46 = vadd.f32 %v15138_v53, %v941_v16  ;;  %v2244_v57 = vrot.slane %v1879_v11, 2  ;;  %v2899_v41 = vmul.f32 %v12173_v13, %v8224_v22  ;;  %v2900_v33 = vmul.f32 %v12175_v15, %v8228_v23 }
 0x38e   : > { %v1723_v27 = vadd.f32 %v15139_v5, %v942_v2  ;;  %v5635_v40 = vadd.f32 %v5350_v17, %v4999_v50  ;;  %v3835_v0 = vmul.f32 %v8375_v1, %v2734_v42  ;;  %v3836_v20 = vmul.f32 %v15116_v36, %v2735_v29  ;;  %v4692_v42 = vld [vmem:[#allocation2 + $0x590] sm:$0x1] }
 0x38f   : > { %v6460_v52 = vadd.f32 %v6148_v56, %v5632_v45  ;;  %v15140_v16 = vrot.slane %v12418_v47, 2  ;;  %v15141_v35 = vrot.slane %v12430_v18, 2  ;;  %v4856_v2 = vmul.f32 %v15119_v21, %v12507_v55 }
 0x390   : > { %v6463_v17 = vadd.f32 %v6154_v7, %v5635_v40  ;;  %v4198_v50 = vrot.slane %v3835_v0, 2  ;;  %v4200_v29 = vrot.slane %v3836_v20, 2  ;;  %v4857_v45 = vmul.f32 %v15121_v62, %v12509_v14 }
 0x391   : > { %v2243_v51 = vsel %vm2052_vm1, %v15140_v16, %v2242_v48  ;;  %v2245_v34 = vsel %vm2052_vm1, %v15141_v35, %v2244_v57  ;;  %v8029_v53 = vpack.c.bf16 %v6460_v52, %v6460_v52  ;;  %v5792_v47 = vmul.f32 %v12543_v44, %v4691_v24 }
 0x392   : > { %v2551_v8 = vadd.f32 %v2243_v51, %v1722_v46  ;;  %v2552_v11 = vadd.f32 %v2245_v34, %v1723_v27  ;;  %v8031_v48 = vpack.c.bf16 %v6463_v17, %v6463_v17  ;;  %v15142_v57 = vrot.slane %v12481_v43, 2  ;;  %v778_v51 = vld [vmem:[#allocation2 + $0x4d8] sm:$0x1] }
 0x393   : > { %v7471_v16 = vshrl.u32 %v8029_v53, 16  ;;  %v15143_v7 = vrot.slane %v12485_v54, 2  ;;  %v5793_v46 = vmul.f32 %v12550_v30, %v4692_v42  ;;  %v6155_v20 = vrot.slane %v5792_v47, 2  ;;  %v2736_v43 = vld [vmem:[#allocation2 + $0x538] sm:$0x1] }
 0x394   : > { %v3043_v56 = vadd.f32 %v2899_v41, %v2551_v8  ;;  %v3044_v18 = vadd.f32 %v2900_v33, %v2552_v11  ;;  %v4199_v5 = vsel %vm2052_vm1, %v15142_v57, %v4198_v50  ;;  %v7476_v40 = vshrl.u32 %v8031_v48, 16  ;;  %v4693_v53 = vld [vmem:[#allocation2 + $0x598] sm:$0x1] }
 0x395   : > { %v4201_v27 = vsel %vm2052_vm1, %v15143_v7, %v4200_v29  ;;  %v7479_v0 = vshll.u32 %v8031_v48, 16  ;;  %v15144_v52 = vrot.slane %v12467_v4, 1  ;;  %v15145_v41 = vrot.slane %v12471_v9, 1 }
 0x396   : > { %v7947_v35 = vrot.slane %v7471_v16, 11  ;;  %v15146_v34 = vrot.slane %v12558_v28, 2  ;;  %v6157_v17 = vrot.slane %v5793_v46, 2  ;;  %v7483_v8 = vrot.slane %v12619_v59, 4  ;;  %v15171_v59 = vld [vmem:[#allocation11_spill] sm:$0xff] }
 0x397   : > { %v3679_v24 = vadd.f32 %v15144_v52, %v3043_v56  ;;  %v3680_v33 = vadd.f32 %v15145_v41, %v3044_v18  ;;  %v12715_v11 = vrot.slane %v7476_v40, 7  ;;  %v943_v4 = vmul.f32 %v14502_v6, %v12571_v58 }
 0x398   : > { %v6156_v54 = vsel %vm2052_vm1, %v15146_v34, %v6155_v20  ;;  %v15147_v9 = vrot.slane %v12562_v12, 2  ;;  %v1880_v28 = vmul.f32 %v8499_v60, %v778_v51  ;;  %v2901_v47 = vmul.f32 %v12268_v39, %v8502_v61 }
 0x399   : > { %v4507_v50 = vadd.f32 %v4199_v5, %v3679_v24  ;;  %v4508_v42 = vadd.f32 %v4201_v27, %v3680_v33  ;;  %v3837_v48 = vmul.f32 %v8508_v49, %v2736_v43  ;;  %v7481_v56 = vor.u32 %v7479_v0, %v12715_v11  ;;  %v15153_v24 = vld [vmem:[#allocation18_spill] sm:$0xff]  ;;  %v15155_v43 = vld [vmem:[#allocation7_spill] sm:$0xff] }
 0x39a   : > { %v6158_v29 = vsel %vm2052_vm1, %v15147_v9, %v6157_v17  ;;  %v15148_v5 = vrot.slane %v12588_v32, 1  ;;  %v2246_v16 = vrot.slane %v1880_v28, 2  ;;  %v4858_v12 = vmul.f32 %v14525_v37, %v12627_v26  ;;  %v15151_v32 = vld [vmem:[#allocation10_spill] sm:$0xff]  ;;  %v15159_v9 = vld [vmem:[#allocation5_spill] sm:$0xff] }
 0x39b   : > { %v5000_v18 = vadd.f32 %v4856_v2, %v4507_v50  ;;  %v5001_v57 = vadd.f32 %v4857_v45, %v4508_v42  ;;  %v4202_v7 = vrot.slane %v3837_v48, 2  ;;  %v5794_v27 = vmul.f32 %v12652_v10, %v4693_v53  ;;  %v15157_v50 = vld [vmem:[#allocation34_spill] sm:$0xff] }
 0x39c   : > { %v1724_v58 = vadd.f32 %v15148_v5, %v943_v4  ;;  %v7482_v46 = vsel %vm8551_vm4, %v7947_v35, %v7481_v56  ;;  %v15149_v39 = vrot.slane %v12534_v31, 1  ;;  %v15150_v40 = vrot.slane %v12538_v3, 1  ;;  %v15156_v3 = vld [vmem:[#allocation4_spill] sm:$0xff]  ;;  %v15160_v48 = vld [vmem:[#allocation6_spill] sm:$0xff] }
 0x39d   : > { %v7492_v45 = vrot.slane %v12715_v11, 4  ;;  %7746 = vst [vmem:[%s8571_s28 + $0x128] sm:$0xf] %v7482_v46  ;;  %v15152_v0 = vrot.slane %v15151_v32, 2  ;;  %v15154_v41 = vrot.slane %v15153_v24, 2  ;;  %v6159_v51 = vrot.slane %v5794_v27, 2 }
 0x39e   : > { %v5636_v20 = vadd.f32 %v15149_v39, %v5000_v18  ;;  %v5637_v2 = vadd.f32 %v15150_v40, %v5001_v57  ;;  %v947_v35 = vmul.f32 %v15155_v43, %v14928_v63  ;;  %v948_v42 = vmul.f32 %v15157_v50, %v15156_v3  ;;  %v15165_v24 = vld [vmem:[#allocation39_spill] sm:$0xff] }
 0x39f   : > { %v2247_v52 = vsel %vm2052_vm1, %v15152_v0, %v2246_v16  ;;  %v4203_v33 = vsel %vm2052_vm1, %v15154_v41, %v4202_v7  ;;  %v15158_v4 = vrot.slane %v12663_v19, 2  ;;  %v1205_v28 = vmul.f32 %v15155_v43, %v15159_v9  ;;  %v15161_v7 = vld [vmem:[#allocation8_spill] sm:$0xff]  ;;  %v15164_v0 = vld [vmem:[#allocation26_spill] sm:$0xff] }
 0x3a0   : > { %v6464_v31 = vadd.f32 %v6156_v54, %v5636_v20  ;;  %v6465_v34 = vadd.f32 %v6158_v29, %v5637_v2  ;;  %v2553_v17 = vadd.f32 %v2247_v52, %v1724_v58  ;;  %v1206_v56 = vmul.f32 %v15157_v50, %v15160_v48  ;;  %v15162_v20 = vld [vmem:[#allocation28_spill] sm:$0xff] }
 0x3a1   : > { %v6160_v53 = vsel %vm2052_vm1, %v15158_v4, %v6159_v51  ;;  %v12759_v18 = vmul.f32 %v12173_v13, %v15159_v9  ;;  %v12763_v57 = vmul.f32 %v12175_v15, %v15160_v48  ;;  %v1881_v19 = vmul.f32 %v15155_v43, %v14936_v25  ;;  %v15185_v48 = vld [vmem:[#allocation25_spill] sm:$0xff] }
 0x3a2   : > { %v8032_v54 = vpack.c.bf16 %v6465_v34, %v6464_v31  ;;  %v3045_v29 = vadd.f32 %v2901_v47, %v2553_v17  ;;  %v1437_v5 = vrot.slane %v1205_v28, 1  ;;  %v1438_v58 = vrot.slane %v1206_v56, 1 }
 0x3a3   : > { %v14330_v16 = vrot.slane %v12759_v18, 1  ;;  %v1882_v27 = vmul.f32 %v15157_v50, %v15161_v7  ;;  %v15163_v40 = vrot.slane %v15162_v20, 1  ;;  %v14329_v47 = vrot.slane %v12763_v57, 1 }
 0x3a4   : > { %v7485_v46 = vshrl.u32 %v8032_v54, 16  ;;  %v7488_v39 = vshll.u32 %v8032_v54, 16  ;;  %v1725_v52 = vadd.f32 %v1437_v5, %v15164_v0  ;;  %v1726_v41 = vadd.f32 %v1438_v58, %v15165_v24  ;;  %v15172_v24 = vld [vmem:[#allocation27_spill] sm:$0xff] }
 0x3a5   : > { %v3681_v2 = vadd.f32 %v15163_v40, %v3045_v29  ;;  %v1441_v32 = vsel %vm1319_vm0, %v1437_v5, %v14330_v16  ;;  %v12780_v51 = vmul.f32 %v12173_v13, %v14936_v25  ;;  %v1443_v34 = vsel %vm1319_vm0, %v1438_v58, %v14329_v47  ;;  %v15166_v5 = vld [vmem:[#allocation35_spill] sm:$0xff]  ;;  %v15170_v40 = vld [vmem:[#allocation13_spill] sm:$0xff] }
 0x3a6   : > { %v7487_v43 = vrot.slane %v7485_v46, 7  ;;  %v1728_v17 = vadd.f32 %v1441_v32, %v947_v35  ;;  %v1729_v50 = vadd.f32 %v1443_v34, %v948_v42  ;;  %v12787_v4 = vmul.f32 %v12175_v15, %v15161_v7  ;;  %v15167_v35 = vld [vmem:[#allocation33_spill] sm:$0xff] }
 0x3a7   : > { %v4509_v31 = vadd.f32 %v4203_v33, %v3681_v2  ;;  %v2248_v28 = vrot.slane %v1881_v19, 2  ;;  %v2249_v56 = vrot.slane %v1882_v27, 2  ;;  %v14328_v13 = vrot.slane %v12780_v51, 2  ;;  %v15168_v19 = vld [vmem:[#allocation31_spill] sm:$0xff]  ;;  %v15178_v16 = vld [vmem:[#allocation21_spill] sm:$0xff] }
 0x3a8   : > { %v7490_v54 = vor.u32 %v7488_v39, %v7487_v43  ;;  %v2905_v33 = vmul.f32 %v15166_v5, %v8224_v22  ;;  %v14326_v46 = vrot.slane %v12787_v4, 2  ;;  %v2906_v42 = vmul.f32 %v15167_v35, %v8228_v23 }
 0x3a9   : > { %v5002_v29 = vadd.f32 %v4858_v12, %v4509_v31  ;;  %v2554_v20 = vadd.f32 %v2248_v28, %v1725_v52  ;;  %v2555_v58 = vadd.f32 %v2249_v56, %v1726_v41  ;;  %v15169_v27 = vrot.slane %v15168_v19, 1  ;;  %v15173_v31 = vld [vmem:[#allocation14_spill] sm:$0xff] }
 0x3aa   : > { %v7491_v15 = vsel %vm8551_vm4, %v7483_v8, %v7490_v54  ;;  %v2252_v39 = vsel %vm2052_vm1, %v2248_v28, %v14328_v13  ;;  %v3163_v2 = vmul.f32 %v15166_v5, %v15170_v40  ;;  %v2254_v32 = vsel %vm2052_vm1, %v2249_v56, %v14326_v46  ;;  %v12848_v46 = vld [vmem:[#allocation2 + $0x5d0] sm:$0xff]  ;;  %v15177_v13 = vld [vmem:[#allocation12_spill] sm:$0xff] }
 0x3ab   : > { %v5638_v12 = vadd.f32 %v15169_v27, %v5002_v29  ;;  %7747 = vst [vmem:[%s8571_s28 + $0x12c] sm:$0xff] %v7491_v15  ;;  %v2557_v0 = vadd.f32 %v2252_v39, %v1728_v17  ;;  %v3046_v52 = vadd.f32 %v15171_v59, %v2554_v20  ;;  %v3047_v8 = vadd.f32 %v15172_v24, %v2555_v58 }
 0x3ac   : > { %v2558_v43 = vadd.f32 %v2254_v32, %v1729_v50  ;;  %v3164_v34 = vmul.f32 %v15167_v35, %v15173_v31  ;;  %v12816_v28 = vmul.f32 %v12507_v55, %v15170_v40  ;;  %v12820_v29 = vmul.f32 %v12509_v14, %v15173_v31  ;;  %v12835_v32 = vld [vmem:[#allocation2 + $0x5b8] sm:$0xff] }
 0x3ad   : > { %v6466_v41 = vadd.f32 %v6160_v53, %v5638_v12  ;;  %v3049_v54 = vadd.f32 %v2905_v33, %v2557_v0  ;;  %v3394_v56 = vrot.slane %v3163_v2, 1  ;;  %v3838_v17 = vmul.f32 %v15166_v5, %v8375_v1  ;;  %15174 = vst [vmem:[#allocation9_spill] sm:$0xff] %v12835_v32  ;;  %v12837_v0 = vld [vmem:[#allocation2 + $0x5c0] sm:$0xff] }
 0x3ae   : > { %v3050_v58 = vadd.f32 %v2906_v42, %v2558_v43  ;;  %v3395_v53 = vrot.slane %v3164_v34, 1  ;;  %v14325_v50 = vrot.slane %v12816_v28, 1  ;;  %v14327_v15 = vrot.slane %v12820_v29, 1  ;;  %15175 = vst [vmem:[#allocation3_spill] sm:$0xff] %v12837_v0 }
 0x3af   : > { %v8033_v20 = vpack.c.bf16 %v6466_v41, %v6466_v41  ;;  %v3682_v19 = vadd.f32 %v3394_v56, %v3046_v52  ;;  %v3839_v27 = vmul.f32 %v15167_v35, %v15116_v36  ;;  %v12830_v33 = vmul.f32 %v12507_v55, %v8375_v1  ;;  %v12942_v35 = vld [vmem:[#allocation2 + $0x5e0] sm:$0xff] }
 0x3b0   : > { %v3398_v2 = vsel %vm1319_vm0, %v3394_v56, %v14325_v50  ;;  %v3683_v42 = vadd.f32 %v3395_v53, %v3047_v8  ;;  %v3400_v59 = vsel %vm1319_vm0, %v3395_v53, %v14327_v15  ;;  %v12844_v24 = vmul.f32 %v12509_v14, %v15116_v36 }
 0x3b1   : > { %v7494_v12 = vshrl.u32 %v8033_v20, 16  ;;  %v7497_v39 = vshll.u32 %v8033_v20, 16  ;;  %v3685_v52 = vadd.f32 %v3398_v2, %v3049_v54  ;;  %v4204_v41 = vrot.slane %v3838_v17, 2 }
 0x3b2   : > { %v3686_v34 = vadd.f32 %v3400_v59, %v3050_v58  ;;  %v4205_v20 = vrot.slane %v3839_v27, 2  ;;  %v14331_v56 = vrot.slane %v12830_v33, 2  ;;  %v14333_v8 = vrot.slane %v12844_v24, 2  ;;  %v12857_v27 = vld [vmem:[#allocation2 + $0x5d8] sm:$0xff] }
 0x3b3   : > { %v7496_v43 = vrot.slane %v7494_v12, 7  ;;  %v4510_v50 = vadd.f32 %v4204_v41, %v3682_v19  ;;  %v4862_v53 = vmul.f32 %v15119_v21, %v12835_v32  ;;  %v4863_v54 = vmul.f32 %v15121_v62, %v12837_v0  ;;  %v15176_v12 = vld [vmem:[#allocation20_spill] sm:$0xff] }
 0x3b4   : > { %v4208_v17 = vsel %vm2052_vm1, %v4204_v41, %v14331_v56  ;;  %v4511_v58 = vadd.f32 %v4205_v20, %v3683_v42  ;;  %v5120_v19 = vmul.f32 %v15176_v12, %v12835_v32  ;;  %v4210_v59 = vsel %vm2052_vm1, %v4205_v20, %v14333_v8 }
 0x3b5   : > { %v7499_v2 = vor.u32 %v7497_v39, %v7496_v43  ;;  %v4513_v15 = vadd.f32 %v4208_v17, %v3685_v52  ;;  %v5003_v47 = vadd.f32 %v15177_v13, %v4510_v50  ;;  %v5121_v39 = vmul.f32 %v15178_v16, %v12837_v0  ;;  %v15179_v43 = vld [vmem:[#allocation36_spill] sm:$0xff] }
 0x3b6   : > { %v4514_v41 = vadd.f32 %v4210_v59, %v3686_v34  ;;  %v5004_v56 = vadd.f32 %v15179_v43, %v4511_v58  ;;  %v12874_v31 = vmul.f32 %v15176_v12, %v12848_v46  ;;  %v12879_v13 = vmul.f32 %v15178_v16, %v12857_v27 }
 0x3b7   : > { %v7500_v42 = vsel %vm8551_vm4, %v7492_v45, %v7499_v2  ;;  %v5006_v20 = vadd.f32 %v4862_v53, %v4513_v15  ;;  %v5351_v50 = vrot.slane %v5120_v19, 1  ;;  %v5352_v52 = vrot.slane %v5121_v39, 1  ;;  %v784_v2 = vld [vmem:[#allocation2 + $0x508] sm:$0xff] }
 0x3b8   : > { %15180 = vst [vmem:[#allocation17_spill] sm:$0xff] %v12874_v31  ;;  %7748 = vst [vmem:[%s8571_s28 + $0x134] sm:$0xf] %v7500_v42  ;;  %v5007_v17 = vadd.f32 %v4863_v54, %v4514_v41  ;;  %v14335_v11 = vrot.slane %v12874_v31, 1  ;;  %v5795_v45 = vmul.f32 %v12543_v44, %v12835_v32  ;;  %v5796_v34 = vmul.f32 %v12550_v30, %v12837_v0  ;;  %v12898_v41 = vld [vmem:[#allocation2 + $0x520] sm:$0xff] }
 0x3b9   : > { %15181 = vst [vmem:[#allocation32_spill] sm:$0xff] %v12879_v13  ;;  %v14340_v58 = vrot.slane %v12879_v13, 1  ;;  %v5639_v59 = vadd.f32 %v5351_v50, %v5003_v47  ;;  %v5640_v15 = vadd.f32 %v5352_v52, %v5004_v56  ;;  %v12889_v53 = vmul.f32 %v12543_v44, %v12848_v46  ;;  %v15192_v13 = vld [vmem:[#allocation38_spill] sm:$0xff] }
 0x3ba   : > { %v5355_v54 = vsel %vm1319_vm0, %v5351_v50, %v14335_v11  ;;  %v12896_v19 = vmul.f32 %v12550_v30, %v12857_v27  ;;  %v6161_v39 = vrot.slane %v5795_v45, 2  ;;  %v6162_v42 = vrot.slane %v5796_v34, 2  ;;  %v15182_v34 = vld [vmem:[#allocation23_spill] sm:$0xff] }
 0x3bb   : > { %v5357_v47 = vsel %vm1319_vm0, %v5352_v52, %v14340_v58  ;;  %v5642_v56 = vadd.f32 %v5355_v54, %v5006_v20  ;;  %v14341_v43 = vrot.slane %v12889_v53, 2  ;;  %v949_v8 = vmul.f32 %v14502_v6, %v784_v2 }
 0x3bc   : > { %v5643_v16 = vadd.f32 %v5357_v47, %v5007_v17  ;;  %v14346_v50 = vrot.slane %v12896_v19, 2  ;;  %v6467_v11 = vadd.f32 %v6161_v39, %v5639_v59  ;;  %v6468_v12 = vadd.f32 %v6162_v42, %v5640_v15 }
 0x3bd   : > { %v6165_v45 = vsel %vm2052_vm1, %v6161_v39, %v14341_v43  ;;  %v1207_v40 = vmul.f32 %v15182_v34, %v784_v2  ;;  %v12912_v0 = vmul.f32 %v15182_v34, %v12898_v41  ;;  %v1883_v20 = vmul.f32 %v8499_v60, %v784_v2  ;;  %v15184_v2 = vld [vmem:[#allocation22_spill] sm:$0xff] }
 0x3be   : > { %v6167_v52 = vsel %vm2052_vm1, %v6162_v42, %v14346_v50  ;;  %v6470_v17 = vadd.f32 %v6165_v45, %v5642_v56  ;;  %v8034_v54 = vpack.c.bf16 %v6468_v12, %v6467_v11  ;;  %v12920_v59 = vmul.f32 %v8499_v60, %v12898_v41  ;;  %v15186_v11 = vld [vmem:[#allocation37_spill] sm:$0xff]  ;;  %v12936_v45 = vld [vmem:[#allocation2 + $0x5c8] sm:$0xff] }
 0x3bf   : > { %v6471_v15 = vadd.f32 %v6167_v52, %v5643_v16  ;;  %v1439_v39 = vrot.slane %v1207_v40, 1  ;;  %v14348_v47 = vrot.slane %v12912_v0, 1  ;;  %v2250_v58 = vrot.slane %v1883_v20, 2  ;;  %15188 = vst [vmem:[#allocation7_spill] sm:$0xff] %v12936_v45 }
 0x3c0   : > { %15183 = vst [vmem:[#allocation10_spill] sm:$0xff] %v12920_v59  ;;  %v7502_v43 = vshrl.u32 %v8034_v54, 16  ;;  %v14350_v34 = vrot.slane %v12920_v59, 2  ;;  %v2907_v32 = vmul.f32 %v15184_v2, %v8502_v61  ;;  %v3165_v42 = vmul.f32 %v15184_v2, %v15185_v48 }
 0x3c1   : > { %v8036_v56 = vpack.c.bf16 %v6471_v15, %v6470_v17  ;;  %v1445_v12 = vsel %vm1319_vm0, %v1439_v39, %v14348_v47  ;;  %v1727_v16 = vadd.f32 %v1439_v39, %v15186_v11  ;;  %v12934_v40 = vmul.f32 %v12627_v26, %v15185_v48 }
 0x3c2   : > { %v7948_v20 = vrot.slane %v7502_v43, 11  ;;  %v1730_v52 = vadd.f32 %v1445_v12, %v949_v8  ;;  %v2256_v54 = vsel %vm2052_vm1, %v2250_v58, %v14350_v34  ;;  %v3396_v50 = vrot.slane %v3165_v42, 1  ;;  %v15190_v42 = vld [vmem:[#allocation24_spill] sm:$0xff] }
 0x3c3   : > { %15187 = vst [vmem:[#allocation18_spill] sm:$0xff] %v12934_v40  ;;  %v7507_v17 = vshrl.u32 %v8036_v56, 16  ;;  %v7510_v15 = vshll.u32 %v8036_v56, 16  ;;  %v2556_v9 = vadd.f32 %v2250_v58, %v1727_v16  ;;  %v14353_v47 = vrot.slane %v12934_v40, 1  ;;  %v15191_v16 = vld [vmem:[#allocation29_spill] sm:$0xff] }
 0x3c4   : > { %v2559_v39 = vadd.f32 %v2256_v54, %v1730_v52  ;;  %v3840_v11 = vmul.f32 %v15184_v2, %v8508_v49  ;;  %v12948_v43 = vmul.f32 %v12627_v26, %v8508_v49  ;;  %v4864_v8 = vmul.f32 %v14525_v37, %v12936_v45  ;;  %v789_v40 = vld [vmem:[#allocation2 + $0x530] sm:$0x1] }
 0x3c5   : > { %v12952_v12 = vrot.slane %v7507_v17, 7  ;;  %v3048_v56 = vadd.f32 %v15190_v42, %v2556_v9  ;;  %v3402_v58 = vsel %vm1319_vm0, %v3396_v50, %v14353_v47  ;;  %v5122_v52 = vmul.f32 %v15191_v16, %v12936_v45 }
 0x3c6   : > { %15189 = vst [vmem:[#allocation4_spill] sm:$0xff] %v12948_v43  ;;  %v3051_v54 = vadd.f32 %v2907_v32, %v2559_v39  ;;  %v4206_v2 = vrot.slane %v3840_v11, 2  ;;  %v14356_v34 = vrot.slane %v12948_v43, 2  ;;  %v12963_v48 = vmul.f32 %v15191_v16, %v12942_v35  ;;  %v788_v16 = vld [vmem:[#allocation2 + $0x528] sm:$0x1]  ;;  %v8108_v43 = vld [vmem:[#allocation2 + $0x518] sm:$0xff] }
 0x3c7   : > { %v7512_v17 = vor.u32 %v7510_v15, %v12952_v12  ;;  %v3684_v5 = vadd.f32 %v3396_v50, %v3048_v56  ;;  %v5353_v9 = vrot.slane %v5122_v52, 1  ;;  %v5797_v42 = vmul.f32 %v12652_v10, %v12936_v45  ;;  %v8107_v52 = vld [vmem:[#allocation2 + $0x510] sm:$0xff] }
 0x3c8   : > { %v3687_v47 = vadd.f32 %v3402_v58, %v3051_v54  ;;  %v4212_v32 = vsel %vm2052_vm1, %v4206_v2, %v14356_v34  ;;  %v14363_v39 = vrot.slane %v12963_v48, 1  ;;  %v12974_v11 = vmul.f32 %v12652_v10, %v12942_v35 }
 0x3c9   : > { %v7513_v50 = vsel %vm8551_vm4, %v7948_v20, %v7512_v17  ;;  %v4512_v15 = vadd.f32 %v4206_v2, %v3684_v5  ;;  %v6163_v56 = vrot.slane %v5797_v42, 2  ;;  %v950_v58 = vmul.f32 %v8107_v52, %v14928_v63  ;;  %v2746_v42 = vld [vmem:[#allocation2 + $0x588] sm:$0x1] }
 0x3ca   : > { %7749 = vst [vmem:[%s8571_s28 + $0x138] sm:$0xff] %v7513_v50  ;;  %v4515_v54 = vadd.f32 %v4212_v32, %v3687_v47  ;;  %v5359_v34 = vsel %vm1319_vm0, %v5353_v9, %v14363_v39  ;;  %v14364_v45 = vrot.slane %v12974_v11, 2  ;;  %v951_v59 = vmul.f32 %v8108_v43, %v15156_v3  ;;  %v2747_v47 = vld [vmem:[#allocation2 + $0x590] sm:$0x1] }
 0x3cb   : > { %v5005_v31 = vadd.f32 %v15192_v13, %v4512_v15  ;;  %v15193_v20 = vrot.slane %v12759_v18, 1  ;;  %v1887_v2 = vmul.f32 %v14936_v25, %v788_v16  ;;  %v1888_v17 = vmul.f32 %v15161_v7, %v789_v40 }
 0x3cc   : > { %v5008_v32 = vadd.f32 %v4864_v8, %v4515_v54  ;;  %v6169_v50 = vsel %vm2052_vm1, %v6163_v56, %v14364_v45  ;;  %v15194_v52 = vrot.slane %v12763_v57, 1  ;;  %v2908_v13 = vmul.f32 %v12507_v55, %v8224_v22  ;;  %v4703_v54 = vld [vmem:[#allocation2 + $0x5e8] sm:$0x1] }
 0x3cd   : > { %v1731_v5 = vadd.f32 %v15193_v20, %v950_v58  ;;  %v5641_v43 = vadd.f32 %v5353_v9, %v5005_v31  ;;  %v2257_v18 = vrot.slane %v1887_v2, 2  ;;  %v2259_v15 = vrot.slane %v1888_v17, 2  ;;  %v4704_v20 = vld [vmem:[#allocation2 + $0x5f0] sm:$0x1] }
 0x3ce   : > { %v1732_v39 = vadd.f32 %v15194_v52, %v951_v59  ;;  %v2909_v16 = vmul.f32 %v12509_v14, %v8228_v23  ;;  %v5644_v40 = vadd.f32 %v5359_v34, %v5008_v32  ;;  %v3844_v58 = vmul.f32 %v8375_v1, %v2746_v42 }
 0x3cf   : > { %v3845_v8 = vmul.f32 %v15116_v36, %v2747_v47  ;;  %v4865_v57 = vmul.f32 %v15119_v21, %v12848_v46  ;;  %v6469_v59 = vadd.f32 %v6163_v56, %v5641_v43  ;;  %v15195_v52 = vrot.slane %v12780_v51, 2 }
 0x3d0   : > { %v15196_v9 = vrot.slane %v12787_v4, 2  ;;  %v4866_v34 = vmul.f32 %v15121_v62, %v12857_v27  ;;  %v6472_v17 = vadd.f32 %v6169_v50, %v5644_v40  ;;  %v4213_v32 = vrot.slane %v3844_v58, 2 }
 0x3d1   : > { %v2258_v31 = vsel %vm2052_vm1, %v15195_v52, %v2257_v18  ;;  %v8035_v45 = vpack.c.bf16 %v6469_v59, %v6469_v59  ;;  %v4215_v36 = vrot.slane %v3845_v8, 2  ;;  %v5801_v21 = vmul.f32 %v12543_v44, %v4703_v54  ;;  %v2748_v54 = vld [vmem:[#allocation2 + $0x598] sm:$0x1] }
 0x3d2   : > { %v2260_v2 = vsel %vm2052_vm1, %v15196_v9, %v2259_v15  ;;  %v2560_v42 = vadd.f32 %v2258_v31, %v1731_v5  ;;  %v5802_v56 = vmul.f32 %v12550_v30, %v4704_v20  ;;  %v8037_v51 = vpack.c.bf16 %v6472_v17, %v6472_v17 }
 0x3d3   : > { %v2561_v47 = vadd.f32 %v2260_v2, %v1732_v39  ;;  %v15197_v4 = vrot.slane %v12830_v33, 2  ;;  %v7515_v52 = vshrl.u32 %v8035_v45, 16  ;;  %v15198_v9 = vrot.slane %v12844_v24, 2  ;;  %v4705_v2 = vld [vmem:[#allocation2 + $0x5f8] sm:$0x1] }
 0x3d4   : > { %v3052_v43 = vadd.f32 %v2908_v13, %v2560_v42  ;;  %v6170_v39 = vrot.slane %v5801_v21, 2  ;;  %v6172_v50 = vrot.slane %v5802_v56, 2  ;;  %v7520_v40 = vshrl.u32 %v8037_v51, 16 }
 0x3d5   : > { %v3053_v18 = vadd.f32 %v2909_v16, %v2561_v47  ;;  %v4214_v15 = vsel %vm2052_vm1, %v15197_v4, %v4213_v32  ;;  %v4216_v5 = vsel %vm2052_vm1, %v15198_v9, %v4215_v36  ;;  %v7523_v58 = vshll.u32 %v8037_v51, 16  ;;  %v790_v16 = vld [vmem:[#allocation2 + $0x538] sm:$0x1] }
 0x3d6   : > { %v15199_v44 = vrot.slane %v12816_v28, 1  ;;  %v15200_v30 = vrot.slane %v12820_v29, 1  ;;  %v7949_v33 = vrot.slane %v7515_v52, 11  ;;  %v15201_v20 = vrot.slane %v12889_v53, 2  ;;  %v15204_v52 = vld [vmem:[#allocation17_spill] sm:$0xff] }
 0x3d7   : > { %v15202_v24 = vrot.slane %v12896_v19, 2  ;;  %v7527_v36 = vrot.slane %v12952_v12, 4  ;;  %v13030_v59 = vrot.slane %v7520_v40, 7  ;;  %v952_v29 = vmul.f32 %v14502_v6, %v12898_v41 }
 0x3d8   : > { %v3688_v8 = vadd.f32 %v15199_v44, %v3052_v43  ;;  %v3689_v13 = vadd.f32 %v15200_v30, %v3053_v18  ;;  %v6171_v45 = vsel %vm2052_vm1, %v15201_v20, %v6170_v39  ;;  %v1889_v17 = vmul.f32 %v8499_v60, %v790_v16  ;;  %v15206_v39 = vld [vmem:[#allocation32_spill] sm:$0xff] }
 0x3d9   : > { %v6173_v21 = vsel %vm2052_vm1, %v15202_v24, %v6172_v50  ;;  %v2910_v53 = vmul.f32 %v12627_v26, %v8502_v61  ;;  %v3846_v19 = vmul.f32 %v8508_v49, %v2748_v54  ;;  %v4867_v42 = vmul.f32 %v14525_v37, %v12942_v35  ;;  %v15212_v44 = vld [vmem:[#allocation4_spill] sm:$0xff]  ;;  %v15215_v24 = vld [vmem:[#allocation35_spill] sm:$0xff] }
 0x3da   : > { %v4516_v28 = vadd.f32 %v4214_v15, %v3688_v8  ;;  %v4517_v31 = vadd.f32 %v4216_v5, %v3689_v13  ;;  %v7525_v47 = vor.u32 %v7523_v58, %v13030_v59  ;;  %v15203_v51 = vrot.slane %v12912_v0, 1  ;;  %v15210_v0 = vld [vmem:[#allocation10_spill] sm:$0xff] }
 0x3db   : > { %v2261_v41 = vrot.slane %v1889_v17, 2  ;;  %v4217_v18 = vrot.slane %v3846_v19, 2  ;;  %v5803_v4 = vmul.f32 %v12652_v10, %v4705_v2  ;;  %v7536_v15 = vrot.slane %v13030_v59, 4  ;;  %v15217_v2 = vld [vmem:[#allocation33_spill] sm:$0xff] }
 0x3dc   : > { %v5009_v32 = vadd.f32 %v4865_v57, %v4516_v28  ;;  %v5010_v56 = vadd.f32 %v4866_v34, %v4517_v31  ;;  %v1733_v43 = vadd.f32 %v15203_v51, %v952_v29  ;;  %v7526_v26 = vsel %vm8551_vm4, %v7949_v33, %v7525_v47  ;;  %v15208_v57 = vld [vmem:[#allocation19_spill] sm:$0xff]  ;;  %v15218_v19 = vld [vmem:[#allocation5_spill] sm:$0xff] }
 0x3dd   : > { %v15205_v9 = vrot.slane %v15204_v52, 1  ;;  %v15207_v50 = vrot.slane %v15206_v39, 1  ;;  %v13053_v34 = vmul.f32 %v15208_v57, %v14928_v63  ;;  %7750 = vst [vmem:[%s8571_s28 + $0x140] sm:$0xf] %v7526_v26  ;;  %v15211_v58 = vrot.slane %v15210_v0, 2 }
 0x3de   : > { %v15213_v8 = vrot.slane %v15212_v44, 2  ;;  %v6174_v13 = vrot.slane %v5803_v4, 2  ;;  %v13064_v16 = vmul.f32 %v15208_v57, %v15156_v3  ;;  %v956_v28 = vmul.f32 %v15215_v24, %v14928_v63 }
 0x3df   : > { %v5645_v5 = vadd.f32 %v15205_v9, %v5009_v32  ;;  %v5646_v40 = vadd.f32 %v15207_v50, %v5010_v56  ;;  %15209 = vst [vmem:[#allocation34_spill] sm:$0xff] %v13053_v34  ;;  %v2262_v10 = vsel %vm2052_vm1, %v15211_v58, %v2261_v41  ;;  %v15216_v31 = vrot.slane %v12974_v11, 2  ;;  %v15219_v32 = vld [vmem:[#allocation6_spill] sm:$0xff] }
 0x3e0   : > { %v4218_v30 = vsel %vm2052_vm1, %v15213_v8, %v4217_v18  ;;  %15214 = vst [vmem:[#allocation8_spill] sm:$0xff] %v13064_v16  ;;  %v2562_v20 = vadd.f32 %v2262_v10, %v1733_v43  ;;  %v957_v17 = vmul.f32 %v15217_v2, %v15156_v3  ;;  %v1211_v47 = vmul.f32 %v15215_v24, %v15218_v19  ;;  %v15220_v9 = vld [vmem:[#allocation18_spill] sm:$0xff] }
 0x3e1   : > { %v6473_v54 = vadd.f32 %v6171_v45, %v5645_v5  ;;  %v6474_v33 = vadd.f32 %v6173_v21, %v5646_v40  ;;  %v6175_v29 = vsel %vm2052_vm1, %v15216_v31, %v6174_v13  ;;  %v1212_v56 = vmul.f32 %v15217_v2, %v15219_v32 }
 0x3e2   : > { %v3054_v45 = vadd.f32 %v2910_v53, %v2562_v20  ;;  %v13079_v21 = vmul.f32 %v12507_v55, %v15218_v19  ;;  %v13083_v11 = vmul.f32 %v12509_v14, %v15219_v32  ;;  %v1446_v43 = vrot.slane %v1211_v47, 1  ;;  %v13283_v32 = vld [vmem:[#allocation2 + $0x628] sm:$0xff]  ;;  %v13299_v19 = vld [vmem:[#allocation2 + $0x640] sm:$0xff] }
 0x3e3   : > { %v8038_v51 = vpack.c.bf16 %v6474_v33, %v6473_v54  ;;  %v1447_v41 = vrot.slane %v1212_v56, 1  ;;  %v1890_v18 = vmul.f32 %v15215_v24, %v14936_v25  ;;  %v1891_v4 = vmul.f32 %v15217_v2, %v15161_v7  ;;  %15244 = vst [vmem:[#allocation24_spill] sm:$0xff] %v13283_v32 }
 0x3e4   : > { %v15221_v53 = vrot.slane %v15220_v9, 1  ;;  %v14374_v39 = vrot.slane %v13079_v21, 1  ;;  %v14370_v50 = vrot.slane %v13083_v11, 1  ;;  %v1734_v40 = vadd.f32 %v1446_v43, %v13053_v34 }
 0x3e5   : > { %v7529_v26 = vshrl.u32 %v8038_v51, 16  ;;  %v7532_v52 = vshll.u32 %v8038_v51, 16  ;;  %v1735_v0 = vadd.f32 %v1447_v41, %v13064_v16  ;;  %v13097_v58 = vmul.f32 %v12507_v55, %v14936_v25 }
 0x3e6   : > { %v3690_v5 = vadd.f32 %v15221_v53, %v3054_v45  ;;  %v1450_v8 = vsel %vm1319_vm0, %v1446_v43, %v14374_v39  ;;  %v13104_v13 = vmul.f32 %v12509_v14, %v15161_v7  ;;  %v1452_v54 = vsel %vm1319_vm0, %v1447_v41, %v14370_v50 }
 0x3e7   : > { %v7531_v10 = vrot.slane %v7529_v26, 7  ;;  %v1737_v33 = vadd.f32 %v1450_v8, %v956_v28  ;;  %v2263_v20 = vrot.slane %v1890_v18, 2  ;;  %v2264_v24 = vrot.slane %v1891_v4, 2  ;;  %v15225_v18 = vld [vmem:[#allocation9_spill] sm:$0xff] }
 0x3e8   : > { %v4518_v44 = vadd.f32 %v4218_v30, %v3690_v5  ;;  %v1738_v2 = vadd.f32 %v1452_v54, %v957_v17  ;;  %v14368_v30 = vrot.slane %v13097_v58, 2  ;;  %v14367_v47 = vrot.slane %v13104_v13, 2 }
 0x3e9   : > { %v7534_v55 = vor.u32 %v7532_v52, %v7531_v10  ;;  %v2563_v56 = vadd.f32 %v2263_v20, %v1734_v40  ;;  %v2564_v51 = vadd.f32 %v2264_v24, %v1735_v0  ;;  %v13113_v14 = vmul.f32 %v15208_v57, %v8224_v22  ;;  %v15227_v40 = vld [vmem:[#allocation13_spill] sm:$0xff]  ;;  %v15228_v10 = vld [vmem:[#allocation14_spill] sm:$0xff] }
 0x3ea   : > { %v5011_v31 = vadd.f32 %v4867_v42, %v4518_v44  ;;  %v15223_v45 = vrot.slane %v12963_v48, 1  ;;  %v2267_v42 = vsel %vm2052_vm1, %v2263_v20, %v14368_v30  ;;  %v13126_v17 = vmul.f32 %v15208_v57, %v8228_v23  ;;  %v15226_v48 = vld [vmem:[#allocation3_spill] sm:$0xff] }
 0x3eb   : > { %15222 = vst [vmem:[#allocation28_spill] sm:$0xff] %v13113_v14  ;;  %v7535_v28 = vsel %vm8551_vm4, %v7527_v36, %v7534_v55  ;;  %v2269_v41 = vsel %vm2052_vm1, %v2264_v24, %v14367_v47  ;;  %v2566_v12 = vadd.f32 %v2267_v42, %v1737_v33  ;;  %v2914_v36 = vmul.f32 %v15225_v18, %v8224_v22 }
 0x3ec   : > { %v5647_v43 = vadd.f32 %v15223_v45, %v5011_v31  ;;  %15224 = vst [vmem:[#allocation26_spill] sm:$0xff] %v13126_v17  ;;  %7751 = vst [vmem:[%s8571_s28 + $0x144] sm:$0xff] %v7535_v28  ;;  %v2915_v4 = vmul.f32 %v15226_v48, %v8228_v23  ;;  %v2567_v52 = vadd.f32 %v2269_v41, %v1738_v2  ;;  %v15229_v2 = vld [vmem:[#allocation15_spill] sm:$0xff] }
 0x3ed   : > { %v3055_v9 = vadd.f32 %v13113_v14, %v2563_v56  ;;  %v3056_v53 = vadd.f32 %v13126_v17, %v2564_v51  ;;  %v3058_v5 = vadd.f32 %v2914_v36, %v2566_v12  ;;  %v3169_v0 = vmul.f32 %v15225_v18, %v15227_v40 }
 0x3ee   : > { %v6475_v26 = vadd.f32 %v6175_v29, %v5647_v43  ;;  %v3170_v44 = vmul.f32 %v15226_v48, %v15228_v10  ;;  %v13144_v8 = vmul.f32 %v12848_v46, %v15227_v40  ;;  %v3059_v33 = vadd.f32 %v2915_v4, %v2567_v52 }
 0x3ef   : > { %v13148_v29 = vmul.f32 %v12857_v27, %v15228_v10  ;;  %v3847_v20 = vmul.f32 %v15225_v18, %v8375_v1  ;;  %v3403_v24 = vrot.slane %v3169_v0, 1  ;;  %v3848_v56 = vmul.f32 %v15226_v48, %v15229_v2  ;;  %v15249_v48 = vld [vmem:[#allocation29_spill] sm:$0xff] }
 0x3f0   : > { %v8039_v54 = vpack.c.bf16 %v6475_v26, %v6475_v26  ;;  %v3404_v55 = vrot.slane %v3170_v44, 1  ;;  %v14369_v31 = vrot.slane %v13144_v8, 1  ;;  %v13158_v43 = vmul.f32 %v12848_v46, %v8375_v1  ;;  %v13170_v44 = vld [vmem:[#allocation2 + $0x618] sm:$0xff] }
 0x3f1   : > { %v14371_v45 = vrot.slane %v13148_v29, 1  ;;  %v3691_v41 = vadd.f32 %v3403_v24, %v3055_v9  ;;  %v13165_v36 = vmul.f32 %v12857_v27, %v15229_v2  ;;  %v4219_v0 = vrot.slane %v3847_v20, 2  ;;  %15230 = vst [vmem:[#allocation39_spill] sm:$0xff] %v13170_v44 }
 0x3f2   : > { %v7538_v51 = vshrl.u32 %v8039_v54, 16  ;;  %v7541_v28 = vshll.u32 %v8039_v54, 16  ;;  %v3407_v42 = vsel %vm1319_vm0, %v3403_v24, %v14369_v31  ;;  %v3692_v12 = vadd.f32 %v3404_v55, %v3056_v53  ;;  %v13174_v53 = vld [vmem:[#allocation2 + $0x620] sm:$0xff] }
 0x3f3   : > { %v3409_v26 = vsel %vm1319_vm0, %v3404_v55, %v14371_v45  ;;  %v3694_v52 = vadd.f32 %v3407_v42, %v3058_v5  ;;  %v4220_v47 = vrot.slane %v3848_v56, 2  ;;  %v14373_v30 = vrot.slane %v13158_v43, 2  ;;  %15231 = vst [vmem:[#allocation31_spill] sm:$0xff] %v13174_v53  ;;  %v13190_v56 = vld [vmem:[#allocation2 + $0x630] sm:$0xff]  ;;  %v15235_v45 = vld [vmem:[#allocation20_spill] sm:$0xff] }
 0x3f4   : > { %v7540_v4 = vrot.slane %v7538_v51, 7  ;;  %v3695_v54 = vadd.f32 %v3409_v26, %v3059_v33  ;;  %v14372_v9 = vrot.slane %v13165_v36, 2  ;;  %v4519_v31 = vadd.f32 %v4219_v0, %v3691_v41  ;;  %v15232_v51 = vld [vmem:[#allocation16_spill] sm:$0xff] }
 0x3f5   : > { %v13178_v50 = vmul.f32 %v15208_v57, %v15232_v51  ;;  %v13182_v5 = vmul.f32 %v15208_v57, %v15121_v62  ;;  %v4223_v33 = vsel %vm2052_vm1, %v4219_v0, %v14373_v30  ;;  %v4520_v55 = vadd.f32 %v4220_v47, %v3692_v12  ;;  %v15236_v30 = vld [vmem:[#allocation21_spill] sm:$0xff] }
 0x3f6   : > { %v7543_v24 = vor.u32 %v7541_v28, %v7540_v4  ;;  %v4225_v20 = vsel %vm2052_vm1, %v4220_v47, %v14372_v9  ;;  %v13192_v28 = vld [vmem:[#allocation2 + $0x638] sm:$0xff]  ;;  %v4871_v42 = vmul.f32 %v15232_v51, %v13170_v44  ;;  %v4522_v4 = vadd.f32 %v4223_v33, %v3694_v52 }
 0x3f7   : > { %15233 = vst [vmem:[#allocation11_spill] sm:$0xff] %v13178_v50  ;;  %15234 = vst [vmem:[#allocation27_spill] sm:$0xff] %v13182_v5  ;;  %v4523_v26 = vadd.f32 %v4225_v20, %v3695_v54  ;;  %v4872_v0 = vmul.f32 %v15121_v62, %v13174_v53  ;;  %v5012_v47 = vadd.f32 %v13178_v50, %v4519_v31  ;;  %v13227_v20 = vld [vmem:[%s13700_s1 + $0x20] ss:$0 sm:$0xff]  ;;  %v796_v50 = vld [vmem:[#allocation2 + $0x568] sm:$0xff] }
 0x3f8   : > { %v7544_v41 = vsel %vm8551_vm4, %v7536_v15, %v7543_v24  ;;  %v5013_v12 = vadd.f32 %v13182_v5, %v4520_v55  ;;  %v5126_v9 = vmul.f32 %v15235_v45, %v13170_v44  ;;  %v5127_v39 = vmul.f32 %v15236_v30, %v13174_v53  ;;  %v13220_v24 = vld [vmem:[%s13700_s1 + $0x18] ss:$0 sm:$0xff] }
 0x3f9   : > { %7752 = vst [vmem:[%s8571_s28 + $0x14c] sm:$0xf] %v7544_v41  ;;  %v5015_v59 = vadd.f32 %v4871_v42, %v4522_v4  ;;  %v5016_v10 = vadd.f32 %v4872_v0, %v4523_v26  ;;  %v13211_v15 = vmul.f32 %v15235_v45, %v13190_v56  ;;  %v13215_v52 = vmul.f32 %v15236_v30, %v13192_v28 }
 0x3fa   : > { %v5360_v54 = vrot.slane %v5126_v9, 1  ;;  %v5361_v31 = vrot.slane %v5127_v39, 1  ;;  %v5804_v33 = vmul.f32 %v13220_v24, %v13170_v44  ;;  %v5805_v55 = vmul.f32 %v13227_v20, %v13174_v53 }
 0x3fb   : > { %15237 = vst [vmem:[#allocation12_spill] sm:$0xff] %v13215_v52  ;;  %v14390_v42 = vrot.slane %v13211_v15, 1  ;;  %v14389_v39 = vrot.slane %v13215_v52, 1  ;;  %v13235_v9 = vmul.f32 %v13220_v24, %v13190_v56  ;;  %v13239_v41 = vmul.f32 %v13227_v20, %v13192_v28 }
 0x3fc   : > { %v5648_v4 = vadd.f32 %v5360_v54, %v5012_v47  ;;  %v5649_v26 = vadd.f32 %v5361_v31, %v5013_v12  ;;  %v6176_v0 = vrot.slane %v5804_v33, 2  ;;  %v6177_v5 = vrot.slane %v5805_v55, 2  ;;  %v13249_v12 = vld [vmem:[#allocation2 + $0x580] sm:$0xff] }
 0x3fd   : > { %v5364_v30 = vsel %vm1319_vm0, %v5360_v54, %v14390_v42  ;;  %v5366_v45 = vsel %vm1319_vm0, %v5361_v31, %v14389_v39  ;;  %v14392_v17 = vrot.slane %v13235_v9, 2  ;;  %v14391_v14 = vrot.slane %v13239_v41, 2 }
 0x3fe   : > { %v5651_v40 = vadd.f32 %v5364_v30, %v5015_v59  ;;  %v5652_v53 = vadd.f32 %v5366_v45, %v5016_v10  ;;  %v6476_v44 = vadd.f32 %v6176_v0, %v5648_v4  ;;  %v6477_v47 = vadd.f32 %v6177_v5, %v5649_v26  ;;  %v15239_v59 = vld [vmem:[#allocation23_spill] sm:$0xff] }
 0x3ff   : > { %v6180_v33 = vsel %vm2052_vm1, %v6176_v0, %v14392_v17  ;;  %v6182_v54 = vsel %vm2052_vm1, %v6177_v5, %v14391_v14  ;;  %v13259_v31 = vmul.f32 %v15208_v57, %v14502_v6  ;;  %v958_v55 = vmul.f32 %v14502_v6, %v796_v50 }
 0x400   : > { %v6479_v30 = vadd.f32 %v6180_v33, %v5651_v40  ;;  %v6480_v10 = vadd.f32 %v6182_v54, %v5652_v53  ;;  %v8040_v45 = vpack.c.bf16 %v6477_v47, %v6476_v44  ;;  %v1213_v4 = vmul.f32 %v15239_v59, %v796_v50  ;;  %v15242_v44 = vld [vmem:[#allocation7_spill] sm:$0xff] }
 0x401   : > { %15238 = vst [vmem:[#allocation36_spill] sm:$0xff] %v13259_v31  ;;  %v13265_v26 = vmul.f32 %v15239_v59, %v13249_v12  ;;  %v1892_v0 = vmul.f32 %v8499_v60, %v796_v50  ;;  %v13270_v5 = vmul.f32 %v8499_v60, %v13249_v12  ;;  %v13274_v39 = vmul.f32 %v15208_v57, %v8502_v61  ;;  %v15243_v50 = vld [vmem:[#allocation25_spill] sm:$0xff] }
 0x402   : > { %v8042_v42 = vpack.c.bf16 %v6480_v10, %v6479_v30  ;;  %v7546_v40 = vshrl.u32 %v8040_v45, 16  ;;  %v1448_v53 = vrot.slane %v1213_v4, 1  ;;  %v2916_v47 = vmul.f32 %v15242_v44, %v8502_v61 }
 0x403   : > { %15240 = vst [vmem:[#allocation22_spill] sm:$0xff] %v13270_v5  ;;  %15241 = vst [vmem:[#allocation37_spill] sm:$0xff] %v13274_v39  ;;  %v14399_v33 = vrot.slane %v13265_v26, 1  ;;  %v2265_v54 = vrot.slane %v1892_v0, 2  ;;  %v14400_v14 = vrot.slane %v13270_v5, 2  ;;  %v3171_v17 = vmul.f32 %v15242_v44, %v15243_v50 }
 0x404   : > { %v7950_v59 = vrot.slane %v7546_v40, 11  ;;  %v7551_v16 = vshrl.u32 %v8042_v42, 16  ;;  %v7554_v34 = vshll.u32 %v8042_v42, 16  ;;  %v1736_v57 = vadd.f32 %v1448_v53, %v13259_v31 }
 0x405   : > { %v1454_v30 = vsel %vm1319_vm0, %v1448_v53, %v14399_v33  ;;  %v2271_v10 = vsel %vm2052_vm1, %v2265_v54, %v14400_v14  ;;  %v13293_v45 = vmul.f32 %v12942_v35, %v15243_v50  ;;  %v3405_v4 = vrot.slane %v3171_v17, 1  ;;  %v13306_v14 = vld [vmem:[#allocation2 + $0x18] sm:$0xff] }
 0x406   : > { %v13295_v0 = vrot.slane %v7551_v16, 7  ;;  %v1739_v42 = vadd.f32 %v1454_v30, %v958_v55  ;;  %v2565_v40 = vadd.f32 %v2265_v54, %v1736_v57  ;;  %v3849_v31 = vmul.f32 %v15242_v44, %v8508_v49  ;;  %15247 = vst [vmem:[#allocation32_spill] sm:$0xff] %v13306_v14 }
 0x407   : > { %15245 = vst [vmem:[#allocation38_spill] sm:$0xff] %v13293_v45  ;;  %v14406_v53 = vrot.slane %v13293_v45, 1  ;;  %v13304_v33 = vmul.f32 %v12942_v35, %v8508_v49  ;;  %v13310_v17 = vmul.f32 %v13306_v14, %v14525_v37  ;;  %v4873_v16 = vmul.f32 %v14525_v37, %v13283_v32 }
 0x408   : > { %v7556_v55 = vor.u32 %v7554_v34, %v13295_v0  ;;  %v2568_v44 = vadd.f32 %v2271_v10, %v1739_v42  ;;  %v3057_v54 = vadd.f32 %v13274_v39, %v2565_v40  ;;  %v4221_v57 = vrot.slane %v3849_v31, 2  ;;  %v13331_v31 = vld [vmem:[%s13700_s1 + $0x28] ss:$0 sm:$0xff] }
 0x409   : > { %15246 = vst [vmem:[#allocation17_spill] sm:$0xff] %v13304_v33  ;;  %15248 = vst [vmem:[#allocation19_spill] sm:$0xff] %v13310_v17  ;;  %v3411_v30 = vsel %vm1319_vm0, %v3405_v4, %v14406_v53  ;;  %v14412_v50 = vrot.slane %v13304_v33, 2  ;;  %v5128_v14 = vmul.f32 %v15249_v48, %v13283_v32  ;;  %v13324_v5 = vmul.f32 %v15249_v48, %v13299_v19  ;;  %v800_v53 = vld [vmem:[#allocation2 + $0x588] sm:$0x1] }
 0x40a   : > { %v7557_v34 = vsel %vm8551_vm4, %v7950_v59, %v7556_v55  ;;  %v3060_v10 = vadd.f32 %v2916_v47, %v2568_v44  ;;  %v3693_v42 = vadd.f32 %v3405_v4, %v3057_v54  ;;  %v5806_v40 = vmul.f32 %v13331_v31, %v13283_v32  ;;  %v801_v47 = vld [vmem:[#allocation2 + $0x590] sm:$0x1] }
 0x40b   : > { %15250 = vst [vmem:[#allocation10_spill] sm:$0xff] %v13324_v5  ;;  %7753 = vst [vmem:[%s8571_s28 + $0x150] sm:$0xff] %v7557_v34  ;;  %v4227_v48 = vsel %vm2052_vm1, %v4221_v57, %v14412_v50  ;;  %v5362_v39 = vrot.slane %v5128_v14, 1  ;;  %v14417_v45 = vrot.slane %v13324_v5, 1  ;;  %v13342_v59 = vmul.f32 %v13331_v31, %v13299_v19  ;;  %v8113_v54 = vld [vmem:[#allocation2 + $0x570] sm:$0xff]  ;;  %v8114_v14 = vld [vmem:[#allocation2 + $0x578] sm:$0xff] }
 0x40c   : > { %v3696_v4 = vadd.f32 %v3411_v30, %v3060_v10  ;;  %v4521_v55 = vadd.f32 %v4221_v57, %v3693_v42  ;;  %v6178_v44 = vrot.slane %v5806_v40, 2  ;;  %v959_v32 = vmul.f32 %v8113_v54, %v14928_v63  ;;  %v2758_v42 = vld [vmem:[#allocation2 + $0x5e8] sm:$0x1]  ;;  %v2759_v40 = vld [vmem:[#allocation2 + $0x5f0] sm:$0x1] }
 0x40d   : > { %v5368_v34 = vsel %vm1319_vm0, %v5362_v39, %v14417_v45  ;;  %v14419_v50 = vrot.slane %v13342_v59, 2  ;;  %v960_v33 = vmul.f32 %v8114_v14, %v15156_v3  ;;  %v1896_v38 = vmul.f32 %v14936_v25, %v800_v53 }
 0x40e   : > { %v4524_v18 = vadd.f32 %v4227_v48, %v3696_v4  ;;  %v5014_v52 = vadd.f32 %v13310_v17, %v4521_v55  ;;  %v15251_v57 = vrot.slane %v13079_v21, 1  ;;  %v1897_v10 = vmul.f32 %v15161_v7, %v801_v47 }
 0x40f   : > { %v6184_v54 = vsel %vm2052_vm1, %v6178_v44, %v14419_v50  ;;  %v15252_v45 = vrot.slane %v13083_v11, 1  ;;  %v2272_v14 = vrot.slane %v1896_v38, 2  ;;  %v2917_v48 = vmul.f32 %v12848_v46, %v8224_v22  ;;  %v4715_v11 = vld [vmem:[#allocation2 + $0x648] sm:$0x1] }
 0x410   : > { %v1740_v30 = vadd.f32 %v15251_v57, %v959_v32  ;;  %v5017_v53 = vadd.f32 %v4873_v16, %v4524_v18  ;;  %v5650_v4 = vadd.f32 %v5362_v39, %v5014_v52  ;;  %v2274_v55 = vrot.slane %v1897_v10, 2  ;;  %v4716_v16 = vld [vmem:[#allocation2 + $0x650] sm:$0x1] }
 0x411   : > { %v1741_v5 = vadd.f32 %v15252_v45, %v960_v33  ;;  %v2918_v32 = vmul.f32 %v12857_v27, %v8228_v23  ;;  %v15253_v21 = vrot.slane %v13097_v58, 2  ;;  %v3853_v57 = vmul.f32 %v8375_v1, %v2758_v42 }
 0x412   : > { %v3854_v50 = vmul.f32 %v15229_v2, %v2759_v40  ;;  %v4874_v38 = vmul.f32 %v15232_v51, %v13190_v56  ;;  %v5653_v33 = vadd.f32 %v5368_v34, %v5017_v53  ;;  %v6478_v45 = vadd.f32 %v6178_v44, %v5650_v4 }
 0x413   : > { %v2273_v47 = vsel %vm2052_vm1, %v15253_v21, %v2272_v14  ;;  %v15254_v18 = vrot.slane %v13104_v13, 2  ;;  %v4228_v58 = vrot.slane %v3853_v57, 2  ;;  %v4875_v42 = vmul.f32 %v15121_v62, %v13192_v28  ;;  %v2760_v57 = vld [vmem:[#allocation2 + $0x5f8] sm:$0x1] }
 0x414   : > { %v2569_v39 = vadd.f32 %v2273_v47, %v1740_v30  ;;  %v4230_v17 = vrot.slane %v3854_v50, 2  ;;  %v6481_v14 = vadd.f32 %v6184_v54, %v5653_v33  ;;  %v8041_v40 = vpack.c.bf16 %v6478_v45, %v6478_v45  ;;  %v802_v47 = vld [vmem:[#allocation2 + $0x598] sm:$0x1] }
 0x415   : > { %v2275_v52 = vsel %vm2052_vm1, %v15254_v18, %v2274_v55  ;;  %v5810_v2 = vmul.f32 %v13220_v24, %v4715_v11  ;;  %v15255_v44 = vrot.slane %v13158_v43, 2  ;;  %v15256_v34 = vrot.slane %v13165_v36, 2  ;;  %v4717_v18 = vld [vmem:[#allocation2 + $0x658] sm:$0x1] }
 0x416   : > { %v2570_v10 = vadd.f32 %v2275_v52, %v1741_v5  ;;  %v3061_v21 = vadd.f32 %v2917_v48, %v2569_v39  ;;  %v5811_v5 = vmul.f32 %v13227_v20, %v4716_v16  ;;  %v8043_v50 = vpack.c.bf16 %v6481_v14, %v6481_v14 }
 0x417   : > { %v4229_v13 = vsel %vm2052_vm1, %v15255_v44, %v4228_v58  ;;  %v4231_v30 = vsel %vm2052_vm1, %v15256_v34, %v4230_v17  ;;  %v7559_v53 = vshrl.u32 %v8041_v40, 16  ;;  %v15257_v62 = vrot.slane %v13144_v8, 1 }
 0x418   : > { %v3062_v51 = vadd.f32 %v2918_v32, %v2570_v10  ;;  %v6185_v4 = vrot.slane %v5810_v2, 2  ;;  %v15258_v48 = vrot.slane %v13148_v29, 1  ;;  %v6187_v32 = vrot.slane %v5811_v5, 2 }
 0x419   : > { %v3697_v54 = vadd.f32 %v15257_v62, %v3061_v21  ;;  %v7571_v43 = vrot.slane %v13295_v0, 4  ;;  %v961_v36 = vmul.f32 %v14502_v6, %v13249_v12  ;;  %v7951_v17 = vrot.slane %v7559_v53, 11  ;;  %v15265_v53 = vld [vmem:[#allocation9_spill] sm:$0xff]  ;;  %v15286_v0 = vld [vmem:[#allocation14_spill] sm:$0xff] }
 0x41a   : > { %v3698_v55 = vadd.f32 %v15258_v48, %v3062_v51  ;;  %v7564_v11 = vshrl.u32 %v8043_v50, 16  ;;  %v7567_v33 = vshll.u32 %v8043_v50, 16  ;;  %v15259_v8 = vrot.slane %v13235_v9, 2  ;;  %v15267_v48 = vld [vmem:[#allocation22_spill] sm:$0xff] }
 0x41b   : > { %v4525_v45 = vadd.f32 %v4229_v13, %v3697_v54  ;;  %v15260_v29 = vrot.slane %v13239_v41, 2  ;;  %v15261_v16 = vrot.slane %v13265_v26, 1  ;;  %v1898_v14 = vmul.f32 %v8499_v60, %v802_v47 }
 0x41c   : > { %v4526_v52 = vadd.f32 %v4231_v30, %v3698_v55  ;;  %v6186_v2 = vsel %vm2052_vm1, %v15259_v8, %v6185_v4  ;;  %v13399_v58 = vrot.slane %v7564_v11, 7  ;;  %v2919_v40 = vmul.f32 %v12942_v35, %v8502_v61  ;;  %v15263_v30 = vld [vmem:[#allocation12_spill] sm:$0xff]  ;;  %v15270_v11 = vld [vmem:[#allocation17_spill] sm:$0xff] }
 0x41d   : > { %v6188_v39 = vsel %vm2052_vm1, %v15260_v29, %v6187_v32  ;;  %v1742_v10 = vadd.f32 %v15261_v16, %v961_v36  ;;  %v5018_v12 = vadd.f32 %v4874_v38, %v4525_v45  ;;  %v3855_v9 = vmul.f32 %v8508_v49, %v2760_v57  ;;  %v15269_v32 = vld [vmem:[#allocation3_spill] sm:$0xff] }
 0x41e   : > { %v5019_v21 = vadd.f32 %v4875_v42, %v4526_v52  ;;  %v4876_v41 = vmul.f32 %v14525_v37, %v13299_v19  ;;  %v5812_v51 = vmul.f32 %v13331_v31, %v4717_v18  ;;  %v7569_v26 = vor.u32 %v7567_v33, %v13399_v58 }
 0x41f   : > { %v15262_v44 = vrot.slane %v13211_v15, 1  ;;  %v2276_v38 = vrot.slane %v1898_v14, 2  ;;  %v7580_v34 = vrot.slane %v13399_v58, 4  ;;  %v15264_v5 = vrot.slane %v15263_v30, 1 }
 0x420   : > { %v4232_v42 = vrot.slane %v3855_v9, 2  ;;  %v6189_v50 = vrot.slane %v5812_v51, 2  ;;  %v965_v62 = vmul.f32 %v15265_v53, %v14928_v63  ;;  %v7570_v37 = vsel %vm8551_vm4, %v7951_v17, %v7569_v26  ;;  %v15273_v17 = vld [vmem:[#allocation5_spill] sm:$0xff] }
 0x421   : > { %v5654_v13 = vadd.f32 %v15262_v44, %v5018_v12  ;;  %v5655_v35 = vadd.f32 %v15264_v5, %v5019_v21  ;;  %v15268_v55 = vrot.slane %v15267_v48, 2  ;;  %v966_v47 = vmul.f32 %v15269_v32, %v15156_v3  ;;  %7754 = vst [vmem:[%s8571_s28 + $0x158] sm:$0xf] %v7570_v37  ;;  %v15278_v37 = vld [vmem:[#allocation8_spill] sm:$0xff] }
 0x422   : > { %v15271_v33 = vrot.slane %v15270_v11, 2  ;;  %v15272_v18 = vrot.slane %v13342_v59, 2  ;;  %v1217_v8 = vmul.f32 %v15265_v53, %v15273_v17  ;;  %v13436_v16 = vmul.f32 %v12848_v46, %v15273_v17  ;;  %v15279_v17 = vld [vmem:[#allocation39_spill] sm:$0xff] }
 0x423   : > { %v6482_v4 = vadd.f32 %v6186_v2, %v5654_v13  ;;  %v2277_v15 = vsel %vm2052_vm1, %v15268_v55, %v2276_v38  ;;  %v6483_v36 = vadd.f32 %v6188_v39, %v5655_v35  ;;  %v15274_v2 = vld [vmem:[#allocation6_spill] sm:$0xff]  ;;  %v1899_v59 = vmul.f32 %v15265_v53, %v14936_v25 }
 0x424   : > { %v2571_v57 = vadd.f32 %v2277_v15, %v1742_v10  ;;  %v4233_v45 = vsel %vm2052_vm1, %v15271_v33, %v4232_v42  ;;  %v6190_v52 = vsel %vm2052_vm1, %v15272_v18, %v6189_v50  ;;  %v1218_v29 = vmul.f32 %v15269_v32, %v15274_v2  ;;  %v15275_v38 = vld [vmem:[#allocation38_spill] sm:$0xff] }
 0x425   : > { %v13440_v39 = vmul.f32 %v12857_v27, %v15274_v2  ;;  %v8044_v10 = vpack.c.bf16 %v6483_v36, %v6482_v4  ;;  %v1900_v14 = vmul.f32 %v15269_v32, %v15161_v7  ;;  %v1455_v21 = vrot.slane %v1217_v8, 1  ;;  %v15277_v50 = vld [vmem:[#allocation34_spill] sm:$0xff]  ;;  %v15280_v2 = vld [vmem:[#allocation31_spill] sm:$0xff] }
 0x426   : > { %v3063_v12 = vadd.f32 %v2919_v40, %v2571_v57  ;;  %v1456_v9 = vrot.slane %v1218_v29, 1  ;;  %v1458_v51 = vrot.slane %v13436_v16, 1  ;;  %v15276_v30 = vrot.slane %v15275_v38, 1 }
 0x427   : > { %v1460_v26 = vrot.slane %v13440_v39, 1  ;;  %v7573_v44 = vshrl.u32 %v8044_v10, 16  ;;  %v7576_v13 = vshll.u32 %v8044_v10, 16  ;;  %v13452_v40 = vmul.f32 %v12848_v46, %v14936_v25 }
 0x428   : > { %v3699_v5 = vadd.f32 %v15276_v30, %v3063_v12  ;;  %v1459_v35 = vsel %vm1319_vm0, %v1455_v21, %v1458_v51  ;;  %v1743_v53 = vadd.f32 %v1455_v21, %v15277_v50  ;;  %v1744_v4 = vadd.f32 %v1456_v9, %v15278_v37  ;;  %v15283_v21 = vld [vmem:[#allocation13_spill] sm:$0xff]  ;;  %v15285_v30 = vld [vmem:[#allocation26_spill] sm:$0xff] }
 0x429   : > { %v1461_v42 = vsel %vm1319_vm0, %v1456_v9, %v1460_v26  ;;  %v7575_v48 = vrot.slane %v7573_v44, 7  ;;  %v1746_v15 = vadd.f32 %v1459_v35, %v965_v62  ;;  %v13464_v46 = vmul.f32 %v12857_v27, %v15161_v7 }
 0x42a   : > { %v4527_v55 = vadd.f32 %v4233_v45, %v3699_v5  ;;  %v1747_v32 = vadd.f32 %v1461_v42, %v966_v47  ;;  %v2278_v36 = vrot.slane %v1899_v59, 2  ;;  %v2279_v57 = vrot.slane %v1900_v14, 2 }
 0x42b   : > { %v14431_v11 = vrot.slane %v13452_v40, 2  ;;  %v7578_v33 = vor.u32 %v7576_v13, %v7575_v48  ;;  %v2923_v8 = vmul.f32 %v15279_v17, %v8224_v22  ;;  %v2924_v29 = vmul.f32 %v15280_v2, %v8228_v23  ;;  %v15284_v13 = vld [vmem:[#allocation28_spill] sm:$0xff] }
 0x42c   : > { %v5020_v18 = vadd.f32 %v4876_v41, %v4527_v55  ;;  %v14429_v27 = vrot.slane %v13464_v46, 2  ;;  %v2572_v47 = vadd.f32 %v2278_v36, %v1743_v53  ;;  %v2573_v45 = vadd.f32 %v2279_v57, %v1744_v4  ;;  %v15281_v41 = vld [vmem:[#allocation10_spill] sm:$0xff] }
 0x42d   : > { %v2282_v62 = vsel %vm2052_vm1, %v2278_v36, %v14431_v11  ;;  %v7579_v10 = vsel %vm8551_vm4, %v7571_v43, %v7578_v33  ;;  %v15282_v12 = vrot.slane %v15281_v41, 1  ;;  %v3175_v9 = vmul.f32 %v15279_v17, %v15283_v21  ;;  %v813_v11 = vld [vmem:[#allocation2 + $0x5f0] sm:$0x1] }
 0x42e   : > { %v2575_v14 = vadd.f32 %v2282_v62, %v1746_v15  ;;  %7755 = vst [vmem:[%s8571_s28 + $0x15c] sm:$0xff] %v7579_v10  ;;  %v2284_v44 = vsel %vm2052_vm1, %v2279_v57, %v14429_v27  ;;  %v3064_v38 = vadd.f32 %v15284_v13, %v2572_v47  ;;  %v3065_v5 = vadd.f32 %v15285_v30, %v2573_v45  ;;  %v15289_v30 = vld [vmem:[#allocation32_spill] sm:$0xff] }
 0x42f   : > { %v5656_v59 = vadd.f32 %v15282_v12, %v5020_v18  ;;  %v3176_v35 = vmul.f32 %v15280_v2, %v15286_v0  ;;  %v2576_v42 = vadd.f32 %v2284_v44, %v1747_v32  ;;  %v13493_v53 = vmul.f32 %v13190_v56, %v15283_v21 }
 0x430   : > { %v3067_v50 = vadd.f32 %v2923_v8, %v2575_v14  ;;  %v13497_v37 = vmul.f32 %v13192_v28, %v15286_v0  ;;  %v3412_v4 = vrot.slane %v3175_v9, 1  ;;  %v3856_v55 = vmul.f32 %v15279_v17, %v8375_v1  ;;  %v15290_v0 = vld [vmem:[#allocation21_spill] sm:$0xff] }
 0x431   : > { %v6484_v43 = vadd.f32 %v6190_v52, %v5656_v59  ;;  %v3413_v48 = vrot.slane %v3176_v35, 1  ;;  %v3068_v36 = vadd.f32 %v2924_v29, %v2576_v42  ;;  %v14426_v57 = vrot.slane %v13493_v53, 1  ;;  %v15287_v52 = vld [vmem:[#allocation15_spill] sm:$0xff] }
 0x432   : > { %v3857_v32 = vmul.f32 %v15280_v2, %v15287_v52  ;;  %v14423_v33 = vrot.slane %v13497_v37, 1  ;;  %v3700_v18 = vadd.f32 %v3412_v4, %v3064_v38  ;;  %v13507_v62 = vmul.f32 %v13190_v56, %v8375_v1  ;;  %v15288_v38 = vld [vmem:[#allocation20_spill] sm:$0xff] }
 0x433   : > { %v8045_v15 = vpack.c.bf16 %v6484_v43, %v6484_v43  ;;  %v3701_v8 = vadd.f32 %v3413_v48, %v3065_v5  ;;  %v3416_v17 = vsel %vm1319_vm0, %v3412_v4, %v14426_v57  ;;  %v13514_v29 = vmul.f32 %v13192_v28, %v15287_v52 }
 0x434   : > { %v3418_v2 = vsel %vm1319_vm0, %v3413_v48, %v14423_v33  ;;  %v3703_v10 = vadd.f32 %v3416_v17, %v3067_v50  ;;  %v4234_v41 = vrot.slane %v3856_v55, 2  ;;  %v4235_v12 = vrot.slane %v3857_v32, 2  ;;  %v15292_v32 = vld [vmem:[#allocation27_spill] sm:$0xff]  ;;  %v15296_v33 = vld [vmem:[#allocation36_spill] sm:$0xff] }
 0x435   : > { %v7582_v47 = vshrl.u32 %v8045_v15, 16  ;;  %v7585_v45 = vshll.u32 %v8045_v15, 16  ;;  %v3704_v14 = vadd.f32 %v3418_v2, %v3068_v36  ;;  %v14428_v21 = vrot.slane %v13507_v62, 2  ;;  %v15291_v15 = vld [vmem:[#allocation11_spill] sm:$0xff] }
 0x436   : > { %v14424_v9 = vrot.slane %v13514_v29, 2  ;;  %v4528_v44 = vadd.f32 %v4234_v41, %v3700_v18  ;;  %v4529_v13 = vadd.f32 %v4235_v12, %v3701_v8  ;;  %v5132_v5 = vmul.f32 %v15289_v30, %v15288_v38 }
 0x437   : > { %v7584_v59 = vrot.slane %v7582_v47, 7  ;;  %v5133_v35 = vmul.f32 %v15289_v30, %v15290_v0  ;;  %v4238_v42 = vsel %vm2052_vm1, %v4234_v41, %v14428_v21  ;;  %v5813_v4 = vmul.f32 %v15289_v30, %v13220_v24 }
 0x438   : > { %v4240_v50 = vsel %vm2052_vm1, %v4235_v12, %v14424_v9  ;;  %v4531_v48 = vadd.f32 %v4238_v42, %v3703_v10  ;;  %v5021_v36 = vadd.f32 %v15291_v15, %v4528_v44  ;;  %v5022_v18 = vadd.f32 %v15292_v32, %v4529_v13  ;;  %v808_v12 = vld [vmem:[#allocation2 + $0x5c8] sm:$0xff] }
 0x439   : > { %v7587_v43 = vor.u32 %v7585_v45, %v7584_v59  ;;  %v4532_v55 = vadd.f32 %v4240_v50, %v3704_v14  ;;  %v13539_v47 = vrot.slane %v5132_v5, 1  ;;  %v13541_v45 = vrot.slane %v5133_v35, 1  ;;  %v13550_v59 = vld [vmem:[#allocation2 + $0x5e0] sm:$0xff] }
 0x43a   : > { %v5814_v17 = vmul.f32 %v15289_v30, %v13227_v20  ;;  %v5024_v2 = vadd.f32 %v15291_v15, %v4531_v48  ;;  %v13548_v41 = vrot.slane %v5813_v4, 2  ;;  %v15293_v5 = vld [vmem:[#allocation23_spill] sm:$0xff]  ;;  %v13569_v4 = vmul.f32 %v8499_v60, %v13550_v59 }
 0x43b   : > { %v7588_v8 = vsel %vm8551_vm4, %v7580_v34, %v7587_v43  ;;  %v5025_v10 = vadd.f32 %v15292_v32, %v4532_v55  ;;  %v5657_v58 = vadd.f32 %v13539_v47, %v5021_v36  ;;  %v5658_v34 = vadd.f32 %v13541_v45, %v5022_v18 }
 0x43c   : > { %7756 = vst [vmem:[%s8571_s28 + $0x164] sm:$0xf] %v7588_v8  ;;  %v5660_v14 = vadd.f32 %v13539_v47, %v5024_v2  ;;  %v13556_v13 = vrot.slane %v5814_v17, 2  ;;  %v1219_v0 = vmul.f32 %v15293_v5, %v808_v12  ;;  %v13562_v35 = vmul.f32 %v15293_v5, %v13550_v59 }
 0x43d   : > { %v5661_v44 = vadd.f32 %v13541_v45, %v5025_v10  ;;  %v6485_v38 = vadd.f32 %v13548_v41, %v5657_v58  ;;  %v1901_v43 = vmul.f32 %v8499_v60, %v808_v12  ;;  %v967_v17 = vmul.f32 %v14502_v6, %v808_v12  ;;  %v15294_v10 = vld [vmem:[#allocation25_spill] sm:$0xff]  ;;  %v15295_v58 = vld [vmem:[#allocation24_spill] sm:$0xff] }
 0x43e   : > { %v6486_v42 = vadd.f32 %v13556_v13, %v5658_v34  ;;  %v6488_v50 = vadd.f32 %v13548_v41, %v5660_v14  ;;  %v1457_v55 = vrot.slane %v1219_v0, 1  ;;  %v14425_v36 = vrot.slane %v13562_v35, 1 }
 0x43f   : > { %v6489_v48 = vadd.f32 %v13556_v13, %v5661_v44  ;;  %v2280_v18 = vrot.slane %v1901_v43, 2  ;;  %v14427_v2 = vrot.slane %v13569_v4, 2  ;;  %v3177_v34 = vmul.f32 %v15295_v58, %v15294_v10 }
 0x440   : > { %v8046_v8 = vpack.c.bf16 %v6486_v42, %v6485_v38  ;;  %v1463_v14 = vsel %vm1319_vm0, %v1457_v55, %v14425_v36  ;;  %v1745_v9 = vadd.f32 %v1457_v55, %v15296_v33  ;;  %v13583_v44 = vmul.f32 %v13299_v19, %v15294_v10  ;;  %v15297_v10 = vld [vmem:[#allocation37_spill] sm:$0xff] }
 0x441   : > { %v8048_v5 = vpack.c.bf16 %v6489_v48, %v6488_v50  ;;  %v1748_v38 = vadd.f32 %v1463_v14, %v967_v17  ;;  %v2925_v12 = vmul.f32 %v15295_v58, %v8502_v61  ;;  %v3414_v43 = vrot.slane %v3177_v34, 1 }
 0x442   : > { %v7590_v0 = vshrl.u32 %v8046_v8, 16  ;;  %v2286_v50 = vsel %vm2052_vm1, %v2280_v18, %v14427_v2  ;;  %v2574_v48 = vadd.f32 %v2280_v18, %v1745_v9  ;;  %v14430_v36 = vrot.slane %v13583_v44, 1  ;;  %v15298_v9 = vld [vmem:[#allocation29_spill] sm:$0xff] }
 0x443   : > { %v7595_v42 = vshrl.u32 %v8048_v5, 16  ;;  %v7598_v57 = vshll.u32 %v8048_v5, 16  ;;  %v2577_v33 = vadd.f32 %v2286_v50, %v1748_v38  ;;  %v3858_v55 = vmul.f32 %v15295_v58, %v8508_v49 }
 0x444   : > { %v13595_v8 = vmul.f32 %v13299_v19, %v8508_v49  ;;  %v3066_v34 = vadd.f32 %v15297_v10, %v2574_v48  ;;  %v3420_v14 = vsel %vm1319_vm0, %v3414_v43, %v14430_v36  ;;  %v5134_v18 = vmul.f32 %v15289_v30, %v15298_v9  ;;  %v812_v10 = vld [vmem:[#allocation2 + $0x5e8] sm:$0x1]  ;;  %v8115_v9 = vld [vmem:[#allocation2 + $0x5d0] sm:$0xff] }
 0x445   : > { %v13597_v17 = vrot.slane %v7595_v42, 7  ;;  %v3069_v5 = vadd.f32 %v2925_v12, %v2577_v33  ;;  %v4236_v38 = vrot.slane %v3858_v55, 2  ;;  %v5815_v58 = vmul.f32 %v13331_v31, %v15289_v30  ;;  %v2770_v55 = vld [vmem:[#allocation2 + $0x648] sm:$0x1] }
 0x446   : > { %v4241_v50 = vrot.slane %v13595_v8, 2  ;;  %v7952_v2 = vrot.slane %v7590_v0, 11  ;;  %v3702_v21 = vadd.f32 %v3414_v43, %v3066_v34  ;;  %v13609_v48 = vrot.slane %v5134_v18, 1  ;;  %v8116_v0 = vld [vmem:[#allocation2 + $0x5d8] sm:$0xff]  ;;  %v2771_v34 = vld [vmem:[#allocation2 + $0x650] sm:$0x1] }
 0x447   : > { %v7600_v42 = vor.u32 %v7598_v57, %v13597_v17  ;;  %v3705_v27 = vadd.f32 %v3420_v14, %v3069_v5  ;;  %v13611_v36 = vrot.slane %v5815_v58, 2  ;;  %v968_v12 = vmul.f32 %v8115_v9, %v14928_v63  ;;  %v4727_v5 = vld [vmem:[#allocation2 + $0x6a8] sm:$0x1]  ;;  %v15299_v58 = vld [vmem:[#allocation19_spill] sm:$0xff] }
 0x448   : > { %v4242_v30 = vsel %vm2052_vm1, %v4236_v38, %v4241_v50  ;;  %v4530_v57 = vadd.f32 %v4236_v38, %v3702_v21  ;;  %v969_v43 = vmul.f32 %v8116_v0, %v15156_v3  ;;  %v1905_v63 = vmul.f32 %v14936_v25, %v812_v10  ;;  %v814_v0 = vld [vmem:[#allocation2 + $0x5f8] sm:$0x1] }
 0x449   : > { %v7601_v33 = vsel %vm8551_vm4, %v7952_v2, %v7600_v42  ;;  %v4533_v14 = vadd.f32 %v4242_v30, %v3705_v27  ;;  %v1749_v18 = vadd.f32 %v1458_v51, %v968_v12  ;;  %v1906_v21 = vmul.f32 %v15161_v7, %v813_v11  ;;  %v4728_v12 = vld [vmem:[#allocation2 + $0x6b0] sm:$0x1] }
 0x44a   : > { %7757 = vst [vmem:[%s8571_s28 + $0x168] sm:$0xff] %v7601_v33  ;;  %v5023_v2 = vadd.f32 %v15299_v58, %v4530_v57  ;;  %v1750_v42 = vadd.f32 %v1460_v26, %v969_v43  ;;  %v2287_v3 = vrot.slane %v1905_v63, 2  ;;  %v3862_v9 = vmul.f32 %v8375_v1, %v2770_v55 }
 0x44b   : > { %v5026_v38 = vadd.f32 %v15299_v58, %v4533_v14  ;;  %v3863_v27 = vmul.f32 %v15287_v52, %v2771_v34  ;;  %v2289_v51 = vrot.slane %v1906_v21, 2  ;;  %v2926_v25 = vmul.f32 %v13190_v56, %v8224_v22 }
 0x44c   : > { %v5659_v16 = vadd.f32 %v13609_v48, %v5023_v2  ;;  %v5819_v10 = vmul.f32 %v13220_v24, %v4727_v5  ;;  %v15300_v26 = vrot.slane %v13452_v40, 2  ;;  %v2927_v11 = vmul.f32 %v13192_v28, %v8228_v23 }
 0x44d   : > { %v5662_v39 = vadd.f32 %v13609_v48, %v5026_v38  ;;  %v4243_v1 = vrot.slane %v3862_v9, 2  ;;  %v15301_v33 = vrot.slane %v13464_v46, 2  ;;  %v4245_v56 = vrot.slane %v3863_v27, 2  ;;  %v2772_v38 = vld [vmem:[#allocation2 + $0x658] sm:$0x1] }
 0x44e   : > { %v2288_v7 = vsel %vm2052_vm1, %v15300_v26, %v2287_v3  ;;  %v6487_v52 = vadd.f32 %v13611_v36, %v5659_v16  ;;  %v5820_v55 = vmul.f32 %v13227_v20, %v4728_v12  ;;  %v6200_v34 = vrot.slane %v5819_v10, 2 }
 0x44f   : > { %v2290_v30 = vsel %vm2052_vm1, %v15301_v33, %v2289_v51  ;;  %v2578_v22 = vadd.f32 %v2288_v7, %v1749_v18  ;;  %v6490_v24 = vadd.f32 %v13611_v36, %v5662_v39  ;;  %v15302_v14 = vrot.slane %v13507_v62, 2 }
 0x450   : > { %v2579_v57 = vadd.f32 %v2290_v30, %v1750_v42  ;;  %v8047_v40 = vpack.c.bf16 %v6487_v52, %v6487_v52  ;;  %v970_v46 = vmul.f32 %v14502_v6, %v13550_v59  ;;  %v15303_v5 = vrot.slane %v13493_v53, 1 }
 0x451   : > { %v3070_v43 = vadd.f32 %v2926_v25, %v2578_v22  ;;  %v8049_v23 = vpack.c.bf16 %v6490_v24, %v6490_v24  ;;  %v4244_v63 = vsel %vm2052_vm1, %v15302_v14, %v4243_v1  ;;  %v15304_v42 = vrot.slane %v13514_v29, 2 }
 0x452   : > { %v3071_v28 = vadd.f32 %v2927_v11, %v2579_v57  ;;  %v7603_v18 = vshrl.u32 %v8047_v40, 16  ;;  %v1907_v20 = vmul.f32 %v8499_v60, %v814_v0  ;;  %v15305_v9 = vrot.slane %v13497_v37, 1  ;;  %v4729_v60 = vld [vmem:[#allocation2 + $0x6b8] sm:$0x1] }
 0x453   : > { %v3706_v2 = vadd.f32 %v15303_v5, %v3070_v43  ;;  %v4246_v21 = vsel %vm2052_vm1, %v15304_v42, %v4245_v56  ;;  %v7608_v3 = vshrl.u32 %v8049_v23, 16  ;;  %v15306_v27 = vrot.slane %v13562_v35, 1 }
 0x454   : > { %v3707_v62 = vadd.f32 %v15305_v9, %v3071_v28  ;;  %v7611_v51 = vshll.u32 %v8049_v23, 16  ;;  %v6202_v59 = vrot.slane %v5820_v55, 2  ;;  %v2291_v25 = vrot.slane %v1907_v20, 2 }
 0x455   : > { %v1751_v16 = vadd.f32 %v15306_v27, %v970_v46  ;;  %v4534_v6 = vadd.f32 %v4244_v63, %v3706_v2  ;;  %v7610_v53 = vrot.slane %v7608_v3, 7  ;;  %v2928_v29 = vmul.f32 %v13299_v19, %v8502_v61 }
 0x456   : > { %v4535_v10 = vadd.f32 %v4246_v21, %v3707_v62  ;;  %v3864_v39 = vmul.f32 %v8508_v49, %v2772_v38  ;;  %v7953_v26 = vrot.slane %v7603_v18, 11  ;;  %v6201_v35 = vsel %vm2052_vm1, %v13548_v41, %v6200_v34 }
 0x457   : > { %v5027_v37 = vadd.f32 %v15291_v15, %v4534_v6  ;;  %v15307_v7 = vrot.slane %v13569_v4, 2  ;;  %v7613_v1 = vor.u32 %v7611_v51, %v7610_v53  ;;  %v6203_v49 = vsel %vm2052_vm1, %v13556_v13, %v6202_v59 }
 0x458   : > { %v5028_v12 = vadd.f32 %v15292_v32, %v4535_v10  ;;  %v4247_v33 = vrot.slane %v3864_v39, 2  ;;  %v5821_v19 = vmul.f32 %v13331_v31, %v4729_v60  ;;  %v7615_v40 = vrot.slane %v13597_v17, 4 }
 0x459   : > { %v2292_v11 = vsel %vm2052_vm1, %v15307_v7, %v2291_v25  ;;  %v5663_v61 = vadd.f32 %v13539_v47, %v5027_v37  ;;  %v7614_v15 = vsel %vm8551_vm4, %v7953_v26, %v7613_v1  ;;  %v15308_v47 = vrot.slane %v13583_v44, 1 }
 0x45a   : > { %v2580_v52 = vadd.f32 %v2292_v11, %v1751_v16  ;;  %v5664_v41 = vadd.f32 %v13541_v45, %v5028_v12  ;;  %7758 = vst [vmem:[%s8571_s28 + $0x170] sm:$0xf] %v7614_v15  ;;  %v4248_v32 = vsel %vm2052_vm1, %v4241_v50, %v4247_v33  ;;  %v6204_v13 = vrot.slane %v5821_v19, 2 }
 0x45b   : > { %v6491_v30 = vadd.f32 %v6201_v35, %v5663_v61  ;;  %v7624_v14 = vrot.slane %v7610_v53, 4 }
 0x45c   : > { %v3072_v4 = vadd.f32 %v2928_v29, %v2580_v52  ;;  %v6492_v22 = vadd.f32 %v6203_v49, %v5664_v41  ;;  %v6205_v45 = vsel %vm2052_vm1, %v13611_v36, %v6204_v13 }
 0x45e   : > { %v3708_v56 = vadd.f32 %v15308_v47, %v3072_v4  ;;  %v8050_v24 = vpack.c.bf16 %v6492_v22, %v6491_v30 }
 0x460   : > { %v4536_v31 = vadd.f32 %v4248_v32, %v3708_v56  ;;  %v7617_v57 = vshrl.u32 %v8050_v24, 16  ;;  %v7620_v43 = vshll.u32 %v8050_v24, 16 }
 0x462   : > { %v5029_v0 = vadd.f32 %v15299_v58, %v4536_v31  ;;  %v7619_v8 = vrot.slane %v7617_v57, 7 }
 0x464   : > { %v5665_v50 = vadd.f32 %v13609_v48, %v5029_v0  ;;  %v7622_v55 = vor.u32 %v7620_v43, %v7619_v8 }
 0x466   : > { %v6493_v44 = vadd.f32 %v6205_v45, %v5665_v50  ;;  %v7623_v34 = vsel %vm8551_vm4, %v7615_v40, %v7622_v55 }
 0x467   : > { %7759 = vst [vmem:[%s8571_s28 + $0x174] sm:$0xff] %v7623_v34 }
 0x468   : > { %v8051_v23 = vpack.c.bf16 %v6493_v44, %v6493_v44 }
 0x46a   : > { %v7626_v28 = vshrl.u32 %v8051_v23, 16  ;;  %v7629_v63 = vshll.u32 %v8051_v23, 16 }
 0x46c   : > { %v7628_v58 = vrot.slane %v7626_v28, 7 }
 0x46e   : > { %v7631_v46 = vor.u32 %v7629_v63, %v7628_v58 }
 0x470   : > { %v7632_v36 = vsel %vm8551_vm4, %v7624_v14, %v7631_v46 }
 0x471   : > { %7760 = vst [vmem:[%s8571_s28 + $0x17c] sm:$0xf] %v7632_v36 }
 0x472 PF: > { %s12_s9 = sadd.s32 1, %s8123_s9  }
 0x473   : > { %p9_p4 = scmp.ge.s32.totalorder %s12_s9, 4  }
 0x475   :  { %11 = sbr.rel (!%p9_p4) target bundleno = 1 (0x1), region = 60 }

</bundles_post_ra>
